<compile_context>
chip_gen: v7x
topology: tpu7x:2x2x1
jax: 0.10.0
libtpu: 0.0.40
codegen_flags: <defaults>
</compile_context>

<pallas_src>
import numpy as np
import jax
import jax.numpy as jnp
from jax.experimental import pallas as pl
from jax.experimental.pallas import tpu as pltpu

PART = 6                 # PCB number of horizontal stripes
BN_EPS = 1e-5
LANE = 128               # TPU lane width; channel dims padded to this
TM_MAX = 512             # max im2col rows per grid step
CLASS_NUM = 256          # mini stand-in for the re-id class count
NUM_BOTTLENECK = 128     # mini stand-in for ClassBlock num_bottleneck=256


def _round_up(x, m):
    return (x + m - 1) // m * m


def _choose_tm(m):
    """Row-tile size: big tiles for large M (HBM roofline), >=2 grid steps when
    possible (v7x megacore), always sublane(8)-aligned. The ragged last block is
    handled by Pallas' masked OOB stores, so M is never explicitly padded."""
    if m >= 2 * TM_MAX:
        return TM_MAX
    return max(8, _round_up((m + 1) // 2, 8))


# ----------------------------- Pallas kernels ------------------------------

def _make_matmul_kernel(apply_relu, has_residual):
    """out = [relu]( A @ W_folded + bias [+ residual] ); bf16 MXU inputs,
    f32 accumulate and f32 epilogue, bf16 store."""
    if has_residual:
        def kernel(a_ref, w_ref, b_ref, r_ref, o_ref):
            acc = jnp.dot(a_ref[...], w_ref[...], preferred_element_type=jnp.float32)
            acc = acc + b_ref[...] + r_ref[...].astype(jnp.float32)
            if apply_relu:
                acc = jnp.maximum(acc, 0.0)
            o_ref[...] = acc.astype(o_ref.dtype)
    else:
        def kernel(a_ref, w_ref, b_ref, o_ref):
            acc = jnp.dot(a_ref[...], w_ref[...], preferred_element_type=jnp.float32)
            acc = acc + b_ref[...]
            if apply_relu:
                acc = jnp.maximum(acc, 0.0)
            o_ref[...] = acc.astype(o_ref.dtype)
    return kernel


def _maxpool_kernel(p_ref, o_ref):
    # p_ref: (9, TM, C) -> max over the leading window axis: 8 elementwise vmax.
    o_ref[...] = jnp.max(p_ref[...], axis=0)


def _avgpool_kernel(x_ref, o_ref):
    # x_ref: (B, PART, rows_per_part, C) bf16 -> f32 mean per stripe.
    o_ref[...] = jnp.mean(x_ref[...].astype(jnp.float32), axis=2)


def _classblock_kernel(x_ref, w1_ref, b1_ref, w2_ref, b2_ref, o_ref):
    # One PCB part-classifier: Linear + folded BN1d, then Linear.
    # (ClassBlock relu=False; Dropout is identity at inference.)
    h = jnp.dot(x_ref[0], w1_ref[0], preferred_element_type=jnp.float32) + b1_ref[0]
    o_ref[0] = (jnp.dot(h.astype(jnp.bfloat16), w2_ref[0],
                        preferred_element_type=jnp.float32) + b2_ref[0])


# ----------------------------- Pallas wrappers ------------------------------

def _matmul_bias_act(a, w, bias, residual=None, relu=True):
    """a:(M,K) bf16, w:(K,N) bf16 (BN scale pre-folded), bias:(1,N) f32."""
    m, k = a.shape
    n = w.shape[1]
    tm = _choose_tm(m)
    grid = (pl.cdiv(m, tm),)
    # W / bias have constant index maps -> Pallas only DMAs them once per call.
    in_specs = [
        pl.BlockSpec((tm, k), lambda i: (i, 0)),
        pl.BlockSpec((k, n), lambda i: (0, 0)),
        pl.BlockSpec((1, n), lambda i: (0, 0)),
    ]
    args = [a, w, bias]
    if residual is not None:
        in_specs.append(pl.BlockSpec((tm, n), lambda i: (i, 0)))
        args.append(residual)
    kernel = _make_matmul_kernel(relu, residual is not None)
    return pl.pallas_call(
        kernel,
        out_shape=jax.ShapeDtypeStruct((m, n), jnp.bfloat16),
        grid=grid,
        in_specs=in_specs,
        out_specs=pl.BlockSpec((tm, n), lambda i: (i, 0)),
        compiler_params=pltpu.CompilerParams(dimension_semantics=("parallel",)),
    )(*args)


def _extract_patches(x, kh, kw, stride, pad, pad_value=0.0):
    """x: (B,H,W,C) NHWC -> (B,Ho,Wo,kh*kw,C) patches (wrapper im2col glue)."""
    b, h, w, c = x.shape
    xp = jnp.pad(x, ((0, 0), (pad, pad), (pad, pad), (0, 0)),
                 constant_values=pad_value)
    ho = (h + 2 * pad - kh) // stride + 1
    wo = (w + 2 * pad - kw) // stride + 1
    cols = []
    for i in range(kh):
        for j in range(kw):
            cols.append(xp[:, i:i + stride * ho:stride, j:j + stride * wo:stride, :])
    patches = jnp.stack(cols, axis=3)
    return patches, ho, wo


def conv_bn(x, w4, bias, stride, pad, relu=True, residual=None):
    """Conv2d(no bias) + folded BatchNorm (+ residual) (+ ReLU), NHWC, bf16 I/O.

    w4 is (kh, kw, Cin, Cout) with the BN scale already folded into its columns.
    """
    kh, kw, cin, cout = w4.shape
    if kh == 1 and kw == 1:
        # 1x1 conv: no im2col. Stride-2 downsample is just a strided slice.
        xs = x[:, ::stride, ::stride, :] if stride > 1 else x
        b, ho, wo, _ = xs.shape
        a = xs.reshape(b * ho * wo, cin)
    else:
        patches, ho, wo = _extract_patches(x, kh, kw, stride, pad)
        b = x.shape[0]
        a = patches.reshape(b * ho * wo, kh * kw * cin)
    m = b * ho * wo
    r = residual.reshape(m, cout) if residual is not None else None
    out = _matmul_bias_act(a, w4.reshape(kh * kw * cin, cout), bias,
                           residual=r, relu=relu)
    return out.reshape(b, ho, wo, cout)


def maxpool_3x3_s2(x):
    """MaxPool2d(kernel=3, stride=2, padding=1), NHWC, bf16."""
    b, h, w, c = x.shape
    xp = jnp.pad(x, ((0, 0), (1, 1), (1, 1), (0, 0)), constant_values=-jnp.inf)
    ho = (h + 2 - 3) // 2 + 1
    wo = (w + 2 - 3) // 2 + 1
    cols = [xp[:, i:i + 2 * ho:2, j:j + 2 * wo:2, :]
            for i in range(3) for j in range(3)]
    m = b * ho * wo
    p = jnp.stack(cols, axis=0).reshape(9, m, c)   # window axis leading
    tm = _choose_tm(m)
    out = pl.pallas_call(
        _maxpool_kernel,
        out_shape=jax.ShapeDtypeStruct((m, c), x.dtype),
        grid=(pl.cdiv(m, tm),),
        in_specs=[pl.BlockSpec((9, tm, c), lambda i: (0, i, 0))],
        out_specs=pl.BlockSpec((tm, c), lambda i: (i, 0)),
        compiler_params=pltpu.CompilerParams(dimension_semantics=("parallel",)),
    )(p)
    return out.reshape(b, ho, wo, c)


def adaptive_avgpool_part(x, part=PART):
    """AdaptiveAvgPool2d((part, 1)) for H % part == 0 (equal stripes), NHWC."""
    b, h, w, c = x.shape
    # TODO(synk): overlapping adaptive-pool bins (H % part != 0) not implemented;
    # PCB feature maps satisfy H % 6 == 0.
    assert h % part == 0, "feature-map height must be divisible by `part`"
    r = (h // part) * w
    xr = x.reshape(b, part, r, c)
    return pl.pallas_call(
        _avgpool_kernel,
        out_shape=jax.ShapeDtypeStruct((b, part, c), jnp.float32),
        grid=(1,),
        in_specs=[pl.BlockSpec((b, part, r, c), lambda i: (0, 0, 0, 0))],
        out_specs=pl.BlockSpec((b, part, c), lambda i: (0, 0, 0)),
    )(xr)


def classblocks(feat, cp):
    """Run the 6 per-part ClassBlock heads. feat: (B, PART, C) f32."""
    xb = jnp.transpose(feat, (1, 0, 2)).astype(jnp.bfloat16)   # (PART, B, C)
    part, b, c = xb.shape
    nb = cp['w1'].shape[-1]
    ncls = cp['w2'].shape[-1]
    return pl.pallas_call(
        _classblock_kernel,
        out_shape=jax.ShapeDtypeStruct((part, b, ncls), jnp.float32),
        grid=(part,),
        in_specs=[pl.BlockSpec((1, b, c), lambda i: (i, 0, 0)),
                  pl.BlockSpec((1, c, nb), lambda i: (i, 0, 0)),
                  pl.BlockSpec((1, 1, nb), lambda i: (i, 0, 0)),
                  pl.BlockSpec((1, nb, ncls), lambda i: (i, 0, 0)),
                  pl.BlockSpec((1, 1, ncls), lambda i: (i, 0, 0))],
        out_specs=pl.BlockSpec((1, b, ncls), lambda i: (i, 0, 0)),
        compiler_params=pltpu.CompilerParams(dimension_semantics=("parallel",)),
    )(xb, cp['w1'], cp['b1'], cp['w2'], cp['b2'])


# ----------------------------- model parameters -----------------------------

def _make_conv_bn_params(key, kh, kw, cin, cout, cin_pad=None, cout_pad=None):
    """Conv weight with inference-BN scale folded in, zero-padded to lane-dense
    channel counts. Padded channels carry exactly zero end-to-end."""
    cin_pad = cin if cin_pad is None else cin_pad
    cout_pad = cout if cout_pad is None else cout_pad
    k1, k2, k3, k4, k5 = jax.random.split(key, 5)
    fan_in = kh * kw * cin
    w = jax.random.normal(k1, (kh, kw, cin, cout), jnp.float32) / np.sqrt(fan_in)
    gamma = jax.random.uniform(k2, (cout,), jnp.float32, 0.5, 1.5)
    beta = 0.1 * jax.random.normal(k3, (cout,), jnp.float32)
    mean = 0.1 * jax.random.normal(k4, (cout,), jnp.float32)
    var = jax.random.uniform(k5, (cout,), jnp.float32, 0.5, 1.5)
    scale = gamma / jnp.sqrt(var + BN_EPS)          # folded inference BN
    bias = beta - mean * scale
    wf = w * scale                                  # fold scale into weights (f32)
    wp = jnp.zeros((kh, kw, cin_pad, cout_pad), jnp.float32)
    wp = wp.at[:, :, :cin, :cout].set(wf)
    bp = jnp.zeros((cout_pad,), jnp.float32).at[:cout].set(bias)
    return dict(w=wp.astype(jnp.bfloat16), bias=bp.reshape(1, cout_pad))


def _make_bottleneck_params(key, cin, width, cout, cin_pad, width_pad, cout_pad):
    k1, k2, k3, k4 = jax.random.split(key, 4)
    return dict(
        c1=_make_conv_bn_params(k1, 1, 1, cin, width, cin_pad, width_pad),
        c2=_make_conv_bn_params(k2, 3, 3, width, width, width_pad, width_pad),
        c3=_make_conv_bn_params(k3, 1, 1, width, cout, width_pad, cout_pad),
        down=_make_conv_bn_params(k4, 1, 1, cin, cout, cin_pad, cout_pad),
    )


def _make_classblock_params(key, cin, nb, ncls):
    k0, k1, k2, k3, k4 = jax.random.split(key, 5)
    w1 = jax.random.normal(k0, (cin, nb), jnp.float32) * np.sqrt(2.0 / cin)
    b1 = jnp.zeros((nb,), jnp.float32)
    gamma = 1.0 + 0.02 * jax.random.normal(k1, (nb,), jnp.float32)
    beta = jnp.zeros((nb,), jnp.float32)
    mean = 0.1 * jax.random.normal(k2, (nb,), jnp.float32)
    var = jax.random.uniform(k3, (nb,), jnp.float32, 0.5, 1.5)
    scale = gamma / jnp.sqrt(var + BN_EPS)
    w1f = w1 * scale                                # fold BN1d into the linear
    b1f = b1 * scale + beta - mean * scale
    w2 = 0.001 * jax.random.normal(k4, (nb, ncls), jnp.float32)
    b2 = jnp.zeros((ncls,), jnp.float32)
    return dict(w1=w1f.astype(jnp.bfloat16), b1=b1f.reshape(1, nb),
                w2=w2.astype(jnp.bfloat16), b2=b2.reshape(1, ncls))


def make_params(key, cin=3, class_num=CLASS_NUM, num_bottleneck=NUM_BOTTLENECK):
    keys = jax.random.split(key, 6)
    params = dict(
        conv1=_make_conv_bn_params(keys[0], 7, 7, cin, 16, cin, LANE),
        layer1=_make_bottleneck_params(keys[1], 16, 8, 32, LANE, LANE, LANE),
        layer2=_make_bottleneck_params(keys[2], 32, 16, 64, LANE, LANE, LANE),
        layer3=_make_bottleneck_params(keys[3], 64, 32, 128, LANE, LANE, LANE),
        layer4=_make_bottleneck_params(keys[4], 128, 64, 256, LANE, LANE, 256),
    )
    ckeys = jax.random.split(keys[5], PART)
    heads = [_make_classblock_params(ck, 256, num_bottleneck, class_num)
             for ck in ckeys]
    params['classifiers'] = dict(
        w1=jnp.stack([h['w1'] for h in heads]),
        b1=jnp.stack([h['b1'] for h in heads]),
        w2=jnp.stack([h['w2'] for h in heads]),
        b2=jnp.stack([h['b2'] for h in heads]),
    )
    return params


# ------------------------------- forward pass -------------------------------

def bottleneck(x, p, stride):
    out = conv_bn(x, p['c1']['w'], p['c1']['bias'], stride=1, pad=0, relu=True)
    out = conv_bn(out, p['c2']['w'], p['c2']['bias'], stride=stride, pad=1, relu=True)
    identity = conv_bn(x, p['down']['w'], p['down']['bias'],
                       stride=stride, pad=0, relu=False)
    # relu(bn3(conv3(out)) + identity) fused into one Pallas matmul kernel
    out = conv_bn(out, p['c3']['w'], p['c3']['bias'], stride=1, pad=0, relu=True,
                  residual=identity)
    return out


def pcb_forward(x_nchw, params):
    # Input is NCHW (PyTorch convention); compute in NHWC, bf16 activations.
    x = jnp.transpose(x_nchw, (0, 2, 3, 1)).astype(jnp.bfloat16)
    p = params
    x = conv_bn(x, p['conv1']['w'], p['conv1']['bias'],
                stride=2, pad=3, relu=True)                   # conv1 + bn1 + relu
    x = maxpool_3x3_s2(x)                                      # maxpool
    x = bottleneck(x, p['layer1'], stride=1)                   # layer1
    x = bottleneck(x, p['layer2'], stride=2)                   # layer2
    x = bottleneck(x, p['layer3'], stride=2)                   # layer3
    # PCB sets layer4[0].conv2.stride and downsample stride to (1, 1):
    x = bottleneck(x, p['layer4'], stride=1)                   # layer4
    feat = adaptive_avgpool_part(x, PART)                      # (B, 6, C) f32
    # TODO(synk): nn.Dropout(p=0.5) (top-level and inside each ClassBlock) is the
    # identity at inference and is therefore omitted.
    logits = classblocks(feat, p['classifiers'])               # (6, B, class_num)
    return tuple(logits[i] for i in range(PART))               # list of 6 preds


if __name__ == "__main__":
    key = jax.random.PRNGKey(0)
    kx, kp = jax.random.split(key)
    # Small PCB-style input (H x W = 96 x 32) so the final map is 6 x 2 spatially.
    x = jax.random.normal(kx, (2, 3, 96, 32), jnp.float32)     # NCHW
    params = make_params(kp)

    fwd = jax.jit(pcb_forward)
    ys = fwd(x, params)
    ys = jax.block_until_ready(ys)
    assert len(ys) == PART
    for y in ys:
        assert y.shape == (2, CLASS_NUM), y.shape
        assert bool(jnp.all(jnp.isfinite(y)))
    print("KERNEL_OK")
</pallas_src>

<mosaic_0001>
module attributes {stable_mosaic.version = 11 : i64} {
  func.func @kernel(%arg0: i32, %arg1: memref<512x147xbf16, #tpu.memory_space<vmem>>, %arg2: memref<147x128xbf16, #tpu.memory_space<vmem>>, %arg3: memref<1x128xf32, #tpu.memory_space<vmem>>, %arg4: memref<512x128xbf16, #tpu.memory_space<vmem>>) attributes {dimension_semantics = [#tpu.dimension_semantics<parallel>], iteration_bounds = array<i64: 3>, scalar_prefetch = 0 : i64, scratch_operands = 0 : i64, tpu.core_type = #tpu.core_type<tc>, window_params = [{transform_indices = @transform_0, window_bounds = array<i64: 512, 147>}, {pipeline_mode = #tpu.pipeline_mode<synchronous>, transform_indices = @transform_1, window_bounds = array<i64: 147, 128>}, {pipeline_mode = #tpu.pipeline_mode<synchronous>, transform_indices = @transform_2, window_bounds = array<i64: 1, 128>}, {transform_indices = @transform_3, window_bounds = array<i64: 512, 128>}]} {
    %c0 = arith.constant 0 : index
    %c0_0 = arith.constant 0 : index
    %0 = vector.load %arg1[%c0, %c0_0] : memref<512x147xbf16, #tpu.memory_space<vmem>>, vector<512x147xbf16>
    %c0_1 = arith.constant 0 : index
    %c0_2 = arith.constant 0 : index
    %1 = vector.load %arg2[%c0_1, %c0_2] : memref<147x128xbf16, #tpu.memory_space<vmem>>, vector<147x128xbf16>
    %cst = arith.constant dense<0.000000e+00> : vector<512x128xf32>
    %2 = tpu.matmul %0, %1, %cst {dimension_numbers = #tpu.dot_dimension_numbers<[1], [0], [0], [1], [0, 0, 1, 1], [], []>} : vector<512x147xbf16>, vector<147x128xbf16>, vector<512x128xf32> -> vector<512x128xf32>
    %c0_3 = arith.constant 0 : index
    %c0_4 = arith.constant 0 : index
    %3 = vector.load %arg3[%c0_3, %c0_4] : memref<1x128xf32, #tpu.memory_space<vmem>>, vector<1x128xf32>
    %4 = vector.broadcast %3 : vector<1x128xf32> to vector<512x128xf32>
    %5 = arith.addf %2, %4 : vector<512x128xf32>
    %cst_5 = arith.constant 0.000000e+00 : f32
    %6 = vector.broadcast %cst_5 : f32 to vector<512x128xf32>
    %7 = arith.maximumf %5, %6 : vector<512x128xf32>
    %8 = arith.truncf %7 : vector<512x128xf32> to vector<512x128xbf16>
    %c0_6 = arith.constant 0 : index
    %c0_7 = arith.constant 0 : index
    %9 = vector.load %arg4[%c0_6, %c0_7] : memref<512x128xbf16, #tpu.memory_space<vmem>>, vector<512x128xbf16>
    tpu.vector_store %arg4[%c0_6, %c0_7], %8 {strides = array<i32>} : memref<512x128xbf16, #tpu.memory_space<vmem>>, vector<512x128xbf16>,
    return
  }
  func.func @transform_0(%arg0: i32) -> (i32, i32) {
    %c0_i32 = arith.constant 0 : i32
    %c0_i32_0 = arith.constant 0 : i32
    return %arg0, %c0_i32 : i32, i32
  }
  func.func @transform_1(%arg0: i32) -> (i32, i32) {
    %c0_i32 = arith.constant 0 : i32
    %c0_i32_0 = arith.constant 0 : i32
    %c0_i32_1 = arith.constant 0 : i32
    return %c0_i32, %c0_i32_0 : i32, i32
  }
  func.func @transform_2(%arg0: i32) -> (i32, i32) {
    %c0_i32 = arith.constant 0 : i32
    %c0_i32_0 = arith.constant 0 : i32
    %c0_i32_1 = arith.constant 0 : i32
    return %c0_i32, %c0_i32_0 : i32, i32
  }
  func.func @transform_3(%arg0: i32) -> (i32, i32) {
    %c0_i32 = arith.constant 0 : i32
    %c0_i32_0 = arith.constant 0 : i32
    return %arg0, %c0_i32 : i32, i32
  }
}

module attributes {stable_mosaic.version = 11 : i64} {
  func.func @_maxpool_kernel(%arg0: i32, %arg1: memref<9x192x128xbf16, #tpu.memory_space<vmem>>, %arg2: memref<192x128xbf16, #tpu.memory_space<vmem>>) attributes {dimension_semantics = [#tpu.dimension_semantics<parallel>], iteration_bounds = array<i64: 2>, scalar_prefetch = 0 : i64, scratch_operands = 0 : i64, tpu.core_type = #tpu.core_type<tc>, window_params = [{transform_indices = @transform_0, window_bounds = array<i64: 9, 192, 128>}, {transform_indices = @transform_1, window_bounds = array<i64: 192, 128>}]} {
    %c0 = arith.constant 0 : index
    %c0_0 = arith.constant 0 : index
    %c0_1 = arith.constant 0 : index
    %0 = vector.load %arg1[%c0, %c0_0, %c0_1] : memref<9x192x128xbf16, #tpu.memory_space<vmem>>, vector<9x192x128xbf16>
    %cst = arith.constant dense<0xFF80> : vector<192x128xbf16>
    %1 = vector.multi_reduction <maximumf>, %0, %cst [0] : vector<9x192x128xbf16> to vector<192x128xbf16>
    %c0_2 = arith.constant 0 : index
    %c0_3 = arith.constant 0 : index
    %2 = vector.load %arg2[%c0_2, %c0_3] : memref<192x128xbf16, #tpu.memory_space<vmem>>, vector<192x128xbf16>
    tpu.vector_store %arg2[%c0_2, %c0_3], %1 {strides = array<i32>} : memref<192x128xbf16, #tpu.memory_space<vmem>>, vector<192x128xbf16>,
    return
  }
  func.func @transform_0(%arg0: i32) -> (i32, i32, i32) {
    %c0_i32 = arith.constant 0 : i32
    %c0_i32_0 = arith.constant 0 : i32
    %c0_i32_1 = arith.constant 0 : i32
    return %c0_i32, %arg0, %c0_i32_0 : i32, i32, i32
  }
  func.func @transform_1(%arg0: i32) -> (i32, i32) {
    %c0_i32 = arith.constant 0 : i32
    %c0_i32_0 = arith.constant 0 : i32
    return %arg0, %c0_i32 : i32, i32
  }
}

module attributes {stable_mosaic.version = 11 : i64} {
  func.func @kernel(%arg0: i32, %arg1: memref<192x128xbf16, #tpu.memory_space<vmem>>, %arg2: memref<128x128xbf16, #tpu.memory_space<vmem>>, %arg3: memref<1x128xf32, #tpu.memory_space<vmem>>, %arg4: memref<192x128xbf16, #tpu.memory_space<vmem>>) attributes {dimension_semantics = [#tpu.dimension_semantics<parallel>], iteration_bounds = array<i64: 2>, scalar_prefetch = 0 : i64, scratch_operands = 0 : i64, tpu.core_type = #tpu.core_type<tc>, window_params = [{transform_indices = @transform_0, window_bounds = array<i64: 192, 128>}, {pipeline_mode = #tpu.pipeline_mode<synchronous>, transform_indices = @transform_1, window_bounds = array<i64: 128, 128>}, {pipeline_mode = #tpu.pipeline_mode<synchronous>, transform_indices = @transform_2, window_bounds = array<i64: 1, 128>}, {transform_indices = @transform_3, window_bounds = array<i64: 192, 128>}]} {
    %c0 = arith.constant 0 : index
    %c0_0 = arith.constant 0 : index
    %0 = vector.load %arg1[%c0, %c0_0] : memref<192x128xbf16, #tpu.memory_space<vmem>>, vector<192x128xbf16>
    %c0_1 = arith.constant 0 : index
    %c0_2 = arith.constant 0 : index
    %1 = vector.load %arg2[%c0_1, %c0_2] : memref<128x128xbf16, #tpu.memory_space<vmem>>, vector<128x128xbf16>
    %cst = arith.constant dense<0.000000e+00> : vector<192x128xf32>
    %2 = tpu.matmul %0, %1, %cst {dimension_numbers = #tpu.dot_dimension_numbers<[1], [0], [0], [1], [0, 0, 1, 1], [], []>} : vector<192x128xbf16>, vector<128x128xbf16>, vector<192x128xf32> -> vector<192x128xf32>
    %c0_3 = arith.constant 0 : index
    %c0_4 = arith.constant 0 : index
    %3 = vector.load %arg3[%c0_3, %c0_4] : memref<1x128xf32, #tpu.memory_space<vmem>>, vector<1x128xf32>
    %4 = vector.broadcast %3 : vector<1x128xf32> to vector<192x128xf32>
    %5 = arith.addf %2, %4 : vector<192x128xf32>
    %cst_5 = arith.constant 0.000000e+00 : f32
    %6 = vector.broadcast %cst_5 : f32 to vector<192x128xf32>
    %7 = arith.maximumf %5, %6 : vector<192x128xf32>
    %8 = arith.truncf %7 : vector<192x128xf32> to vector<192x128xbf16>
    %c0_6 = arith.constant 0 : index
    %c0_7 = arith.constant 0 : index
    %9 = vector.load %arg4[%c0_6, %c0_7] : memref<192x128xbf16, #tpu.memory_space<vmem>>, vector<192x128xbf16>
    tpu.vector_store %arg4[%c0_6, %c0_7], %8 {strides = array<i32>} : memref<192x128xbf16, #tpu.memory_space<vmem>>, vector<192x128xbf16>,
    return
  }
  func.func @transform_0(%arg0: i32) -> (i32, i32) {
    %c0_i32 = arith.constant 0 : i32
    %c0_i32_0 = arith.constant 0 : i32
    return %arg0, %c0_i32 : i32, i32
  }
  func.func @transform_1(%arg0: i32) -> (i32, i32) {
    %c0_i32 = arith.constant 0 : i32
    %c0_i32_0 = arith.constant 0 : i32
    %c0_i32_1 = arith.constant 0 : i32
    return %c0_i32, %c0_i32_0 : i32, i32
  }
  func.func @transform_2(%arg0: i32) -> (i32, i32) {
    %c0_i32 = arith.constant 0 : i32
    %c0_i32_0 = arith.constant 0 : i32
    %c0_i32_1 = arith.constant 0 : i32
    return %c0_i32, %c0_i32_0 : i32, i32
  }
  func.func @transform_3(%arg0: i32) -> (i32, i32) {
    %c0_i32 = arith.constant 0 : i32
    %c0_i32_0 = arith.constant 0 : i32
    return %arg0, %c0_i32 : i32, i32
  }
}

module attributes {stable_mosaic.version = 11 : i64} {
  func.func @kernel(%arg0: i32, %arg1: memref<192x128xbf16, #tpu.memory_space<vmem>>, %arg2: memref<128x128xbf16, #tpu.memory_space<vmem>>, %arg3: memref<1x128xf32, #tpu.memory_space<vmem>>, %arg4: memref<192x128xbf16, #tpu.memory_space<vmem>>) attributes {dimension_semantics = [#tpu.dimension_semantics<parallel>], iteration_bounds = array<i64: 2>, scalar_prefetch = 0 : i64, scratch_operands = 0 : i64, tpu.core_type = #tpu.core_type<tc>, window_params = [{transform_indices = @transform_0, window_bounds = array<i64: 192, 128>}, {pipeline_mode = #tpu.pipeline_mode<synchronous>, transform_indices = @transform_1, window_bounds = array<i64: 128, 128>}, {pipeline_mode = #tpu.pipeline_mode<synchronous>, transform_indices = @transform_2, window_bounds = array<i64: 1, 128>}, {transform_indices = @transform_3, window_bounds = array<i64: 192, 128>}]} {
    %c0 = arith.constant 0 : index
    %c0_0 = arith.constant 0 : index
    %0 = vector.load %arg1[%c0, %c0_0] : memref<192x128xbf16, #tpu.memory_space<vmem>>, vector<192x128xbf16>
    %c0_1 = arith.constant 0 : index
    %c0_2 = arith.constant 0 : index
    %1 = vector.load %arg2[%c0_1, %c0_2] : memref<128x128xbf16, #tpu.memory_space<vmem>>, vector<128x128xbf16>
    %cst = arith.constant dense<0.000000e+00> : vector<192x128xf32>
    %2 = tpu.matmul %0, %1, %cst {dimension_numbers = #tpu.dot_dimension_numbers<[1], [0], [0], [1], [0, 0, 1, 1], [], []>} : vector<192x128xbf16>, vector<128x128xbf16>, vector<192x128xf32> -> vector<192x128xf32>
    %c0_3 = arith.constant 0 : index
    %c0_4 = arith.constant 0 : index
    %3 = vector.load %arg3[%c0_3, %c0_4] : memref<1x128xf32, #tpu.memory_space<vmem>>, vector<1x128xf32>
    %4 = vector.broadcast %3 : vector<1x128xf32> to vector<192x128xf32>
    %5 = arith.addf %2, %4 : vector<192x128xf32>
    %6 = arith.truncf %5 : vector<192x128xf32> to vector<192x128xbf16>
    %c0_5 = arith.constant 0 : index
    %c0_6 = arith.constant 0 : index
    %7 = vector.load %arg4[%c0_5, %c0_6] : memref<192x128xbf16, #tpu.memory_space<vmem>>, vector<192x128xbf16>
    tpu.vector_store %arg4[%c0_5, %c0_6], %6 {strides = array<i32>} : memref<192x128xbf16, #tpu.memory_space<vmem>>, vector<192x128xbf16>,
    return
  }
  func.func @transform_0(%arg0: i32) -> (i32, i32) {
    %c0_i32 = arith.constant 0 : i32
    %c0_i32_0 = arith.constant 0 : i32
    return %arg0, %c0_i32 : i32, i32
  }
  func.func @transform_1(%arg0: i32) -> (i32, i32) {
    %c0_i32 = arith.constant 0 : i32
    %c0_i32_0 = arith.constant 0 : i32
    %c0_i32_1 = arith.constant 0 : i32
    return %c0_i32, %c0_i32_0 : i32, i32
  }
  func.func @transform_2(%arg0: i32) -> (i32, i32) {
    %c0_i32 = arith.constant 0 : i32
    %c0_i32_0 = arith.constant 0 : i32
    %c0_i32_1 = arith.constant 0 : i32
    return %c0_i32, %c0_i32_0 : i32, i32
  }
  func.func @transform_3(%arg0: i32) -> (i32, i32) {
    %c0_i32 = arith.constant 0 : i32
    %c0_i32_0 = arith.constant 0 : i32
    return %arg0, %c0_i32 : i32, i32
  }
}

module attributes {stable_mosaic.version = 11 : i64} {
  func.func @kernel(%arg0: i32, %arg1: memref<192x1152xbf16, #tpu.memory_space<vmem>>, %arg2: memref<1152x128xbf16, #tpu.memory_space<vmem>>, %arg3: memref<1x128xf32, #tpu.memory_space<vmem>>, %arg4: memref<192x128xbf16, #tpu.memory_space<vmem>>) attributes {dimension_semantics = [#tpu.dimension_semantics<parallel>], iteration_bounds = array<i64: 2>, scalar_prefetch = 0 : i64, scratch_operands = 0 : i64, tpu.core_type = #tpu.core_type<tc>, window_params = [{transform_indices = @transform_0, window_bounds = array<i64: 192, 1152>}, {pipeline_mode = #tpu.pipeline_mode<synchronous>, transform_indices = @transform_1, window_bounds = array<i64: 1152, 128>}, {pipeline_mode = #tpu.pipeline_mode<synchronous>, transform_indices = @transform_2, window_bounds = array<i64: 1, 128>}, {transform_indices = @transform_3, window_bounds = array<i64: 192, 128>}]} {
    %c0 = arith.constant 0 : index
    %c0_0 = arith.constant 0 : index
    %0 = vector.load %arg1[%c0, %c0_0] : memref<192x1152xbf16, #tpu.memory_space<vmem>>, vector<192x1152xbf16>
    %c0_1 = arith.constant 0 : index
    %c0_2 = arith.constant 0 : index
    %1 = vector.load %arg2[%c0_1, %c0_2] : memref<1152x128xbf16, #tpu.memory_space<vmem>>, vector<1152x128xbf16>
    %cst = arith.constant dense<0.000000e+00> : vector<192x128xf32>
    %2 = tpu.matmul %0, %1, %cst {dimension_numbers = #tpu.dot_dimension_numbers<[1], [0], [0], [1], [0, 0, 1, 1], [], []>} : vector<192x1152xbf16>, vector<1152x128xbf16>, vector<192x128xf32> -> vector<192x128xf32>
    %c0_3 = arith.constant 0 : index
    %c0_4 = arith.constant 0 : index
    %3 = vector.load %arg3[%c0_3, %c0_4] : memref<1x128xf32, #tpu.memory_space<vmem>>, vector<1x128xf32>
    %4 = vector.broadcast %3 : vector<1x128xf32> to vector<192x128xf32>
    %5 = arith.addf %2, %4 : vector<192x128xf32>
    %cst_5 = arith.constant 0.000000e+00 : f32
    %6 = vector.broadcast %cst_5 : f32 to vector<192x128xf32>
    %7 = arith.maximumf %5, %6 : vector<192x128xf32>
    %8 = arith.truncf %7 : vector<192x128xf32> to vector<192x128xbf16>
    %c0_6 = arith.constant 0 : index
    %c0_7 = arith.constant 0 : index
    %9 = vector.load %arg4[%c0_6, %c0_7] : memref<192x128xbf16, #tpu.memory_space<vmem>>, vector<192x128xbf16>
    tpu.vector_store %arg4[%c0_6, %c0_7], %8 {strides = array<i32>} : memref<192x128xbf16, #tpu.memory_space<vmem>>, vector<192x128xbf16>,
    return
  }
  func.func @transform_0(%arg0: i32) -> (i32, i32) {
    %c0_i32 = arith.constant 0 : i32
    %c0_i32_0 = arith.constant 0 : i32
    return %arg0, %c0_i32 : i32, i32
  }
  func.func @transform_1(%arg0: i32) -> (i32, i32) {
    %c0_i32 = arith.constant 0 : i32
    %c0_i32_0 = arith.constant 0 : i32
    %c0_i32_1 = arith.constant 0 : i32
    return %c0_i32, %c0_i32_0 : i32, i32
  }
  func.func @transform_2(%arg0: i32) -> (i32, i32) {
    %c0_i32 = arith.constant 0 : i32
    %c0_i32_0 = arith.constant 0 : i32
    %c0_i32_1 = arith.constant 0 : i32
    return %c0_i32, %c0_i32_0 : i32, i32
  }
  func.func @transform_3(%arg0: i32) -> (i32, i32) {
    %c0_i32 = arith.constant 0 : i32
    %c0_i32_0 = arith.constant 0 : i32
    return %arg0, %c0_i32 : i32, i32
  }
}

module attributes {stable_mosaic.version = 11 : i64} {
  func.func @kernel(%arg0: i32, %arg1: memref<192x128xbf16, #tpu.memory_space<vmem>>, %arg2: memref<128x128xbf16, #tpu.memory_space<vmem>>, %arg3: memref<1x128xf32, #tpu.memory_space<vmem>>, %arg4: memref<192x128xbf16, #tpu.memory_space<vmem>>, %arg5: memref<192x128xbf16, #tpu.memory_space<vmem>>) attributes {dimension_semantics = [#tpu.dimension_semantics<parallel>], iteration_bounds = array<i64: 2>, scalar_prefetch = 0 : i64, scratch_operands = 0 : i64, tpu.core_type = #tpu.core_type<tc>, window_params = [{transform_indices = @transform_0, window_bounds = array<i64: 192, 128>}, {pipeline_mode = #tpu.pipeline_mode<synchronous>, transform_indices = @transform_1, window_bounds = array<i64: 128, 128>}, {pipeline_mode = #tpu.pipeline_mode<synchronous>, transform_indices = @transform_2, window_bounds = array<i64: 1, 128>}, {transform_indices = @transform_3, window_bounds = array<i64: 192, 128>}, {transform_indices = @transform_4, window_bounds = array<i64: 192, 128>}]} {
    %c0 = arith.constant 0 : index
    %c0_0 = arith.constant 0 : index
    %0 = vector.load %arg1[%c0, %c0_0] : memref<192x128xbf16, #tpu.memory_space<vmem>>, vector<192x128xbf16>
    %c0_1 = arith.constant 0 : index
    %c0_2 = arith.constant 0 : index
    %1 = vector.load %arg2[%c0_1, %c0_2] : memref<128x128xbf16, #tpu.memory_space<vmem>>, vector<128x128xbf16>
    %cst = arith.constant dense<0.000000e+00> : vector<192x128xf32>
    %2 = tpu.matmul %0, %1, %cst {dimension_numbers = #tpu.dot_dimension_numbers<[1], [0], [0], [1], [0, 0, 1, 1], [], []>} : vector<192x128xbf16>, vector<128x128xbf16>, vector<192x128xf32> -> vector<192x128xf32>
    %c0_3 = arith.constant 0 : index
    %c0_4 = arith.constant 0 : index
    %3 = vector.load %arg3[%c0_3, %c0_4] : memref<1x128xf32, #tpu.memory_space<vmem>>, vector<1x128xf32>
    %4 = vector.broadcast %3 : vector<1x128xf32> to vector<192x128xf32>
    %5 = arith.addf %2, %4 : vector<192x128xf32>
    %c0_5 = arith.constant 0 : index
    %c0_6 = arith.constant 0 : index
    %6 = vector.load %arg4[%c0_5, %c0_6] : memref<192x128xbf16, #tpu.memory_space<vmem>>, vector<192x128xbf16>
    %7 = arith.extf %6 : vector<192x128xbf16> to vector<192x128xf32>
    %8 = arith.addf %5, %7 : vector<192x128xf32>
    %cst_7 = arith.constant 0.000000e+00 : f32
    %9 = vector.broadcast %cst_7 : f32 to vector<192x128xf32>
    %10 = arith.maximumf %8, %9 : vector<192x128xf32>
    %11 = arith.truncf %10 : vector<192x128xf32> to vector<192x128xbf16>
    %c0_8 = arith.constant 0 : index
    %c0_9 = arith.constant 0 : index
    %12 = vector.load %arg5[%c0_8, %c0_9] : memref<192x128xbf16, #tpu.memory_space<vmem>>, vector<192x128xbf16>
    tpu.vector_store %arg5[%c0_8, %c0_9], %11 {strides = array<i32>} : memref<192x128xbf16, #tpu.memory_space<vmem>>, vector<192x128xbf16>,
    return
  }
  func.func @transform_0(%arg0: i32) -> (i32, i32) {
    %c0_i32 = arith.constant 0 : i32
    %c0_i32_0 = arith.constant 0 : i32
    return %arg0, %c0_i32 : i32, i32
  }
  func.func @transform_1(%arg0: i32) -> (i32, i32) {
    %c0_i32 = arith.constant 0 : i32
    %c0_i32_0 = arith.constant 0 : i32
    %c0_i32_1 = arith.constant 0 : i32
    return %c0_i32, %c0_i32_0 : i32, i32
  }
  func.func @transform_2(%arg0: i32) -> (i32, i32) {
    %c0_i32 = arith.constant 0 : i32
    %c0_i32_0 = arith.constant 0 : i32
    %c0_i32_1 = arith.constant 0 : i32
    return %c0_i32, %c0_i32_0 : i32, i32
  }
  func.func @transform_3(%arg0: i32) -> (i32, i32) {
    %c0_i32 = arith.constant 0 : i32
    %c0_i32_0 = arith.constant 0 : i32
    return %arg0, %c0_i32 : i32, i32
  }
  func.func @transform_4(%arg0: i32) -> (i32, i32) {
    %c0_i32 = arith.constant 0 : i32
    %c0_i32_0 = arith.constant 0 : i32
    return %arg0, %c0_i32 : i32, i32
  }
}

module attributes {stable_mosaic.version = 11 : i64} {
  func.func @kernel(%arg0: i32, %arg1: memref<48x1152xbf16, #tpu.memory_space<vmem>>, %arg2: memref<1152x128xbf16, #tpu.memory_space<vmem>>, %arg3: memref<1x128xf32, #tpu.memory_space<vmem>>, %arg4: memref<48x128xbf16, #tpu.memory_space<vmem>>) attributes {dimension_semantics = [#tpu.dimension_semantics<parallel>], iteration_bounds = array<i64: 2>, scalar_prefetch = 0 : i64, scratch_operands = 0 : i64, tpu.core_type = #tpu.core_type<tc>, window_params = [{transform_indices = @transform_0, window_bounds = array<i64: 48, 1152>}, {pipeline_mode = #tpu.pipeline_mode<synchronous>, transform_indices = @transform_1, window_bounds = array<i64: 1152, 128>}, {pipeline_mode = #tpu.pipeline_mode<synchronous>, transform_indices = @transform_2, window_bounds = array<i64: 1, 128>}, {transform_indices = @transform_3, window_bounds = array<i64: 48, 128>}]} {
    %c0 = arith.constant 0 : index
    %c0_0 = arith.constant 0 : index
    %0 = vector.load %arg1[%c0, %c0_0] : memref<48x1152xbf16, #tpu.memory_space<vmem>>, vector<48x1152xbf16>
    %c0_1 = arith.constant 0 : index
    %c0_2 = arith.constant 0 : index
    %1 = vector.load %arg2[%c0_1, %c0_2] : memref<1152x128xbf16, #tpu.memory_space<vmem>>, vector<1152x128xbf16>
    %cst = arith.constant dense<0.000000e+00> : vector<48x128xf32>
    %2 = tpu.matmul %0, %1, %cst {dimension_numbers = #tpu.dot_dimension_numbers<[1], [0], [0], [1], [0, 0, 1, 1], [], []>} : vector<48x1152xbf16>, vector<1152x128xbf16>, vector<48x128xf32> -> vector<48x128xf32>
    %c0_3 = arith.constant 0 : index
    %c0_4 = arith.constant 0 : index
    %3 = vector.load %arg3[%c0_3, %c0_4] : memref<1x128xf32, #tpu.memory_space<vmem>>, vector<1x128xf32>
    %4 = vector.broadcast %3 : vector<1x128xf32> to vector<48x128xf32>
    %5 = arith.addf %2, %4 : vector<48x128xf32>
    %cst_5 = arith.constant 0.000000e+00 : f32
    %6 = vector.broadcast %cst_5 : f32 to vector<48x128xf32>
    %7 = arith.maximumf %5, %6 : vector<48x128xf32>
    %8 = arith.truncf %7 : vector<48x128xf32> to vector<48x128xbf16>
    %c0_6 = arith.constant 0 : index
    %c0_7 = arith.constant 0 : index
    %9 = vector.load %arg4[%c0_6, %c0_7] : memref<48x128xbf16, #tpu.memory_space<vmem>>, vector<48x128xbf16>
    tpu.vector_store %arg4[%c0_6, %c0_7], %8 {strides = array<i32>} : memref<48x128xbf16, #tpu.memory_space<vmem>>, vector<48x128xbf16>,
    return
  }
  func.func @transform_0(%arg0: i32) -> (i32, i32) {
    %c0_i32 = arith.constant 0 : i32
    %c0_i32_0 = arith.constant 0 : i32
    return %arg0, %c0_i32 : i32, i32
  }
  func.func @transform_1(%arg0: i32) -> (i32, i32) {
    %c0_i32 = arith.constant 0 : i32
    %c0_i32_0 = arith.constant 0 : i32
    %c0_i32_1 = arith.constant 0 : i32
    return %c0_i32, %c0_i32_0 : i32, i32
  }
  func.func @transform_2(%arg0: i32) -> (i32, i32) {
    %c0_i32 = arith.constant 0 : i32
    %c0_i32_0 = arith.constant 0 : i32
    %c0_i32_1 = arith.constant 0 : i32
    return %c0_i32, %c0_i32_0 : i32, i32
  }
  func.func @transform_3(%arg0: i32) -> (i32, i32) {
    %c0_i32 = arith.constant 0 : i32
    %c0_i32_0 = arith.constant 0 : i32
    return %arg0, %c0_i32 : i32, i32
  }
}

module attributes {stable_mosaic.version = 11 : i64} {
  func.func @kernel(%arg0: i32, %arg1: memref<48x128xbf16, #tpu.memory_space<vmem>>, %arg2: memref<128x128xbf16, #tpu.memory_space<vmem>>, %arg3: memref<1x128xf32, #tpu.memory_space<vmem>>, %arg4: memref<48x128xbf16, #tpu.memory_space<vmem>>) attributes {dimension_semantics = [#tpu.dimension_semantics<parallel>], iteration_bounds = array<i64: 2>, scalar_prefetch = 0 : i64, scratch_operands = 0 : i64, tpu.core_type = #tpu.core_type<tc>, window_params = [{transform_indices = @transform_0, window_bounds = array<i64: 48, 128>}, {pipeline_mode = #tpu.pipeline_mode<synchronous>, transform_indices = @transform_1, window_bounds = array<i64: 128, 128>}, {pipeline_mode = #tpu.pipeline_mode<synchronous>, transform_indices = @transform_2, window_bounds = array<i64: 1, 128>}, {transform_indices = @transform_3, window_bounds = array<i64: 48, 128>}]} {
    %c0 = arith.constant 0 : index
    %c0_0 = arith.constant 0 : index
    %0 = vector.load %arg1[%c0, %c0_0] : memref<48x128xbf16, #tpu.memory_space<vmem>>, vector<48x128xbf16>
    %c0_1 = arith.constant 0 : index
    %c0_2 = arith.constant 0 : index
    %1 = vector.load %arg2[%c0_1, %c0_2] : memref<128x128xbf16, #tpu.memory_space<vmem>>, vector<128x128xbf16>
    %cst = arith.constant dense<0.000000e+00> : vector<48x128xf32>
    %2 = tpu.matmul %0, %1, %cst {dimension_numbers = #tpu.dot_dimension_numbers<[1], [0], [0], [1], [0, 0, 1, 1], [], []>} : vector<48x128xbf16>, vector<128x128xbf16>, vector<48x128xf32> -> vector<48x128xf32>
    %c0_3 = arith.constant 0 : index
    %c0_4 = arith.constant 0 : index
    %3 = vector.load %arg3[%c0_3, %c0_4] : memref<1x128xf32, #tpu.memory_space<vmem>>, vector<1x128xf32>
    %4 = vector.broadcast %3 : vector<1x128xf32> to vector<48x128xf32>
    %5 = arith.addf %2, %4 : vector<48x128xf32>
    %6 = arith.truncf %5 : vector<48x128xf32> to vector<48x128xbf16>
    %c0_5 = arith.constant 0 : index
    %c0_6 = arith.constant 0 : index
    %7 = vector.load %arg4[%c0_5, %c0_6] : memref<48x128xbf16, #tpu.memory_space<vmem>>, vector<48x128xbf16>
    tpu.vector_store %arg4[%c0_5, %c0_6], %6 {strides = array<i32>} : memref<48x128xbf16, #tpu.memory_space<vmem>>, vector<48x128xbf16>,
    return
  }
  func.func @transform_0(%arg0: i32) -> (i32, i32) {
    %c0_i32 = arith.constant 0 : i32
    %c0_i32_0 = arith.constant 0 : i32
    return %arg0, %c0_i32 : i32, i32
  }
  func.func @transform_1(%arg0: i32) -> (i32, i32) {
    %c0_i32 = arith.constant 0 : i32
    %c0_i32_0 = arith.constant 0 : i32
    %c0_i32_1 = arith.constant 0 : i32
    return %c0_i32, %c0_i32_0 : i32, i32
  }
  func.func @transform_2(%arg0: i32) -> (i32, i32) {
    %c0_i32 = arith.constant 0 : i32
    %c0_i32_0 = arith.constant 0 : i32
    %c0_i32_1 = arith.constant 0 : i32
    return %c0_i32, %c0_i32_0 : i32, i32
  }
  func.func @transform_3(%arg0: i32) -> (i32, i32) {
    %c0_i32 = arith.constant 0 : i32
    %c0_i32_0 = arith.constant 0 : i32
    return %arg0, %c0_i32 : i32, i32
  }
}

module attributes {stable_mosaic.version = 11 : i64} {
  func.func @kernel(%arg0: i32, %arg1: memref<48x128xbf16, #tpu.memory_space<vmem>>, %arg2: memref<128x128xbf16, #tpu.memory_space<vmem>>, %arg3: memref<1x128xf32, #tpu.memory_space<vmem>>, %arg4: memref<48x128xbf16, #tpu.memory_space<vmem>>, %arg5: memref<48x128xbf16, #tpu.memory_space<vmem>>) attributes {dimension_semantics = [#tpu.dimension_semantics<parallel>], iteration_bounds = array<i64: 2>, scalar_prefetch = 0 : i64, scratch_operands = 0 : i64, tpu.core_type = #tpu.core_type<tc>, window_params = [{transform_indices = @transform_0, window_bounds = array<i64: 48, 128>}, {pipeline_mode = #tpu.pipeline_mode<synchronous>, transform_indices = @transform_1, window_bounds = array<i64: 128, 128>}, {pipeline_mode = #tpu.pipeline_mode<synchronous>, transform_indices = @transform_2, window_bounds = array<i64: 1, 128>}, {transform_indices = @transform_3, window_bounds = array<i64: 48, 128>}, {transform_indices = @transform_4, window_bounds = array<i64: 48, 128>}]} {
    %c0 = arith.constant 0 : index
    %c0_0 = arith.constant 0 : index
    %0 = vector.load %arg1[%c0, %c0_0] : memref<48x128xbf16, #tpu.memory_space<vmem>>, vector<48x128xbf16>
    %c0_1 = arith.constant 0 : index
    %c0_2 = arith.constant 0 : index
    %1 = vector.load %arg2[%c0_1, %c0_2] : memref<128x128xbf16, #tpu.memory_space<vmem>>, vector<128x128xbf16>
    %cst = arith.constant dense<0.000000e+00> : vector<48x128xf32>
    %2 = tpu.matmul %0, %1, %cst {dimension_numbers = #tpu.dot_dimension_numbers<[1], [0], [0], [1], [0, 0, 1, 1], [], []>} : vector<48x128xbf16>, vector<128x128xbf16>, vector<48x128xf32> -> vector<48x128xf32>
    %c0_3 = arith.constant 0 : index
    %c0_4 = arith.constant 0 : index
    %3 = vector.load %arg3[%c0_3, %c0_4] : memref<1x128xf32, #tpu.memory_space<vmem>>, vector<1x128xf32>
    %4 = vector.broadcast %3 : vector<1x128xf32> to vector<48x128xf32>
    %5 = arith.addf %2, %4 : vector<48x128xf32>
    %c0_5 = arith.constant 0 : index
    %c0_6 = arith.constant 0 : index
    %6 = vector.load %arg4[%c0_5, %c0_6] : memref<48x128xbf16, #tpu.memory_space<vmem>>, vector<48x128xbf16>
    %7 = arith.extf %6 : vector<48x128xbf16> to vector<48x128xf32>
    %8 = arith.addf %5, %7 : vector<48x128xf32>
    %cst_7 = arith.constant 0.000000e+00 : f32
    %9 = vector.broadcast %cst_7 : f32 to vector<48x128xf32>
    %10 = arith.maximumf %8, %9 : vector<48x128xf32>
    %11 = arith.truncf %10 : vector<48x128xf32> to vector<48x128xbf16>
    %c0_8 = arith.constant 0 : index
    %c0_9 = arith.constant 0 : index
    %12 = vector.load %arg5[%c0_8, %c0_9] : memref<48x128xbf16, #tpu.memory_space<vmem>>, vector<48x128xbf16>
    tpu.vector_store %arg5[%c0_8, %c0_9], %11 {strides = array<i32>} : memref<48x128xbf16, #tpu.memory_space<vmem>>, vector<48x128xbf16>,
    return
  }
  func.func @transform_0(%arg0: i32) -> (i32, i32) {
    %c0_i32 = arith.constant 0 : i32
    %c0_i32_0 = arith.constant 0 : i32
    return %arg0, %c0_i32 : i32, i32
  }
  func.func @transform_1(%arg0: i32) -> (i32, i32) {
    %c0_i32 = arith.constant 0 : i32
    %c0_i32_0 = arith.constant 0 : i32
    %c0_i32_1 = arith.constant 0 : i32
    return %c0_i32, %c0_i32_0 : i32, i32
  }
  func.func @transform_2(%arg0: i32) -> (i32, i32) {
    %c0_i32 = arith.constant 0 : i32
    %c0_i32_0 = arith.constant 0 : i32
    %c0_i32_1 = arith.constant 0 : i32
    return %c0_i32, %c0_i32_0 : i32, i32
  }
  func.func @transform_3(%arg0: i32) -> (i32, i32) {
    %c0_i32 = arith.constant 0 : i32
    %c0_i32_0 = arith.constant 0 : i32
    return %arg0, %c0_i32 : i32, i32
  }
  func.func @transform_4(%arg0: i32) -> (i32, i32) {
    %c0_i32 = arith.constant 0 : i32
    %c0_i32_0 = arith.constant 0 : i32
    return %arg0, %c0_i32 : i32, i32
  }
}

module attributes {stable_mosaic.version = 11 : i64} {
  func.func @kernel(%arg0: i32, %arg1: memref<48x128xbf16, #tpu.memory_space<vmem>>, %arg2: memref<128x128xbf16, #tpu.memory_space<vmem>>, %arg3: memref<1x128xf32, #tpu.memory_space<vmem>>, %arg4: memref<48x128xbf16, #tpu.memory_space<vmem>>) attributes {dimension_semantics = [#tpu.dimension_semantics<parallel>], iteration_bounds = array<i64: 2>, scalar_prefetch = 0 : i64, scratch_operands = 0 : i64, tpu.core_type = #tpu.core_type<tc>, window_params = [{transform_indices = @transform_0, window_bounds = array<i64: 48, 128>}, {pipeline_mode = #tpu.pipeline_mode<synchronous>, transform_indices = @transform_1, window_bounds = array<i64: 128, 128>}, {pipeline_mode = #tpu.pipeline_mode<synchronous>, transform_indices = @transform_2, window_bounds = array<i64: 1, 128>}, {transform_indices = @transform_3, window_bounds = array<i64: 48, 128>}]} {
    %c0 = arith.constant 0 : index
    %c0_0 = arith.constant 0 : index
    %0 = vector.load %arg1[%c0, %c0_0] : memref<48x128xbf16, #tpu.memory_space<vmem>>, vector<48x128xbf16>
    %c0_1 = arith.constant 0 : index
    %c0_2 = arith.constant 0 : index
    %1 = vector.load %arg2[%c0_1, %c0_2] : memref<128x128xbf16, #tpu.memory_space<vmem>>, vector<128x128xbf16>
    %cst = arith.constant dense<0.000000e+00> : vector<48x128xf32>
    %2 = tpu.matmul %0, %1, %cst {dimension_numbers = #tpu.dot_dimension_numbers<[1], [0], [0], [1], [0, 0, 1, 1], [], []>} : vector<48x128xbf16>, vector<128x128xbf16>, vector<48x128xf32> -> vector<48x128xf32>
    %c0_3 = arith.constant 0 : index
    %c0_4 = arith.constant 0 : index
    %3 = vector.load %arg3[%c0_3, %c0_4] : memref<1x128xf32, #tpu.memory_space<vmem>>, vector<1x128xf32>
    %4 = vector.broadcast %3 : vector<1x128xf32> to vector<48x128xf32>
    %5 = arith.addf %2, %4 : vector<48x128xf32>
    %cst_5 = arith.constant 0.000000e+00 : f32
    %6 = vector.broadcast %cst_5 : f32 to vector<48x128xf32>
    %7 = arith.maximumf %5, %6 : vector<48x128xf32>
    %8 = arith.truncf %7 : vector<48x128xf32> to vector<48x128xbf16>
    %c0_6 = arith.constant 0 : index
    %c0_7 = arith.constant 0 : index
    %9 = vector.load %arg4[%c0_6, %c0_7] : memref<48x128xbf16, #tpu.memory_space<vmem>>, vector<48x128xbf16>
    tpu.vector_store %arg4[%c0_6, %c0_7], %8 {strides = array<i32>} : memref<48x128xbf16, #tpu.memory_space<vmem>>, vector<48x128xbf16>,
    return
  }
  func.func @transform_0(%arg0: i32) -> (i32, i32) {
    %c0_i32 = arith.constant 0 : i32
    %c0_i32_0 = arith.constant 0 : i32
    return %arg0, %c0_i32 : i32, i32
  }
  func.func @transform_1(%arg0: i32) -> (i32, i32) {
    %c0_i32 = arith.constant 0 : i32
    %c0_i32_0 = arith.constant 0 : i32
    %c0_i32_1 = arith.constant 0 : i32
    return %c0_i32, %c0_i32_0 : i32, i32
  }
  func.func @transform_2(%arg0: i32) -> (i32, i32) {
    %c0_i32 = arith.constant 0 : i32
    %c0_i32_0 = arith.constant 0 : i32
    %c0_i32_1 = arith.constant 0 : i32
    return %c0_i32, %c0_i32_0 : i32, i32
  }
  func.func @transform_3(%arg0: i32) -> (i32, i32) {
    %c0_i32 = arith.constant 0 : i32
    %c0_i32_0 = arith.constant 0 : i32
    return %arg0, %c0_i32 : i32, i32
  }
}

module attributes {stable_mosaic.version = 11 : i64} {
  func.func @kernel(%arg0: i32, %arg1: memref<16x1152xbf16, #tpu.memory_space<vmem>>, %arg2: memref<1152x128xbf16, #tpu.memory_space<vmem>>, %arg3: memref<1x128xf32, #tpu.memory_space<vmem>>, %arg4: memref<16x128xbf16, #tpu.memory_space<vmem>>) attributes {dimension_semantics = [#tpu.dimension_semantics<parallel>], iteration_bounds = array<i64: 2>, scalar_prefetch = 0 : i64, scratch_operands = 0 : i64, tpu.core_type = #tpu.core_type<tc>, window_params = [{transform_indices = @transform_0, window_bounds = array<i64: 16, 1152>}, {pipeline_mode = #tpu.pipeline_mode<synchronous>, transform_indices = @transform_1, window_bounds = array<i64: 1152, 128>}, {pipeline_mode = #tpu.pipeline_mode<synchronous>, transform_indices = @transform_2, window_bounds = array<i64: 1, 128>}, {transform_indices = @transform_3, window_bounds = array<i64: 16, 128>}]} {
    %c0 = arith.constant 0 : index
    %c0_0 = arith.constant 0 : index
    %0 = vector.load %arg1[%c0, %c0_0] : memref<16x1152xbf16, #tpu.memory_space<vmem>>, vector<16x1152xbf16>
    %c0_1 = arith.constant 0 : index
    %c0_2 = arith.constant 0 : index
    %1 = vector.load %arg2[%c0_1, %c0_2] : memref<1152x128xbf16, #tpu.memory_space<vmem>>, vector<1152x128xbf16>
    %cst = arith.constant dense<0.000000e+00> : vector<16x128xf32>
    %2 = tpu.matmul %0, %1, %cst {dimension_numbers = #tpu.dot_dimension_numbers<[1], [0], [0], [1], [0, 0, 1, 1], [], []>} : vector<16x1152xbf16>, vector<1152x128xbf16>, vector<16x128xf32> -> vector<16x128xf32>
    %c0_3 = arith.constant 0 : index
    %c0_4 = arith.constant 0 : index
    %3 = vector.load %arg3[%c0_3, %c0_4] : memref<1x128xf32, #tpu.memory_space<vmem>>, vector<1x128xf32>
    %4 = vector.broadcast %3 : vector<1x128xf32> to vector<16x128xf32>
    %5 = arith.addf %2, %4 : vector<16x128xf32>
    %cst_5 = arith.constant 0.000000e+00 : f32
    %6 = vector.broadcast %cst_5 : f32 to vector<16x128xf32>
    %7 = arith.maximumf %5, %6 : vector<16x128xf32>
    %8 = arith.truncf %7 : vector<16x128xf32> to vector<16x128xbf16>
    %c0_6 = arith.constant 0 : index
    %c0_7 = arith.constant 0 : index
    %9 = vector.load %arg4[%c0_6, %c0_7] : memref<16x128xbf16, #tpu.memory_space<vmem>>, vector<16x128xbf16>
    tpu.vector_store %arg4[%c0_6, %c0_7], %8 {strides = array<i32>} : memref<16x128xbf16, #tpu.memory_space<vmem>>, vector<16x128xbf16>,
    return
  }
  func.func @transform_0(%arg0: i32) -> (i32, i32) {
    %c0_i32 = arith.constant 0 : i32
    %c0_i32_0 = arith.constant 0 : i32
    return %arg0, %c0_i32 : i32, i32
  }
  func.func @transform_1(%arg0: i32) -> (i32, i32) {
    %c0_i32 = arith.constant 0 : i32
    %c0_i32_0 = arith.constant 0 : i32
    %c0_i32_1 = arith.constant 0 : i32
    return %c0_i32, %c0_i32_0 : i32, i32
  }
  func.func @transform_2(%arg0: i32) -> (i32, i32) {
    %c0_i32 = arith.constant 0 : i32
    %c0_i32_0 = arith.constant 0 : i32
    %c0_i32_1 = arith.constant 0 : i32
    return %c0_i32, %c0_i32_0 : i32, i32
  }
  func.func @transform_3(%arg0: i32) -> (i32, i32) {
    %c0_i32 = arith.constant 0 : i32
    %c0_i32_0 = arith.constant 0 : i32
    return %arg0, %c0_i32 : i32, i32
  }
}

module attributes {stable_mosaic.version = 11 : i64} {
  func.func @kernel(%arg0: i32, %arg1: memref<16x128xbf16, #tpu.memory_space<vmem>>, %arg2: memref<128x128xbf16, #tpu.memory_space<vmem>>, %arg3: memref<1x128xf32, #tpu.memory_space<vmem>>, %arg4: memref<16x128xbf16, #tpu.memory_space<vmem>>) attributes {dimension_semantics = [#tpu.dimension_semantics<parallel>], iteration_bounds = array<i64: 2>, scalar_prefetch = 0 : i64, scratch_operands = 0 : i64, tpu.core_type = #tpu.core_type<tc>, window_params = [{transform_indices = @transform_0, window_bounds = array<i64: 16, 128>}, {pipeline_mode = #tpu.pipeline_mode<synchronous>, transform_indices = @transform_1, window_bounds = array<i64: 128, 128>}, {pipeline_mode = #tpu.pipeline_mode<synchronous>, transform_indices = @transform_2, window_bounds = array<i64: 1, 128>}, {transform_indices = @transform_3, window_bounds = array<i64: 16, 128>}]} {
    %c0 = arith.constant 0 : index
    %c0_0 = arith.constant 0 : index
    %0 = vector.load %arg1[%c0, %c0_0] : memref<16x128xbf16, #tpu.memory_space<vmem>>, vector<16x128xbf16>
    %c0_1 = arith.constant 0 : index
    %c0_2 = arith.constant 0 : index
    %1 = vector.load %arg2[%c0_1, %c0_2] : memref<128x128xbf16, #tpu.memory_space<vmem>>, vector<128x128xbf16>
    %cst = arith.constant dense<0.000000e+00> : vector<16x128xf32>
    %2 = tpu.matmul %0, %1, %cst {dimension_numbers = #tpu.dot_dimension_numbers<[1], [0], [0], [1], [0, 0, 1, 1], [], []>} : vector<16x128xbf16>, vector<128x128xbf16>, vector<16x128xf32> -> vector<16x128xf32>
    %c0_3 = arith.constant 0 : index
    %c0_4 = arith.constant 0 : index
    %3 = vector.load %arg3[%c0_3, %c0_4] : memref<1x128xf32, #tpu.memory_space<vmem>>, vector<1x128xf32>
    %4 = vector.broadcast %3 : vector<1x128xf32> to vector<16x128xf32>
    %5 = arith.addf %2, %4 : vector<16x128xf32>
    %6 = arith.truncf %5 : vector<16x128xf32> to vector<16x128xbf16>
    %c0_5 = arith.constant 0 : index
    %c0_6 = arith.constant 0 : index
    %7 = vector.load %arg4[%c0_5, %c0_6] : memref<16x128xbf16, #tpu.memory_space<vmem>>, vector<16x128xbf16>
    tpu.vector_store %arg4[%c0_5, %c0_6], %6 {strides = array<i32>} : memref<16x128xbf16, #tpu.memory_space<vmem>>, vector<16x128xbf16>,
    return
  }
  func.func @transform_0(%arg0: i32) -> (i32, i32) {
    %c0_i32 = arith.constant 0 : i32
    %c0_i32_0 = arith.constant 0 : i32
    return %arg0, %c0_i32 : i32, i32
  }
  func.func @transform_1(%arg0: i32) -> (i32, i32) {
    %c0_i32 = arith.constant 0 : i32
    %c0_i32_0 = arith.constant 0 : i32
    %c0_i32_1 = arith.constant 0 : i32
    return %c0_i32, %c0_i32_0 : i32, i32
  }
  func.func @transform_2(%arg0: i32) -> (i32, i32) {
    %c0_i32 = arith.constant 0 : i32
    %c0_i32_0 = arith.constant 0 : i32
    %c0_i32_1 = arith.constant 0 : i32
    return %c0_i32, %c0_i32_0 : i32, i32
  }
  func.func @transform_3(%arg0: i32) -> (i32, i32) {
    %c0_i32 = arith.constant 0 : i32
    %c0_i32_0 = arith.constant 0 : i32
    return %arg0, %c0_i32 : i32, i32
  }
}

module attributes {stable_mosaic.version = 11 : i64} {
  func.func @kernel(%arg0: i32, %arg1: memref<16x128xbf16, #tpu.memory_space<vmem>>, %arg2: memref<128x128xbf16, #tpu.memory_space<vmem>>, %arg3: memref<1x128xf32, #tpu.memory_space<vmem>>, %arg4: memref<16x128xbf16, #tpu.memory_space<vmem>>, %arg5: memref<16x128xbf16, #tpu.memory_space<vmem>>) attributes {dimension_semantics = [#tpu.dimension_semantics<parallel>], iteration_bounds = array<i64: 2>, scalar_prefetch = 0 : i64, scratch_operands = 0 : i64, tpu.core_type = #tpu.core_type<tc>, window_params = [{transform_indices = @transform_0, window_bounds = array<i64: 16, 128>}, {pipeline_mode = #tpu.pipeline_mode<synchronous>, transform_indices = @transform_1, window_bounds = array<i64: 128, 128>}, {pipeline_mode = #tpu.pipeline_mode<synchronous>, transform_indices = @transform_2, window_bounds = array<i64: 1, 128>}, {transform_indices = @transform_3, window_bounds = array<i64: 16, 128>}, {transform_indices = @transform_4, window_bounds = array<i64: 16, 128>}]} {
    %c0 = arith.constant 0 : index
    %c0_0 = arith.constant 0 : index
    %0 = vector.load %arg1[%c0, %c0_0] : memref<16x128xbf16, #tpu.memory_space<vmem>>, vector<16x128xbf16>
    %c0_1 = arith.constant 0 : index
    %c0_2 = arith.constant 0 : index
    %1 = vector.load %arg2[%c0_1, %c0_2] : memref<128x128xbf16, #tpu.memory_space<vmem>>, vector<128x128xbf16>
    %cst = arith.constant dense<0.000000e+00> : vector<16x128xf32>
    %2 = tpu.matmul %0, %1, %cst {dimension_numbers = #tpu.dot_dimension_numbers<[1], [0], [0], [1], [0, 0, 1, 1], [], []>} : vector<16x128xbf16>, vector<128x128xbf16>, vector<16x128xf32> -> vector<16x128xf32>
    %c0_3 = arith.constant 0 : index
    %c0_4 = arith.constant 0 : index
    %3 = vector.load %arg3[%c0_3, %c0_4] : memref<1x128xf32, #tpu.memory_space<vmem>>, vector<1x128xf32>
    %4 = vector.broadcast %3 : vector<1x128xf32> to vector<16x128xf32>
    %5 = arith.addf %2, %4 : vector<16x128xf32>
    %c0_5 = arith.constant 0 : index
    %c0_6 = arith.constant 0 : index
    %6 = vector.load %arg4[%c0_5, %c0_6] : memref<16x128xbf16, #tpu.memory_space<vmem>>, vector<16x128xbf16>
    %7 = arith.extf %6 : vector<16x128xbf16> to vector<16x128xf32>
    %8 = arith.addf %5, %7 : vector<16x128xf32>
    %cst_7 = arith.constant 0.000000e+00 : f32
    %9 = vector.broadcast %cst_7 : f32 to vector<16x128xf32>
    %10 = arith.maximumf %8, %9 : vector<16x128xf32>
    %11 = arith.truncf %10 : vector<16x128xf32> to vector<16x128xbf16>
    %c0_8 = arith.constant 0 : index
    %c0_9 = arith.constant 0 : index
    %12 = vector.load %arg5[%c0_8, %c0_9] : memref<16x128xbf16, #tpu.memory_space<vmem>>, vector<16x128xbf16>
    tpu.vector_store %arg5[%c0_8, %c0_9], %11 {strides = array<i32>} : memref<16x128xbf16, #tpu.memory_space<vmem>>, vector<16x128xbf16>,
    return
  }
  func.func @transform_0(%arg0: i32) -> (i32, i32) {
    %c0_i32 = arith.constant 0 : i32
    %c0_i32_0 = arith.constant 0 : i32
    return %arg0, %c0_i32 : i32, i32
  }
  func.func @transform_1(%arg0: i32) -> (i32, i32) {
    %c0_i32 = arith.constant 0 : i32
    %c0_i32_0 = arith.constant 0 : i32
    %c0_i32_1 = arith.constant 0 : i32
    return %c0_i32, %c0_i32_0 : i32, i32
  }
  func.func @transform_2(%arg0: i32) -> (i32, i32) {
    %c0_i32 = arith.constant 0 : i32
    %c0_i32_0 = arith.constant 0 : i32
    %c0_i32_1 = arith.constant 0 : i32
    return %c0_i32, %c0_i32_0 : i32, i32
  }
  func.func @transform_3(%arg0: i32) -> (i32, i32) {
    %c0_i32 = arith.constant 0 : i32
    %c0_i32_0 = arith.constant 0 : i32
    return %arg0, %c0_i32 : i32, i32
  }
  func.func @transform_4(%arg0: i32) -> (i32, i32) {
    %c0_i32 = arith.constant 0 : i32
    %c0_i32_0 = arith.constant 0 : i32
    return %arg0, %c0_i32 : i32, i32
  }
}

module attributes {stable_mosaic.version = 11 : i64} {
  func.func @kernel(%arg0: i32, %arg1: memref<16x128xbf16, #tpu.memory_space<vmem>>, %arg2: memref<128x128xbf16, #tpu.memory_space<vmem>>, %arg3: memref<1x128xf32, #tpu.memory_space<vmem>>, %arg4: memref<16x128xbf16, #tpu.memory_space<vmem>>) attributes {dimension_semantics = [#tpu.dimension_semantics<parallel>], iteration_bounds = array<i64: 2>, scalar_prefetch = 0 : i64, scratch_operands = 0 : i64, tpu.core_type = #tpu.core_type<tc>, window_params = [{transform_indices = @transform_0, window_bounds = array<i64: 16, 128>}, {pipeline_mode = #tpu.pipeline_mode<synchronous>, transform_indices = @transform_1, window_bounds = array<i64: 128, 128>}, {pipeline_mode = #tpu.pipeline_mode<synchronous>, transform_indices = @transform_2, window_bounds = array<i64: 1, 128>}, {transform_indices = @transform_3, window_bounds = array<i64: 16, 128>}]} {
    %c0 = arith.constant 0 : index
    %c0_0 = arith.constant 0 : index
    %0 = vector.load %arg1[%c0, %c0_0] : memref<16x128xbf16, #tpu.memory_space<vmem>>, vector<16x128xbf16>
    %c0_1 = arith.constant 0 : index
    %c0_2 = arith.constant 0 : index
    %1 = vector.load %arg2[%c0_1, %c0_2] : memref<128x128xbf16, #tpu.memory_space<vmem>>, vector<128x128xbf16>
    %cst = arith.constant dense<0.000000e+00> : vector<16x128xf32>
    %2 = tpu.matmul %0, %1, %cst {dimension_numbers = #tpu.dot_dimension_numbers<[1], [0], [0], [1], [0, 0, 1, 1], [], []>} : vector<16x128xbf16>, vector<128x128xbf16>, vector<16x128xf32> -> vector<16x128xf32>
    %c0_3 = arith.constant 0 : index
    %c0_4 = arith.constant 0 : index
    %3 = vector.load %arg3[%c0_3, %c0_4] : memref<1x128xf32, #tpu.memory_space<vmem>>, vector<1x128xf32>
    %4 = vector.broadcast %3 : vector<1x128xf32> to vector<16x128xf32>
    %5 = arith.addf %2, %4 : vector<16x128xf32>
    %cst_5 = arith.constant 0.000000e+00 : f32
    %6 = vector.broadcast %cst_5 : f32 to vector<16x128xf32>
    %7 = arith.maximumf %5, %6 : vector<16x128xf32>
    %8 = arith.truncf %7 : vector<16x128xf32> to vector<16x128xbf16>
    %c0_6 = arith.constant 0 : index
    %c0_7 = arith.constant 0 : index
    %9 = vector.load %arg4[%c0_6, %c0_7] : memref<16x128xbf16, #tpu.memory_space<vmem>>, vector<16x128xbf16>
    tpu.vector_store %arg4[%c0_6, %c0_7], %8 {strides = array<i32>} : memref<16x128xbf16, #tpu.memory_space<vmem>>, vector<16x128xbf16>,
    return
  }
  func.func @transform_0(%arg0: i32) -> (i32, i32) {
    %c0_i32 = arith.constant 0 : i32
    %c0_i32_0 = arith.constant 0 : i32
    return %arg0, %c0_i32 : i32, i32
  }
  func.func @transform_1(%arg0: i32) -> (i32, i32) {
    %c0_i32 = arith.constant 0 : i32
    %c0_i32_0 = arith.constant 0 : i32
    %c0_i32_1 = arith.constant 0 : i32
    return %c0_i32, %c0_i32_0 : i32, i32
  }
  func.func @transform_2(%arg0: i32) -> (i32, i32) {
    %c0_i32 = arith.constant 0 : i32
    %c0_i32_0 = arith.constant 0 : i32
    %c0_i32_1 = arith.constant 0 : i32
    return %c0_i32, %c0_i32_0 : i32, i32
  }
  func.func @transform_3(%arg0: i32) -> (i32, i32) {
    %c0_i32 = arith.constant 0 : i32
    %c0_i32_0 = arith.constant 0 : i32
    return %arg0, %c0_i32 : i32, i32
  }
}

module attributes {stable_mosaic.version = 11 : i64} {
  func.func @kernel(%arg0: i32, %arg1: memref<16x128xbf16, #tpu.memory_space<vmem>>, %arg2: memref<128x256xbf16, #tpu.memory_space<vmem>>, %arg3: memref<1x256xf32, #tpu.memory_space<vmem>>, %arg4: memref<16x256xbf16, #tpu.memory_space<vmem>>) attributes {dimension_semantics = [#tpu.dimension_semantics<parallel>], iteration_bounds = array<i64: 2>, scalar_prefetch = 0 : i64, scratch_operands = 0 : i64, tpu.core_type = #tpu.core_type<tc>, window_params = [{transform_indices = @transform_0, window_bounds = array<i64: 16, 128>}, {pipeline_mode = #tpu.pipeline_mode<synchronous>, transform_indices = @transform_1, window_bounds = array<i64: 128, 256>}, {pipeline_mode = #tpu.pipeline_mode<synchronous>, transform_indices = @transform_2, window_bounds = array<i64: 1, 256>}, {transform_indices = @transform_3, window_bounds = array<i64: 16, 256>}]} {
    %c0 = arith.constant 0 : index
    %c0_0 = arith.constant 0 : index
    %0 = vector.load %arg1[%c0, %c0_0] : memref<16x128xbf16, #tpu.memory_space<vmem>>, vector<16x128xbf16>
    %c0_1 = arith.constant 0 : index
    %c0_2 = arith.constant 0 : index
    %1 = vector.load %arg2[%c0_1, %c0_2] : memref<128x256xbf16, #tpu.memory_space<vmem>>, vector<128x256xbf16>
    %cst = arith.constant dense<0.000000e+00> : vector<16x256xf32>
    %2 = tpu.matmul %0, %1, %cst {dimension_numbers = #tpu.dot_dimension_numbers<[1], [0], [0], [1], [0, 0, 1, 1], [], []>} : vector<16x128xbf16>, vector<128x256xbf16>, vector<16x256xf32> -> vector<16x256xf32>
    %c0_3 = arith.constant 0 : index
    %c0_4 = arith.constant 0 : index
    %3 = vector.load %arg3[%c0_3, %c0_4] : memref<1x256xf32, #tpu.memory_space<vmem>>, vector<1x256xf32>
    %4 = vector.broadcast %3 : vector<1x256xf32> to vector<16x256xf32>
    %5 = arith.addf %2, %4 : vector<16x256xf32>
    %6 = arith.truncf %5 : vector<16x256xf32> to vector<16x256xbf16>
    %c0_5 = arith.constant 0 : index
    %c0_6 = arith.constant 0 : index
    %7 = vector.load %arg4[%c0_5, %c0_6] : memref<16x256xbf16, #tpu.memory_space<vmem>>, vector<16x256xbf16>
    tpu.vector_store %arg4[%c0_5, %c0_6], %6 {strides = array<i32>} : memref<16x256xbf16, #tpu.memory_space<vmem>>, vector<16x256xbf16>,
    return
  }
  func.func @transform_0(%arg0: i32) -> (i32, i32) {
    %c0_i32 = arith.constant 0 : i32
    %c0_i32_0 = arith.constant 0 : i32
    return %arg0, %c0_i32 : i32, i32
  }
  func.func @transform_1(%arg0: i32) -> (i32, i32) {
    %c0_i32 = arith.constant 0 : i32
    %c0_i32_0 = arith.constant 0 : i32
    %c0_i32_1 = arith.constant 0 : i32
    return %c0_i32, %c0_i32_0 : i32, i32
  }
  func.func @transform_2(%arg0: i32) -> (i32, i32) {
    %c0_i32 = arith.constant 0 : i32
    %c0_i32_0 = arith.constant 0 : i32
    %c0_i32_1 = arith.constant 0 : i32
    return %c0_i32, %c0_i32_0 : i32, i32
  }
  func.func @transform_3(%arg0: i32) -> (i32, i32) {
    %c0_i32 = arith.constant 0 : i32
    %c0_i32_0 = arith.constant 0 : i32
    return %arg0, %c0_i32 : i32, i32
  }
}

module attributes {stable_mosaic.version = 11 : i64} {
  func.func @kernel(%arg0: i32, %arg1: memref<16x128xbf16, #tpu.memory_space<vmem>>, %arg2: memref<128x256xbf16, #tpu.memory_space<vmem>>, %arg3: memref<1x256xf32, #tpu.memory_space<vmem>>, %arg4: memref<16x256xbf16, #tpu.memory_space<vmem>>, %arg5: memref<16x256xbf16, #tpu.memory_space<vmem>>) attributes {dimension_semantics = [#tpu.dimension_semantics<parallel>], iteration_bounds = array<i64: 2>, scalar_prefetch = 0 : i64, scratch_operands = 0 : i64, tpu.core_type = #tpu.core_type<tc>, window_params = [{transform_indices = @transform_0, window_bounds = array<i64: 16, 128>}, {pipeline_mode = #tpu.pipeline_mode<synchronous>, transform_indices = @transform_1, window_bounds = array<i64: 128, 256>}, {pipeline_mode = #tpu.pipeline_mode<synchronous>, transform_indices = @transform_2, window_bounds = array<i64: 1, 256>}, {transform_indices = @transform_3, window_bounds = array<i64: 16, 256>}, {transform_indices = @transform_4, window_bounds = array<i64: 16, 256>}]} {
    %c0 = arith.constant 0 : index
    %c0_0 = arith.constant 0 : index
    %0 = vector.load %arg1[%c0, %c0_0] : memref<16x128xbf16, #tpu.memory_space<vmem>>, vector<16x128xbf16>
    %c0_1 = arith.constant 0 : index
    %c0_2 = arith.constant 0 : index
    %1 = vector.load %arg2[%c0_1, %c0_2] : memref<128x256xbf16, #tpu.memory_space<vmem>>, vector<128x256xbf16>
    %cst = arith.constant dense<0.000000e+00> : vector<16x256xf32>
    %2 = tpu.matmul %0, %1, %cst {dimension_numbers = #tpu.dot_dimension_numbers<[1], [0], [0], [1], [0, 0, 1, 1], [], []>} : vector<16x128xbf16>, vector<128x256xbf16>, vector<16x256xf32> -> vector<16x256xf32>
    %c0_3 = arith.constant 0 : index
    %c0_4 = arith.constant 0 : index
    %3 = vector.load %arg3[%c0_3, %c0_4] : memref<1x256xf32, #tpu.memory_space<vmem>>, vector<1x256xf32>
    %4 = vector.broadcast %3 : vector<1x256xf32> to vector<16x256xf32>
    %5 = arith.addf %2, %4 : vector<16x256xf32>
    %c0_5 = arith.constant 0 : index
    %c0_6 = arith.constant 0 : index
    %6 = vector.load %arg4[%c0_5, %c0_6] : memref<16x256xbf16, #tpu.memory_space<vmem>>, vector<16x256xbf16>
    %7 = arith.extf %6 : vector<16x256xbf16> to vector<16x256xf32>
    %8 = arith.addf %5, %7 : vector<16x256xf32>
    %cst_7 = arith.constant 0.000000e+00 : f32
    %9 = vector.broadcast %cst_7 : f32 to vector<16x256xf32>
    %10 = arith.maximumf %8, %9 : vector<16x256xf32>
    %11 = arith.truncf %10 : vector<16x256xf32> to vector<16x256xbf16>
    %c0_8 = arith.constant 0 : index
    %c0_9 = arith.constant 0 : index
    %12 = vector.load %arg5[%c0_8, %c0_9] : memref<16x256xbf16, #tpu.memory_space<vmem>>, vector<16x256xbf16>
    tpu.vector_store %arg5[%c0_8, %c0_9], %11 {strides = array<i32>} : memref<16x256xbf16, #tpu.memory_space<vmem>>, vector<16x256xbf16>,
    return
  }
  func.func @transform_0(%arg0: i32) -> (i32, i32) {
    %c0_i32 = arith.constant 0 : i32
    %c0_i32_0 = arith.constant 0 : i32
    return %arg0, %c0_i32 : i32, i32
  }
  func.func @transform_1(%arg0: i32) -> (i32, i32) {
    %c0_i32 = arith.constant 0 : i32
    %c0_i32_0 = arith.constant 0 : i32
    %c0_i32_1 = arith.constant 0 : i32
    return %c0_i32, %c0_i32_0 : i32, i32
  }
  func.func @transform_2(%arg0: i32) -> (i32, i32) {
    %c0_i32 = arith.constant 0 : i32
    %c0_i32_0 = arith.constant 0 : i32
    %c0_i32_1 = arith.constant 0 : i32
    return %c0_i32, %c0_i32_0 : i32, i32
  }
  func.func @transform_3(%arg0: i32) -> (i32, i32) {
    %c0_i32 = arith.constant 0 : i32
    %c0_i32_0 = arith.constant 0 : i32
    return %arg0, %c0_i32 : i32, i32
  }
  func.func @transform_4(%arg0: i32) -> (i32, i32) {
    %c0_i32 = arith.constant 0 : i32
    %c0_i32_0 = arith.constant 0 : i32
    return %arg0, %c0_i32 : i32, i32
  }
}

module attributes {stable_mosaic.version = 11 : i64} {
  func.func @_avgpool_kernel(%arg0: i32, %arg1: memref<2x6x2x256xbf16, #tpu.memory_space<vmem>>, %arg2: memref<2x6x256xf32, #tpu.memory_space<vmem>>) attributes {dimension_semantics = [#tpu.dimension_semantics<arbitrary>], iteration_bounds = array<i64: 1>, scalar_prefetch = 0 : i64, scratch_operands = 0 : i64, tpu.core_type = #tpu.core_type<tc>, window_params = [{pipeline_mode = #tpu.pipeline_mode<synchronous>, transform_indices = @transform_0, window_bounds = array<i64: 2, 6, 2, 256>}, {pipeline_mode = #tpu.pipeline_mode<synchronous>, transform_indices = @transform_1, window_bounds = array<i64: 2, 6, 256>}]} {
    %c0 = arith.constant 0 : index
    %c0_0 = arith.constant 0 : index
    %c0_1 = arith.constant 0 : index
    %c0_2 = arith.constant 0 : index
    %0 = vector.load %arg1[%c0, %c0_0, %c0_1, %c0_2] : memref<2x6x2x256xbf16, #tpu.memory_space<vmem>>, vector<2x6x2x256xbf16>
    %1 = arith.extf %0 : vector<2x6x2x256xbf16> to vector<2x6x2x256xf32>
    %cst = arith.constant dense<0.000000e+00> : vector<2x6x256xf32>
    %2 = vector.multi_reduction <add>, %1, %cst [2] : vector<2x6x2x256xf32> to vector<2x6x256xf32>
    %cst_3 = arith.constant 2.000000e+00 : f32
    %3 = vector.broadcast %cst_3 : f32 to vector<2x6x256xf32>
    %4 = arith.divf %2, %3 : vector<2x6x256xf32>
    %c0_4 = arith.constant 0 : index
    %c0_5 = arith.constant 0 : index
    %c0_6 = arith.constant 0 : index
    %5 = vector.load %arg2[%c0_4, %c0_5, %c0_6] : memref<2x6x256xf32, #tpu.memory_space<vmem>>, vector<2x6x256xf32>
    tpu.vector_store %arg2[%c0_4, %c0_5, %c0_6], %4 {strides = array<i32>} : memref<2x6x256xf32, #tpu.memory_space<vmem>>, vector<2x6x256xf32>,
    return
  }
  func.func @transform_0(%arg0: i32) -> (i32, i32, i32, i32) {
    %c0_i32 = arith.constant 0 : i32
    %c0_i32_0 = arith.constant 0 : i32
    %c0_i32_1 = arith.constant 0 : i32
    %c0_i32_2 = arith.constant 0 : i32
    %c0_i32_3 = arith.constant 0 : i32
    return %c0_i32, %c0_i32_0, %c0_i32_1, %c0_i32_2 : i32, i32, i32, i32
  }
  func.func @transform_1(%arg0: i32) -> (i32, i32, i32) {
    %c0_i32 = arith.constant 0 : i32
    %c0_i32_0 = arith.constant 0 : i32
    %c0_i32_1 = arith.constant 0 : i32
    %c0_i32_2 = arith.constant 0 : i32
    return %c0_i32, %c0_i32_0, %c0_i32_1 : i32, i32, i32
  }
}

module attributes {stable_mosaic.version = 11 : i64} {
  func.func @_classblock_kernel(%arg0: i32, %arg1: memref<1x2x256xbf16, #tpu.memory_space<vmem>>, %arg2: memref<1x256x128xbf16, #tpu.memory_space<vmem>>, %arg3: memref<1x1x128xf32, #tpu.memory_space<vmem>>, %arg4: memref<1x128x256xbf16, #tpu.memory_space<vmem>>, %arg5: memref<1x1x256xf32, #tpu.memory_space<vmem>>, %arg6: memref<1x2x256xf32, #tpu.memory_space<vmem>>) attributes {dimension_semantics = [#tpu.dimension_semantics<parallel>], iteration_bounds = array<i64: 6>, scalar_prefetch = 0 : i64, scratch_operands = 0 : i64, tpu.core_type = #tpu.core_type<tc>, window_params = [{transform_indices = @transform_0, window_bounds = array<i64: 1, 2, 256>}, {transform_indices = @transform_1, window_bounds = array<i64: 1, 256, 128>}, {transform_indices = @transform_2, window_bounds = array<i64: 1, 1, 128>}, {transform_indices = @transform_3, window_bounds = array<i64: 1, 128, 256>}, {transform_indices = @transform_4, window_bounds = array<i64: 1, 1, 256>}, {transform_indices = @transform_5, window_bounds = array<i64: 1, 2, 256>}]} {
    %c0 = arith.constant 0 : index
    %c0_0 = arith.constant 0 : index
    %c0_1 = arith.constant 0 : index
    %0 = vector.load %arg1[%c0, %c0_0, %c0_1] : memref<1x2x256xbf16, #tpu.memory_space<vmem>>, vector<1x2x256xbf16>
    %1 = vector.shape_cast %0 : vector<1x2x256xbf16> to vector<2x256xbf16>
    %c0_2 = arith.constant 0 : index
    %c0_3 = arith.constant 0 : index
    %c0_4 = arith.constant 0 : index
    %2 = vector.load %arg2[%c0_2, %c0_3, %c0_4] : memref<1x256x128xbf16, #tpu.memory_space<vmem>>, vector<1x256x128xbf16>
    %3 = vector.shape_cast %2 : vector<1x256x128xbf16> to vector<256x128xbf16>
    %cst = arith.constant dense<0.000000e+00> : vector<2x128xf32>
    %4 = tpu.matmul %1, %3, %cst {dimension_numbers = #tpu.dot_dimension_numbers<[1], [0], [0], [1], [0, 0, 1, 1], [], []>} : vector<2x256xbf16>, vector<256x128xbf16>, vector<2x128xf32> -> vector<2x128xf32>
    %c0_5 = arith.constant 0 : index
    %c0_6 = arith.constant 0 : index
    %c0_7 = arith.constant 0 : index
    %5 = vector.load %arg3[%c0_5, %c0_6, %c0_7] : memref<1x1x128xf32, #tpu.memory_space<vmem>>, vector<1x1x128xf32>
    %6 = vector.shape_cast %5 : vector<1x1x128xf32> to vector<1x128xf32>
    %7 = vector.broadcast %6 : vector<1x128xf32> to vector<2x128xf32>
    %8 = arith.addf %4, %7 : vector<2x128xf32>
    %9 = arith.truncf %8 : vector<2x128xf32> to vector<2x128xbf16>
    %c0_8 = arith.constant 0 : index
    %c0_9 = arith.constant 0 : index
    %c0_10 = arith.constant 0 : index
    %10 = vector.load %arg4[%c0_8, %c0_9, %c0_10] : memref<1x128x256xbf16, #tpu.memory_space<vmem>>, vector<1x128x256xbf16>
    %11 = vector.shape_cast %10 : vector<1x128x256xbf16> to vector<128x256xbf16>
    %cst_11 = arith.constant dense<0.000000e+00> : vector<2x256xf32>
    %12 = tpu.matmul %9, %11, %cst_11 {dimension_numbers = #tpu.dot_dimension_numbers<[1], [0], [0], [1], [0, 0, 1, 1], [], []>} : vector<2x128xbf16>, vector<128x256xbf16>, vector<2x256xf32> -> vector<2x256xf32>
    %c0_12 = arith.constant 0 : index
    %c0_13 = arith.constant 0 : index
    %c0_14 = arith.constant 0 : index
    %13 = vector.load %arg5[%c0_12, %c0_13, %c0_14] : memref<1x1x256xf32, #tpu.memory_space<vmem>>, vector<1x1x256xf32>
    %14 = vector.shape_cast %13 : vector<1x1x256xf32> to vector<1x256xf32>
    %15 = vector.broadcast %14 : vector<1x256xf32> to vector<2x256xf32>
    %16 = arith.addf %12, %15 : vector<2x256xf32>
    %c0_15 = arith.constant 0 : index
    %c0_16 = arith.constant 0 : index
    %c0_17 = arith.constant 0 : index
    %17 = vector.load %arg6[%c0_15, %c0_16, %c0_17] : memref<1x2x256xf32, #tpu.memory_space<vmem>>, vector<1x2x256xf32>
    %18 = vector.shape_cast %17 : vector<1x2x256xf32> to vector<2x256xf32>
    %19 = vector.shape_cast %16 : vector<2x256xf32> to vector<1x2x256xf32>
    tpu.vector_store %arg6[%c0_15, %c0_16, %c0_17], %19 {strides = array<i32>} : memref<1x2x256xf32, #tpu.memory_space<vmem>>, vector<1x2x256xf32>,
    return
  }
  func.func @transform_0(%arg0: i32) -> (i32, i32, i32) {
    %c0_i32 = arith.constant 0 : i32
    %c0_i32_0 = arith.constant 0 : i32
    %c0_i32_1 = arith.constant 0 : i32
    return %arg0, %c0_i32, %c0_i32_0 : i32, i32, i32
  }
  func.func @transform_1(%arg0: i32) -> (i32, i32, i32) {
    %c0_i32 = arith.constant 0 : i32
    %c0_i32_0 = arith.constant 0 : i32
    %c0_i32_1 = arith.constant 0 : i32
    return %arg0, %c0_i32, %c0_i32_0 : i32, i32, i32
  }
  func.func @transform_2(%arg0: i32) -> (i32, i32, i32) {
    %c0_i32 = arith.constant 0 : i32
    %c0_i32_0 = arith.constant 0 : i32
    %c0_i32_1 = arith.constant 0 : i32
    return %arg0, %c0_i32, %c0_i32_0 : i32, i32, i32
  }
  func.func @transform_3(%arg0: i32) -> (i32, i32, i32) {
    %c0_i32 = arith.constant 0 : i32
    %c0_i32_0 = arith.constant 0 : i32
    %c0_i32_1 = arith.constant 0 : i32
    return %arg0, %c0_i32, %c0_i32_0 : i32, i32, i32
  }
  func.func @transform_4(%arg0: i32) -> (i32, i32, i32) {
    %c0_i32 = arith.constant 0 : i32
    %c0_i32_0 = arith.constant 0 : i32
    %c0_i32_1 = arith.constant 0 : i32
    return %arg0, %c0_i32, %c0_i32_0 : i32, i32, i32
  }
  func.func @transform_5(%arg0: i32) -> (i32, i32, i32) {
    %c0_i32 = arith.constant 0 : i32
    %c0_i32_0 = arith.constant 0 : i32
    %c0_i32_1 = arith.constant 0 : i32
    return %arg0, %c0_i32, %c0_i32_0 : i32, i32, i32
  }
}

</mosaic_0001>

<bundles_post_ra>
// kernel: pcb_forward.20
= control target key start
LH: loop header
LB: loop body
LE: loop exit
PB: predicated region body
PF: predicated region fallthrough
CT: control target
= control target key end

     0   :  { %s2051_s12 = smov 0   ;;  %s2303_s0 = inlined_call_operand.vmem [shape: bf16[1536,147], index: 0, kind: input, shape index: {}]   ;;  %s2304_s1 = inlined_call_operand.vmem [shape: bf16[147,128], index: 1, kind: input, shape index: {}]   ;;  %s2305_s2 = inlined_call_operand.vmem [shape: f32[1,128], index: 2, kind: input, shape index: {}]   ;;  %s2306_s3 = inlined_call_operand.vmem [shape: bf16[1536,128], index: 3, kind: output, shape index: {}]  }
   0x1 LB: > { %s1446_s13 = sadd.s32 4294967295, %s2027_s12   ;;  %p1450_p0 = scmp.ge.s32.totalorder %s2027_s12, 1  ;;  %s2027_s12 = sphi %s2051_s12, %s13_s12  }
   0x2   : > { %p139_p1 = scmp.lt.s32.totalorder %s2027_s12, 4 }
   0x4   : > { %p140_p2 = pnand %p1450_p0, %p139_p1 }
   0x5   : > { %v1915_v0 = vld [vmem:[%s2304_s1] sm:$0xff] (!%p140_p2)   ;;  %v2029_v1 = vmov (!%p140_p2), 0   ;;  %v1916_v2 = vld [vmem:[%s2304_s1 + $0x8] sm:$0xff] (!%p140_p2)   ;;  %v1917_v3 = vld [vmem:[%s2304_s1 + $0x10] sm:$0xff] (!%p140_p2)   ;;  %s1451_s20 = sshll.u32 (!%p140_p2), %s1446_s13, 6  ;;  %vm613_vm0 = vcmask (!%p140_p2), 154624  }
   0x6   : > { %143 = sbr.rel (%p140_p2) target bundleno = 387 (0x183), region = 32  ;;  %717 = vmatprep.subr.bf16.mxu0 (!%p140_p2), %v2029_v1  ;;  %1885 = vmatprep.subr.bf16.mxu1 (!%p140_p2), %v2029_v1  ;;  %p165_p3 = scmp.lt.s32.totalorder (!%p140_p2), %s1451_s20, 191  ;;  %v1918_v4 = vld [vmem:[%s2304_s1 + $0x18] sm:$0xff] (!%p140_p2)   ;;  %v1919_v5 = vld [vmem:[%s2304_s1 + $0x20] sm:$0xff] (!%p140_p2)   ;;  %v1920_v8 = vld [vmem:[%s2304_s1 + $0x28] sm:$0xff] (!%p140_p2)   ;;  %vm710_vm1 = vcmask (!%p140_p2), 1040384  }
   0x7   : > { %718 = vmatpush1.bf16.msra.mxu0 (!%p140_p2), %v1915_v0  ;;  %1895 = vmatpush1.bf16.msra.mxu1 (!%p140_p2), %v1915_v0  ;;  %v1921_v9 = vld [vmem:[%s2304_s1 + $0x30] sm:$0xff] (!%p140_p2)   ;;  %v1922_v10 = vld [vmem:[%s2304_s1 + $0x38] sm:$0xff] (!%p140_p2)   ;;  %vm711_vm2 = vcmask (!%p140_p2), 1041408   ;;  %v2030_v11 = vmov (!%p140_p2), 65535   ;;  %v1923_v13 = vld [vmem:[%s2304_s1 + $0x40] sm:$0xff] (!%p140_p2)  }
   0x8   : > { %719 = vmatprep.subr.bf16.mxu0 (!%p140_p2), %v2029_v1  ;;  %1886 = vmatprep.subr.bf16.mxu1 (!%p140_p2), %v2029_v1  ;;  %v712_v12 = vsel (!%p140_p2), %vm710_vm1, 4294967295, %v2030_v11  ;;  %v1924_v14 = vld [vmem:[%s2304_s1 + $0x48] ss:$0 sps:$4 sm:$0x33] (!%p140_p2)  }
   0x9   : > { %v713_v15 = vsel (!%p140_p2), %vm711_vm2, %v712_v12, 0 }
   0xa   : > { %v715_v16 = vand.u32 (!%p140_p2), %v1924_v14, %v713_v15  ;;  %v2196_v15 = vld [vmem:[%s2305_s2] ss:$0 sm:$0xff] (!%p140_p2) }
   0xb   : > { %720 = vmatpush1.bf16.msra.mxu0 (!%p140_p2), %v1916_v2  ;;  %1896 = vmatpush1.bf16.msra.mxu1 (!%p140_p2), %v1916_v2 }
   0xc   : > { %721 = vmatprep.subr.bf16.mxu0 (!%p140_p2), %v2029_v1  ;;  %1887 = vmatprep.subr.bf16.mxu1 (!%p140_p2), %v2029_v1 }
   0xd   : > { %s2308_s20 = smov (!%p165_p3, %s1451_s20), 191 }
   0xe   : > { %s1629_s23 = sshll.u32 %s2308_s20, 3  ;;  %s1455_s15 = sshll.u32 %s2308_s20, 2 }
   0xf   : > { %722 = vmatpush1.bf16.msra.mxu0 %v1917_v3  ;;  %1897 = vmatpush1.bf16.msra.mxu1 %v1917_v3  ;;  %s2077_s26 = scalar_lea.vmem %s2303_s0, %s1629_s23  ;;  %s2206_s18 = scalar_lea.vmem %s2306_s3, %s1455_s15 }
  0x10   : > { %723 = vmatprep.subr.bf16.mxu0 %v2029_v1  ;;  %1888 = vmatprep.subr.bf16.mxu1 %v2029_v1  ;;  %v1927_v6 = vld [vmem:[%s2077_s26 + $0x4] ss:$8 sps:$4 sm:$0xff]   ;;  %v1925_v17 = vld [vmem:[%s2077_s26] ss:$8 sps:$4 sm:$0xff]   ;;  %v1931_v19 = vld [vmem:[%s2077_s26 + $0x14] ss:$8 sps:$4 sm:$0xff]  }
  0x11   : > { %v1930_v7 = vld [vmem:[%s2077_s26 + $0x104] ss:$8 sps:$4 sm:$0xff]   ;;  %1531 = vmatprep.mubr.msk.bf16.mxu0 %vm613_vm0, %v1927_v6  ;;  %v1928_v18 = vld [vmem:[%s2077_s26 + $0x100] ss:$8 sps:$4 sm:$0xff]   ;;  %v1933_v20 = vld [vmem:[%s2077_s26 + $0x114] ss:$8 sps:$4 sm:$0xff]  }
  0x12   : > { %1547 = vmatprep.mubr.msk.bf16.mxu1 %vm613_vm0, %v1930_v7  ;;  %v1935_v21 = vld [vmem:[%s2077_s26 + $0x10] ss:$8 sps:$4 sm:$0xff]   ;;  %v1937_v23 = vld [vmem:[%s2077_s26 + $0x24] ss:$8 sps:$4 sm:$0xff]   ;;  %v1941_v25 = vld [vmem:[%s2077_s26 + $0x20] ss:$8 sps:$4 sm:$0xff]  }
  0x13   : > { %724 = vmatpush1.bf16.msra.mxu0 %v1918_v4  ;;  %1898 = vmatpush1.bf16.msra.mxu1 %v1918_v4  ;;  %v1936_v22 = vld [vmem:[%s2077_s26 + $0x110] ss:$8 sps:$4 sm:$0xff]   ;;  %v1939_v24 = vld [vmem:[%s2077_s26 + $0x124] ss:$8 sps:$4 sm:$0xff]   ;;  %v1942_v26 = vld [vmem:[%s2077_s26 + $0x120] ss:$8 sps:$4 sm:$0xff]  }
  0x14   : > { %725 = vmatprep.subr.bf16.mxu0 %v2029_v1  ;;  %1889 = vmatprep.subr.bf16.mxu1 %v2029_v1  ;;  %v1943_v27 = vld [vmem:[%s2077_s26 + $0x34] ss:$8 sps:$4 sm:$0xff]   ;;  %v1947_v29 = vld [vmem:[%s2077_s26 + $0x30] ss:$8 sps:$4 sm:$0xff]   ;;  %v1949_v31 = vld [vmem:[%s2077_s26 + $0x44] ss:$8 sps:$4 sm:$0xff]  }
  0x15   : > { %v1945_v28 = vld [vmem:[%s2077_s26 + $0x134] ss:$8 sps:$4 sm:$0xff]   ;;  %v1948_v30 = vld [vmem:[%s2077_s26 + $0x130] ss:$8 sps:$4 sm:$0xff]   ;;  %v1951_v32 = vld [vmem:[%s2077_s26 + $0x144] ss:$8 sps:$4 sm:$0xff]  }
  0x16   : > { %v1953_v33 = vld [vmem:[%s2077_s26 + $0x40] ss:$8 sps:$4 sm:$0xff]   ;;  %v1955_v35 = vld [vmem:[%s2077_s26 + $0x54] ss:$8 sps:$4 sm:$0xff]   ;;  %v1959_v37 = vld [vmem:[%s2077_s26 + $0x50] ss:$8 sps:$4 sm:$0xff]  }
  0x17   : > { %726 = vmatpush1.bf16.msra.mxu0 %v1919_v5  ;;  %1899 = vmatpush1.bf16.msra.mxu1 %v1919_v5  ;;  %v1954_v34 = vld [vmem:[%s2077_s26 + $0x140] ss:$8 sps:$4 sm:$0xff]   ;;  %v1957_v36 = vld [vmem:[%s2077_s26 + $0x154] ss:$8 sps:$4 sm:$0xff]   ;;  %v1960_v38 = vld [vmem:[%s2077_s26 + $0x150] ss:$8 sps:$4 sm:$0xff]  }
  0x18   : > { %727 = vmatprep.subr.bf16.mxu0 %v2029_v1  ;;  %1890 = vmatprep.subr.bf16.mxu1 %v2029_v1  ;;  %v1961_v39 = vld [vmem:[%s2077_s26 + $0x64] ss:$8 sps:$4 sm:$0xff]   ;;  %v1965_v41 = vld [vmem:[%s2077_s26 + $0x60] ss:$8 sps:$4 sm:$0xff]   ;;  %v1967_v43 = vld [vmem:[%s2077_s26 + $0x74] ss:$8 sps:$4 sm:$0xff]  }
  0x19   : > { %v1963_v40 = vld [vmem:[%s2077_s26 + $0x164] ss:$8 sps:$4 sm:$0xff]   ;;  %v1966_v42 = vld [vmem:[%s2077_s26 + $0x160] ss:$8 sps:$4 sm:$0xff]   ;;  %v1969_v44 = vld [vmem:[%s2077_s26 + $0x174] ss:$8 sps:$4 sm:$0xff]  }
  0x1a   : > { %v1971_v45 = vld [vmem:[%s2077_s26 + $0x70] ss:$8 sps:$4 sm:$0xff]   ;;  %v1973_v47 = vld [vmem:[%s2077_s26 + $0x84] ss:$8 sps:$4 sm:$0xff]   ;;  %v1977_v49 = vld [vmem:[%s2077_s26 + $0x80] ss:$8 sps:$4 sm:$0xff]  }
  0x1b   : > { %728 = vmatpush1.bf16.msra.mxu0 %v1920_v8  ;;  %1900 = vmatpush1.bf16.msra.mxu1 %v1920_v8  ;;  %v1972_v46 = vld [vmem:[%s2077_s26 + $0x170] ss:$8 sps:$4 sm:$0xff]   ;;  %v1975_v48 = vld [vmem:[%s2077_s26 + $0x184] ss:$8 sps:$4 sm:$0xff]   ;;  %v1978_v50 = vld [vmem:[%s2077_s26 + $0x180] ss:$8 sps:$4 sm:$0xff]  }
  0x1c   : > { %729 = vmatprep.subr.bf16.mxu0 %v2029_v1  ;;  %1891 = vmatprep.subr.bf16.mxu1 %v2029_v1  ;;  %v1979_v51 = vld [vmem:[%s2077_s26 + $0x94] ss:$8 sps:$4 sm:$0xff]   ;;  %v1983_v53 = vld [vmem:[%s2077_s26 + $0x90] ss:$8 sps:$4 sm:$0xff]   ;;  %v1985_v55 = vld [vmem:[%s2077_s26 + $0xa4] ss:$8 sps:$4 sm:$0xff]  }
  0x1d   : > { %v1981_v52 = vld [vmem:[%s2077_s26 + $0x194] ss:$8 sps:$4 sm:$0xff]   ;;  %v1984_v54 = vld [vmem:[%s2077_s26 + $0x190] ss:$8 sps:$4 sm:$0xff]   ;;  %v1987_v56 = vld [vmem:[%s2077_s26 + $0x1a4] ss:$8 sps:$4 sm:$0xff]  }
  0x1e   : > { %v1989_v57 = vld [vmem:[%s2077_s26 + $0xa0] ss:$8 sps:$4 sm:$0xff]   ;;  %v1991_v59 = vld [vmem:[%s2077_s26 + $0xb4] ss:$8 sps:$4 sm:$0xff]   ;;  %v1995_v61 = vld [vmem:[%s2077_s26 + $0xb0] ss:$8 sps:$4 sm:$0xff]  }
  0x1f   : > { %730 = vmatpush1.bf16.msra.mxu0 %v1921_v9  ;;  %1901 = vmatpush1.bf16.msra.mxu1 %v1921_v9  ;;  %v1990_v58 = vld [vmem:[%s2077_s26 + $0x1a0] ss:$8 sps:$4 sm:$0xff]   ;;  %v1993_v60 = vld [vmem:[%s2077_s26 + $0x1b4] ss:$8 sps:$4 sm:$0xff]   ;;  %v1996_v62 = vld [vmem:[%s2077_s26 + $0x1b0] ss:$8 sps:$4 sm:$0xff]  }
  0x20   : > { %731 = vmatprep.subr.bf16.mxu0 %v2029_v1  ;;  %1892 = vmatprep.subr.bf16.mxu1 %v2029_v1  ;;  %v1997_v63 = vld [vmem:[%s2077_s26 + $0xc4] ss:$8 sps:$4 sm:$0xff]   ;;  %v2002_v2 = vld [vmem:[%s2077_s26 + $0x1c0] ss:$8 sps:$4 sm:$0xff]   ;;  %v2003_v3 = vld [vmem:[%s2077_s26 + $0xd4] ss:$8 sps:$4 sm:$0xff]  }
  0x21   : > { %v1999_v0 = vld [vmem:[%s2077_s26 + $0x1c4] ss:$8 sps:$4 sm:$0xff]   ;;  %v2005_v4 = vld [vmem:[%s2077_s26 + $0x1d4] ss:$8 sps:$4 sm:$0xff]   ;;  %v2007_v5 = vld [vmem:[%s2077_s26 + $0xd0] ss:$8 sps:$4 sm:$0xff]  }
  0x22   : > { %v2008_v6 = vld [vmem:[%s2077_s26 + $0x1d0] ss:$8 sps:$4 sm:$0xff]   ;;  %v2009_v7 = vld [vmem:[%s2077_s26 + $0xe4] ss:$8 sps:$4 sm:$0xff]   ;;  %v2013_v9 = vld [vmem:[%s2077_s26 + $0xe0] ss:$8 sps:$4 sm:$0xff]  }
  0x23   : > { %732 = vmatpush1.bf16.msra.mxu0 %v1922_v10  ;;  %1902 = vmatpush1.bf16.msra.mxu1 %v1922_v10  ;;  %v2011_v8 = vld [vmem:[%s2077_s26 + $0x1e4] ss:$8 sps:$4 sm:$0xff]   ;;  %v2014_v10 = vld [vmem:[%s2077_s26 + $0x1e0] ss:$8 sps:$4 sm:$0xff]   ;;  %v2015_v11 = vld [vmem:[%s2077_s26 + $0xf4] ss:$8 sps:$4 sm:$0xff]  }
  0x24   : > { %733 = vmatprep.subr.bf16.mxu0 %v2029_v1  ;;  %1893 = vmatprep.subr.bf16.mxu1 %v2029_v1  ;;  %v2017_v12 = vld [vmem:[%s2077_s26 + $0x1f4] ss:$8 sps:$4 sm:$0xff]   ;;  %v2020_v14 = vld [vmem:[%s2077_s26 + $0x1f0] ss:$8 sps:$4 sm:$0xff]  }
  0x27   : > { %734 = vmatpush1.bf16.msra.mxu0 %v1923_v13  ;;  %1903 = vmatpush1.bf16.msra.mxu1 %v1923_v13  ;;  %v2019_v13 = vld [vmem:[%s2077_s26 + $0xf0] ss:$8 sps:$4 sm:$0xff]  }
  0x28   : > { %735 = vmatprep.subr.bf16.mxu0 %v2029_v1  ;;  %1894 = vmatprep.subr.bf16.mxu1 %v2029_v1  ;;  %v2001_v1 = vld [vmem:[%s2077_s26 + $0xc0] ss:$8 sps:$4 sm:$0xff]  }
  0x2b   : > { %736 = vmatpush1.bf16.msra.mxu0 %v715_v16  ;;  %1904 = vmatpush1.bf16.msra.mxu1 %v715_v16 }
  0x2e   : > { %750 = vmatmul.mubr.bf16.vlgmr.msra.gmra.mrb[0].mxu0 %v1925_v17  ;;  %878 = vmatmul.mubr.bf16.vlgmr.msra.gmra.mrb[0].mxu1 %v1928_v18 }
  0x2f   : > { %1532 = vmatprep.mubr.msk.bf16.mxu0 %vm613_vm0, %v1931_v19  ;;  %1548 = vmatprep.mubr.msk.bf16.mxu1 %vm613_vm0, %v1933_v20 }
  0x36   : > { %758 = vmatmul.mubr.bf16.gmra.mrb[4].mxu0 %v1935_v21  ;;  %886 = vmatmul.mubr.bf16.gmra.mrb[4].mxu1 %v1936_v22 }
  0x37   : > { %1533 = vmatprep.mubr.msk.bf16.mxu0 %vm613_vm0, %v1937_v23  ;;  %1549 = vmatprep.mubr.msk.bf16.mxu1 %vm613_vm0, %v1939_v24 }
  0x3e   : > { %766 = vmatmul.mubr.bf16.gmra.mrb[8].mxu0 %v1941_v25  ;;  %894 = vmatmul.mubr.bf16.gmra.mrb[8].mxu1 %v1942_v26 }
  0x3f   : > { %1534 = vmatprep.mubr.msk.bf16.mxu0 %vm613_vm0, %v1943_v27  ;;  %1550 = vmatprep.mubr.msk.bf16.mxu1 %vm613_vm0, %v1945_v28 }
  0x46   : > { %774 = vmatmul.mubr.bf16.gmra.mrb[12].mxu0 %v1947_v29  ;;  %902 = vmatmul.mubr.bf16.gmra.mrb[12].mxu1 %v1948_v30 }
  0x47   : > { %1535 = vmatprep.mubr.msk.bf16.mxu0 %vm613_vm0, %v1949_v31  ;;  %1551 = vmatprep.mubr.msk.bf16.mxu1 %vm613_vm0, %v1951_v32 }
  0x4e   : > { %782 = vmatmul.mubr.bf16.gmra.mrb[16].mxu0 %v1953_v33  ;;  %910 = vmatmul.mubr.bf16.gmra.mrb[16].mxu1 %v1954_v34 }
  0x4f   : > { %1536 = vmatprep.mubr.msk.bf16.mxu0 %vm613_vm0, %v1955_v35  ;;  %1552 = vmatprep.mubr.msk.bf16.mxu1 %vm613_vm0, %v1957_v36 }
  0x56   : > { %790 = vmatmul.mubr.bf16.gmra.mrb[20].mxu0 %v1959_v37  ;;  %918 = vmatmul.mubr.bf16.gmra.mrb[20].mxu1 %v1960_v38 }
  0x57   : > { %1537 = vmatprep.mubr.msk.bf16.mxu0 %vm613_vm0, %v1961_v39  ;;  %1553 = vmatprep.mubr.msk.bf16.mxu1 %vm613_vm0, %v1963_v40 }
  0x5e   : > { %798 = vmatmul.mubr.bf16.gmra.mrb[24].mxu0 %v1965_v41  ;;  %926 = vmatmul.mubr.bf16.gmra.mrb[24].mxu1 %v1966_v42 }
  0x5f   : > { %1538 = vmatprep.mubr.msk.bf16.mxu0 %vm613_vm0, %v1967_v43  ;;  %1554 = vmatprep.mubr.msk.bf16.mxu1 %vm613_vm0, %v1969_v44 }
  0x66   : > { %806 = vmatmul.mubr.bf16.gmra.mrb[28].mxu0 %v1971_v45  ;;  %934 = vmatmul.mubr.bf16.gmra.mrb[28].mxu1 %v1972_v46 }
  0x67   : > { %1539 = vmatprep.mubr.msk.bf16.mxu0 %vm613_vm0, %v1973_v47  ;;  %1555 = vmatprep.mubr.msk.bf16.mxu1 %vm613_vm0, %v1975_v48 }
  0x6e   : > { %814 = vmatmul.mubr.bf16.gmra.mrb[32].mxu0 %v1977_v49  ;;  %942 = vmatmul.mubr.bf16.gmra.mrb[32].mxu1 %v1978_v50 }
  0x6f   : > { %1540 = vmatprep.mubr.msk.bf16.mxu0 %vm613_vm0, %v1979_v51  ;;  %1556 = vmatprep.mubr.msk.bf16.mxu1 %vm613_vm0, %v1981_v52 }
  0x76   : > { %822 = vmatmul.mubr.bf16.gmra.mrb[36].mxu0 %v1983_v53  ;;  %950 = vmatmul.mubr.bf16.gmra.mrb[36].mxu1 %v1984_v54 }
  0x77   : > { %1541 = vmatprep.mubr.msk.bf16.mxu0 %vm613_vm0, %v1985_v55  ;;  %1557 = vmatprep.mubr.msk.bf16.mxu1 %vm613_vm0, %v1987_v56 }
  0x7e   : > { %830 = vmatmul.mubr.bf16.gmra.mrb[40].mxu0 %v1989_v57  ;;  %958 = vmatmul.mubr.bf16.gmra.mrb[40].mxu1 %v1990_v58 }
  0x7f   : > { %1542 = vmatprep.mubr.msk.bf16.mxu0 %vm613_vm0, %v1991_v59  ;;  %1558 = vmatprep.mubr.msk.bf16.mxu1 %vm613_vm0, %v1993_v60 }
  0x86   : > { %838 = vmatmul.mubr.bf16.gmra.mrb[44].mxu0 %v1995_v61  ;;  %966 = vmatmul.mubr.bf16.gmra.mrb[44].mxu1 %v1996_v62 }
  0x87   : > { %1543 = vmatprep.mubr.msk.bf16.mxu0 %vm613_vm0, %v1997_v63  ;;  %1559 = vmatprep.mubr.msk.bf16.mxu1 %vm613_vm0, %v1999_v0 }
  0x8e   : > { %846 = vmatmul.mubr.bf16.gmra.mrb[48].mxu0 %v2001_v1  ;;  %974 = vmatmul.mubr.bf16.gmra.mrb[48].mxu1 %v2002_v2 }
  0x8f   : > { %1544 = vmatprep.mubr.msk.bf16.mxu0 %vm613_vm0, %v2003_v3  ;;  %1560 = vmatprep.mubr.msk.bf16.mxu1 %vm613_vm0, %v2005_v4 }
  0x96   : > { %854 = vmatmul.mubr.bf16.gmra.mrb[52].mxu0 %v2007_v5  ;;  %982 = vmatmul.mubr.bf16.gmra.mrb[52].mxu1 %v2008_v6 }
  0x97   : > { %1545 = vmatprep.mubr.msk.bf16.mxu0 %vm613_vm0, %v2009_v7  ;;  %1561 = vmatprep.mubr.msk.bf16.mxu1 %vm613_vm0, %v2011_v8 }
  0x9e   : > { %862 = vmatmul.mubr.bf16.gmra.mrb[56].mxu0 %v2013_v9  ;;  %990 = vmatmul.mubr.bf16.gmra.mrb[56].mxu1 %v2014_v10 }
  0x9f   : > { %1546 = vmatprep.mubr.msk.bf16.mxu0 %vm613_vm0, %v2015_v11  ;;  %1562 = vmatprep.mubr.msk.bf16.mxu1 %vm613_vm0, %v2017_v12 }
  0xa6   : > { %870 = vmatmul.mubr.bf16.gmra.mrb[60].mxu0 %v2019_v13  ;;  %998 = vmatmul.mubr.bf16.gmra.mrb[60].mxu1 %v2020_v14 }
 0x101   : > { %v751_v16 = vpop.f32.mrb[0].mxu0  ;;  %v879_v17 = vpop.f32.mrb[0].mxu1 }
 0x102   : > { %v752_v18 = vadd.f32 %v2196_v15, %v751_v16  ;;  %v880_v19 = vadd.f32 %v2196_v15, %v879_v17  ;;  %v753_v20 = vpop.f32.mrb[1].mxu0  ;;  %v881_v21 = vpop.f32.mrb[1].mxu1 }
 0x103   : > { %v754_v22 = vpop.f32.mrb[2].mxu0  ;;  %v882_v23 = vpop.f32.mrb[2].mxu1 }
 0x104   : > { %v755_v24 = vadd.f32 %v2196_v15, %v754_v22  ;;  %v883_v25 = vadd.f32 %v2196_v15, %v882_v23  ;;  %v756_v26 = vpop.f32.mrb[3].mxu0  ;;  %v884_v27 = vpop.f32.mrb[3].mxu1  ;;  %v1006_v28 = vmax.f32 %v752_v18, 0.0  ;;  %v1038_v29 = vmax.f32 %v880_v19, 0.0 }
 0x106   : > { %v1007_v30 = vmax.f32 %v755_v24, 0.0  ;;  %v1039_v31 = vmax.f32 %v883_v25, 0.0 }
 0x108   : > { %v1697_v32 = vpack.c.bf16 %v1007_v30, %v1006_v28  ;;  %v1777_v33 = vpack.c.bf16 %v1039_v31, %v1038_v29 }
 0x109   : > { %v759_v34 = vpop.f32.mrb[4].mxu0  ;;  %v887_v35 = vpop.f32.mrb[4].mxu1 }
 0x10a   : > { %1698 = vst [vmem:[%s2206_s18] sm:$0xff] %v1697_v32   ;;  %1869 = vst [vmem:[%s2206_s18 + $0x80] sm:$0xff] %v1777_v33   ;;  %v760_v36 = vadd.f32 %v2196_v15, %v759_v34  ;;  %v888_v37 = vadd.f32 %v2196_v15, %v887_v35  ;;  %v761_v38 = vpop.f32.mrb[5].mxu0  ;;  %v889_v39 = vpop.f32.mrb[5].mxu1 }
 0x10b   : > { %v762_v40 = vpop.f32.mrb[6].mxu0  ;;  %v890_v41 = vpop.f32.mrb[6].mxu1 }
 0x10c   : > { %v763_v42 = vadd.f32 %v2196_v15, %v762_v40  ;;  %v891_v43 = vadd.f32 %v2196_v15, %v890_v41  ;;  %v764_v44 = vpop.f32.mrb[7].mxu0  ;;  %v892_v45 = vpop.f32.mrb[7].mxu1  ;;  %v1008_v46 = vmax.f32 %v760_v36, 0.0  ;;  %v1040_v47 = vmax.f32 %v888_v37, 0.0 }
 0x10e   : > { %v1009_v48 = vmax.f32 %v763_v42, 0.0  ;;  %v1041_v49 = vmax.f32 %v891_v43, 0.0 }
 0x110   : > { %v1702_v50 = vpack.c.bf16 %v1009_v48, %v1008_v46  ;;  %v1782_v51 = vpack.c.bf16 %v1041_v49, %v1040_v47 }
 0x111   : > { %v767_v52 = vpop.f32.mrb[8].mxu0  ;;  %v895_v53 = vpop.f32.mrb[8].mxu1 }
 0x112   : > { %1854 = vst [vmem:[%s2206_s18 + $0x8] sm:$0xff] %v1702_v50   ;;  %1870 = vst [vmem:[%s2206_s18 + $0x88] sm:$0xff] %v1782_v51   ;;  %v768_v54 = vadd.f32 %v2196_v15, %v767_v52  ;;  %v896_v55 = vadd.f32 %v2196_v15, %v895_v53  ;;  %v769_v56 = vpop.f32.mrb[9].mxu0  ;;  %v897_v57 = vpop.f32.mrb[9].mxu1 }
 0x113   : > { %v770_v58 = vpop.f32.mrb[10].mxu0  ;;  %v898_v59 = vpop.f32.mrb[10].mxu1 }
 0x114   : > { %v771_v60 = vadd.f32 %v2196_v15, %v770_v58  ;;  %v899_v61 = vadd.f32 %v2196_v15, %v898_v59  ;;  %v772_v62 = vpop.f32.mrb[11].mxu0  ;;  %v900_v63 = vpop.f32.mrb[11].mxu1  ;;  %v1010_v0 = vmax.f32 %v768_v54, 0.0  ;;  %v1042_v1 = vmax.f32 %v896_v55, 0.0 }
 0x116   : > { %v1011_v2 = vmax.f32 %v771_v60, 0.0  ;;  %v1043_v3 = vmax.f32 %v899_v61, 0.0 }
 0x118   : > { %v1707_v4 = vpack.c.bf16 %v1011_v2, %v1010_v0  ;;  %v1787_v5 = vpack.c.bf16 %v1043_v3, %v1042_v1 }
 0x119   : > { %v775_v6 = vpop.f32.mrb[12].mxu0  ;;  %v903_v7 = vpop.f32.mrb[12].mxu1 }
 0x11a   : > { %1855 = vst [vmem:[%s2206_s18 + $0x10] sm:$0xff] %v1707_v4   ;;  %1871 = vst [vmem:[%s2206_s18 + $0x90] sm:$0xff] %v1787_v5   ;;  %v776_v8 = vadd.f32 %v2196_v15, %v775_v6  ;;  %v904_v9 = vadd.f32 %v2196_v15, %v903_v7  ;;  %v777_v10 = vpop.f32.mrb[13].mxu0  ;;  %v905_v11 = vpop.f32.mrb[13].mxu1 }
 0x11b   : > { %v778_v12 = vpop.f32.mrb[14].mxu0  ;;  %v906_v13 = vpop.f32.mrb[14].mxu1 }
 0x11c   : > { %v779_v14 = vadd.f32 %v2196_v15, %v778_v12  ;;  %v907_v16 = vadd.f32 %v2196_v15, %v906_v13  ;;  %v780_v17 = vpop.f32.mrb[15].mxu0  ;;  %v908_v18 = vpop.f32.mrb[15].mxu1  ;;  %v1012_v19 = vmax.f32 %v776_v8, 0.0  ;;  %v1044_v20 = vmax.f32 %v904_v9, 0.0 }
 0x11e   : > { %v1013_v21 = vmax.f32 %v779_v14, 0.0  ;;  %v1045_v22 = vmax.f32 %v907_v16, 0.0 }
 0x120   : > { %v1712_v23 = vpack.c.bf16 %v1013_v21, %v1012_v19  ;;  %v1792_v24 = vpack.c.bf16 %v1045_v22, %v1044_v20 }
 0x121   : > { %v783_v25 = vpop.f32.mrb[16].mxu0  ;;  %v911_v26 = vpop.f32.mrb[16].mxu1 }
 0x122   : > { %1856 = vst [vmem:[%s2206_s18 + $0x18] sm:$0xff] %v1712_v23   ;;  %1872 = vst [vmem:[%s2206_s18 + $0x98] sm:$0xff] %v1792_v24   ;;  %v784_v27 = vadd.f32 %v2196_v15, %v783_v25  ;;  %v912_v28 = vadd.f32 %v2196_v15, %v911_v26  ;;  %v785_v29 = vpop.f32.mrb[17].mxu0  ;;  %v913_v30 = vpop.f32.mrb[17].mxu1 }
 0x123   : > { %v786_v31 = vpop.f32.mrb[18].mxu0  ;;  %v914_v32 = vpop.f32.mrb[18].mxu1 }
 0x124   : > { %v787_v33 = vadd.f32 %v2196_v15, %v786_v31  ;;  %v915_v34 = vadd.f32 %v2196_v15, %v914_v32  ;;  %v788_v35 = vpop.f32.mrb[19].mxu0  ;;  %v916_v36 = vpop.f32.mrb[19].mxu1  ;;  %v1014_v37 = vmax.f32 %v784_v27, 0.0  ;;  %v1046_v38 = vmax.f32 %v912_v28, 0.0 }
 0x126   : > { %v1015_v39 = vmax.f32 %v787_v33, 0.0  ;;  %v1047_v40 = vmax.f32 %v915_v34, 0.0 }
 0x128   : > { %v1717_v41 = vpack.c.bf16 %v1015_v39, %v1014_v37  ;;  %v1797_v42 = vpack.c.bf16 %v1047_v40, %v1046_v38 }
 0x129   : > { %v791_v43 = vpop.f32.mrb[20].mxu0  ;;  %v919_v44 = vpop.f32.mrb[20].mxu1 }
 0x12a   : > { %1857 = vst [vmem:[%s2206_s18 + $0x20] sm:$0xff] %v1717_v41   ;;  %1873 = vst [vmem:[%s2206_s18 + $0xa0] sm:$0xff] %v1797_v42   ;;  %v792_v45 = vadd.f32 %v2196_v15, %v791_v43  ;;  %v920_v46 = vadd.f32 %v2196_v15, %v919_v44  ;;  %v793_v47 = vpop.f32.mrb[21].mxu0  ;;  %v921_v48 = vpop.f32.mrb[21].mxu1 }
 0x12b   : > { %v794_v49 = vpop.f32.mrb[22].mxu0  ;;  %v922_v50 = vpop.f32.mrb[22].mxu1 }
 0x12c   : > { %v795_v51 = vadd.f32 %v2196_v15, %v794_v49  ;;  %v923_v52 = vadd.f32 %v2196_v15, %v922_v50  ;;  %v796_v53 = vpop.f32.mrb[23].mxu0  ;;  %v924_v54 = vpop.f32.mrb[23].mxu1  ;;  %v1016_v55 = vmax.f32 %v792_v45, 0.0  ;;  %v1048_v56 = vmax.f32 %v920_v46, 0.0 }
 0x12e   : > { %v1017_v57 = vmax.f32 %v795_v51, 0.0  ;;  %v1049_v58 = vmax.f32 %v923_v52, 0.0 }
 0x130   : > { %v1722_v59 = vpack.c.bf16 %v1017_v57, %v1016_v55  ;;  %v1802_v60 = vpack.c.bf16 %v1049_v58, %v1048_v56 }
 0x131   : > { %v799_v61 = vpop.f32.mrb[24].mxu0  ;;  %v927_v62 = vpop.f32.mrb[24].mxu1 }
 0x132   : > { %1858 = vst [vmem:[%s2206_s18 + $0x28] sm:$0xff] %v1722_v59   ;;  %1874 = vst [vmem:[%s2206_s18 + $0xa8] sm:$0xff] %v1802_v60   ;;  %v800_v63 = vadd.f32 %v2196_v15, %v799_v61  ;;  %v928_v0 = vadd.f32 %v2196_v15, %v927_v62  ;;  %v801_v1 = vpop.f32.mrb[25].mxu0  ;;  %v929_v2 = vpop.f32.mrb[25].mxu1 }
 0x133   : > { %v802_v3 = vpop.f32.mrb[26].mxu0  ;;  %v930_v4 = vpop.f32.mrb[26].mxu1 }
 0x134   : > { %v803_v5 = vadd.f32 %v2196_v15, %v802_v3  ;;  %v931_v6 = vadd.f32 %v2196_v15, %v930_v4  ;;  %v804_v7 = vpop.f32.mrb[27].mxu0  ;;  %v932_v8 = vpop.f32.mrb[27].mxu1  ;;  %v1018_v9 = vmax.f32 %v800_v63, 0.0  ;;  %v1050_v10 = vmax.f32 %v928_v0, 0.0 }
 0x136   : > { %v1019_v11 = vmax.f32 %v803_v5, 0.0  ;;  %v1051_v12 = vmax.f32 %v931_v6, 0.0 }
 0x138   : > { %v1727_v13 = vpack.c.bf16 %v1019_v11, %v1018_v9  ;;  %v1807_v14 = vpack.c.bf16 %v1051_v12, %v1050_v10 }
 0x139   : > { %v807_v16 = vpop.f32.mrb[28].mxu0  ;;  %v935_v17 = vpop.f32.mrb[28].mxu1 }
 0x13a   : > { %1859 = vst [vmem:[%s2206_s18 + $0x30] sm:$0xff] %v1727_v13   ;;  %1875 = vst [vmem:[%s2206_s18 + $0xb0] sm:$0xff] %v1807_v14   ;;  %v808_v18 = vadd.f32 %v2196_v15, %v807_v16  ;;  %v936_v19 = vadd.f32 %v2196_v15, %v935_v17  ;;  %v809_v20 = vpop.f32.mrb[29].mxu0  ;;  %v937_v21 = vpop.f32.mrb[29].mxu1 }
 0x13b   : > { %v810_v22 = vpop.f32.mrb[30].mxu0  ;;  %v938_v23 = vpop.f32.mrb[30].mxu1 }
 0x13c   : > { %v811_v24 = vadd.f32 %v2196_v15, %v810_v22  ;;  %v939_v25 = vadd.f32 %v2196_v15, %v938_v23  ;;  %v812_v26 = vpop.f32.mrb[31].mxu0  ;;  %v940_v27 = vpop.f32.mrb[31].mxu1  ;;  %v1020_v28 = vmax.f32 %v808_v18, 0.0  ;;  %v1052_v29 = vmax.f32 %v936_v19, 0.0 }
 0x13e   : > { %v1021_v30 = vmax.f32 %v811_v24, 0.0  ;;  %v1053_v31 = vmax.f32 %v939_v25, 0.0 }
 0x140   : > { %v1732_v32 = vpack.c.bf16 %v1021_v30, %v1020_v28  ;;  %v1812_v33 = vpack.c.bf16 %v1053_v31, %v1052_v29 }
 0x141   : > { %v815_v34 = vpop.f32.mrb[32].mxu0  ;;  %v943_v35 = vpop.f32.mrb[32].mxu1 }
 0x142   : > { %1860 = vst [vmem:[%s2206_s18 + $0x38] sm:$0xff] %v1732_v32   ;;  %1876 = vst [vmem:[%s2206_s18 + $0xb8] sm:$0xff] %v1812_v33   ;;  %v816_v36 = vadd.f32 %v2196_v15, %v815_v34  ;;  %v944_v37 = vadd.f32 %v2196_v15, %v943_v35  ;;  %v817_v38 = vpop.f32.mrb[33].mxu0  ;;  %v945_v39 = vpop.f32.mrb[33].mxu1 }
 0x143   : > { %v818_v40 = vpop.f32.mrb[34].mxu0  ;;  %v946_v41 = vpop.f32.mrb[34].mxu1 }
 0x144   : > { %v819_v42 = vadd.f32 %v2196_v15, %v818_v40  ;;  %v947_v43 = vadd.f32 %v2196_v15, %v946_v41  ;;  %v820_v44 = vpop.f32.mrb[35].mxu0  ;;  %v948_v45 = vpop.f32.mrb[35].mxu1  ;;  %v1022_v46 = vmax.f32 %v816_v36, 0.0  ;;  %v1054_v47 = vmax.f32 %v944_v37, 0.0 }
 0x146   : > { %v1023_v48 = vmax.f32 %v819_v42, 0.0  ;;  %v1055_v49 = vmax.f32 %v947_v43, 0.0 }
 0x148   : > { %v1737_v50 = vpack.c.bf16 %v1023_v48, %v1022_v46  ;;  %v1817_v51 = vpack.c.bf16 %v1055_v49, %v1054_v47 }
 0x149   : > { %v823_v52 = vpop.f32.mrb[36].mxu0  ;;  %v951_v53 = vpop.f32.mrb[36].mxu1 }
 0x14a   : > { %1861 = vst [vmem:[%s2206_s18 + $0x40] sm:$0xff] %v1737_v50   ;;  %1877 = vst [vmem:[%s2206_s18 + $0xc0] sm:$0xff] %v1817_v51   ;;  %v824_v54 = vadd.f32 %v2196_v15, %v823_v52  ;;  %v952_v55 = vadd.f32 %v2196_v15, %v951_v53  ;;  %v825_v56 = vpop.f32.mrb[37].mxu0  ;;  %v953_v57 = vpop.f32.mrb[37].mxu1 }
 0x14b   : > { %v826_v58 = vpop.f32.mrb[38].mxu0  ;;  %v954_v59 = vpop.f32.mrb[38].mxu1 }
 0x14c   : > { %v827_v60 = vadd.f32 %v2196_v15, %v826_v58  ;;  %v955_v61 = vadd.f32 %v2196_v15, %v954_v59  ;;  %v828_v62 = vpop.f32.mrb[39].mxu0  ;;  %v956_v63 = vpop.f32.mrb[39].mxu1  ;;  %v1024_v0 = vmax.f32 %v824_v54, 0.0  ;;  %v1056_v1 = vmax.f32 %v952_v55, 0.0 }
 0x14e   : > { %v1025_v2 = vmax.f32 %v827_v60, 0.0  ;;  %v1057_v3 = vmax.f32 %v955_v61, 0.0 }
 0x150   : > { %v1742_v4 = vpack.c.bf16 %v1025_v2, %v1024_v0  ;;  %v1822_v5 = vpack.c.bf16 %v1057_v3, %v1056_v1 }
 0x151   : > { %v831_v6 = vpop.f32.mrb[40].mxu0  ;;  %v959_v7 = vpop.f32.mrb[40].mxu1 }
 0x152   : > { %1862 = vst [vmem:[%s2206_s18 + $0x48] sm:$0xff] %v1742_v4   ;;  %1878 = vst [vmem:[%s2206_s18 + $0xc8] sm:$0xff] %v1822_v5   ;;  %v832_v8 = vadd.f32 %v2196_v15, %v831_v6  ;;  %v960_v9 = vadd.f32 %v2196_v15, %v959_v7  ;;  %v833_v10 = vpop.f32.mrb[41].mxu0  ;;  %v961_v11 = vpop.f32.mrb[41].mxu1 }
 0x153   : > { %v834_v12 = vpop.f32.mrb[42].mxu0  ;;  %v962_v13 = vpop.f32.mrb[42].mxu1 }
 0x154   : > { %v835_v14 = vadd.f32 %v2196_v15, %v834_v12  ;;  %v963_v16 = vadd.f32 %v2196_v15, %v962_v13  ;;  %v836_v17 = vpop.f32.mrb[43].mxu0  ;;  %v964_v18 = vpop.f32.mrb[43].mxu1  ;;  %v1026_v19 = vmax.f32 %v832_v8, 0.0  ;;  %v1058_v20 = vmax.f32 %v960_v9, 0.0 }
 0x156   : > { %v1027_v21 = vmax.f32 %v835_v14, 0.0  ;;  %v1059_v22 = vmax.f32 %v963_v16, 0.0 }
 0x158   : > { %v1747_v23 = vpack.c.bf16 %v1027_v21, %v1026_v19  ;;  %v1827_v24 = vpack.c.bf16 %v1059_v22, %v1058_v20 }
 0x159   : > { %v839_v25 = vpop.f32.mrb[44].mxu0  ;;  %v967_v26 = vpop.f32.mrb[44].mxu1 }
 0x15a   : > { %1863 = vst [vmem:[%s2206_s18 + $0x50] sm:$0xff] %v1747_v23   ;;  %1879 = vst [vmem:[%s2206_s18 + $0xd0] sm:$0xff] %v1827_v24   ;;  %v840_v27 = vadd.f32 %v2196_v15, %v839_v25  ;;  %v968_v28 = vadd.f32 %v2196_v15, %v967_v26  ;;  %v841_v29 = vpop.f32.mrb[45].mxu0  ;;  %v969_v30 = vpop.f32.mrb[45].mxu1 }
 0x15b   : > { %v842_v31 = vpop.f32.mrb[46].mxu0  ;;  %v970_v32 = vpop.f32.mrb[46].mxu1 }
 0x15c   : > { %v843_v33 = vadd.f32 %v2196_v15, %v842_v31  ;;  %v971_v34 = vadd.f32 %v2196_v15, %v970_v32  ;;  %v844_v35 = vpop.f32.mrb[47].mxu0  ;;  %v972_v36 = vpop.f32.mrb[47].mxu1  ;;  %v1028_v37 = vmax.f32 %v840_v27, 0.0  ;;  %v1060_v38 = vmax.f32 %v968_v28, 0.0 }
 0x15e   : > { %v1029_v39 = vmax.f32 %v843_v33, 0.0  ;;  %v1061_v40 = vmax.f32 %v971_v34, 0.0 }
 0x160   : > { %v1752_v41 = vpack.c.bf16 %v1029_v39, %v1028_v37  ;;  %v1832_v42 = vpack.c.bf16 %v1061_v40, %v1060_v38 }
 0x161   : > { %v847_v43 = vpop.f32.mrb[48].mxu0  ;;  %v975_v44 = vpop.f32.mrb[48].mxu1 }
 0x162   : > { %1864 = vst [vmem:[%s2206_s18 + $0x58] sm:$0xff] %v1752_v41   ;;  %1880 = vst [vmem:[%s2206_s18 + $0xd8] sm:$0xff] %v1832_v42   ;;  %v848_v45 = vadd.f32 %v2196_v15, %v847_v43  ;;  %v976_v46 = vadd.f32 %v2196_v15, %v975_v44  ;;  %v849_v47 = vpop.f32.mrb[49].mxu0  ;;  %v977_v48 = vpop.f32.mrb[49].mxu1 }
 0x163   : > { %v850_v49 = vpop.f32.mrb[50].mxu0  ;;  %v978_v50 = vpop.f32.mrb[50].mxu1 }
 0x164   : > { %v851_v51 = vadd.f32 %v2196_v15, %v850_v49  ;;  %v979_v52 = vadd.f32 %v2196_v15, %v978_v50  ;;  %v852_v53 = vpop.f32.mrb[51].mxu0  ;;  %v980_v54 = vpop.f32.mrb[51].mxu1  ;;  %v1030_v55 = vmax.f32 %v848_v45, 0.0  ;;  %v1062_v56 = vmax.f32 %v976_v46, 0.0 }
 0x166   : > { %v1031_v57 = vmax.f32 %v851_v51, 0.0  ;;  %v1063_v58 = vmax.f32 %v979_v52, 0.0 }
 0x168   : > { %v1757_v59 = vpack.c.bf16 %v1031_v57, %v1030_v55  ;;  %v1837_v60 = vpack.c.bf16 %v1063_v58, %v1062_v56 }
 0x169   : > { %v855_v61 = vpop.f32.mrb[52].mxu0  ;;  %v983_v62 = vpop.f32.mrb[52].mxu1 }
 0x16a   : > { %1865 = vst [vmem:[%s2206_s18 + $0x60] sm:$0xff] %v1757_v59   ;;  %1881 = vst [vmem:[%s2206_s18 + $0xe0] sm:$0xff] %v1837_v60   ;;  %v856_v63 = vadd.f32 %v2196_v15, %v855_v61  ;;  %v984_v0 = vadd.f32 %v2196_v15, %v983_v62  ;;  %v857_v1 = vpop.f32.mrb[53].mxu0  ;;  %v985_v2 = vpop.f32.mrb[53].mxu1 }
 0x16b   : > { %v858_v3 = vpop.f32.mrb[54].mxu0  ;;  %v986_v4 = vpop.f32.mrb[54].mxu1 }
 0x16c   : > { %v859_v5 = vadd.f32 %v2196_v15, %v858_v3  ;;  %v987_v6 = vadd.f32 %v2196_v15, %v986_v4  ;;  %v860_v7 = vpop.f32.mrb[55].mxu0  ;;  %v988_v8 = vpop.f32.mrb[55].mxu1  ;;  %v1032_v9 = vmax.f32 %v856_v63, 0.0  ;;  %v1064_v10 = vmax.f32 %v984_v0, 0.0 }
 0x16e   : > { %v1033_v11 = vmax.f32 %v859_v5, 0.0  ;;  %v1065_v12 = vmax.f32 %v987_v6, 0.0 }
 0x170   : > { %v1762_v13 = vpack.c.bf16 %v1033_v11, %v1032_v9  ;;  %v1842_v14 = vpack.c.bf16 %v1065_v12, %v1064_v10 }
 0x171   : > { %v863_v16 = vpop.f32.mrb[56].mxu0  ;;  %v991_v17 = vpop.f32.mrb[56].mxu1 }
 0x172   : > { %1866 = vst [vmem:[%s2206_s18 + $0x68] sm:$0xff] %v1762_v13   ;;  %1882 = vst [vmem:[%s2206_s18 + $0xe8] sm:$0xff] %v1842_v14   ;;  %v864_v18 = vadd.f32 %v2196_v15, %v863_v16  ;;  %v992_v19 = vadd.f32 %v2196_v15, %v991_v17  ;;  %v865_v20 = vpop.f32.mrb[57].mxu0  ;;  %v993_v21 = vpop.f32.mrb[57].mxu1 }
 0x173   : > { %v866_v22 = vpop.f32.mrb[58].mxu0  ;;  %v994_v23 = vpop.f32.mrb[58].mxu1 }
 0x174   : > { %v867_v24 = vadd.f32 %v2196_v15, %v866_v22  ;;  %v995_v25 = vadd.f32 %v2196_v15, %v994_v23  ;;  %v868_v26 = vpop.f32.mrb[59].mxu0  ;;  %v996_v27 = vpop.f32.mrb[59].mxu1  ;;  %v1034_v28 = vmax.f32 %v864_v18, 0.0  ;;  %v1066_v29 = vmax.f32 %v992_v19, 0.0 }
 0x176   : > { %v1035_v30 = vmax.f32 %v867_v24, 0.0  ;;  %v1067_v31 = vmax.f32 %v995_v25, 0.0 }
 0x178   : > { %v1767_v32 = vpack.c.bf16 %v1035_v30, %v1034_v28  ;;  %v1847_v33 = vpack.c.bf16 %v1067_v31, %v1066_v29 }
 0x179   : > { %v871_v34 = vpop.f32.mrb[60].mxu0  ;;  %v999_v35 = vpop.f32.mrb[60].mxu1 }
 0x17a   : > { %1867 = vst [vmem:[%s2206_s18 + $0x70] sm:$0xff] %v1767_v32   ;;  %1883 = vst [vmem:[%s2206_s18 + $0xf0] sm:$0xff] %v1847_v33   ;;  %v872_v36 = vadd.f32 %v2196_v15, %v871_v34  ;;  %v1000_v37 = vadd.f32 %v2196_v15, %v999_v35  ;;  %v873_v38 = vpop.f32.mrb[61].mxu0  ;;  %v1001_v39 = vpop.f32.mrb[61].mxu1 }
 0x17b   : > { %v874_v40 = vpop.f32.mrb[62].mxu0  ;;  %v1002_v41 = vpop.f32.mrb[62].mxu1 }
 0x17c   : > { %v875_v42 = vadd.f32 %v2196_v15, %v874_v40  ;;  %v1003_v43 = vadd.f32 %v2196_v15, %v1002_v41  ;;  %v876_v44 = vpop.f32.mrb[63].mxu0  ;;  %v1004_v45 = vpop.f32.mrb[63].mxu1  ;;  %v1036_v46 = vmax.f32 %v872_v36, 0.0  ;;  %v1068_v47 = vmax.f32 %v1000_v37, 0.0 }
 0x17e   : > { %v1037_v48 = vmax.f32 %v875_v42, 0.0  ;;  %v1069_v49 = vmax.f32 %v1003_v43, 0.0 }
 0x180   : > { %v1772_v50 = vpack.c.bf16 %v1037_v48, %v1036_v46  ;;  %v1852_v51 = vpack.c.bf16 %v1069_v49, %v1068_v47 }
 0x182   : > { %1868 = vst [vmem:[%s2206_s18 + $0x78] sm:$0xff] %v1772_v50   ;;  %1884 = vst [vmem:[%s2206_s18 + $0xf8] sm:$0xff] %v1852_v51  }
 0x183 PF: > { %s13_s12 = sadd.s32 1, %s2027_s12  }
 0x184   : > { %p10_p4 = scmp.ge.s32.totalorder %s13_s12, 5  }
 0x186   :  { %12 = sbr.rel (!%p10_p4) target bundleno = 1 (0x1), region = 62 }

// kernel: pcb_forward.22
= control target key start
LH: loop header
LB: loop body
LE: loop exit
PB: predicated region body
PF: predicated region fallthrough
CT: control target
= control target key end

     0   :  { %s952_s12 = smov 0   ;;  %s1057_s0 = inlined_call_operand.vmem [shape: bf16[384,128], index: 0, kind: input, shape index: {}]   ;;  %s1058_s1 = inlined_call_operand.vmem [shape: bf16[128,128], index: 1, kind: input, shape index: {}]   ;;  %s1059_s2 = inlined_call_operand.vmem [shape: f32[1,128], index: 2, kind: input, shape index: {}]   ;;  %s1060_s3 = inlined_call_operand.vmem [shape: bf16[384,128], index: 3, kind: output, shape index: {}]  }
   0x1 LB: > { %s671_s13 = sadd.s32 4294967295, %s930_s12   ;;  %p675_p0 = scmp.ge.s32.totalorder %s930_s12, 1  ;;  %s930_s12 = sphi %s952_s12, %s13_s12  }
   0x2   : > { %p138_p1 = scmp.lt.s32.totalorder %s930_s12, 3 }
   0x4   : > { %p139_p2 = pnand %p675_p0, %p138_p1 }
   0x5   : > { %v904_v0 = vld [vmem:[%s1058_s1] sm:$0xff] (!%p139_p2)   ;;  %s162_s16 = smul.u32 (!%p139_p2), 24, %s671_s13  ;;  %v905_v1 = vld [vmem:[%s1058_s1 + $0x8] sm:$0xff] (!%p139_p2)   ;;  %v906_v2 = vld [vmem:[%s1058_s1 + $0x10] sm:$0xff] (!%p139_p2)  }
   0x6   : > { %142 = sbr.rel (%p139_p2) target bundleno = 276 (0x114), region = 32  ;;  %840 = vmatprep.subr.bf16.mxu0 (!%p139_p2), %v904_v0  ;;  %880 = vmatprep.subr.bf16.mxu1 (!%p139_p2), %v904_v0  ;;  %v907_v3 = vld [vmem:[%s1058_s1 + $0x18] sm:$0xff] (!%p139_p2)   ;;  %v908_v6 = vld [vmem:[%s1058_s1 + $0x20] sm:$0xff] (!%p139_p2)   ;;  %v909_v7 = vld [vmem:[%s1058_s1 + $0x28] sm:$0xff] (!%p139_p2)  }
   0x7   : > { %p163_p3 = scmp.lt.s32.totalorder (!%p139_p2), %s162_s16, 47  ;;  %841 = vmatpush3.bf16.msra.mxu0 (!%p139_p2), %v904_v0  ;;  %888 = vmatpush3.bf16.msra.mxu1 (!%p139_p2), %v904_v0  ;;  %v910_v8 = vld [vmem:[%s1058_s1 + $0x30] sm:$0xff] (!%p139_p2)   ;;  %v911_v9 = vld [vmem:[%s1058_s1 + $0x38] sm:$0xff] (!%p139_p2)   ;;  %v1009_v20 = vld [vmem:[%s1059_s2] ss:$0 sm:$0xff] (!%p139_p2) }
   0x8   : > { %842 = vmatprep.subr.bf16.mxu0 (!%p139_p2), %v905_v1  ;;  %881 = vmatprep.subr.bf16.mxu1 (!%p139_p2), %v905_v1 }
   0xb   : > { %843 = vmatpush3.bf16.msra.mxu0 (!%p139_p2), %v905_v1  ;;  %889 = vmatpush3.bf16.msra.mxu1 (!%p139_p2), %v905_v1 }
   0xc   : > { %844 = vmatprep.subr.bf16.mxu0 (!%p139_p2), %v906_v2  ;;  %882 = vmatprep.subr.bf16.mxu1 (!%p139_p2), %v906_v2 }
   0xd   : > { %s1062_s16 = smov (!%p163_p3, %s162_s16), 47 }
   0xe   : > { %s676_s21 = sshll.u32 %s1062_s16, 2 }
   0xf   : > { %s980_s26 = scalar_lea.vmem %s1057_s0, %s676_s21  ;;  %845 = vmatpush3.bf16.msra.mxu0 %v906_v2  ;;  %890 = vmatpush3.bf16.msra.mxu1 %v906_v2  ;;  %s1024_s13 = scalar_lea.vmem %s1060_s3, %s676_s21 }
  0x10   : > { %v912_v4 = vld [vmem:[%s980_s26] sm:$0xff]   ;;  %v913_v5 = vld [vmem:[%s980_s26 + $0x30] sm:$0xff]   ;;  %846 = vmatprep.subr.bf16.mxu0 %v907_v3  ;;  %883 = vmatprep.subr.bf16.mxu1 %v907_v3  ;;  %v914_v10 = vld [vmem:[%s980_s26 + $0x8] sm:$0xff]  }
  0x11   : > { %856 = vmatprep.mubr.bf16.mxu0 %v912_v4  ;;  %868 = vmatprep.mubr.bf16.mxu1 %v913_v5  ;;  %v915_v11 = vld [vmem:[%s980_s26 + $0x38] sm:$0xff]   ;;  %v916_v12 = vld [vmem:[%s980_s26 + $0x10] sm:$0xff]   ;;  %v917_v13 = vld [vmem:[%s980_s26 + $0x40] sm:$0xff]  }
  0x12   : > { %v918_v14 = vld [vmem:[%s980_s26 + $0x18] sm:$0xff]   ;;  %v919_v15 = vld [vmem:[%s980_s26 + $0x48] sm:$0xff]   ;;  %v920_v16 = vld [vmem:[%s980_s26 + $0x20] sm:$0xff]  }
  0x13   : > { %847 = vmatpush3.bf16.msra.mxu0 %v907_v3  ;;  %891 = vmatpush3.bf16.msra.mxu1 %v907_v3  ;;  %v921_v17 = vld [vmem:[%s980_s26 + $0x50] sm:$0xff]   ;;  %v922_v18 = vld [vmem:[%s980_s26 + $0x28] sm:$0xff]   ;;  %v923_v19 = vld [vmem:[%s980_s26 + $0x58] sm:$0xff]  }
  0x14   : > { %848 = vmatprep.subr.bf16.mxu0 %v908_v6  ;;  %884 = vmatprep.subr.bf16.mxu1 %v908_v6 }
  0x17   : > { %849 = vmatpush3.bf16.msra.mxu0 %v908_v6  ;;  %892 = vmatpush3.bf16.msra.mxu1 %v908_v6 }
  0x18   : > { %850 = vmatprep.subr.bf16.mxu0 %v909_v7  ;;  %885 = vmatprep.subr.bf16.mxu1 %v909_v7 }
  0x1b   : > { %851 = vmatpush3.bf16.msra.mxu0 %v909_v7  ;;  %893 = vmatpush3.bf16.msra.mxu1 %v909_v7 }
  0x1c   : > { %852 = vmatprep.subr.bf16.mxu0 %v910_v8  ;;  %886 = vmatprep.subr.bf16.mxu1 %v910_v8 }
  0x1f   : > { %853 = vmatpush3.bf16.msra.mxu0 %v910_v8  ;;  %894 = vmatpush3.bf16.msra.mxu1 %v910_v8 }
  0x20   : > { %854 = vmatprep.subr.bf16.mxu0 %v911_v9  ;;  %887 = vmatprep.subr.bf16.mxu1 %v911_v9 }
  0x23   : > { %855 = vmatpush3.bf16.msra.mxu0 %v911_v9  ;;  %895 = vmatpush3.bf16.msra.mxu1 %v911_v9 }
  0x26   : > { %857 = vmatmul.mubr.bf16.vlgmr.msra.gmra.mrb[0].mxu0 %v914_v10  ;;  %869 = vmatmul.mubr.bf16.vlgmr.msra.gmra.mrb[0].mxu1 %v915_v11 }
  0x27   : > { %860 = vmatprep.mubr.bf16.mxu0 %v916_v12  ;;  %872 = vmatprep.mubr.bf16.mxu1 %v917_v13 }
  0x2e   : > { %861 = vmatmul.mubr.bf16.gmra.mrb[4].mxu0 %v918_v14  ;;  %873 = vmatmul.mubr.bf16.gmra.mrb[4].mxu1 %v919_v15 }
  0x2f   : > { %864 = vmatprep.mubr.bf16.mxu0 %v920_v16  ;;  %876 = vmatprep.mubr.bf16.mxu1 %v921_v17 }
  0x36   : > { %865 = vmatmul.mubr.bf16.gmra.mrb[8].mxu0 %v922_v18  ;;  %877 = vmatmul.mubr.bf16.gmra.mrb[8].mxu1 %v923_v19 }
  0xf9   : > { %v858_v21 = vpop.f32.mrb[0].mxu0  ;;  %v870_v22 = vpop.f32.mrb[0].mxu1 }
  0xfa   : > { %v385_v23 = vadd.f32 %v858_v21, %v1009_v20  ;;  %v433_v24 = vadd.f32 %v870_v22, %v1009_v20  ;;  %v376_v25 = vpop.f32.mrb[1].mxu0  ;;  %v424_v26 = vpop.f32.mrb[1].mxu1 }
  0xfb   : > { %v377_v27 = vadd.f32 %v1009_v20, %v376_v25  ;;  %v425_v28 = vadd.f32 %v1009_v20, %v424_v26  ;;  %v859_v29 = vpop.f32.mrb[2].mxu0  ;;  %v871_v30 = vpop.f32.mrb[2].mxu1 }
  0xfc   : > { %v388_v31 = vadd.f32 %v859_v29, %v1009_v20  ;;  %v436_v32 = vadd.f32 %v871_v30, %v1009_v20  ;;  %v379_v33 = vpop.f32.mrb[3].mxu0  ;;  %v427_v34 = vpop.f32.mrb[3].mxu1  ;;  %v473_v37 = vmax.f32 %v385_v23, 0.0  ;;  %v485_v38 = vmax.f32 %v433_v24, 0.0 }
  0xfd   : > { %v380_v35 = vadd.f32 %v1009_v20, %v379_v33  ;;  %v428_v36 = vadd.f32 %v1009_v20, %v427_v34  ;;  %v471_v41 = vmax.f32 %v377_v27, 0.0  ;;  %v483_v42 = vmax.f32 %v425_v28, 0.0 }
  0xfe   : > { %v474_v39 = vmax.f32 %v388_v31, 0.0  ;;  %v486_v40 = vmax.f32 %v436_v32, 0.0 }
  0xff   : > { %v472_v43 = vmax.f32 %v380_v35, 0.0  ;;  %v484_v44 = vmax.f32 %v428_v36, 0.0 }
 0x100   : > { %v757_v45 = vpack.c.bf16 %v474_v39, %v473_v37  ;;  %v787_v46 = vpack.c.bf16 %v486_v40, %v485_v38 }
 0x101   : > { %v752_v47 = vpack.c.bf16 %v472_v43, %v471_v41  ;;  %v782_v48 = vpack.c.bf16 %v484_v44, %v483_v42  ;;  %v862_v49 = vpop.f32.mrb[4].mxu0  ;;  %v874_v50 = vpop.f32.mrb[4].mxu1 }
 0x102   : > { %809 = vst [vmem:[%s1024_s13 + $0x8] sm:$0xff] %v757_v45   ;;  %815 = vst [vmem:[%s1024_s13 + $0x38] sm:$0xff] %v787_v46   ;;  %v401_v51 = vadd.f32 %v862_v49, %v1009_v20  ;;  %v449_v52 = vadd.f32 %v874_v50, %v1009_v20  ;;  %v392_v53 = vpop.f32.mrb[5].mxu0  ;;  %v440_v54 = vpop.f32.mrb[5].mxu1 }
 0x103   : > { %753 = vst [vmem:[%s1024_s13] sm:$0xff] %v752_v47   ;;  %814 = vst [vmem:[%s1024_s13 + $0x30] sm:$0xff] %v782_v48   ;;  %v393_v55 = vadd.f32 %v1009_v20, %v392_v53  ;;  %v441_v56 = vadd.f32 %v1009_v20, %v440_v54  ;;  %v863_v57 = vpop.f32.mrb[6].mxu0  ;;  %v875_v58 = vpop.f32.mrb[6].mxu1 }
 0x104   : > { %v404_v59 = vadd.f32 %v863_v57, %v1009_v20  ;;  %v452_v60 = vadd.f32 %v875_v58, %v1009_v20  ;;  %v395_v61 = vpop.f32.mrb[7].mxu0  ;;  %v443_v62 = vpop.f32.mrb[7].mxu1  ;;  %v477_v1 = vmax.f32 %v401_v51, 0.0  ;;  %v489_v2 = vmax.f32 %v449_v52, 0.0 }
 0x105   : > { %v396_v63 = vadd.f32 %v1009_v20, %v395_v61  ;;  %v444_v0 = vadd.f32 %v1009_v20, %v443_v62  ;;  %v475_v5 = vmax.f32 %v393_v55, 0.0  ;;  %v487_v6 = vmax.f32 %v441_v56, 0.0 }
 0x106   : > { %v478_v3 = vmax.f32 %v404_v59, 0.0  ;;  %v490_v4 = vmax.f32 %v452_v60, 0.0 }
 0x107   : > { %v476_v7 = vmax.f32 %v396_v63, 0.0  ;;  %v488_v8 = vmax.f32 %v444_v0, 0.0 }
 0x108   : > { %v767_v9 = vpack.c.bf16 %v478_v3, %v477_v1  ;;  %v797_v10 = vpack.c.bf16 %v490_v4, %v489_v2 }
 0x109   : > { %v762_v11 = vpack.c.bf16 %v476_v7, %v475_v5  ;;  %v792_v12 = vpack.c.bf16 %v488_v8, %v487_v6  ;;  %v866_v13 = vpop.f32.mrb[8].mxu0  ;;  %v878_v14 = vpop.f32.mrb[8].mxu1 }
 0x10a   : > { %811 = vst [vmem:[%s1024_s13 + $0x18] sm:$0xff] %v767_v9   ;;  %817 = vst [vmem:[%s1024_s13 + $0x48] sm:$0xff] %v797_v10   ;;  %v417_v15 = vadd.f32 %v866_v13, %v1009_v20  ;;  %v465_v16 = vadd.f32 %v878_v14, %v1009_v20  ;;  %v408_v17 = vpop.f32.mrb[9].mxu0  ;;  %v456_v18 = vpop.f32.mrb[9].mxu1 }
 0x10b   : > { %810 = vst [vmem:[%s1024_s13 + $0x10] sm:$0xff] %v762_v11   ;;  %816 = vst [vmem:[%s1024_s13 + $0x40] sm:$0xff] %v792_v12   ;;  %v409_v19 = vadd.f32 %v1009_v20, %v408_v17  ;;  %v457_v21 = vadd.f32 %v1009_v20, %v456_v18  ;;  %v867_v22 = vpop.f32.mrb[10].mxu0  ;;  %v879_v23 = vpop.f32.mrb[10].mxu1 }
 0x10c   : > { %v420_v24 = vadd.f32 %v867_v22, %v1009_v20  ;;  %v468_v25 = vadd.f32 %v879_v23, %v1009_v20  ;;  %v411_v26 = vpop.f32.mrb[11].mxu0  ;;  %v459_v27 = vpop.f32.mrb[11].mxu1  ;;  %v481_v30 = vmax.f32 %v417_v15, 0.0  ;;  %v493_v31 = vmax.f32 %v465_v16, 0.0 }
 0x10d   : > { %v412_v28 = vadd.f32 %v1009_v20, %v411_v26  ;;  %v460_v29 = vadd.f32 %v1009_v20, %v459_v27  ;;  %v479_v34 = vmax.f32 %v409_v19, 0.0  ;;  %v491_v35 = vmax.f32 %v457_v21, 0.0 }
 0x10e   : > { %v482_v32 = vmax.f32 %v420_v24, 0.0  ;;  %v494_v33 = vmax.f32 %v468_v25, 0.0 }
 0x10f   : > { %v480_v36 = vmax.f32 %v412_v28, 0.0  ;;  %v492_v37 = vmax.f32 %v460_v29, 0.0 }
 0x110   : > { %v777_v38 = vpack.c.bf16 %v482_v32, %v481_v30  ;;  %v807_v39 = vpack.c.bf16 %v494_v33, %v493_v31 }
 0x111   : > { %v772_v40 = vpack.c.bf16 %v480_v36, %v479_v34  ;;  %v802_v41 = vpack.c.bf16 %v492_v37, %v491_v35 }
 0x112   : > { %813 = vst [vmem:[%s1024_s13 + $0x28] sm:$0xff] %v777_v38   ;;  %819 = vst [vmem:[%s1024_s13 + $0x58] sm:$0xff] %v807_v39  }
 0x113   : > { %812 = vst [vmem:[%s1024_s13 + $0x20] sm:$0xff] %v772_v40   ;;  %818 = vst [vmem:[%s1024_s13 + $0x50] sm:$0xff] %v802_v41  }
 0x114 PF: > { %s13_s12 = sadd.s32 1, %s930_s12  }
 0x115   : > { %p10_p4 = scmp.ge.s32.totalorder %s13_s12, 4  }
 0x117   :  { %12 = sbr.rel (!%p10_p4) target bundleno = 1 (0x1), region = 62 }

// kernel: pcb_forward.21
= control target key start
LH: loop header
LB: loop body
LE: loop exit
PB: predicated region body
PF: predicated region fallthrough
CT: control target
= control target key end

     0   :  { %s2319_s6 = smov 0   ;;  %s2321_s7 = smov 0   ;;  %s3043_s0 = inlined_call_operand.vmem [shape: bf16[9,384,128], index: 0, kind: input, shape index: {}]   ;;  %s3044_s1 = inlined_call_operand.vmem [shape: bf16[384,128], index: 1, kind: output, shape index: {}]  }
   0x1   :  { %s2323_s8 = smov 0  }
   0x2 LB: > { %s2166_s9 = sadd.s32 4294967295, %s2307_s8   ;;  %s2336_s10 = sadd.s32 1, %s2307_s8   ;;  %s2307_s8 = sphi %s2323_s8, %s3047_s8   ;;  %s2303_s7 = sphi %s2321_s7, %s3046_s7   ;;  %s2299_s6 = sphi %s2319_s6, %s3045_s6  }
   0x3   : > { %s15_s11 = ssub.s32 %s2307_s8, %s2336_s10  ;;  %s18_s12 = sadd.s32 1, %s2303_s7 }
   0x4   : > { %p16_p0 = scmp.eq.s32.totalorder %s15_s11, 0  ;;  %p25_p1 = scmp.ne.s32.totalorder %s2303_s7, %s2299_s6 }
   0x5   : > { %p26_p2 = scmp.eq.s32.totalorder %s2307_s8, 0  ;;  %p2169_p4 = scmp.ge.s32.totalorder %s2307_s8, 2 }
   0x6   : > { %s2345_s13 = scalar_select %p16_p0, %s2303_s7, %s18_s12  }
   0x7   : > { %p27_p3 = por %p26_p2, %p25_p1  ;;  %77 = sbr.rel (%p2169_p4) target bundleno = 73 (0x49), region = 16 }
   0xe   : > { %80 = sbr.rel (!%p27_p3) target bundleno = 73 (0x49), region = 20  ;;  %s82_s14 = sand.u32 (%p27_p3), 1, %s2303_s7  }
   0xf   : > { %s2175_s15 = smul.u32 (%p27_p3), 96, %s2307_s8 }
  0x10   : > { %s2259_s16 = smul.u32 (%p27_p3), 864, %s82_s14 }
  0x11   : > { %s2353_s19 = scalar_lea.vmem (%p27_p3), %s3043_s0, %s2175_s15 }
  0x12   : > { %v103_v0 = vld [vmem:[%s2353_s19] sm:$0xff] (%p27_p3)   ;;  %v107_v1 = vld [vmem:[%s2353_s19 + $0x8] sm:$0xff] (%p27_p3)   ;;  %v111_v2 = vld [vmem:[%s2353_s19 + $0x10] sm:$0xff] (%p27_p3)   ;;  %s2358_s20 = scalar_lea.vmem (%p27_p3), [#allocation2], %s2259_s16 }
  0x13   : > { %104 = vst [vmem:[%s2358_s20] sm:$0xff] (%p27_p3), %v103_v0   ;;  %108 = vst [vmem:[%s2358_s20 + $0x8] sm:$0xff] (%p27_p3), %v107_v1   ;;  %v115_v3 = vld [vmem:[%s2353_s19 + $0x18] sm:$0xff] (%p27_p3)   ;;  %v119_v4 = vld [vmem:[%s2353_s19 + $0x20] sm:$0xff] (%p27_p3)  }
  0x14   : > { %112 = vst [vmem:[%s2358_s20 + $0x10] sm:$0xff] (%p27_p3), %v111_v2   ;;  %v123_v5 = vld [vmem:[%s2353_s19 + $0x28] sm:$0xff] (%p27_p3)   ;;  %116 = vst [vmem:[%s2358_s20 + $0x18] sm:$0xff] (%p27_p3), %v115_v3   ;;  %v127_v6 = vld [vmem:[%s2353_s19 + $0x30] sm:$0xff] (%p27_p3)  }
  0x15   : > { %120 = vst [vmem:[%s2358_s20 + $0x20] sm:$0xff] %v119_v4   ;;  %124 = vst [vmem:[%s2358_s20 + $0x28] sm:$0xff] %v123_v5   ;;  %v131_v7 = vld [vmem:[%s2353_s19 + $0x38] sm:$0xff]   ;;  %v135_v8 = vld [vmem:[%s2353_s19 + $0x40] sm:$0xff]  }
  0x16   : > { %128 = vst [vmem:[%s2358_s20 + $0x30] sm:$0xff] %v127_v6   ;;  %132 = vst [vmem:[%s2358_s20 + $0x38] sm:$0xff] %v131_v7   ;;  %v139_v9 = vld [vmem:[%s2353_s19 + $0x48] sm:$0xff]   ;;  %v143_v10 = vld [vmem:[%s2353_s19 + $0x50] sm:$0xff]  }
  0x17   : > { %136 = vst [vmem:[%s2358_s20 + $0x40] sm:$0xff] %v135_v8   ;;  %v147_v11 = vld [vmem:[%s2353_s19 + $0x58] sm:$0xff]   ;;  %140 = vst [vmem:[%s2358_s20 + $0x48] sm:$0xff] %v139_v9   ;;  %v151_v12 = vld [vmem:[%s2353_s19 + $0xc0] sm:$0xff]  }
  0x18   : > { %144 = vst [vmem:[%s2358_s20 + $0x50] sm:$0xff] %v143_v10   ;;  %148 = vst [vmem:[%s2358_s20 + $0x58] sm:$0xff] %v147_v11   ;;  %v155_v13 = vld [vmem:[%s2353_s19 + $0xc8] sm:$0xff]   ;;  %v159_v14 = vld [vmem:[%s2353_s19 + $0xd0] sm:$0xff]  }
  0x19   : > { %152 = vst [vmem:[%s2358_s20 + $0x60] sm:$0xff] %v151_v12   ;;  %156 = vst [vmem:[%s2358_s20 + $0x68] sm:$0xff] %v155_v13   ;;  %v163_v15 = vld [vmem:[%s2353_s19 + $0xd8] sm:$0xff]   ;;  %v167_v16 = vld [vmem:[%s2353_s19 + $0xe0] sm:$0xff]  }
  0x1a   : > { %160 = vst [vmem:[%s2358_s20 + $0x70] sm:$0xff] %v159_v14   ;;  %v171_v17 = vld [vmem:[%s2353_s19 + $0xe8] sm:$0xff]   ;;  %164 = vst [vmem:[%s2358_s20 + $0x78] sm:$0xff] %v163_v15   ;;  %v175_v18 = vld [vmem:[%s2353_s19 + $0xf0] sm:$0xff]  }
  0x1b   : > { %168 = vst [vmem:[%s2358_s20 + $0x80] sm:$0xff] %v167_v16   ;;  %172 = vst [vmem:[%s2358_s20 + $0x88] sm:$0xff] %v171_v17   ;;  %v179_v19 = vld [vmem:[%s2353_s19 + $0xf8] sm:$0xff]   ;;  %v183_v20 = vld [vmem:[%s2353_s19 + $0x100] sm:$0xff]  }
  0x1c   : > { %176 = vst [vmem:[%s2358_s20 + $0x90] sm:$0xff] %v175_v18   ;;  %180 = vst [vmem:[%s2358_s20 + $0x98] sm:$0xff] %v179_v19   ;;  %v187_v21 = vld [vmem:[%s2353_s19 + $0x108] sm:$0xff]   ;;  %v191_v22 = vld [vmem:[%s2353_s19 + $0x110] sm:$0xff]  }
  0x1d   : > { %184 = vst [vmem:[%s2358_s20 + $0xa0] sm:$0xff] %v183_v20   ;;  %v195_v23 = vld [vmem:[%s2353_s19 + $0x118] sm:$0xff]   ;;  %188 = vst [vmem:[%s2358_s20 + $0xa8] sm:$0xff] %v187_v21   ;;  %v199_v24 = vld [vmem:[%s2353_s19 + $0x180] sm:$0xff]  }
  0x1e   : > { %192 = vst [vmem:[%s2358_s20 + $0xb0] sm:$0xff] %v191_v22   ;;  %196 = vst [vmem:[%s2358_s20 + $0xb8] sm:$0xff] %v195_v23   ;;  %v203_v25 = vld [vmem:[%s2353_s19 + $0x188] sm:$0xff]   ;;  %v207_v26 = vld [vmem:[%s2353_s19 + $0x190] sm:$0xff]  }
  0x1f   : > { %200 = vst [vmem:[%s2358_s20 + $0xc0] sm:$0xff] %v199_v24   ;;  %204 = vst [vmem:[%s2358_s20 + $0xc8] sm:$0xff] %v203_v25   ;;  %v211_v27 = vld [vmem:[%s2353_s19 + $0x198] sm:$0xff]   ;;  %v215_v28 = vld [vmem:[%s2353_s19 + $0x1a0] sm:$0xff]  }
  0x20   : > { %208 = vst [vmem:[%s2358_s20 + $0xd0] sm:$0xff] %v207_v26   ;;  %v219_v29 = vld [vmem:[%s2353_s19 + $0x1a8] sm:$0xff]   ;;  %212 = vst [vmem:[%s2358_s20 + $0xd8] sm:$0xff] %v211_v27   ;;  %v223_v30 = vld [vmem:[%s2353_s19 + $0x1b0] sm:$0xff]  }
  0x21   : > { %216 = vst [vmem:[%s2358_s20 + $0xe0] sm:$0xff] %v215_v28   ;;  %220 = vst [vmem:[%s2358_s20 + $0xe8] sm:$0xff] %v219_v29   ;;  %v227_v31 = vld [vmem:[%s2353_s19 + $0x1b8] sm:$0xff]   ;;  %v231_v32 = vld [vmem:[%s2353_s19 + $0x1c0] sm:$0xff]  }
  0x22   : > { %224 = vst [vmem:[%s2358_s20 + $0xf0] sm:$0xff] %v223_v30   ;;  %228 = vst [vmem:[%s2358_s20 + $0xf8] sm:$0xff] %v227_v31   ;;  %v235_v33 = vld [vmem:[%s2353_s19 + $0x1c8] sm:$0xff]   ;;  %v239_v34 = vld [vmem:[%s2353_s19 + $0x1d0] sm:$0xff]  }
  0x23   : > { %232 = vst [vmem:[%s2358_s20 + $0x100] sm:$0xff] %v231_v32   ;;  %v243_v35 = vld [vmem:[%s2353_s19 + $0x1d8] sm:$0xff]   ;;  %236 = vst [vmem:[%s2358_s20 + $0x108] sm:$0xff] %v235_v33   ;;  %v247_v36 = vld [vmem:[%s2353_s19 + $0x240] sm:$0xff]  }
  0x24   : > { %240 = vst [vmem:[%s2358_s20 + $0x110] sm:$0xff] %v239_v34   ;;  %244 = vst [vmem:[%s2358_s20 + $0x118] sm:$0xff] %v243_v35   ;;  %v251_v37 = vld [vmem:[%s2353_s19 + $0x248] sm:$0xff]   ;;  %v255_v38 = vld [vmem:[%s2353_s19 + $0x250] sm:$0xff]  }
  0x25   : > { %248 = vst [vmem:[%s2358_s20 + $0x120] sm:$0xff] %v247_v36   ;;  %252 = vst [vmem:[%s2358_s20 + $0x128] sm:$0xff] %v251_v37   ;;  %v259_v39 = vld [vmem:[%s2353_s19 + $0x258] sm:$0xff]   ;;  %v263_v40 = vld [vmem:[%s2353_s19 + $0x260] sm:$0xff]  }
  0x26   : > { %256 = vst [vmem:[%s2358_s20 + $0x130] sm:$0xff] %v255_v38   ;;  %v267_v41 = vld [vmem:[%s2353_s19 + $0x268] sm:$0xff]   ;;  %260 = vst [vmem:[%s2358_s20 + $0x138] sm:$0xff] %v259_v39   ;;  %v271_v42 = vld [vmem:[%s2353_s19 + $0x270] sm:$0xff]  }
  0x27   : > { %264 = vst [vmem:[%s2358_s20 + $0x140] sm:$0xff] %v263_v40   ;;  %268 = vst [vmem:[%s2358_s20 + $0x148] sm:$0xff] %v267_v41   ;;  %v275_v43 = vld [vmem:[%s2353_s19 + $0x278] sm:$0xff]   ;;  %v279_v44 = vld [vmem:[%s2353_s19 + $0x280] sm:$0xff]  }
  0x28   : > { %272 = vst [vmem:[%s2358_s20 + $0x150] sm:$0xff] %v271_v42   ;;  %276 = vst [vmem:[%s2358_s20 + $0x158] sm:$0xff] %v275_v43   ;;  %v283_v45 = vld [vmem:[%s2353_s19 + $0x288] sm:$0xff]   ;;  %v287_v46 = vld [vmem:[%s2353_s19 + $0x290] sm:$0xff]  }
  0x29   : > { %280 = vst [vmem:[%s2358_s20 + $0x160] sm:$0xff] %v279_v44   ;;  %v291_v47 = vld [vmem:[%s2353_s19 + $0x298] sm:$0xff]   ;;  %284 = vst [vmem:[%s2358_s20 + $0x168] sm:$0xff] %v283_v45   ;;  %v295_v48 = vld [vmem:[%s2353_s19 + $0x300] sm:$0xff]  }
  0x2a   : > { %288 = vst [vmem:[%s2358_s20 + $0x170] sm:$0xff] %v287_v46   ;;  %292 = vst [vmem:[%s2358_s20 + $0x178] sm:$0xff] %v291_v47   ;;  %v299_v49 = vld [vmem:[%s2353_s19 + $0x308] sm:$0xff]   ;;  %v303_v50 = vld [vmem:[%s2353_s19 + $0x310] sm:$0xff]  }
  0x2b   : > { %296 = vst [vmem:[%s2358_s20 + $0x180] sm:$0xff] %v295_v48   ;;  %300 = vst [vmem:[%s2358_s20 + $0x188] sm:$0xff] %v299_v49   ;;  %v307_v51 = vld [vmem:[%s2353_s19 + $0x318] sm:$0xff]   ;;  %v311_v52 = vld [vmem:[%s2353_s19 + $0x320] sm:$0xff]  }
  0x2c   : > { %304 = vst [vmem:[%s2358_s20 + $0x190] sm:$0xff] %v303_v50   ;;  %v315_v53 = vld [vmem:[%s2353_s19 + $0x328] sm:$0xff]   ;;  %308 = vst [vmem:[%s2358_s20 + $0x198] sm:$0xff] %v307_v51   ;;  %v319_v54 = vld [vmem:[%s2353_s19 + $0x330] sm:$0xff]  }
  0x2d   : > { %312 = vst [vmem:[%s2358_s20 + $0x1a0] sm:$0xff] %v311_v52   ;;  %316 = vst [vmem:[%s2358_s20 + $0x1a8] sm:$0xff] %v315_v53   ;;  %v323_v55 = vld [vmem:[%s2353_s19 + $0x338] sm:$0xff]   ;;  %v327_v56 = vld [vmem:[%s2353_s19 + $0x340] sm:$0xff]  }
  0x2e   : > { %320 = vst [vmem:[%s2358_s20 + $0x1b0] sm:$0xff] %v319_v54   ;;  %324 = vst [vmem:[%s2358_s20 + $0x1b8] sm:$0xff] %v323_v55   ;;  %v331_v57 = vld [vmem:[%s2353_s19 + $0x348] sm:$0xff]   ;;  %v335_v58 = vld [vmem:[%s2353_s19 + $0x350] sm:$0xff]  }
  0x2f   : > { %328 = vst [vmem:[%s2358_s20 + $0x1c0] sm:$0xff] %v327_v56   ;;  %v339_v59 = vld [vmem:[%s2353_s19 + $0x358] sm:$0xff]   ;;  %332 = vst [vmem:[%s2358_s20 + $0x1c8] sm:$0xff] %v331_v57   ;;  %v343_v60 = vld [vmem:[%s2353_s19 + $0x3c0] sm:$0xff]  }
  0x30   : > { %336 = vst [vmem:[%s2358_s20 + $0x1d0] sm:$0xff] %v335_v58   ;;  %340 = vst [vmem:[%s2358_s20 + $0x1d8] sm:$0xff] %v339_v59   ;;  %v347_v61 = vld [vmem:[%s2353_s19 + $0x3c8] sm:$0xff]   ;;  %v351_v62 = vld [vmem:[%s2353_s19 + $0x3d0] sm:$0xff]  }
  0x31   : > { %344 = vst [vmem:[%s2358_s20 + $0x1e0] sm:$0xff] %v343_v60   ;;  %348 = vst [vmem:[%s2358_s20 + $0x1e8] sm:$0xff] %v347_v61   ;;  %v355_v63 = vld [vmem:[%s2353_s19 + $0x3d8] sm:$0xff]   ;;  %v359_v0 = vld [vmem:[%s2353_s19 + $0x3e0] sm:$0xff]  }
  0x32   : > { %352 = vst [vmem:[%s2358_s20 + $0x1f0] sm:$0xff] %v351_v62   ;;  %v363_v1 = vld [vmem:[%s2353_s19 + $0x3e8] sm:$0xff]   ;;  %356 = vst [vmem:[%s2358_s20 + $0x1f8] sm:$0xff] %v355_v63   ;;  %v367_v2 = vld [vmem:[%s2353_s19 + $0x3f0] sm:$0xff]  }
  0x33   : > { %360 = vst [vmem:[%s2358_s20 + $0x200] sm:$0xff] %v359_v0   ;;  %364 = vst [vmem:[%s2358_s20 + $0x208] sm:$0xff] %v363_v1   ;;  %v371_v3 = vld [vmem:[%s2353_s19 + $0x3f8] sm:$0xff]   ;;  %v375_v4 = vld [vmem:[%s2353_s19 + $0x400] sm:$0xff]  }
  0x34   : > { %368 = vst [vmem:[%s2358_s20 + $0x210] sm:$0xff] %v367_v2   ;;  %372 = vst [vmem:[%s2358_s20 + $0x218] sm:$0xff] %v371_v3   ;;  %v379_v5 = vld [vmem:[%s2353_s19 + $0x408] sm:$0xff]   ;;  %v383_v6 = vld [vmem:[%s2353_s19 + $0x410] sm:$0xff]  }
  0x35   : > { %376 = vst [vmem:[%s2358_s20 + $0x220] sm:$0xff] %v375_v4   ;;  %v387_v7 = vld [vmem:[%s2353_s19 + $0x418] sm:$0xff]   ;;  %380 = vst [vmem:[%s2358_s20 + $0x228] sm:$0xff] %v379_v5   ;;  %v391_v8 = vld [vmem:[%s2353_s19 + $0x480] sm:$0xff]  }
  0x36   : > { %384 = vst [vmem:[%s2358_s20 + $0x230] sm:$0xff] %v383_v6   ;;  %388 = vst [vmem:[%s2358_s20 + $0x238] sm:$0xff] %v387_v7   ;;  %v395_v9 = vld [vmem:[%s2353_s19 + $0x488] sm:$0xff]   ;;  %v399_v10 = vld [vmem:[%s2353_s19 + $0x490] sm:$0xff]  }
  0x37   : > { %392 = vst [vmem:[%s2358_s20 + $0x240] sm:$0xff] %v391_v8   ;;  %396 = vst [vmem:[%s2358_s20 + $0x248] sm:$0xff] %v395_v9   ;;  %v403_v11 = vld [vmem:[%s2353_s19 + $0x498] sm:$0xff]   ;;  %v407_v12 = vld [vmem:[%s2353_s19 + $0x4a0] sm:$0xff]  }
  0x38   : > { %400 = vst [vmem:[%s2358_s20 + $0x250] sm:$0xff] %v399_v10   ;;  %v411_v13 = vld [vmem:[%s2353_s19 + $0x4a8] sm:$0xff]   ;;  %404 = vst [vmem:[%s2358_s20 + $0x258] sm:$0xff] %v403_v11   ;;  %v415_v14 = vld [vmem:[%s2353_s19 + $0x4b0] sm:$0xff]  }
  0x39   : > { %408 = vst [vmem:[%s2358_s20 + $0x260] sm:$0xff] %v407_v12   ;;  %412 = vst [vmem:[%s2358_s20 + $0x268] sm:$0xff] %v411_v13   ;;  %v419_v15 = vld [vmem:[%s2353_s19 + $0x4b8] sm:$0xff]   ;;  %v423_v16 = vld [vmem:[%s2353_s19 + $0x4c0] sm:$0xff]  }
  0x3a   : > { %416 = vst [vmem:[%s2358_s20 + $0x270] sm:$0xff] %v415_v14   ;;  %420 = vst [vmem:[%s2358_s20 + $0x278] sm:$0xff] %v419_v15   ;;  %v427_v17 = vld [vmem:[%s2353_s19 + $0x4c8] sm:$0xff]   ;;  %v431_v18 = vld [vmem:[%s2353_s19 + $0x4d0] sm:$0xff]  }
  0x3b   : > { %424 = vst [vmem:[%s2358_s20 + $0x280] sm:$0xff] %v423_v16   ;;  %v435_v19 = vld [vmem:[%s2353_s19 + $0x4d8] sm:$0xff]   ;;  %428 = vst [vmem:[%s2358_s20 + $0x288] sm:$0xff] %v427_v17   ;;  %v439_v20 = vld [vmem:[%s2353_s19 + $0x540] sm:$0xff]  }
  0x3c   : > { %432 = vst [vmem:[%s2358_s20 + $0x290] sm:$0xff] %v431_v18   ;;  %436 = vst [vmem:[%s2358_s20 + $0x298] sm:$0xff] %v435_v19   ;;  %v443_v21 = vld [vmem:[%s2353_s19 + $0x548] sm:$0xff]   ;;  %v447_v22 = vld [vmem:[%s2353_s19 + $0x550] sm:$0xff]  }
  0x3d   : > { %440 = vst [vmem:[%s2358_s20 + $0x2a0] sm:$0xff] %v439_v20   ;;  %444 = vst [vmem:[%s2358_s20 + $0x2a8] sm:$0xff] %v443_v21   ;;  %v451_v23 = vld [vmem:[%s2353_s19 + $0x558] sm:$0xff]   ;;  %v455_v24 = vld [vmem:[%s2353_s19 + $0x560] sm:$0xff]  }
  0x3e   : > { %448 = vst [vmem:[%s2358_s20 + $0x2b0] sm:$0xff] %v447_v22   ;;  %v459_v25 = vld [vmem:[%s2353_s19 + $0x568] sm:$0xff]   ;;  %452 = vst [vmem:[%s2358_s20 + $0x2b8] sm:$0xff] %v451_v23   ;;  %v463_v26 = vld [vmem:[%s2353_s19 + $0x570] sm:$0xff]  }
  0x3f   : > { %456 = vst [vmem:[%s2358_s20 + $0x2c0] sm:$0xff] %v455_v24   ;;  %460 = vst [vmem:[%s2358_s20 + $0x2c8] sm:$0xff] %v459_v25   ;;  %v467_v27 = vld [vmem:[%s2353_s19 + $0x578] sm:$0xff]   ;;  %v471_v28 = vld [vmem:[%s2353_s19 + $0x580] sm:$0xff]  }
  0x40   : > { %464 = vst [vmem:[%s2358_s20 + $0x2d0] sm:$0xff] %v463_v26   ;;  %468 = vst [vmem:[%s2358_s20 + $0x2d8] sm:$0xff] %v467_v27   ;;  %v475_v29 = vld [vmem:[%s2353_s19 + $0x588] sm:$0xff]   ;;  %v479_v30 = vld [vmem:[%s2353_s19 + $0x590] sm:$0xff]  }
  0x41   : > { %472 = vst [vmem:[%s2358_s20 + $0x2e0] sm:$0xff] %v471_v28   ;;  %v483_v31 = vld [vmem:[%s2353_s19 + $0x598] sm:$0xff]   ;;  %476 = vst [vmem:[%s2358_s20 + $0x2e8] sm:$0xff] %v475_v29   ;;  %v487_v32 = vld [vmem:[%s2353_s19 + $0x600] sm:$0xff]  }
  0x42   : > { %480 = vst [vmem:[%s2358_s20 + $0x2f0] sm:$0xff] %v479_v30   ;;  %484 = vst [vmem:[%s2358_s20 + $0x2f8] sm:$0xff] %v483_v31   ;;  %v491_v33 = vld [vmem:[%s2353_s19 + $0x608] sm:$0xff]   ;;  %v495_v34 = vld [vmem:[%s2353_s19 + $0x610] sm:$0xff]  }
  0x43   : > { %488 = vst [vmem:[%s2358_s20 + $0x300] sm:$0xff] %v487_v32   ;;  %492 = vst [vmem:[%s2358_s20 + $0x308] sm:$0xff] %v491_v33   ;;  %v499_v35 = vld [vmem:[%s2353_s19 + $0x618] sm:$0xff]   ;;  %v503_v36 = vld [vmem:[%s2353_s19 + $0x620] sm:$0xff]  }
  0x44   : > { %496 = vst [vmem:[%s2358_s20 + $0x310] sm:$0xff] %v495_v34   ;;  %v507_v37 = vld [vmem:[%s2353_s19 + $0x628] sm:$0xff]   ;;  %500 = vst [vmem:[%s2358_s20 + $0x318] sm:$0xff] %v499_v35   ;;  %v511_v38 = vld [vmem:[%s2353_s19 + $0x630] sm:$0xff]  }
  0x45   : > { %504 = vst [vmem:[%s2358_s20 + $0x320] sm:$0xff] %v503_v36   ;;  %508 = vst [vmem:[%s2358_s20 + $0x328] sm:$0xff] %v507_v37   ;;  %v515_v39 = vld [vmem:[%s2353_s19 + $0x638] sm:$0xff]   ;;  %v519_v40 = vld [vmem:[%s2353_s19 + $0x640] sm:$0xff]  }
  0x46   : > { %512 = vst [vmem:[%s2358_s20 + $0x330] sm:$0xff] %v511_v38   ;;  %516 = vst [vmem:[%s2358_s20 + $0x338] sm:$0xff] %v515_v39   ;;  %v523_v41 = vld [vmem:[%s2353_s19 + $0x648] sm:$0xff]   ;;  %v527_v42 = vld [vmem:[%s2353_s19 + $0x650] sm:$0xff]  }
  0x47   : > { %520 = vst [vmem:[%s2358_s20 + $0x340] sm:$0xff] %v519_v40   ;;  %v531_v43 = vld [vmem:[%s2353_s19 + $0x658] sm:$0xff]   ;;  %524 = vst [vmem:[%s2358_s20 + $0x348] sm:$0xff] %v523_v41  }
  0x48   : > { %528 = vst [vmem:[%s2358_s20 + $0x350] sm:$0xff] %v527_v42   ;;  %532 = vst [vmem:[%s2358_s20 + $0x358] sm:$0xff] %v531_v43  }
  0x49 PF: > { %p2171_p5 = scmp.ge.s32.totalorder %s2307_s8, 1  ;;  %p988_p6 = scmp.lt.s32.totalorder %s2307_s8, 3 }
  0x4b   : > { %p989_p7 = pnand %p2171_p5, %p988_p6 }
  0x4c   : > { %s995_s21 = sand.u32 (!%p989_p7), 1, %s2299_s6   ;;  %vm1238_vm0 = vcmask (!%p989_p7), 1043456   ;;  %s1015_s24 = smul.u32 (!%p989_p7), 24, %s2166_s9 }
  0x4d   : > { %992 = sbr.rel (%p989_p7) target bundleno = 242 (0xf2), region = 61 }
  0x4e   : > { %s2260_s22 = smul.u32 (!%p989_p7), 864, %s995_s21  ;;  %p1016_p8 = scmp.lt.s32.totalorder (!%p989_p7), %s1015_s24, 47 }
  0x50   : > { %s2576_s23 = scalar_lea.vmem (!%p989_p7), [#allocation2], %s2260_s22 }
  0x51   : > { %v1022_v44 = vld [vmem:[%s2576_s23] sm:$0xf] (!%p989_p7)  ;;  %v1023_v47 = vld [vmem:[%s2576_s23 + $0x4] sm:$0xf] (!%p989_p7)  ;;  %v1024_v18 = vld [vmem:[%s2576_s23 + $0x8] sm:$0xf] (!%p989_p7) }
  0x52   : > { %v1046_v45 = vld [vmem:[%s2576_s23 + $0x60] sm:$0xf] (!%p989_p7)  ;;  %v1047_v48 = vld [vmem:[%s2576_s23 + $0x64] sm:$0xf] (!%p989_p7)  ;;  %v1241_v50 = vsel (!%p989_p7), %vm1238_vm0, %v1022_v44, 4286644096 }
  0x53   : > { %v1070_v46 = vld [vmem:[%s2576_s23 + $0xc0] sm:$0xf] (!%p989_p7)  ;;  %v1071_v51 = vld [vmem:[%s2576_s23 + $0xc4] sm:$0xf] (!%p989_p7)  ;;  %v1244_v52 = vsel (!%p989_p7), %vm1238_vm0, %v1046_v45, 4286644096 }
  0x54   : > { %v1094_v49 = vld [vmem:[%s2576_s23 + $0x120] sm:$0xf]  ;;  %v1248_v53 = vsel %vm1238_vm0, %v1070_v46, 4286644096  ;;  %v1246_v55 = vmax.bf16 %v1244_v52, %v1241_v50  ;;  %v1095_v56 = vld [vmem:[%s2576_s23 + $0x124] sm:$0xf] }
  0x55   : > { %v1118_v54 = vld [vmem:[%s2576_s23 + $0x180] sm:$0xf]  ;;  %v1252_v57 = vsel %vm1238_vm0, %v1094_v49, 4286644096  ;;  %v1276_v58 = vsel %vm1238_vm0, %v1023_v47, 4286644096 }
  0x56   : > { %v1142_v59 = vld [vmem:[%s2576_s23 + $0x1e0] sm:$0xf]  ;;  %v1250_v60 = vmax.bf16 %v1248_v53, %v1246_v55  ;;  %v1279_v61 = vsel %vm1238_vm0, %v1047_v48, 4286644096  ;;  %v1283_v62 = vsel %vm1238_vm0, %v1071_v51, 4286644096 }
  0x57   : > { %v1119_v63 = vld [vmem:[%s2576_s23 + $0x184] sm:$0xf]  ;;  %v1256_v0 = vsel %vm1238_vm0, %v1118_v54, 4286644096  ;;  %v1281_v1 = vmax.bf16 %v1279_v61, %v1276_v58  ;;  %v1166_v2 = vld [vmem:[%s2576_s23 + $0x240] sm:$0xf] }
  0x58   : > { %v1190_v3 = vld [vmem:[%s2576_s23 + $0x2a0] sm:$0xf]  ;;  %v1254_v4 = vmax.bf16 %v1252_v57, %v1250_v60  ;;  %v1287_v5 = vsel %vm1238_vm0, %v1095_v56, 4286644096  ;;  %s3049_s24 = smov (!%p1016_p8, %s1015_s24), 47 }
  0x59   : > { %v1143_v6 = vld [vmem:[%s2576_s23 + $0x1e4] sm:$0xf]  ;;  %v1260_v7 = vsel %vm1238_vm0, %v1142_v59, 4286644096  ;;  %v1285_v8 = vmax.bf16 %v1283_v62, %v1281_v1  ;;  %v1214_v10 = vld [vmem:[%s2576_s23 + $0x300] sm:$0xf] }
  0x5a   : > { %v1167_v9 = vld [vmem:[%s2576_s23 + $0x244] sm:$0xf]  ;;  %v1258_v11 = vmax.bf16 %v1256_v0, %v1254_v4  ;;  %v1291_v12 = vsel %vm1238_vm0, %v1119_v63, 4286644096  ;;  %v1264_v15 = vsel %vm1238_vm0, %v1166_v2, 4286644096 }
  0x5b   : > { %v1191_v13 = vld [vmem:[%s2576_s23 + $0x2a4] sm:$0xf]  ;;  %v1268_v16 = vsel %vm1238_vm0, %v1190_v3, 4286644096  ;;  %v1289_v17 = vmax.bf16 %v1287_v5, %v1285_v8  ;;  %v1295_v20 = vsel %vm1238_vm0, %v1143_v6, 4286644096 }
  0x5c   : > { %v1215_v14 = vld [vmem:[%s2576_s23 + $0x304] sm:$0xf]  ;;  %v1262_v19 = vmax.bf16 %v1260_v7, %v1258_v11  ;;  %v1048_v21 = vld [vmem:[%s2576_s23 + $0x68] sm:$0xf]  ;;  %v1272_v23 = vsel %vm1238_vm0, %v1214_v10, 4286644096 }
  0x5d   : > { %v1072_v22 = vld [vmem:[%s2576_s23 + $0xc8] sm:$0xf]  ;;  %v1293_v24 = vmax.bf16 %v1291_v12, %v1289_v17  ;;  %v1299_v25 = vsel %vm1238_vm0, %v1167_v9, 4286644096  ;;  %v1025_v26 = vld [vmem:[%s2576_s23 + $0xc] sm:$0xf] }
  0x5e   : > { %v1266_v27 = vmax.bf16 %v1264_v15, %v1262_v19  ;;  %v1049_v28 = vld [vmem:[%s2576_s23 + $0x6c] sm:$0xf]  ;;  %v1096_v29 = vld [vmem:[%s2576_s23 + $0x128] sm:$0xf]  ;;  %v1311_v30 = vsel %vm1238_vm0, %v1024_v18, 4286644096 }
  0x5f   : > { %v1297_v31 = vmax.bf16 %v1295_v20, %v1293_v24  ;;  %v1120_v32 = vld [vmem:[%s2576_s23 + $0x188] sm:$0xf]  ;;  %v1314_v33 = vsel %vm1238_vm0, %v1048_v21, 4286644096  ;;  %v1318_v34 = vsel %vm1238_vm0, %v1072_v22, 4286644096 }
  0x60   : > { %v1270_v35 = vmax.bf16 %v1268_v16, %v1266_v27  ;;  %v1303_v36 = vsel %vm1238_vm0, %v1191_v13, 4286644096  ;;  %v1307_v37 = vsel %vm1238_vm0, %v1215_v14, 4286644096  ;;  %v1073_v38 = vld [vmem:[%s2576_s23 + $0xcc] sm:$0xf]  ;;  %v1316_v39 = vmax.bf16 %v1314_v33, %v1311_v30 }
  0x61   : > { %v1301_v40 = vmax.bf16 %v1299_v25, %v1297_v31  ;;  %v1097_v41 = vld [vmem:[%s2576_s23 + $0x12c] sm:$0xf]  ;;  %v1144_v42 = vld [vmem:[%s2576_s23 + $0x1e8] sm:$0xf]  ;;  %v1322_v43 = vsel %vm1238_vm0, %v1096_v29, 4286644096 }
  0x62   : > { %v1320_v44 = vmax.bf16 %v1318_v34, %v1316_v39  ;;  %v1326_v45 = vsel %vm1238_vm0, %v1120_v32, 4286644096  ;;  %v1346_v46 = vsel %vm1238_vm0, %v1025_v26, 4286644096  ;;  %v1349_v47 = vsel %vm1238_vm0, %v1049_v28, 4286644096 }
  0x63   : > { %s2172_s25 = sshll.u32 %s3049_s24, 2  ;;  %v1274_v48 = vmax.bf16 %v1272_v23, %v1270_v35  ;;  %v1305_v49 = vmax.bf16 %v1303_v36, %v1301_v40  ;;  %v1121_v50 = vld [vmem:[%s2576_s23 + $0x18c] sm:$0xf]  ;;  %v1351_v51 = vmax.bf16 %v1349_v47, %v1346_v46  ;;  %v1353_v52 = vsel %vm1238_vm0, %v1073_v38, 4286644096 }
  0x64   : > { %v1168_v53 = vld [vmem:[%s2576_s23 + $0x248] sm:$0xf]  ;;  %v1324_v55 = vmax.bf16 %v1322_v43, %v1320_v44  ;;  %v1357_v56 = vsel %vm1238_vm0, %v1097_v41, 4286644096  ;;  %v1145_v58 = vld [vmem:[%s2576_s23 + $0x1ec] sm:$0xf]  ;;  %s2647_s28 = scalar_lea.vmem %s3044_s1, %s2172_s25 }
  0x65   : > { %v1192_v54 = vld [vmem:[%s2576_s23 + $0x2a8] sm:$0xf]  ;;  %v1309_v57 = vmax.bf16 %v1307_v37, %v1305_v49  ;;  %v1330_v59 = vsel %vm1238_vm0, %v1144_v42, 4286644096  ;;  %v1355_v60 = vmax.bf16 %v1353_v52, %v1351_v51  ;;  %v1169_v61 = vld [vmem:[%s2576_s23 + $0x24c] sm:$0xf] }
  0x66   : > { %v1216_v62 = vld [vmem:[%s2576_s23 + $0x308] sm:$0xf]  ;;  %v1328_v63 = vmax.bf16 %v1326_v45, %v1324_v55  ;;  %v1361_v0 = vsel %vm1238_vm0, %v1121_v50, 4286644096  ;;  %v1193_v2 = vld [vmem:[%s2576_s23 + $0x2ac] sm:$0xf] }
  0x67   : > { %v2236_v1 = vcombine.low %v1274_v48, %v1309_v57  ;;  %v1217_v3 = vld [vmem:[%s2576_s23 + $0x30c] sm:$0xf]  ;;  %v1334_v4 = vsel %vm1238_vm0, %v1168_v53, 4286644096  ;;  %v1338_v5 = vsel %vm1238_vm0, %v1192_v54, 4286644096  ;;  %v1359_v6 = vmax.bf16 %v1357_v56, %v1355_v60 }
  0x68   : > { %v1026_v7 = vld [vmem:[%s2576_s23 + $0x10] sm:$0xf]  ;;  %v1332_v8 = vmax.bf16 %v1330_v59, %v1328_v63  ;;  %v1365_v9 = vsel %vm1238_vm0, %v1145_v58, 4286644096  ;;  %v1342_v12 = vsel %vm1238_vm0, %v1216_v62, 4286644096 }
  0x69   : > { %v1050_v10 = vld [vmem:[%s2576_s23 + $0x70] sm:$0xf]  ;;  %2180 = vst [vmem:[%s2647_s28] sm:$0xff] %v2236_v1   ;;  %v1363_v13 = vmax.bf16 %v1361_v0, %v1359_v6  ;;  %v1369_v14 = vsel %vm1238_vm0, %v1169_v61, 4286644096  ;;  %v1027_v15 = vld [vmem:[%s2576_s23 + $0x14] sm:$0xf] }
  0x6a   : > { %v1074_v11 = vld [vmem:[%s2576_s23 + $0xd0] sm:$0xf]  ;;  %v1336_v16 = vmax.bf16 %v1334_v4, %v1332_v8  ;;  %v1051_v17 = vld [vmem:[%s2576_s23 + $0x74] sm:$0xf]  ;;  %v1381_v19 = vsel %vm1238_vm0, %v1026_v7, 4286644096 }
  0x6b   : > { %v1098_v18 = vld [vmem:[%s2576_s23 + $0x130] sm:$0xf]  ;;  %v1367_v20 = vmax.bf16 %v1365_v9, %v1363_v13  ;;  %v1384_v22 = vsel %vm1238_vm0, %v1050_v10, 4286644096  ;;  %v1388_v23 = vsel %vm1238_vm0, %v1074_v11, 4286644096 }
  0x6c   : > { %v1122_v21 = vld [vmem:[%s2576_s23 + $0x190] sm:$0xf]  ;;  %v1340_v24 = vmax.bf16 %v1338_v5, %v1336_v16  ;;  %v1373_v25 = vsel %vm1238_vm0, %v1193_v2, 4286644096  ;;  %v1377_v26 = vsel %vm1238_vm0, %v1217_v3, 4286644096  ;;  %v1386_v28 = vmax.bf16 %v1384_v22, %v1381_v19 }
  0x6d   : > { %v1075_v27 = vld [vmem:[%s2576_s23 + $0xd4] sm:$0xf]  ;;  %v1371_v29 = vmax.bf16 %v1369_v14, %v1367_v20  ;;  %v1146_v31 = vld [vmem:[%s2576_s23 + $0x1f0] sm:$0xf]  ;;  %v1392_v32 = vsel %vm1238_vm0, %v1098_v18, 4286644096 }
  0x6e   : > { %v1099_v30 = vld [vmem:[%s2576_s23 + $0x134] sm:$0xf]  ;;  %v1390_v33 = vmax.bf16 %v1388_v23, %v1386_v28  ;;  %v1396_v34 = vsel %vm1238_vm0, %v1122_v21, 4286644096  ;;  %v1416_v35 = vsel %vm1238_vm0, %v1027_v15, 4286644096  ;;  %v1344_v37 = vmax.bf16 %v1342_v12, %v1340_v24 }
  0x6f   : > { %v1419_v36 = vsel %vm1238_vm0, %v1051_v17, 4286644096  ;;  %v1375_v38 = vmax.bf16 %v1373_v25, %v1371_v29  ;;  %v1123_v39 = vld [vmem:[%s2576_s23 + $0x194] sm:$0xf]  ;;  %v1423_v41 = vsel %vm1238_vm0, %v1075_v27, 4286644096 }
  0x70   : > { %v1421_v40 = vmax.bf16 %v1419_v36, %v1416_v35  ;;  %v1170_v42 = vld [vmem:[%s2576_s23 + $0x250] sm:$0xf]  ;;  %v1394_v44 = vmax.bf16 %v1392_v32, %v1390_v33  ;;  %v1427_v45 = vsel %vm1238_vm0, %v1099_v30, 4286644096  ;;  %v1147_v47 = vld [vmem:[%s2576_s23 + $0x1f4] sm:$0xf] }
  0x71   : > { %v1194_v43 = vld [vmem:[%s2576_s23 + $0x2b0] sm:$0xf]  ;;  %v1379_v46 = vmax.bf16 %v1377_v26, %v1375_v38  ;;  %v1400_v48 = vsel %vm1238_vm0, %v1146_v31, 4286644096  ;;  %v1171_v50 = vld [vmem:[%s2576_s23 + $0x254] sm:$0xf] }
  0x72   : > { %v1425_v49 = vmax.bf16 %v1423_v41, %v1421_v40  ;;  %v1218_v51 = vld [vmem:[%s2576_s23 + $0x310] sm:$0xf]  ;;  %v1398_v52 = vmax.bf16 %v1396_v34, %v1394_v44  ;;  %v1431_v53 = vsel %vm1238_vm0, %v1123_v39, 4286644096  ;;  %v1195_v55 = vld [vmem:[%s2576_s23 + $0x2b4] sm:$0xf] }
  0x73   : > { %v2237_v54 = vcombine.low %v1344_v37, %v1379_v46  ;;  %v1219_v56 = vld [vmem:[%s2576_s23 + $0x314] sm:$0xf]  ;;  %v1404_v57 = vsel %vm1238_vm0, %v1170_v42, 4286644096  ;;  %v1408_v58 = vsel %vm1238_vm0, %v1194_v43, 4286644096 }
  0x74   : > { %v1429_v59 = vmax.bf16 %v1427_v45, %v1425_v49  ;;  %v1028_v60 = vld [vmem:[%s2576_s23 + $0x18] sm:$0xf]  ;;  %v1402_v61 = vmax.bf16 %v1400_v48, %v1398_v52  ;;  %v1435_v62 = vsel %vm1238_vm0, %v1147_v47, 4286644096  ;;  %v1412_v1 = vsel %vm1238_vm0, %v1218_v51, 4286644096 }
  0x75   : > { %v1052_v63 = vld [vmem:[%s2576_s23 + $0x78] sm:$0xf]  ;;  %2238 = vst [vmem:[%s2647_s28 + $0x8] sm:$0xff] %v2237_v54   ;;  %v1439_v3 = vsel %vm1238_vm0, %v1171_v50, 4286644096 }
  0x76   : > { %v1076_v0 = vld [vmem:[%s2576_s23 + $0xd8] sm:$0xf]  ;;  %v1433_v2 = vmax.bf16 %v1431_v53, %v1429_v59  ;;  %v1029_v4 = vld [vmem:[%s2576_s23 + $0x1c] sm:$0xf]  ;;  %v1406_v5 = vmax.bf16 %v1404_v57, %v1402_v61  ;;  %v1451_v8 = vsel %vm1238_vm0, %v1028_v60, 4286644096 }
  0x77   : > { %v1053_v6 = vld [vmem:[%s2576_s23 + $0x7c] sm:$0xf]  ;;  %v1100_v7 = vld [vmem:[%s2576_s23 + $0x138] sm:$0xf]  ;;  %v1454_v11 = vsel %vm1238_vm0, %v1052_v63, 4286644096 }
  0x78   : > { %v1437_v9 = vmax.bf16 %v1435_v62, %v1433_v2  ;;  %v1124_v10 = vld [vmem:[%s2576_s23 + $0x198] sm:$0xf]  ;;  %v1458_v12 = vsel %vm1238_vm0, %v1076_v0, 4286644096  ;;  %v1410_v13 = vmax.bf16 %v1408_v58, %v1406_v5  ;;  %v1443_v14 = vsel %vm1238_vm0, %v1195_v55, 4286644096 }
  0x79   : > { %v1447_v15 = vsel %vm1238_vm0, %v1219_v56, 4286644096  ;;  %v1077_v16 = vld [vmem:[%s2576_s23 + $0xdc] sm:$0xf]  ;;  %v1456_v17 = vmax.bf16 %v1454_v11, %v1451_v8  ;;  %v1148_v20 = vld [vmem:[%s2576_s23 + $0x1f8] sm:$0xf] }
  0x7a   : > { %v1441_v18 = vmax.bf16 %v1439_v3, %v1437_v9  ;;  %v1101_v19 = vld [vmem:[%s2576_s23 + $0x13c] sm:$0xf]  ;;  %v1462_v21 = vsel %vm1238_vm0, %v1100_v7, 4286644096  ;;  %v1466_v23 = vsel %vm1238_vm0, %v1124_v10, 4286644096  ;;  %v1414_v26 = vmax.bf16 %v1412_v1, %v1410_v13 }
  0x7b   : > { %v1460_v22 = vmax.bf16 %v1458_v12, %v1456_v17  ;;  %v1486_v24 = vsel %vm1238_vm0, %v1029_v4, 4286644096  ;;  %v1489_v25 = vsel %vm1238_vm0, %v1053_v6, 4286644096  ;;  %v1125_v28 = vld [vmem:[%s2576_s23 + $0x19c] sm:$0xf] }
  0x7c   : > { %v1445_v27 = vmax.bf16 %v1443_v14, %v1441_v18  ;;  %v1491_v29 = vmax.bf16 %v1489_v25, %v1486_v24  ;;  %v1493_v30 = vsel %vm1238_vm0, %v1077_v16, 4286644096  ;;  %v1172_v31 = vld [vmem:[%s2576_s23 + $0x258] sm:$0xf]  ;;  %v1497_v34 = vsel %vm1238_vm0, %v1101_v19, 4286644096 }
  0x7d   : > { %v1196_v32 = vld [vmem:[%s2576_s23 + $0x2b8] sm:$0xf]  ;;  %v1464_v33 = vmax.bf16 %v1462_v21, %v1460_v22  ;;  %v1149_v36 = vld [vmem:[%s2576_s23 + $0x1fc] sm:$0xf]  ;;  %v1470_v37 = vsel %vm1238_vm0, %v1148_v20, 4286644096 }
  0x7e   : > { %v1449_v35 = vmax.bf16 %v1447_v15, %v1445_v27  ;;  %v1495_v38 = vmax.bf16 %v1493_v30, %v1491_v29  ;;  %v1173_v39 = vld [vmem:[%s2576_s23 + $0x25c] sm:$0xf]  ;;  %v1220_v40 = vld [vmem:[%s2576_s23 + $0x318] sm:$0xf]  ;;  %v1501_v42 = vsel %vm1238_vm0, %v1125_v28, 4286644096 }
  0x7f   : > { %v1468_v41 = vmax.bf16 %v1466_v23, %v1464_v33  ;;  %v1197_v44 = vld [vmem:[%s2576_s23 + $0x2bc] sm:$0xf]  ;;  %v1474_v46 = vsel %vm1238_vm0, %v1172_v31, 4286644096  ;;  %v1478_v47 = vsel %vm1238_vm0, %v1196_v32, 4286644096 }
  0x80   : > { %v2239_v43 = vcombine.low %v1414_v26, %v1449_v35  ;;  %v1221_v45 = vld [vmem:[%s2576_s23 + $0x31c] sm:$0xf]  ;;  %v1499_v48 = vmax.bf16 %v1497_v34, %v1495_v38  ;;  %v1030_v49 = vld [vmem:[%s2576_s23 + $0x20] sm:$0xf]  ;;  %v1505_v51 = vsel %vm1238_vm0, %v1149_v36, 4286644096 }
  0x81   : > { %v1472_v50 = vmax.bf16 %v1470_v37, %v1468_v41  ;;  %v1054_v52 = vld [vmem:[%s2576_s23 + $0x80] sm:$0xf]  ;;  %v1482_v54 = vsel %vm1238_vm0, %v1220_v40, 4286644096  ;;  %v1509_v56 = vsel %vm1238_vm0, %v1173_v39, 4286644096 }
  0x82   : > { %v1078_v53 = vld [vmem:[%s2576_s23 + $0xe0] sm:$0xf]  ;;  %2240 = vst [vmem:[%s2647_s28 + $0x10] sm:$0xff] %v2239_v43   ;;  %v1503_v55 = vmax.bf16 %v1501_v42, %v1499_v48  ;;  %v1031_v57 = vld [vmem:[%s2576_s23 + $0x24] sm:$0xf] }
  0x83   : > { %v1476_v58 = vmax.bf16 %v1474_v46, %v1472_v50  ;;  %v1055_v59 = vld [vmem:[%s2576_s23 + $0x84] sm:$0xf]  ;;  %v1102_v60 = vld [vmem:[%s2576_s23 + $0x140] sm:$0xf]  ;;  %v1521_v61 = vsel %vm1238_vm0, %v1030_v49, 4286644096 }
  0x84   : > { %v1507_v62 = vmax.bf16 %v1505_v51, %v1503_v55  ;;  %v1126_v63 = vld [vmem:[%s2576_s23 + $0x1a0] sm:$0xf]  ;;  %v1524_v0 = vsel %vm1238_vm0, %v1054_v52, 4286644096  ;;  %v1528_v1 = vsel %vm1238_vm0, %v1078_v53, 4286644096 }
  0x85   : > { %v1480_v2 = vmax.bf16 %v1478_v47, %v1476_v58  ;;  %v1513_v3 = vsel %vm1238_vm0, %v1197_v44, 4286644096  ;;  %v1517_v4 = vsel %vm1238_vm0, %v1221_v45, 4286644096  ;;  %v1079_v5 = vld [vmem:[%s2576_s23 + $0xe4] sm:$0xf]  ;;  %v1526_v6 = vmax.bf16 %v1524_v0, %v1521_v61 }
  0x86   : > { %v1511_v7 = vmax.bf16 %v1509_v56, %v1507_v62  ;;  %v1103_v8 = vld [vmem:[%s2576_s23 + $0x144] sm:$0xf]  ;;  %v1150_v9 = vld [vmem:[%s2576_s23 + $0x200] sm:$0xf]  ;;  %v1532_v10 = vsel %vm1238_vm0, %v1102_v60, 4286644096 }
  0x87   : > { %v1530_v11 = vmax.bf16 %v1528_v1, %v1526_v6  ;;  %v1536_v12 = vsel %vm1238_vm0, %v1126_v63, 4286644096  ;;  %v1556_v13 = vsel %vm1238_vm0, %v1031_v57, 4286644096  ;;  %v1559_v14 = vsel %vm1238_vm0, %v1055_v59, 4286644096 }
  0x88   : > { %v1484_v15 = vmax.bf16 %v1482_v54, %v1480_v2  ;;  %v1515_v16 = vmax.bf16 %v1513_v3, %v1511_v7  ;;  %v1127_v17 = vld [vmem:[%s2576_s23 + $0x1a4] sm:$0xf]  ;;  %v1561_v18 = vmax.bf16 %v1559_v14, %v1556_v13  ;;  %v1563_v19 = vsel %vm1238_vm0, %v1079_v5, 4286644096  ;;  %v1174_v20 = vld [vmem:[%s2576_s23 + $0x260] sm:$0xf] }
  0x89   : > { %v1198_v21 = vld [vmem:[%s2576_s23 + $0x2c0] sm:$0xf]  ;;  %v1534_v22 = vmax.bf16 %v1532_v10, %v1530_v11  ;;  %v1567_v23 = vsel %vm1238_vm0, %v1103_v8, 4286644096  ;;  %v1151_v25 = vld [vmem:[%s2576_s23 + $0x204] sm:$0xf] }
  0x8a   : > { %v1519_v24 = vmax.bf16 %v1517_v4, %v1515_v16  ;;  %v1540_v26 = vsel %vm1238_vm0, %v1150_v9, 4286644096  ;;  %v1565_v27 = vmax.bf16 %v1563_v19, %v1561_v18  ;;  %v1175_v28 = vld [vmem:[%s2576_s23 + $0x264] sm:$0xf]  ;;  %v1222_v29 = vld [vmem:[%s2576_s23 + $0x320] sm:$0xf] }
  0x8b   : > { %v1538_v30 = vmax.bf16 %v1536_v12, %v1534_v22  ;;  %v1571_v31 = vsel %vm1238_vm0, %v1127_v17, 4286644096  ;;  %v1199_v33 = vld [vmem:[%s2576_s23 + $0x2c4] sm:$0xf]  ;;  %v1544_v35 = vsel %vm1238_vm0, %v1174_v20, 4286644096 }
  0x8c   : > { %v2241_v32 = vcombine.low %v1484_v15, %v1519_v24  ;;  %v1223_v34 = vld [vmem:[%s2576_s23 + $0x324] sm:$0xf]  ;;  %v1548_v36 = vsel %vm1238_vm0, %v1198_v21, 4286644096  ;;  %v1569_v37 = vmax.bf16 %v1567_v23, %v1565_v27  ;;  %v1032_v38 = vld [vmem:[%s2576_s23 + $0x28] sm:$0xf] }
  0x8d   : > { %v1542_v39 = vmax.bf16 %v1540_v26, %v1538_v30  ;;  %v1575_v40 = vsel %vm1238_vm0, %v1151_v25, 4286644096  ;;  %v1056_v41 = vld [vmem:[%s2576_s23 + $0x88] sm:$0xf]  ;;  %v1552_v43 = vsel %vm1238_vm0, %v1222_v29, 4286644096 }
  0x8e   : > { %v1080_v42 = vld [vmem:[%s2576_s23 + $0xe8] sm:$0xf]  ;;  %2242 = vst [vmem:[%s2647_s28 + $0x18] sm:$0xff] %v2241_v32   ;;  %v1573_v44 = vmax.bf16 %v1571_v31, %v1569_v37  ;;  %v1579_v45 = vsel %vm1238_vm0, %v1175_v28, 4286644096 }
  0x8f   : > { %v1033_v46 = vld [vmem:[%s2576_s23 + $0x2c] sm:$0xf]  ;;  %v1546_v47 = vmax.bf16 %v1544_v35, %v1542_v39  ;;  %v1104_v49 = vld [vmem:[%s2576_s23 + $0x148] sm:$0xf]  ;;  %v1591_v50 = vsel %vm1238_vm0, %v1032_v38, 4286644096 }
  0x90   : > { %v1057_v48 = vld [vmem:[%s2576_s23 + $0x8c] sm:$0xf]  ;;  %v1577_v51 = vmax.bf16 %v1575_v40, %v1573_v44  ;;  %v1128_v52 = vld [vmem:[%s2576_s23 + $0x1a8] sm:$0xf]  ;;  %v1594_v53 = vsel %vm1238_vm0, %v1056_v41, 4286644096 }
  0x91   : > { %v1598_v54 = vsel %vm1238_vm0, %v1080_v42, 4286644096  ;;  %v1550_v55 = vmax.bf16 %v1548_v36, %v1546_v47  ;;  %v1583_v56 = vsel %vm1238_vm0, %v1199_v33, 4286644096  ;;  %v1587_v57 = vsel %vm1238_vm0, %v1223_v34, 4286644096 }
  0x92   : > { %v1081_v58 = vld [vmem:[%s2576_s23 + $0xec] sm:$0xf]  ;;  %v1596_v59 = vmax.bf16 %v1594_v53, %v1591_v50  ;;  %v1581_v60 = vmax.bf16 %v1579_v45, %v1577_v51  ;;  %v1152_v62 = vld [vmem:[%s2576_s23 + $0x208] sm:$0xf]  ;;  %v1602_v63 = vsel %vm1238_vm0, %v1104_v49, 4286644096 }
  0x93   : > { %v1105_v61 = vld [vmem:[%s2576_s23 + $0x14c] sm:$0xf]  ;;  %v1606_v1 = vsel %vm1238_vm0, %v1128_v52, 4286644096  ;;  %v1626_v2 = vsel %vm1238_vm0, %v1033_v46, 4286644096  ;;  %v1554_v4 = vmax.bf16 %v1552_v43, %v1550_v55 }
  0x94   : > { %v1600_v0 = vmax.bf16 %v1598_v54, %v1596_v59  ;;  %v1629_v3 = vsel %vm1238_vm0, %v1057_v48, 4286644096  ;;  %v1585_v5 = vmax.bf16 %v1583_v56, %v1581_v60  ;;  %v1129_v6 = vld [vmem:[%s2576_s23 + $0x1ac] sm:$0xf]  ;;  %v1633_v8 = vsel %vm1238_vm0, %v1081_v58, 4286644096 }
  0x95   : > { %v1631_v7 = vmax.bf16 %v1629_v3, %v1626_v2  ;;  %v1176_v9 = vld [vmem:[%s2576_s23 + $0x268] sm:$0xf]  ;;  %v1637_v12 = vsel %vm1238_vm0, %v1105_v61, 4286644096  ;;  %v1153_v14 = vld [vmem:[%s2576_s23 + $0x20c] sm:$0xf] }
  0x96   : > { %v1200_v10 = vld [vmem:[%s2576_s23 + $0x2c8] sm:$0xf]  ;;  %v1604_v11 = vmax.bf16 %v1602_v63, %v1600_v0  ;;  %v1589_v13 = vmax.bf16 %v1587_v57, %v1585_v5  ;;  %v1610_v15 = vsel %vm1238_vm0, %v1152_v62, 4286644096  ;;  %v1177_v17 = vld [vmem:[%s2576_s23 + $0x26c] sm:$0xf] }
  0x97   : > { %v1635_v16 = vmax.bf16 %v1633_v8, %v1631_v7  ;;  %v1224_v18 = vld [vmem:[%s2576_s23 + $0x328] sm:$0xf]  ;;  %v1641_v20 = vsel %vm1238_vm0, %v1129_v6, 4286644096  ;;  %v1201_v22 = vld [vmem:[%s2576_s23 + $0x2cc] sm:$0xf] }
  0x98   : > { %v1608_v19 = vmax.bf16 %v1606_v1, %v1604_v11  ;;  %v2243_v21 = vcombine.low %v1554_v4, %v1589_v13  ;;  %v1225_v23 = vld [vmem:[%s2576_s23 + $0x32c] sm:$0xf]  ;;  %v1614_v24 = vsel %vm1238_vm0, %v1176_v9, 4286644096  ;;  %v1618_v25 = vsel %vm1238_vm0, %v1200_v10, 4286644096 }
  0x99   : > { %v1639_v26 = vmax.bf16 %v1637_v12, %v1635_v16  ;;  %v1034_v27 = vld [vmem:[%s2576_s23 + $0x30] sm:$0xf]  ;;  %v1645_v29 = vsel %vm1238_vm0, %v1153_v14, 4286644096  ;;  %v1622_v32 = vsel %vm1238_vm0, %v1224_v18, 4286644096 }
  0x9a   : > { %v1612_v28 = vmax.bf16 %v1610_v15, %v1608_v19  ;;  %v1058_v30 = vld [vmem:[%s2576_s23 + $0x90] sm:$0xf]  ;;  %2244 = vst [vmem:[%s2647_s28 + $0x20] sm:$0xff] %v2243_v21   ;;  %v1649_v34 = vsel %vm1238_vm0, %v1177_v17, 4286644096 }
  0x9b   : > { %v1082_v31 = vld [vmem:[%s2576_s23 + $0xf0] sm:$0xf]  ;;  %v1643_v33 = vmax.bf16 %v1641_v20, %v1639_v26  ;;  %v1035_v35 = vld [vmem:[%s2576_s23 + $0x34] sm:$0xf]  ;;  %v1661_v39 = vsel %vm1238_vm0, %v1034_v27, 4286644096 }
  0x9c   : > { %v1616_v36 = vmax.bf16 %v1614_v24, %v1612_v28  ;;  %v1059_v37 = vld [vmem:[%s2576_s23 + $0x94] sm:$0xf]  ;;  %v1106_v38 = vld [vmem:[%s2576_s23 + $0x150] sm:$0xf]  ;;  %v1664_v42 = vsel %vm1238_vm0, %v1058_v30, 4286644096 }
  0x9d   : > { %v1647_v40 = vmax.bf16 %v1645_v29, %v1643_v33  ;;  %v1130_v41 = vld [vmem:[%s2576_s23 + $0x1b0] sm:$0xf]  ;;  %v1668_v43 = vsel %vm1238_vm0, %v1082_v31, 4286644096  ;;  %v1653_v45 = vsel %vm1238_vm0, %v1201_v22, 4286644096  ;;  %v1666_v48 = vmax.bf16 %v1664_v42, %v1661_v39 }
  0x9e   : > { %v1620_v44 = vmax.bf16 %v1618_v25, %v1616_v36  ;;  %v1657_v46 = vsel %vm1238_vm0, %v1225_v23, 4286644096  ;;  %v1083_v47 = vld [vmem:[%s2576_s23 + $0xf4] sm:$0xf]  ;;  %v1154_v51 = vld [vmem:[%s2576_s23 + $0x210] sm:$0xf] }
  0x9f   : > { %v1651_v49 = vmax.bf16 %v1649_v34, %v1647_v40  ;;  %v1107_v50 = vld [vmem:[%s2576_s23 + $0x154] sm:$0xf]  ;;  %v1672_v52 = vsel %vm1238_vm0, %v1106_v38, 4286644096  ;;  %v1670_v53 = vmax.bf16 %v1668_v43, %v1666_v48  ;;  %v1676_v54 = vsel %vm1238_vm0, %v1130_v41, 4286644096 }
  0xa0   : > { %v1696_v55 = vsel %vm1238_vm0, %v1035_v35, 4286644096  ;;  %v1699_v56 = vsel %vm1238_vm0, %v1059_v37, 4286644096  ;;  %v1624_v57 = vmax.bf16 %v1622_v32, %v1620_v44  ;;  %v1131_v59 = vld [vmem:[%s2576_s23 + $0x1b4] sm:$0xf] }
  0xa1   : > { %v1655_v58 = vmax.bf16 %v1653_v45, %v1651_v49  ;;  %v1701_v60 = vmax.bf16 %v1699_v56, %v1696_v55  ;;  %v1703_v61 = vsel %vm1238_vm0, %v1083_v47, 4286644096  ;;  %v1178_v62 = vld [vmem:[%s2576_s23 + $0x270] sm:$0xf]  ;;  %v1674_v0 = vmax.bf16 %v1672_v52, %v1670_v53  ;;  %v1155_v3 = vld [vmem:[%s2576_s23 + $0x214] sm:$0xf] }
  0xa2   : > { %v1202_v63 = vld [vmem:[%s2576_s23 + $0x2d0] sm:$0xf]  ;;  %v1707_v1 = vsel %vm1238_vm0, %v1107_v50, 4286644096  ;;  %v1680_v4 = vsel %vm1238_vm0, %v1154_v51, 4286644096 }
  0xa3   : > { %v1659_v2 = vmax.bf16 %v1657_v46, %v1655_v58  ;;  %v1705_v5 = vmax.bf16 %v1703_v61, %v1701_v60  ;;  %v1179_v6 = vld [vmem:[%s2576_s23 + $0x274] sm:$0xf]  ;;  %v1226_v7 = vld [vmem:[%s2576_s23 + $0x330] sm:$0xf]  ;;  %v1678_v8 = vmax.bf16 %v1676_v54, %v1674_v0  ;;  %v1711_v9 = vsel %vm1238_vm0, %v1131_v59, 4286644096 }
  0xa4   : > { %v1203_v11 = vld [vmem:[%s2576_s23 + $0x2d4] sm:$0xf]  ;;  %v1684_v13 = vsel %vm1238_vm0, %v1178_v62, 4286644096  ;;  %v1688_v14 = vsel %vm1238_vm0, %v1202_v63, 4286644096 }
  0xa5   : > { %v2245_v10 = vcombine.low %v1624_v57, %v1659_v2  ;;  %v1227_v12 = vld [vmem:[%s2576_s23 + $0x334] sm:$0xf]  ;;  %v1709_v15 = vmax.bf16 %v1707_v1, %v1705_v5  ;;  %v1036_v16 = vld [vmem:[%s2576_s23 + $0x38] sm:$0xf]  ;;  %v1682_v17 = vmax.bf16 %v1680_v4, %v1678_v8  ;;  %v1715_v18 = vsel %vm1238_vm0, %v1155_v3, 4286644096 }
  0xa6   : > { %v1060_v19 = vld [vmem:[%s2576_s23 + $0x98] sm:$0xf]  ;;  %v1692_v21 = vsel %vm1238_vm0, %v1226_v7, 4286644096  ;;  %v1719_v23 = vsel %vm1238_vm0, %v1179_v6, 4286644096 }
  0xa7   : > { %v1084_v20 = vld [vmem:[%s2576_s23 + $0xf8] sm:$0xf]  ;;  %2246 = vst [vmem:[%s2647_s28 + $0x28] sm:$0xff] %v2245_v10   ;;  %v1713_v22 = vmax.bf16 %v1711_v9, %v1709_v15  ;;  %v1037_v24 = vld [vmem:[%s2576_s23 + $0x3c] sm:$0xf]  ;;  %v1686_v25 = vmax.bf16 %v1684_v13, %v1682_v17 }
  0xa8   : > { %v1061_v26 = vld [vmem:[%s2576_s23 + $0x9c] sm:$0xf]  ;;  %v1108_v27 = vld [vmem:[%s2576_s23 + $0x158] sm:$0xf]  ;;  %v1731_v28 = vsel %vm1238_vm0, %v1036_v16, 4286644096 }
  0xa9   : > { %v1717_v29 = vmax.bf16 %v1715_v18, %v1713_v22  ;;  %v1132_v30 = vld [vmem:[%s2576_s23 + $0x1b8] sm:$0xf]  ;;  %v1734_v31 = vsel %vm1238_vm0, %v1060_v19, 4286644096  ;;  %v1738_v32 = vsel %vm1238_vm0, %v1084_v20, 4286644096  ;;  %v1690_v33 = vmax.bf16 %v1688_v14, %v1686_v25 }
  0xaa   : > { %v1723_v34 = vsel %vm1238_vm0, %v1203_v11, 4286644096  ;;  %v1727_v35 = vsel %vm1238_vm0, %v1227_v12, 4286644096  ;;  %v1085_v36 = vld [vmem:[%s2576_s23 + $0xfc] sm:$0xf]  ;;  %v1736_v37 = vmax.bf16 %v1734_v31, %v1731_v28 }
  0xab   : > { %v1721_v38 = vmax.bf16 %v1719_v23, %v1717_v29  ;;  %v1109_v39 = vld [vmem:[%s2576_s23 + $0x15c] sm:$0xf]  ;;  %v1156_v40 = vld [vmem:[%s2576_s23 + $0x218] sm:$0xf]  ;;  %v1742_v41 = vsel %vm1238_vm0, %v1108_v27, 4286644096  ;;  %v1694_v46 = vmax.bf16 %v1692_v21, %v1690_v33 }
  0xac   : > { %v1740_v42 = vmax.bf16 %v1738_v32, %v1736_v37  ;;  %v1746_v43 = vsel %vm1238_vm0, %v1132_v30, 4286644096  ;;  %v1766_v44 = vsel %vm1238_vm0, %v1037_v24, 4286644096  ;;  %v1769_v45 = vsel %vm1238_vm0, %v1061_v26, 4286644096 }
  0xad   : > { %v1725_v47 = vmax.bf16 %v1723_v34, %v1721_v38  ;;  %v1133_v48 = vld [vmem:[%s2576_s23 + $0x1bc] sm:$0xf]  ;;  %v1771_v49 = vmax.bf16 %v1769_v45, %v1766_v44  ;;  %v1773_v50 = vsel %vm1238_vm0, %v1085_v36, 4286644096  ;;  %v1180_v51 = vld [vmem:[%s2576_s23 + $0x278] sm:$0xf] }
  0xae   : > { %v1204_v52 = vld [vmem:[%s2576_s23 + $0x2d8] sm:$0xf]  ;;  %v1744_v53 = vmax.bf16 %v1742_v41, %v1740_v42  ;;  %v1777_v54 = vsel %vm1238_vm0, %v1109_v39, 4286644096  ;;  %v1157_v56 = vld [vmem:[%s2576_s23 + $0x21c] sm:$0xf] }
  0xaf   : > { %v1729_v55 = vmax.bf16 %v1727_v35, %v1725_v47  ;;  %v1750_v57 = vsel %vm1238_vm0, %v1156_v40, 4286644096  ;;  %v1775_v58 = vmax.bf16 %v1773_v50, %v1771_v49  ;;  %v1181_v59 = vld [vmem:[%s2576_s23 + $0x27c] sm:$0xf]  ;;  %v1228_v60 = vld [vmem:[%s2576_s23 + $0x338] sm:$0xf] }
  0xb0   : > { %v1748_v61 = vmax.bf16 %v1746_v43, %v1744_v53  ;;  %v1781_v62 = vsel %vm1238_vm0, %v1133_v48, 4286644096  ;;  %v1205_v0 = vld [vmem:[%s2576_s23 + $0x2dc] sm:$0xf]  ;;  %v1754_v2 = vsel %vm1238_vm0, %v1180_v51, 4286644096 }
  0xb1   : > { %v2247_v63 = vcombine.low %v1694_v46, %v1729_v55  ;;  %v1229_v1 = vld [vmem:[%s2576_s23 + $0x33c] sm:$0xf]  ;;  %v1758_v3 = vsel %vm1238_vm0, %v1204_v52, 4286644096  ;;  %v1779_v4 = vmax.bf16 %v1777_v54, %v1775_v58  ;;  %v1038_v5 = vld [vmem:[%s2576_s23 + $0x40] sm:$0xf] }
  0xb2   : > { %v1752_v6 = vmax.bf16 %v1750_v57, %v1748_v61  ;;  %v1785_v7 = vsel %vm1238_vm0, %v1157_v56, 4286644096  ;;  %v1062_v8 = vld [vmem:[%s2576_s23 + $0xa0] sm:$0xf]  ;;  %v1762_v10 = vsel %vm1238_vm0, %v1228_v60, 4286644096 }
  0xb3   : > { %v1086_v9 = vld [vmem:[%s2576_s23 + $0x100] sm:$0xf]  ;;  %2248 = vst [vmem:[%s2647_s28 + $0x30] sm:$0xff] %v2247_v63   ;;  %v1783_v11 = vmax.bf16 %v1781_v62, %v1779_v4  ;;  %v1789_v12 = vsel %vm1238_vm0, %v1181_v59, 4286644096 }
  0xb4   : > { %v1039_v13 = vld [vmem:[%s2576_s23 + $0x44] sm:$0xf]  ;;  %v1756_v14 = vmax.bf16 %v1754_v2, %v1752_v6  ;;  %v1110_v16 = vld [vmem:[%s2576_s23 + $0x160] sm:$0xf]  ;;  %v1801_v17 = vsel %vm1238_vm0, %v1038_v5, 4286644096 }
  0xb5   : > { %v1063_v15 = vld [vmem:[%s2576_s23 + $0xa4] sm:$0xf]  ;;  %v1787_v18 = vmax.bf16 %v1785_v7, %v1783_v11  ;;  %v1134_v19 = vld [vmem:[%s2576_s23 + $0x1c0] sm:$0xf]  ;;  %v1804_v20 = vsel %vm1238_vm0, %v1062_v8, 4286644096 }
  0xb6   : > { %v1808_v21 = vsel %vm1238_vm0, %v1086_v9, 4286644096  ;;  %v1760_v22 = vmax.bf16 %v1758_v3, %v1756_v14  ;;  %v1793_v23 = vsel %vm1238_vm0, %v1205_v0, 4286644096  ;;  %v1797_v24 = vsel %vm1238_vm0, %v1229_v1, 4286644096 }
  0xb7   : > { %v1087_v25 = vld [vmem:[%s2576_s23 + $0x104] sm:$0xf]  ;;  %v1806_v26 = vmax.bf16 %v1804_v20, %v1801_v17  ;;  %v1791_v27 = vmax.bf16 %v1789_v12, %v1787_v18  ;;  %v1158_v29 = vld [vmem:[%s2576_s23 + $0x220] sm:$0xf]  ;;  %v1812_v30 = vsel %vm1238_vm0, %v1110_v16, 4286644096 }
  0xb8   : > { %v1111_v28 = vld [vmem:[%s2576_s23 + $0x164] sm:$0xf]  ;;  %v1816_v32 = vsel %vm1238_vm0, %v1134_v19, 4286644096  ;;  %v1836_v33 = vsel %vm1238_vm0, %v1039_v13, 4286644096  ;;  %v1764_v35 = vmax.bf16 %v1762_v10, %v1760_v22 }
  0xb9   : > { %v1810_v31 = vmax.bf16 %v1808_v21, %v1806_v26  ;;  %v1839_v34 = vsel %vm1238_vm0, %v1063_v15, 4286644096  ;;  %v1795_v36 = vmax.bf16 %v1793_v23, %v1791_v27  ;;  %v1135_v37 = vld [vmem:[%s2576_s23 + $0x1c4] sm:$0xf]  ;;  %v1843_v39 = vsel %vm1238_vm0, %v1087_v25, 4286644096 }
  0xba   : > { %v1841_v38 = vmax.bf16 %v1839_v34, %v1836_v33  ;;  %v1182_v40 = vld [vmem:[%s2576_s23 + $0x280] sm:$0xf]  ;;  %v1847_v43 = vsel %vm1238_vm0, %v1111_v28, 4286644096  ;;  %v1159_v45 = vld [vmem:[%s2576_s23 + $0x224] sm:$0xf] }
  0xbb   : > { %v1206_v41 = vld [vmem:[%s2576_s23 + $0x2e0] sm:$0xf]  ;;  %v1814_v42 = vmax.bf16 %v1812_v30, %v1810_v31  ;;  %v1799_v44 = vmax.bf16 %v1797_v24, %v1795_v36  ;;  %v1820_v46 = vsel %vm1238_vm0, %v1158_v29, 4286644096  ;;  %v1183_v48 = vld [vmem:[%s2576_s23 + $0x284] sm:$0xf] }
  0xbc   : > { %v1845_v47 = vmax.bf16 %v1843_v39, %v1841_v38  ;;  %v1230_v49 = vld [vmem:[%s2576_s23 + $0x340] sm:$0xf]  ;;  %v1851_v51 = vsel %vm1238_vm0, %v1135_v37, 4286644096  ;;  %v1207_v53 = vld [vmem:[%s2576_s23 + $0x2e4] sm:$0xf] }
  0xbd   : > { %v1818_v50 = vmax.bf16 %v1816_v32, %v1814_v42  ;;  %v2249_v52 = vcombine.low %v1764_v35, %v1799_v44  ;;  %v1231_v54 = vld [vmem:[%s2576_s23 + $0x344] sm:$0xf]  ;;  %v1824_v55 = vsel %vm1238_vm0, %v1182_v40, 4286644096  ;;  %v1828_v56 = vsel %vm1238_vm0, %v1206_v41, 4286644096 }
  0xbe   : > { %v1849_v57 = vmax.bf16 %v1847_v43, %v1845_v47  ;;  %v1040_v58 = vld [vmem:[%s2576_s23 + $0x48] sm:$0xf]  ;;  %v1855_v60 = vsel %vm1238_vm0, %v1159_v45, 4286644096  ;;  %v1832_v63 = vsel %vm1238_vm0, %v1230_v49, 4286644096 }
  0xbf   : > { %v1822_v59 = vmax.bf16 %v1820_v46, %v1818_v50  ;;  %v1064_v61 = vld [vmem:[%s2576_s23 + $0xa8] sm:$0xf]  ;;  %2250 = vst [vmem:[%s2647_s28 + $0x38] sm:$0xff] %v2249_v52   ;;  %v1859_v1 = vsel %vm1238_vm0, %v1183_v48, 4286644096 }
  0xc0   : > { %v1088_v62 = vld [vmem:[%s2576_s23 + $0x108] sm:$0xf]  ;;  %v1853_v0 = vmax.bf16 %v1851_v51, %v1849_v57  ;;  %v1041_v2 = vld [vmem:[%s2576_s23 + $0x4c] sm:$0xf]  ;;  %v1871_v6 = vsel %vm1238_vm0, %v1040_v58, 4286644096 }
  0xc1   : > { %v1826_v3 = vmax.bf16 %v1824_v55, %v1822_v59  ;;  %v1065_v4 = vld [vmem:[%s2576_s23 + $0xac] sm:$0xf]  ;;  %v1112_v5 = vld [vmem:[%s2576_s23 + $0x168] sm:$0xf]  ;;  %v1874_v9 = vsel %vm1238_vm0, %v1064_v61, 4286644096 }
  0xc2   : > { %v1857_v7 = vmax.bf16 %v1855_v60, %v1853_v0  ;;  %v1136_v8 = vld [vmem:[%s2576_s23 + $0x1c8] sm:$0xf]  ;;  %v1878_v10 = vsel %vm1238_vm0, %v1088_v62, 4286644096  ;;  %v1863_v12 = vsel %vm1238_vm0, %v1207_v53, 4286644096  ;;  %v1876_v15 = vmax.bf16 %v1874_v9, %v1871_v6 }
  0xc3   : > { %v1830_v11 = vmax.bf16 %v1828_v56, %v1826_v3  ;;  %v1867_v13 = vsel %vm1238_vm0, %v1231_v54, 4286644096  ;;  %v1089_v14 = vld [vmem:[%s2576_s23 + $0x10c] sm:$0xf]  ;;  %v1160_v18 = vld [vmem:[%s2576_s23 + $0x228] sm:$0xf] }
  0xc4   : > { %v1861_v16 = vmax.bf16 %v1859_v1, %v1857_v7  ;;  %v1113_v17 = vld [vmem:[%s2576_s23 + $0x16c] sm:$0xf]  ;;  %v1882_v19 = vsel %vm1238_vm0, %v1112_v5, 4286644096  ;;  %v1880_v20 = vmax.bf16 %v1878_v10, %v1876_v15  ;;  %v1886_v21 = vsel %vm1238_vm0, %v1136_v8, 4286644096 }
  0xc5   : > { %v1906_v22 = vsel %vm1238_vm0, %v1041_v2, 4286644096  ;;  %v1909_v23 = vsel %vm1238_vm0, %v1065_v4, 4286644096  ;;  %v1834_v24 = vmax.bf16 %v1832_v63, %v1830_v11  ;;  %v1137_v26 = vld [vmem:[%s2576_s23 + $0x1cc] sm:$0xf] }
  0xc6   : > { %v1865_v25 = vmax.bf16 %v1863_v12, %v1861_v16  ;;  %v1911_v27 = vmax.bf16 %v1909_v23, %v1906_v22  ;;  %v1913_v28 = vsel %vm1238_vm0, %v1089_v14, 4286644096  ;;  %v1184_v29 = vld [vmem:[%s2576_s23 + $0x288] sm:$0xf]  ;;  %v1884_v31 = vmax.bf16 %v1882_v19, %v1880_v20  ;;  %v1161_v34 = vld [vmem:[%s2576_s23 + $0x22c] sm:$0xf] }
  0xc7   : > { %v1208_v30 = vld [vmem:[%s2576_s23 + $0x2e8] sm:$0xf]  ;;  %v1917_v32 = vsel %vm1238_vm0, %v1113_v17, 4286644096  ;;  %v1890_v35 = vsel %vm1238_vm0, %v1160_v18, 4286644096 }
  0xc8   : > { %v1869_v33 = vmax.bf16 %v1867_v13, %v1865_v25  ;;  %v1915_v36 = vmax.bf16 %v1913_v28, %v1911_v27  ;;  %v1185_v37 = vld [vmem:[%s2576_s23 + $0x28c] sm:$0xf]  ;;  %v1232_v38 = vld [vmem:[%s2576_s23 + $0x348] sm:$0xf]  ;;  %v1888_v39 = vmax.bf16 %v1886_v21, %v1884_v31  ;;  %v1921_v40 = vsel %vm1238_vm0, %v1137_v26, 4286644096 }
  0xc9   : > { %v1209_v42 = vld [vmem:[%s2576_s23 + $0x2ec] sm:$0xf]  ;;  %v1894_v44 = vsel %vm1238_vm0, %v1184_v29, 4286644096  ;;  %v1898_v45 = vsel %vm1238_vm0, %v1208_v30, 4286644096 }
  0xca   : > { %v2251_v41 = vcombine.low %v1834_v24, %v1869_v33  ;;  %v1233_v43 = vld [vmem:[%s2576_s23 + $0x34c] sm:$0xf]  ;;  %v1919_v46 = vmax.bf16 %v1917_v32, %v1915_v36  ;;  %v1042_v47 = vld [vmem:[%s2576_s23 + $0x50] sm:$0xf]  ;;  %v1892_v48 = vmax.bf16 %v1890_v35, %v1888_v39  ;;  %v1925_v49 = vsel %vm1238_vm0, %v1161_v34, 4286644096 }
  0xcb   : > { %v1066_v50 = vld [vmem:[%s2576_s23 + $0xb0] sm:$0xf]  ;;  %v1902_v52 = vsel %vm1238_vm0, %v1232_v38, 4286644096  ;;  %v1929_v54 = vsel %vm1238_vm0, %v1185_v37, 4286644096 }
  0xcc   : > { %v1090_v51 = vld [vmem:[%s2576_s23 + $0x110] sm:$0xf]  ;;  %2252 = vst [vmem:[%s2647_s28 + $0x40] sm:$0xff] %v2251_v41   ;;  %v1923_v53 = vmax.bf16 %v1921_v40, %v1919_v46  ;;  %v1043_v55 = vld [vmem:[%s2576_s23 + $0x54] sm:$0xf]  ;;  %v1896_v56 = vmax.bf16 %v1894_v44, %v1892_v48 }
  0xcd   : > { %v1067_v57 = vld [vmem:[%s2576_s23 + $0xb4] sm:$0xf]  ;;  %v1114_v58 = vld [vmem:[%s2576_s23 + $0x170] sm:$0xf]  ;;  %v1941_v59 = vsel %vm1238_vm0, %v1042_v47, 4286644096 }
  0xce   : > { %v1927_v60 = vmax.bf16 %v1925_v49, %v1923_v53  ;;  %v1138_v61 = vld [vmem:[%s2576_s23 + $0x1d0] sm:$0xf]  ;;  %v1944_v62 = vsel %vm1238_vm0, %v1066_v50, 4286644096  ;;  %v1948_v63 = vsel %vm1238_vm0, %v1090_v51, 4286644096  ;;  %v1900_v0 = vmax.bf16 %v1898_v45, %v1896_v56 }
  0xcf   : > { %v1933_v1 = vsel %vm1238_vm0, %v1209_v42, 4286644096  ;;  %v1937_v2 = vsel %vm1238_vm0, %v1233_v43, 4286644096  ;;  %v1091_v3 = vld [vmem:[%s2576_s23 + $0x114] sm:$0xf]  ;;  %v1946_v4 = vmax.bf16 %v1944_v62, %v1941_v59 }
  0xd0   : > { %v1931_v5 = vmax.bf16 %v1929_v54, %v1927_v60  ;;  %v1115_v6 = vld [vmem:[%s2576_s23 + $0x174] sm:$0xf]  ;;  %v1162_v7 = vld [vmem:[%s2576_s23 + $0x230] sm:$0xf]  ;;  %v1952_v8 = vsel %vm1238_vm0, %v1114_v58, 4286644096  ;;  %v1904_v13 = vmax.bf16 %v1902_v52, %v1900_v0 }
  0xd1   : > { %v1950_v9 = vmax.bf16 %v1948_v63, %v1946_v4  ;;  %v1956_v10 = vsel %vm1238_vm0, %v1138_v61, 4286644096  ;;  %v1976_v11 = vsel %vm1238_vm0, %v1043_v55, 4286644096  ;;  %v1979_v12 = vsel %vm1238_vm0, %v1067_v57, 4286644096 }
  0xd2   : > { %v1935_v14 = vmax.bf16 %v1933_v1, %v1931_v5  ;;  %v1139_v15 = vld [vmem:[%s2576_s23 + $0x1d4] sm:$0xf]  ;;  %v1981_v16 = vmax.bf16 %v1979_v12, %v1976_v11  ;;  %v1983_v17 = vsel %vm1238_vm0, %v1091_v3, 4286644096  ;;  %v1186_v18 = vld [vmem:[%s2576_s23 + $0x290] sm:$0xf] }
  0xd3   : > { %v1210_v19 = vld [vmem:[%s2576_s23 + $0x2f0] sm:$0xf]  ;;  %v1954_v20 = vmax.bf16 %v1952_v8, %v1950_v9  ;;  %v1987_v21 = vsel %vm1238_vm0, %v1115_v6, 4286644096  ;;  %v1163_v23 = vld [vmem:[%s2576_s23 + $0x234] sm:$0xf] }
  0xd4   : > { %v1939_v22 = vmax.bf16 %v1937_v2, %v1935_v14  ;;  %v1960_v24 = vsel %vm1238_vm0, %v1162_v7, 4286644096  ;;  %v1985_v25 = vmax.bf16 %v1983_v17, %v1981_v16  ;;  %v1187_v26 = vld [vmem:[%s2576_s23 + $0x294] sm:$0xf]  ;;  %v1234_v27 = vld [vmem:[%s2576_s23 + $0x350] sm:$0xf] }
  0xd5   : > { %v1958_v28 = vmax.bf16 %v1956_v10, %v1954_v20  ;;  %v1991_v29 = vsel %vm1238_vm0, %v1139_v15, 4286644096  ;;  %v1211_v31 = vld [vmem:[%s2576_s23 + $0x2f4] sm:$0xf]  ;;  %v1964_v33 = vsel %vm1238_vm0, %v1186_v18, 4286644096 }
  0xd6   : > { %v2253_v30 = vcombine.low %v1904_v13, %v1939_v22  ;;  %v1235_v32 = vld [vmem:[%s2576_s23 + $0x354] sm:$0xf]  ;;  %v1968_v34 = vsel %vm1238_vm0, %v1210_v19, 4286644096  ;;  %v1989_v35 = vmax.bf16 %v1987_v21, %v1985_v25  ;;  %v1044_v36 = vld [vmem:[%s2576_s23 + $0x58] sm:$0xf] }
  0xd7   : > { %v1962_v37 = vmax.bf16 %v1960_v24, %v1958_v28  ;;  %v1995_v38 = vsel %vm1238_vm0, %v1163_v23, 4286644096  ;;  %v1068_v39 = vld [vmem:[%s2576_s23 + $0xb8] sm:$0xf]  ;;  %v1972_v41 = vsel %vm1238_vm0, %v1234_v27, 4286644096 }
  0xd8   : > { %v1092_v40 = vld [vmem:[%s2576_s23 + $0x118] sm:$0xf]  ;;  %2254 = vst [vmem:[%s2647_s28 + $0x48] sm:$0xff] %v2253_v30   ;;  %v1993_v42 = vmax.bf16 %v1991_v29, %v1989_v35  ;;  %v1999_v43 = vsel %vm1238_vm0, %v1187_v26, 4286644096 }
  0xd9   : > { %v1045_v44 = vld [vmem:[%s2576_s23 + $0x5c] sm:$0xf]  ;;  %v1966_v45 = vmax.bf16 %v1964_v33, %v1962_v37  ;;  %v1116_v47 = vld [vmem:[%s2576_s23 + $0x178] sm:$0xf]  ;;  %v2011_v48 = vsel %vm1238_vm0, %v1044_v36, 4286644096 }
  0xda   : > { %v1069_v46 = vld [vmem:[%s2576_s23 + $0xbc] sm:$0xf]  ;;  %v1997_v49 = vmax.bf16 %v1995_v38, %v1993_v42  ;;  %v1140_v50 = vld [vmem:[%s2576_s23 + $0x1d8] sm:$0xf]  ;;  %v2014_v51 = vsel %vm1238_vm0, %v1068_v39, 4286644096 }
  0xdb   : > { %v2018_v52 = vsel %vm1238_vm0, %v1092_v40, 4286644096  ;;  %v1970_v53 = vmax.bf16 %v1968_v34, %v1966_v45  ;;  %v2003_v54 = vsel %vm1238_vm0, %v1211_v31, 4286644096  ;;  %v2007_v55 = vsel %vm1238_vm0, %v1235_v32, 4286644096 }
  0xdc   : > { %v1093_v56 = vld [vmem:[%s2576_s23 + $0x11c] sm:$0xf]  ;;  %v2016_v57 = vmax.bf16 %v2014_v51, %v2011_v48  ;;  %v2001_v58 = vmax.bf16 %v1999_v43, %v1997_v49  ;;  %v1164_v60 = vld [vmem:[%s2576_s23 + $0x238] sm:$0xf]  ;;  %v2022_v61 = vsel %vm1238_vm0, %v1116_v47, 4286644096 }
  0xdd   : > { %v1117_v59 = vld [vmem:[%s2576_s23 + $0x17c] sm:$0xf]  ;;  %v2026_v63 = vsel %vm1238_vm0, %v1140_v50, 4286644096  ;;  %v2046_v0 = vsel %vm1238_vm0, %v1045_v44, 4286644096  ;;  %v1974_v2 = vmax.bf16 %v1972_v41, %v1970_v53 }
  0xde   : > { %v2020_v62 = vmax.bf16 %v2018_v52, %v2016_v57  ;;  %v2049_v1 = vsel %vm1238_vm0, %v1069_v46, 4286644096  ;;  %v2005_v3 = vmax.bf16 %v2003_v54, %v2001_v58  ;;  %v1141_v4 = vld [vmem:[%s2576_s23 + $0x1dc] sm:$0xf]  ;;  %v2053_v6 = vsel %vm1238_vm0, %v1093_v56, 4286644096 }
  0xdf   : > { %v2051_v5 = vmax.bf16 %v2049_v1, %v2046_v0  ;;  %v1188_v7 = vld [vmem:[%s2576_s23 + $0x298] sm:$0xf]  ;;  %v2057_v9 = vsel %vm1238_vm0, %v1117_v59, 4286644096  ;;  %v1165_v11 = vld [vmem:[%s2576_s23 + $0x23c] sm:$0xf] }
  0xe0   : > { %v2024_v8 = vmax.bf16 %v2022_v61, %v2020_v62  ;;  %v2009_v10 = vmax.bf16 %v2007_v55, %v2005_v3  ;;  %v2030_v12 = vsel %vm1238_vm0, %v1164_v60, 4286644096  ;;  %v1212_v14 = vld [vmem:[%s2576_s23 + $0x2f8] sm:$0xf]  ;;  %v2061_v16 = vsel %vm1238_vm0, %v1141_v4, 4286644096 }
  0xe1   : > { %v2055_v13 = vmax.bf16 %v2053_v6, %v2051_v5  ;;  %v1189_v18 = vld [vmem:[%s2576_s23 + $0x29c] sm:$0xf]  ;;  %v2034_v19 = vsel %vm1238_vm0, %v1188_v7, 4286644096  ;;  %v2065_v22 = vsel %vm1238_vm0, %v1165_v11, 4286644096 }
  0xe2   : > { %v2028_v15 = vmax.bf16 %v2026_v63, %v2024_v8  ;;  %v2255_v17 = vcombine.low %v1974_v2, %v2009_v10  ;;  %v1213_v23 = vld [vmem:[%s2576_s23 + $0x2fc] sm:$0xf]  ;;  %v1236_v24 = vld [vmem:[%s2576_s23 + $0x358] sm:$0xf]  ;;  %v2038_v25 = vsel %vm1238_vm0, %v1212_v14, 4286644096 }
  0xe3   : > { %v2059_v20 = vmax.bf16 %v2057_v9, %v2055_v13  ;;  %v2069_v28 = vsel %vm1238_vm0, %v1189_v18, 4286644096  ;;  %v1237_v29 = vld [vmem:[%s2576_s23 + $0x35c] sm:$0xf]  ;;  %v2042_v32 = vsel %vm1238_vm0, %v1236_v24, 4286644096 }
  0xe4   : > { %v2032_v21 = vmax.bf16 %v2030_v12, %v2028_v15  ;;  %2256 = vst [vmem:[%s2647_s28 + $0x50] sm:$0xff] %v2255_v17   ;;  %v2073_v33 = vsel %vm1238_vm0, %v1213_v23, 4286644096  ;;  %v2077_v35 = vsel %vm1238_vm0, %v1237_v29, 4286644096 }
  0xe5   : > { %v2063_v26 = vmax.bf16 %v2061_v16, %v2059_v20 }
  0xe6   : > { %v2036_v27 = vmax.bf16 %v2034_v19, %v2032_v21 }
  0xe7   : > { %v2067_v30 = vmax.bf16 %v2065_v22, %v2063_v26 }
  0xe8   : > { %v2040_v31 = vmax.bf16 %v2038_v25, %v2036_v27 }
  0xe9   : > { %v2071_v34 = vmax.bf16 %v2069_v28, %v2067_v30 }
  0xea   : > { %v2044_v36 = vmax.bf16 %v2042_v32, %v2040_v31 }
  0xeb   : > { %v2075_v37 = vmax.bf16 %v2073_v33, %v2071_v34 }
  0xed   : > { %v2079_v38 = vmax.bf16 %v2077_v35, %v2075_v37 }
  0xef   : > { %v2257_v39 = vcombine.low %v2044_v36, %v2079_v38 }
  0xf1   : > { %2258 = vst [vmem:[%s2647_s28 + $0x58] sm:$0xff] %v2257_v39  }
  0xf2 PF: > { %p8_p9 = scmp.ge.s32.totalorder %s2336_s10, 4   ;;  %s3045_s6 = smov %s2303_s7 }
  0xf3   : > { %s3046_s7 = smov %s2345_s13  ;;  %s3047_s8 = smov %s2336_s10 }
  0xf4   :  { %10 = sbr.rel (!%p8_p9) target bundleno = 2 (0x2), region = 100 }

// kernel: pcb_forward.24
= control target key start
LH: loop header
LB: loop body
LE: loop exit
PB: predicated region body
PF: predicated region fallthrough
CT: control target
= control target key end

     0   :  { %s928_s12 = smov 0   ;;  %s1033_s0 = inlined_call_operand.vmem [shape: bf16[384,128], index: 0, kind: input, shape index: {}]   ;;  %s1034_s1 = inlined_call_operand.vmem [shape: bf16[128,128], index: 1, kind: input, shape index: {}]   ;;  %s1035_s2 = inlined_call_operand.vmem [shape: f32[1,128], index: 2, kind: input, shape index: {}]   ;;  %s1036_s3 = inlined_call_operand.vmem [shape: bf16[384,128], index: 3, kind: output, shape index: {}]  }
   0x1 LB: > { %s647_s13 = sadd.s32 4294967295, %s906_s12   ;;  %p651_p0 = scmp.ge.s32.totalorder %s906_s12, 1  ;;  %s906_s12 = sphi %s928_s12, %s13_s12  }
   0x2   : > { %p138_p1 = scmp.lt.s32.totalorder %s906_s12, 3 }
   0x4   : > { %p139_p2 = pnand %p651_p0, %p138_p1 }
   0x5   : > { %v880_v0 = vld [vmem:[%s1034_s1] sm:$0xff] (!%p139_p2)   ;;  %s162_s16 = smul.u32 (!%p139_p2), 24, %s647_s13  ;;  %v881_v1 = vld [vmem:[%s1034_s1 + $0x8] sm:$0xff] (!%p139_p2)   ;;  %v882_v2 = vld [vmem:[%s1034_s1 + $0x10] sm:$0xff] (!%p139_p2)  }
   0x6   : > { %142 = sbr.rel (%p139_p2) target bundleno = 274 (0x112), region = 32  ;;  %816 = vmatprep.subr.bf16.mxu0 (!%p139_p2), %v880_v0  ;;  %856 = vmatprep.subr.bf16.mxu1 (!%p139_p2), %v880_v0  ;;  %v883_v3 = vld [vmem:[%s1034_s1 + $0x18] sm:$0xff] (!%p139_p2)   ;;  %v884_v6 = vld [vmem:[%s1034_s1 + $0x20] sm:$0xff] (!%p139_p2)   ;;  %v885_v7 = vld [vmem:[%s1034_s1 + $0x28] sm:$0xff] (!%p139_p2)  }
   0x7   : > { %p163_p3 = scmp.lt.s32.totalorder (!%p139_p2), %s162_s16, 47  ;;  %817 = vmatpush3.bf16.msra.mxu0 (!%p139_p2), %v880_v0  ;;  %864 = vmatpush3.bf16.msra.mxu1 (!%p139_p2), %v880_v0  ;;  %v886_v8 = vld [vmem:[%s1034_s1 + $0x30] sm:$0xff] (!%p139_p2)   ;;  %v887_v9 = vld [vmem:[%s1034_s1 + $0x38] sm:$0xff] (!%p139_p2)   ;;  %v985_v21 = vld [vmem:[%s1035_s2] ss:$0 sm:$0xff] (!%p139_p2) }
   0x8   : > { %818 = vmatprep.subr.bf16.mxu0 (!%p139_p2), %v881_v1  ;;  %857 = vmatprep.subr.bf16.mxu1 (!%p139_p2), %v881_v1 }
   0xb   : > { %819 = vmatpush3.bf16.msra.mxu0 (!%p139_p2), %v881_v1  ;;  %865 = vmatpush3.bf16.msra.mxu1 (!%p139_p2), %v881_v1 }
   0xc   : > { %820 = vmatprep.subr.bf16.mxu0 (!%p139_p2), %v882_v2  ;;  %858 = vmatprep.subr.bf16.mxu1 (!%p139_p2), %v882_v2 }
   0xd   : > { %s1038_s16 = smov (!%p163_p3, %s162_s16), 47 }
   0xe   : > { %s652_s21 = sshll.u32 %s1038_s16, 2 }
   0xf   : > { %s956_s26 = scalar_lea.vmem %s1033_s0, %s652_s21  ;;  %821 = vmatpush3.bf16.msra.mxu0 %v882_v2  ;;  %866 = vmatpush3.bf16.msra.mxu1 %v882_v2  ;;  %s998_s13 = scalar_lea.vmem %s1036_s3, %s652_s21 }
  0x10   : > { %v888_v4 = vld [vmem:[%s956_s26] sm:$0xff]   ;;  %v889_v5 = vld [vmem:[%s956_s26 + $0x30] sm:$0xff]   ;;  %822 = vmatprep.subr.bf16.mxu0 %v883_v3  ;;  %859 = vmatprep.subr.bf16.mxu1 %v883_v3  ;;  %v890_v10 = vld [vmem:[%s956_s26 + $0x8] sm:$0xff]  }
  0x11   : > { %832 = vmatprep.mubr.bf16.mxu0 %v888_v4  ;;  %844 = vmatprep.mubr.bf16.mxu1 %v889_v5  ;;  %v891_v11 = vld [vmem:[%s956_s26 + $0x38] sm:$0xff]   ;;  %v892_v12 = vld [vmem:[%s956_s26 + $0x10] sm:$0xff]   ;;  %v893_v13 = vld [vmem:[%s956_s26 + $0x40] sm:$0xff]  }
  0x12   : > { %v894_v14 = vld [vmem:[%s956_s26 + $0x18] sm:$0xff]   ;;  %v895_v15 = vld [vmem:[%s956_s26 + $0x48] sm:$0xff]   ;;  %v896_v16 = vld [vmem:[%s956_s26 + $0x20] sm:$0xff]  }
  0x13   : > { %823 = vmatpush3.bf16.msra.mxu0 %v883_v3  ;;  %867 = vmatpush3.bf16.msra.mxu1 %v883_v3  ;;  %v897_v17 = vld [vmem:[%s956_s26 + $0x50] sm:$0xff]   ;;  %v898_v18 = vld [vmem:[%s956_s26 + $0x28] sm:$0xff]   ;;  %v899_v19 = vld [vmem:[%s956_s26 + $0x58] sm:$0xff]  }
  0x14   : > { %824 = vmatprep.subr.bf16.mxu0 %v884_v6  ;;  %860 = vmatprep.subr.bf16.mxu1 %v884_v6 }
  0x17   : > { %825 = vmatpush3.bf16.msra.mxu0 %v884_v6  ;;  %868 = vmatpush3.bf16.msra.mxu1 %v884_v6 }
  0x18   : > { %826 = vmatprep.subr.bf16.mxu0 %v885_v7  ;;  %861 = vmatprep.subr.bf16.mxu1 %v885_v7 }
  0x1b   : > { %827 = vmatpush3.bf16.msra.mxu0 %v885_v7  ;;  %869 = vmatpush3.bf16.msra.mxu1 %v885_v7 }
  0x1c   : > { %828 = vmatprep.subr.bf16.mxu0 %v886_v8  ;;  %862 = vmatprep.subr.bf16.mxu1 %v886_v8 }
  0x1f   : > { %829 = vmatpush3.bf16.msra.mxu0 %v886_v8  ;;  %870 = vmatpush3.bf16.msra.mxu1 %v886_v8 }
  0x20   : > { %830 = vmatprep.subr.bf16.mxu0 %v887_v9  ;;  %863 = vmatprep.subr.bf16.mxu1 %v887_v9 }
  0x23   : > { %831 = vmatpush3.bf16.msra.mxu0 %v887_v9  ;;  %871 = vmatpush3.bf16.msra.mxu1 %v887_v9 }
  0x26   : > { %833 = vmatmul.mubr.bf16.vlgmr.msra.gmra.mrb[0].mxu0 %v890_v10  ;;  %845 = vmatmul.mubr.bf16.vlgmr.msra.gmra.mrb[0].mxu1 %v891_v11 }
  0x27   : > { %836 = vmatprep.mubr.bf16.mxu0 %v892_v12  ;;  %848 = vmatprep.mubr.bf16.mxu1 %v893_v13 }
  0x2e   : > { %837 = vmatmul.mubr.bf16.gmra.mrb[4].mxu0 %v894_v14  ;;  %849 = vmatmul.mubr.bf16.gmra.mrb[4].mxu1 %v895_v15 }
  0x2f   : > { %840 = vmatprep.mubr.bf16.mxu0 %v896_v16  ;;  %852 = vmatprep.mubr.bf16.mxu1 %v897_v17 }
  0x36   : > { %841 = vmatmul.mubr.bf16.gmra.mrb[8].mxu0 %v898_v18  ;;  %853 = vmatmul.mubr.bf16.gmra.mrb[8].mxu1 %v899_v19 }
  0xf9   : > { %v834_v20 = vpop.f32.mrb[0].mxu0  ;;  %v846_v22 = vpop.f32.mrb[0].mxu1 }
  0xfa   : > { %v376_v23 = vpop.f32.mrb[1].mxu0  ;;  %v424_v24 = vpop.f32.mrb[1].mxu1  ;;  %v385_v27 = vadd.f32 %v834_v20, %v985_v21  ;;  %v433_v28 = vadd.f32 %v846_v22, %v985_v21 }
  0xfb   : > { %v835_v25 = vpop.f32.mrb[2].mxu0  ;;  %v847_v26 = vpop.f32.mrb[2].mxu1  ;;  %v377_v33 = vadd.f32 %v985_v21, %v376_v23  ;;  %v425_v34 = vadd.f32 %v985_v21, %v424_v24 }
  0xfc   : > { %v388_v29 = vadd.f32 %v835_v25, %v985_v21  ;;  %v436_v30 = vadd.f32 %v847_v26, %v985_v21  ;;  %v379_v31 = vpop.f32.mrb[3].mxu0  ;;  %v427_v32 = vpop.f32.mrb[3].mxu1 }
  0xfd   : > { %v380_v35 = vadd.f32 %v985_v21, %v379_v31  ;;  %v428_v36 = vadd.f32 %v985_v21, %v427_v32 }
  0xfe   : > { %v733_v37 = vpack.c.bf16 %v388_v29, %v385_v27  ;;  %v763_v38 = vpack.c.bf16 %v436_v30, %v433_v28 }
  0xff   : > { %v728_v39 = vpack.c.bf16 %v380_v35, %v377_v33  ;;  %v758_v40 = vpack.c.bf16 %v428_v36, %v425_v34 }
 0x100   : > { %785 = vst [vmem:[%s998_s13 + $0x8] sm:$0xff] %v733_v37   ;;  %791 = vst [vmem:[%s998_s13 + $0x38] sm:$0xff] %v763_v38  }
 0x101   : > { %729 = vst [vmem:[%s998_s13] sm:$0xff] %v728_v39   ;;  %790 = vst [vmem:[%s998_s13 + $0x30] sm:$0xff] %v758_v40   ;;  %v838_v41 = vpop.f32.mrb[4].mxu0  ;;  %v850_v42 = vpop.f32.mrb[4].mxu1 }
 0x102   : > { %v392_v43 = vpop.f32.mrb[5].mxu0  ;;  %v440_v44 = vpop.f32.mrb[5].mxu1  ;;  %v401_v47 = vadd.f32 %v838_v41, %v985_v21  ;;  %v449_v48 = vadd.f32 %v850_v42, %v985_v21 }
 0x103   : > { %v839_v45 = vpop.f32.mrb[6].mxu0  ;;  %v851_v46 = vpop.f32.mrb[6].mxu1  ;;  %v393_v53 = vadd.f32 %v985_v21, %v392_v43  ;;  %v441_v54 = vadd.f32 %v985_v21, %v440_v44 }
 0x104   : > { %v404_v49 = vadd.f32 %v839_v45, %v985_v21  ;;  %v452_v50 = vadd.f32 %v851_v46, %v985_v21  ;;  %v395_v51 = vpop.f32.mrb[7].mxu0  ;;  %v443_v52 = vpop.f32.mrb[7].mxu1 }
 0x105   : > { %v396_v55 = vadd.f32 %v985_v21, %v395_v51  ;;  %v444_v56 = vadd.f32 %v985_v21, %v443_v52 }
 0x106   : > { %v743_v57 = vpack.c.bf16 %v404_v49, %v401_v47  ;;  %v773_v58 = vpack.c.bf16 %v452_v50, %v449_v48 }
 0x107   : > { %v738_v59 = vpack.c.bf16 %v396_v55, %v393_v53  ;;  %v768_v60 = vpack.c.bf16 %v444_v56, %v441_v54 }
 0x108   : > { %787 = vst [vmem:[%s998_s13 + $0x18] sm:$0xff] %v743_v57   ;;  %793 = vst [vmem:[%s998_s13 + $0x48] sm:$0xff] %v773_v58  }
 0x109   : > { %786 = vst [vmem:[%s998_s13 + $0x10] sm:$0xff] %v738_v59   ;;  %792 = vst [vmem:[%s998_s13 + $0x40] sm:$0xff] %v768_v60   ;;  %v842_v61 = vpop.f32.mrb[8].mxu0  ;;  %v854_v62 = vpop.f32.mrb[8].mxu1 }
 0x10a   : > { %v408_v63 = vpop.f32.mrb[9].mxu0  ;;  %v456_v0 = vpop.f32.mrb[9].mxu1  ;;  %v417_v3 = vadd.f32 %v842_v61, %v985_v21  ;;  %v465_v4 = vadd.f32 %v854_v62, %v985_v21 }
 0x10b   : > { %v843_v1 = vpop.f32.mrb[10].mxu0  ;;  %v855_v2 = vpop.f32.mrb[10].mxu1  ;;  %v409_v9 = vadd.f32 %v985_v21, %v408_v63  ;;  %v457_v10 = vadd.f32 %v985_v21, %v456_v0 }
 0x10c   : > { %v420_v5 = vadd.f32 %v843_v1, %v985_v21  ;;  %v468_v6 = vadd.f32 %v855_v2, %v985_v21  ;;  %v411_v7 = vpop.f32.mrb[11].mxu0  ;;  %v459_v8 = vpop.f32.mrb[11].mxu1 }
 0x10d   : > { %v412_v11 = vadd.f32 %v985_v21, %v411_v7  ;;  %v460_v12 = vadd.f32 %v985_v21, %v459_v8 }
 0x10e   : > { %v753_v13 = vpack.c.bf16 %v420_v5, %v417_v3  ;;  %v783_v14 = vpack.c.bf16 %v468_v6, %v465_v4 }
 0x10f   : > { %v748_v15 = vpack.c.bf16 %v412_v11, %v409_v9  ;;  %v778_v16 = vpack.c.bf16 %v460_v12, %v457_v10 }
 0x110   : > { %789 = vst [vmem:[%s998_s13 + $0x28] sm:$0xff] %v753_v13   ;;  %795 = vst [vmem:[%s998_s13 + $0x58] sm:$0xff] %v783_v14  }
 0x111   : > { %788 = vst [vmem:[%s998_s13 + $0x20] sm:$0xff] %v748_v15   ;;  %794 = vst [vmem:[%s998_s13 + $0x50] sm:$0xff] %v778_v16  }
 0x112 PF: > { %s13_s12 = sadd.s32 1, %s906_s12  }
 0x113   : > { %p10_p4 = scmp.ge.s32.totalorder %s13_s12, 4  }
 0x115   :  { %12 = sbr.rel (!%p10_p4) target bundleno = 1 (0x1), region = 62 }

// kernel: pcb_forward.25
= control target key start
LH: loop header
LB: loop body
LE: loop exit
PB: predicated region body
PF: predicated region fallthrough
CT: control target
= control target key end

     0   :  { %s1150_s15 = smov 0   ;;  %s1326_s0 = inlined_call_operand.vmem [shape: bf16[384,128], index: 0, kind: input, shape index: {}]   ;;  %s1327_s1 = inlined_call_operand.vmem [shape: bf16[128,128], index: 1, kind: input, shape index: {}]   ;;  %s1328_s2 = inlined_call_operand.vmem [shape: f32[1,128], index: 2, kind: input, shape index: {}]   ;;  %s1329_s3 = inlined_call_operand.vmem [shape: bf16[384,128], index: 3, kind: input, shape index: {}]   ;;  %s1330_s4 = inlined_call_operand.vmem [shape: bf16[384,128], index: 4, kind: output, shape index: {}]  }
   0x1 LB: > { %s804_s16 = sadd.s32 4294967295, %s1123_s15   ;;  %p808_p0 = scmp.ge.s32.totalorder %s1123_s15, 1  ;;  %s1123_s15 = sphi %s1150_s15, %s14_s15  }
   0x2   : > { %p174_p1 = scmp.lt.s32.totalorder %s1123_s15, 3 }
   0x4   : > { %p175_p2 = pnand %p808_p0, %p174_p1 }
   0x5   : > { %v1097_v0 = vld [vmem:[%s1327_s1] sm:$0xff] (!%p175_p2)   ;;  %s205_s19 = smul.u32 (!%p175_p2), 24, %s804_s16  ;;  %v1098_v1 = vld [vmem:[%s1327_s1 + $0x8] sm:$0xff] (!%p175_p2)   ;;  %v1099_v2 = vld [vmem:[%s1327_s1 + $0x10] sm:$0xff] (!%p175_p2)  }
   0x6   : > { %178 = sbr.rel (%p175_p2) target bundleno = 279 (0x117), region = 36  ;;  %1033 = vmatprep.subr.bf16.mxu0 (!%p175_p2), %v1097_v0  ;;  %1073 = vmatprep.subr.bf16.mxu1 (!%p175_p2), %v1097_v0  ;;  %v1100_v3 = vld [vmem:[%s1327_s1 + $0x18] sm:$0xff] (!%p175_p2)   ;;  %v1101_v6 = vld [vmem:[%s1327_s1 + $0x20] sm:$0xff] (!%p175_p2)   ;;  %v1102_v7 = vld [vmem:[%s1327_s1 + $0x28] sm:$0xff] (!%p175_p2)  }
   0x7   : > { %p206_p3 = scmp.lt.s32.totalorder (!%p175_p2), %s205_s19, 47  ;;  %1034 = vmatpush3.bf16.msra.mxu0 (!%p175_p2), %v1097_v0  ;;  %1081 = vmatpush3.bf16.msra.mxu1 (!%p175_p2), %v1097_v0  ;;  %v1103_v8 = vld [vmem:[%s1327_s1 + $0x30] sm:$0xff] (!%p175_p2)   ;;  %v1104_v9 = vld [vmem:[%s1327_s1 + $0x38] sm:$0xff] (!%p175_p2)   ;;  %v1227_v28 = vld [vmem:[%s1328_s2] ss:$0 sm:$0xff] (!%p175_p2) }
   0x8   : > { %1035 = vmatprep.subr.bf16.mxu0 (!%p175_p2), %v1098_v1  ;;  %1074 = vmatprep.subr.bf16.mxu1 (!%p175_p2), %v1098_v1 }
   0xb   : > { %1036 = vmatpush3.bf16.msra.mxu0 (!%p175_p2), %v1098_v1  ;;  %1082 = vmatpush3.bf16.msra.mxu1 (!%p175_p2), %v1098_v1 }
   0xc   : > { %1037 = vmatprep.subr.bf16.mxu0 (!%p175_p2), %v1099_v2  ;;  %1075 = vmatprep.subr.bf16.mxu1 (!%p175_p2), %v1099_v2 }
   0xd   : > { %s1332_s19 = smov (!%p206_p3, %s205_s19), 47 }
   0xe   : > { %s1167_s24 = sshll.u32 %s1332_s19, 2 }
   0xf   : > { %s1176_s29 = scalar_lea.vmem %s1326_s0, %s1167_s24  ;;  %1038 = vmatpush3.bf16.msra.mxu0 %v1099_v2  ;;  %1083 = vmatpush3.bf16.msra.mxu1 %v1099_v2  ;;  %s1206_s14 = scalar_lea.vmem %s1329_s3, %s1167_s24 }
  0x10   : > { %v1105_v4 = vld [vmem:[%s1176_s29] sm:$0xff]   ;;  %v1106_v5 = vld [vmem:[%s1176_s29 + $0x30] sm:$0xff]   ;;  %1039 = vmatprep.subr.bf16.mxu0 %v1100_v3  ;;  %1076 = vmatprep.subr.bf16.mxu1 %v1100_v3  ;;  %v1107_v10 = vld [vmem:[%s1176_s29 + $0x8] sm:$0xff]   ;;  %s1265_s20 = scalar_lea.vmem %s1330_s4, %s1167_s24 }
  0x11   : > { %1049 = vmatprep.mubr.bf16.mxu0 %v1105_v4  ;;  %1061 = vmatprep.mubr.bf16.mxu1 %v1106_v5  ;;  %v1108_v11 = vld [vmem:[%s1176_s29 + $0x38] sm:$0xff]   ;;  %v1109_v12 = vld [vmem:[%s1176_s29 + $0x10] sm:$0xff]   ;;  %v1110_v13 = vld [vmem:[%s1176_s29 + $0x40] sm:$0xff]  }
  0x12   : > { %v1111_v14 = vld [vmem:[%s1176_s29 + $0x18] sm:$0xff]   ;;  %v1112_v15 = vld [vmem:[%s1176_s29 + $0x48] sm:$0xff]   ;;  %v1113_v16 = vld [vmem:[%s1176_s29 + $0x20] sm:$0xff]  }
  0x13   : > { %1040 = vmatpush3.bf16.msra.mxu0 %v1100_v3  ;;  %1084 = vmatpush3.bf16.msra.mxu1 %v1100_v3  ;;  %v1114_v17 = vld [vmem:[%s1176_s29 + $0x50] sm:$0xff]   ;;  %v1115_v18 = vld [vmem:[%s1176_s29 + $0x28] sm:$0xff]   ;;  %v1116_v19 = vld [vmem:[%s1176_s29 + $0x58] sm:$0xff]  }
  0x14   : > { %1041 = vmatprep.subr.bf16.mxu0 %v1101_v6  ;;  %1077 = vmatprep.subr.bf16.mxu1 %v1101_v6  ;;  %v991_v20 = vld [vmem:[%s1206_s14 + $0x8] sm:$0xff]   ;;  %v997_v21 = vld [vmem:[%s1206_s14 + $0x38] sm:$0xff]   ;;  %v884_v22 = vld [vmem:[%s1206_s14] sm:$0xff]  }
  0x15   : > { %v996_v23 = vld [vmem:[%s1206_s14 + $0x30] sm:$0xff]   ;;  %v1213_v24 = vld [vmem:[%s1206_s14 + $0x18] sm:$0xff]   ;;  %v1216_v25 = vld [vmem:[%s1206_s14 + $0x48] sm:$0xff]   ;;  %v889_v29 = vunpack.c.l.bf16 %v991_v20  ;;  %v913_v30 = vunpack.c.l.bf16 %v997_v21  ;;  %v885_v31 = vunpack.c.l.bf16 %v884_v22  ;;  %v890_v33 = vunpack.c.h.bf16 %v991_v20 }
  0x16   : > { %v1219_v26 = vld [vmem:[%s1206_s14 + $0x10] sm:$0xff]   ;;  %v1222_v27 = vld [vmem:[%s1206_s14 + $0x40] sm:$0xff]   ;;  %v909_v32 = vunpack.c.l.bf16 %v996_v23  ;;  %v914_v34 = vunpack.c.h.bf16 %v997_v21  ;;  %v886_v35 = vunpack.c.h.bf16 %v884_v22  ;;  %v910_v36 = vunpack.c.h.bf16 %v996_v23  ;;  %v1242_v55 = vld [vmem:[%s1206_s14 + $0x28] sm:$0xff]  }
  0x17   : > { %1042 = vmatpush3.bf16.msra.mxu0 %v1101_v6  ;;  %1085 = vmatpush3.bf16.msra.mxu1 %v1101_v6  ;;  %v897_v39 = vunpack.c.l.bf16 %v1213_v24  ;;  %v921_v40 = vunpack.c.l.bf16 %v1216_v25  ;;  %v893_v41 = vunpack.c.l.bf16 %v1219_v26  ;;  %v917_v42 = vunpack.c.l.bf16 %v1222_v27  ;;  %v1245_v56 = vld [vmem:[%s1206_s14 + $0x58] sm:$0xff]   ;;  %v1250_v63 = vld [vmem:[%s1206_s14 + $0x20] sm:$0xff]   ;;  %v1253_v0 = vld [vmem:[%s1206_s14 + $0x50] sm:$0xff]  }
  0x18   : > { %1043 = vmatprep.subr.bf16.mxu0 %v1102_v7  ;;  %1078 = vmatprep.subr.bf16.mxu1 %v1102_v7  ;;  %v898_v47 = vunpack.c.h.bf16 %v1213_v24  ;;  %v922_v48 = vunpack.c.h.bf16 %v1216_v25  ;;  %v894_v53 = vunpack.c.h.bf16 %v1219_v26  ;;  %v918_v54 = vunpack.c.h.bf16 %v1222_v27 }
  0x1b   : > { %1044 = vmatpush3.bf16.msra.mxu0 %v1102_v7  ;;  %1086 = vmatpush3.bf16.msra.mxu1 %v1102_v7  ;;  %v905_v7 = vunpack.c.l.bf16 %v1242_v55 }
  0x1c   : > { %1045 = vmatprep.subr.bf16.mxu0 %v1103_v8  ;;  %1079 = vmatprep.subr.bf16.mxu1 %v1103_v8 }
  0x1f   : > { %1046 = vmatpush3.bf16.msra.mxu0 %v1103_v8  ;;  %1087 = vmatpush3.bf16.msra.mxu1 %v1103_v8  ;;  %v929_v8 = vunpack.c.l.bf16 %v1245_v56 }
  0x20   : > { %1047 = vmatprep.subr.bf16.mxu0 %v1104_v9  ;;  %1080 = vmatprep.subr.bf16.mxu1 %v1104_v9 }
  0x23   : > { %1048 = vmatpush3.bf16.msra.mxu0 %v1104_v9  ;;  %1088 = vmatpush3.bf16.msra.mxu1 %v1104_v9 }
  0x26   : > { %1050 = vmatmul.mubr.bf16.vlgmr.msra.gmra.mrb[0].mxu0 %v1107_v10  ;;  %1062 = vmatmul.mubr.bf16.vlgmr.msra.gmra.mrb[0].mxu1 %v1108_v11  ;;  %v901_v11 = vunpack.c.l.bf16 %v1250_v63 }
  0x27   : > { %1053 = vmatprep.mubr.bf16.mxu0 %v1109_v12  ;;  %1065 = vmatprep.mubr.bf16.mxu1 %v1110_v13  ;;  %v925_v12 = vunpack.c.l.bf16 %v1253_v0 }
  0x2e   : > { %1054 = vmatmul.mubr.bf16.gmra.mrb[4].mxu0 %v1111_v14  ;;  %1066 = vmatmul.mubr.bf16.gmra.mrb[4].mxu1 %v1112_v15 }
  0x2f   : > { %1057 = vmatprep.mubr.bf16.mxu0 %v1113_v16  ;;  %1069 = vmatprep.mubr.bf16.mxu1 %v1114_v17 }
  0x36   : > { %1058 = vmatmul.mubr.bf16.gmra.mrb[8].mxu0 %v1115_v18  ;;  %1070 = vmatmul.mubr.bf16.gmra.mrb[8].mxu1 %v1116_v19 }
  0xf9   : > { %v1051_v37 = vpop.f32.mrb[0].mxu0  ;;  %v1063_v38 = vpop.f32.mrb[0].mxu1 }
  0xfa   : > { %v434_v43 = vadd.f32 %v1051_v37, %v1227_v28  ;;  %v482_v44 = vadd.f32 %v1063_v38, %v1227_v28  ;;  %v425_v45 = vpop.f32.mrb[1].mxu0  ;;  %v473_v46 = vpop.f32.mrb[1].mxu1 }
  0xfb   : > { %v426_v49 = vadd.f32 %v1227_v28, %v425_v45  ;;  %v474_v50 = vadd.f32 %v1227_v28, %v473_v46  ;;  %v1052_v51 = vpop.f32.mrb[2].mxu0  ;;  %v1064_v52 = vpop.f32.mrb[2].mxu1 }
  0xfc   : > { %v570_v57 = vadd.f32 %v889_v29, %v434_v43  ;;  %v582_v58 = vadd.f32 %v913_v30, %v482_v44  ;;  %v437_v59 = vadd.f32 %v1052_v51, %v1227_v28  ;;  %v485_v60 = vadd.f32 %v1064_v52, %v1227_v28  ;;  %v428_v61 = vpop.f32.mrb[3].mxu0  ;;  %v476_v62 = vpop.f32.mrb[3].mxu1 }
  0xfd   : > { %v568_v1 = vadd.f32 %v885_v31, %v426_v49  ;;  %v580_v2 = vadd.f32 %v909_v32, %v474_v50  ;;  %v429_v3 = vadd.f32 %v1227_v28, %v428_v61  ;;  %v477_v4 = vadd.f32 %v1227_v28, %v476_v62 }
  0xfe   : > { %v571_v5 = vadd.f32 %v890_v33, %v437_v59  ;;  %v583_v6 = vadd.f32 %v914_v34, %v485_v60  ;;  %v594_v13 = vmax.f32 %v570_v57, 0.0  ;;  %v606_v14 = vmax.f32 %v582_v58, 0.0 }
  0xff   : > { %v569_v9 = vadd.f32 %v886_v35, %v429_v3  ;;  %v581_v10 = vadd.f32 %v910_v36, %v477_v4  ;;  %v592_v17 = vmax.f32 %v568_v1, 0.0  ;;  %v604_v18 = vmax.f32 %v580_v2, 0.0 }
 0x100   : > { %v595_v15 = vmax.f32 %v571_v5, 0.0  ;;  %v607_v16 = vmax.f32 %v583_v6, 0.0  ;;  %v906_v60 = vunpack.c.h.bf16 %v1242_v55  ;;  %v930_v61 = vunpack.c.h.bf16 %v1245_v56 }
 0x101   : > { %v593_v19 = vmax.f32 %v569_v9, 0.0  ;;  %v605_v20 = vmax.f32 %v581_v10, 0.0  ;;  %v1055_v21 = vpop.f32.mrb[4].mxu0  ;;  %v1067_v22 = vpop.f32.mrb[4].mxu1  ;;  %v902_v62 = vunpack.c.h.bf16 %v1250_v63  ;;  %v926_v1 = vunpack.c.h.bf16 %v1253_v0 }
 0x102   : > { %v939_v23 = vpack.c.bf16 %v595_v15, %v594_v13  ;;  %v969_v29 = vpack.c.bf16 %v607_v16, %v606_v14  ;;  %v450_v30 = vadd.f32 %v1055_v21, %v1227_v28  ;;  %v498_v31 = vadd.f32 %v1067_v22, %v1227_v28  ;;  %v441_v32 = vpop.f32.mrb[5].mxu0  ;;  %v489_v33 = vpop.f32.mrb[5].mxu1 }
 0x103   : > { %v934_v34 = vpack.c.bf16 %v593_v19, %v592_v17  ;;  %v964_v35 = vpack.c.bf16 %v605_v20, %v604_v18  ;;  %v442_v36 = vadd.f32 %v1227_v28, %v441_v32  ;;  %v490_v37 = vadd.f32 %v1227_v28, %v489_v33  ;;  %v1056_v38 = vpop.f32.mrb[6].mxu0  ;;  %v1068_v43 = vpop.f32.mrb[6].mxu1 }
 0x104   : > { %1002 = vst [vmem:[%s1265_s20 + $0x8] sm:$0xff] %v939_v23   ;;  %1008 = vst [vmem:[%s1265_s20 + $0x38] sm:$0xff] %v969_v29   ;;  %v574_v44 = vadd.f32 %v897_v39, %v450_v30  ;;  %v586_v45 = vadd.f32 %v921_v40, %v498_v31  ;;  %v453_v46 = vadd.f32 %v1056_v38, %v1227_v28  ;;  %v444_v50 = vpop.f32.mrb[7].mxu0  ;;  %v492_v51 = vpop.f32.mrb[7].mxu1 }
 0x105   : > { %v501_v49 = vadd.f32 %v1068_v43, %v1227_v28  ;;  %935 = vst [vmem:[%s1265_s20] sm:$0xff] %v934_v34   ;;  %1007 = vst [vmem:[%s1265_s20 + $0x30] sm:$0xff] %v964_v35   ;;  %v572_v52 = vadd.f32 %v893_v41, %v442_v36  ;;  %v584_v57 = vadd.f32 %v917_v42, %v490_v37 }
 0x106   : > { %v445_v58 = vadd.f32 %v1227_v28, %v444_v50  ;;  %v493_v39 = vadd.f32 %v1227_v28, %v492_v51  ;;  %v575_v40 = vadd.f32 %v898_v47, %v453_v46  ;;  %v598_v2 = vmax.f32 %v574_v44, 0.0 }
 0x107   : > { %v587_v59 = vadd.f32 %v922_v48, %v501_v49  ;;  %v610_v24 = vmax.f32 %v586_v45, 0.0  ;;  %v596_v25 = vmax.f32 %v572_v52, 0.0  ;;  %v608_v48 = vmax.f32 %v584_v57, 0.0 }
 0x108   : > { %v573_v41 = vadd.f32 %v894_v53, %v445_v58  ;;  %v585_v42 = vadd.f32 %v918_v54, %v493_v39  ;;  %v599_v47 = vmax.f32 %v575_v40, 0.0 }
 0x109   : > { %v611_v3 = vmax.f32 %v587_v59, 0.0  ;;  %v1059_v6 = vpop.f32.mrb[8].mxu0  ;;  %v1071_v26 = vpop.f32.mrb[8].mxu1 }
 0x10a   : > { %v597_v4 = vmax.f32 %v573_v41, 0.0  ;;  %v609_v5 = vmax.f32 %v585_v42, 0.0  ;;  %v949_v53 = vpack.c.bf16 %v599_v47, %v598_v2  ;;  %v466_v27 = vadd.f32 %v1059_v6, %v1227_v28  ;;  %v457_v10 = vpop.f32.mrb[9].mxu0  ;;  %v505_v13 = vpop.f32.mrb[9].mxu1 }
 0x10b   : > { %v979_v9 = vpack.c.bf16 %v611_v3, %v610_v24  ;;  %v514_v54 = vadd.f32 %v1071_v26, %v1227_v28  ;;  %v458_v16 = vadd.f32 %v1227_v28, %v457_v10  ;;  %v506_v17 = vadd.f32 %v1227_v28, %v505_v13  ;;  %v1060_v18 = vpop.f32.mrb[10].mxu0  ;;  %v1072_v19 = vpop.f32.mrb[10].mxu1 }
 0x10c   : > { %v944_v14 = vpack.c.bf16 %v597_v4, %v596_v25  ;;  %v974_v15 = vpack.c.bf16 %v609_v5, %v608_v48  ;;  %1004 = vst [vmem:[%s1265_s20 + $0x18] sm:$0xff] %v949_v53   ;;  %v578_v20 = vadd.f32 %v905_v7, %v466_v27  ;;  %v469_v22 = vadd.f32 %v1060_v18, %v1227_v28  ;;  %v460_v29 = vpop.f32.mrb[11].mxu0  ;;  %v508_v30 = vpop.f32.mrb[11].mxu1 }
 0x10d   : > { %1010 = vst [vmem:[%s1265_s20 + $0x48] sm:$0xff] %v979_v9   ;;  %v590_v21 = vadd.f32 %v929_v8, %v514_v54  ;;  %v517_v23 = vadd.f32 %v1072_v19, %v1227_v28  ;;  %v576_v31 = vadd.f32 %v901_v11, %v458_v16  ;;  %v588_v32 = vadd.f32 %v925_v12, %v506_v17 }
 0x10e   : > { %1003 = vst [vmem:[%s1265_s20 + $0x10] sm:$0xff] %v944_v14   ;;  %1009 = vst [vmem:[%s1265_s20 + $0x40] sm:$0xff] %v974_v15   ;;  %v461_v55 = vadd.f32 %v1227_v28, %v460_v29  ;;  %v509_v7 = vadd.f32 %v1227_v28, %v508_v30  ;;  %v579_v56 = vadd.f32 %v906_v60, %v469_v22  ;;  %v602_v35 = vmax.f32 %v578_v20, 0.0 }
 0x10f   : > { %v591_v8 = vadd.f32 %v930_v61, %v517_v23  ;;  %v614_v36 = vmax.f32 %v590_v21, 0.0  ;;  %v600_v11 = vmax.f32 %v576_v31, 0.0  ;;  %v612_v38 = vmax.f32 %v588_v32, 0.0 }
 0x110   : > { %v577_v33 = vadd.f32 %v902_v62, %v461_v55  ;;  %v589_v34 = vadd.f32 %v926_v1, %v509_v7  ;;  %v603_v37 = vmax.f32 %v579_v56, 0.0 }
 0x111   : > { %v615_v63 = vmax.f32 %v591_v8, 0.0 }
 0x112   : > { %v601_v0 = vmax.f32 %v577_v33, 0.0  ;;  %v613_v12 = vmax.f32 %v589_v34, 0.0  ;;  %v959_v43 = vpack.c.bf16 %v603_v37, %v602_v35 }
 0x113   : > { %v989_v44 = vpack.c.bf16 %v615_v63, %v614_v36 }
 0x114   : > { %v954_v45 = vpack.c.bf16 %v601_v0, %v600_v11  ;;  %v984_v28 = vpack.c.bf16 %v613_v12, %v612_v38  ;;  %1006 = vst [vmem:[%s1265_s20 + $0x28] sm:$0xff] %v959_v43  }
 0x115   : > { %1012 = vst [vmem:[%s1265_s20 + $0x58] sm:$0xff] %v989_v44  }
 0x116   : > { %1005 = vst [vmem:[%s1265_s20 + $0x20] sm:$0xff] %v954_v45   ;;  %1011 = vst [vmem:[%s1265_s20 + $0x50] sm:$0xff] %v984_v28  }
 0x117 PF: > { %s14_s15 = sadd.s32 1, %s1123_s15  }
 0x118   : > { %p11_p4 = scmp.ge.s32.totalorder %s14_s15, 4  }
 0x11a   :  { %13 = sbr.rel (!%p11_p4) target bundleno = 1 (0x1), region = 69 }

// kernel: pcb_forward.23
= control target key start
LH: loop header
LB: loop body
LE: loop exit
PB: predicated region body
PF: predicated region fallthrough
CT: control target
= control target key end

     0   :  { %s3280_s12 = smov 0   ;;  %s3816_s0 = inlined_call_operand.vmem [shape: bf16[384,1152], index: 0, kind: input, shape index: {}]   ;;  %s3817_s1 = inlined_call_operand.vmem [shape: bf16[1152,128], index: 1, kind: input, shape index: {}]   ;;  %s3818_s2 = inlined_call_operand.vmem [shape: f32[1,128], index: 2, kind: input, shape index: {}]   ;;  %s3819_s3 = inlined_call_operand.vmem [shape: bf16[384,128], index: 3, kind: output, shape index: {}]  }
   0x1 LB: > { %s2278_s13 = sadd.s32 4294967295, %s3258_s12   ;;  %p2282_p0 = scmp.ge.s32.totalorder %s3258_s12, 1  ;;  %s3258_s12 = sphi %s3280_s12, %s13_s12  }
   0x2   : > { %p139_p1 = scmp.lt.s32.totalorder %s3258_s12, 3 }
   0x4   : > { %p140_p2 = pnand %p2282_p0, %p139_p1 }
   0x5   : > { %v3024_v0 = vld [vmem:[%s3817_s1 + $0x40] sm:$0xff] (!%p140_p2)   ;;  %v3028_v4 = vld [vmem:[%s3817_s1 + $0x48] sm:$0xff] (!%p140_p2)   ;;  %v3032_v8 = vld [vmem:[%s3817_s1 + $0x50] sm:$0xff] (!%p140_p2)   ;;  %s164_s17 = smul.u32 (!%p140_p2), 24, %s2278_s13 }
   0x6   : > { %143 = sbr.rel (%p140_p2) target bundleno = 470 (0x1d6), region = 32  ;;  %v3025_v1 = vld [vmem:[%s3817_s1 + $0xc0] sm:$0xff] (!%p140_p2)   ;;  %2587 = vmatprep.subr.bf16.mxu0 (!%p140_p2), %v3024_v0  ;;  %v3029_v5 = vld [vmem:[%s3817_s1 + $0xc8] sm:$0xff] (!%p140_p2)   ;;  %v3033_v9 = vld [vmem:[%s3817_s1 + $0xd0] sm:$0xff] (!%p140_p2)  }
   0x7   : > { %v3026_v2 = vld [vmem:[%s3817_s1] sm:$0xff] (!%p140_p2)   ;;  %2675 = vmatprep.subr.bf16.mxu1 (!%p140_p2), %v3025_v1  ;;  %v3030_v6 = vld [vmem:[%s3817_s1 + $0x8] sm:$0xff] (!%p140_p2)   ;;  %v3034_v10 = vld [vmem:[%s3817_s1 + $0x10] sm:$0xff] (!%p140_p2)   ;;  %p165_p3 = scmp.lt.s32.totalorder (!%p140_p2), %s164_s17, 47 }
   0x8   : > { %v3027_v3 = vld [vmem:[%s3817_s1 + $0x80] sm:$0xff] (!%p140_p2)   ;;  %2588 = vmatpush3.bf16.msra.mxu0 (!%p140_p2), %v3026_v2  ;;  %v3031_v7 = vld [vmem:[%s3817_s1 + $0x88] sm:$0xff] (!%p140_p2)   ;;  %v3035_v11 = vld [vmem:[%s3817_s1 + $0x90] sm:$0xff] (!%p140_p2)  }
   0x9   : > { %2676 = vmatpush3.bf16.msra.mxu1 (!%p140_p2), %v3027_v3  ;;  %2589 = vmatprep.subr.bf16.mxu0 (!%p140_p2), %v3028_v4  ;;  %v3036_v12 = vld [vmem:[%s3817_s1 + $0x58] sm:$0xff] (!%p140_p2)   ;;  %v3040_v16 = vld [vmem:[%s3817_s1 + $0x60] sm:$0xff] (!%p140_p2)   ;;  %v3044_v20 = vld [vmem:[%s3817_s1 + $0x68] sm:$0xff] (!%p140_p2)  }
   0xa   : > { %2677 = vmatprep.subr.bf16.mxu1 (!%p140_p2), %v3029_v5  ;;  %v3037_v13 = vld [vmem:[%s3817_s1 + $0xd8] sm:$0xff] (!%p140_p2)   ;;  %v3041_v17 = vld [vmem:[%s3817_s1 + $0xe0] sm:$0xff] (!%p140_p2)   ;;  %v3045_v21 = vld [vmem:[%s3817_s1 + $0xe8] sm:$0xff] (!%p140_p2)  }
   0xb   : > { %v3038_v14 = vld [vmem:[%s3817_s1 + $0x18] sm:$0xff] (!%p140_p2)   ;;  %v3042_v18 = vld [vmem:[%s3817_s1 + $0x20] sm:$0xff] (!%p140_p2)   ;;  %v3046_v22 = vld [vmem:[%s3817_s1 + $0x28] sm:$0xff] (!%p140_p2)  }
   0xc   : > { %2590 = vmatpush3.bf16.msra.mxu0 (!%p140_p2), %v3030_v6  ;;  %v3039_v15 = vld [vmem:[%s3817_s1 + $0x98] sm:$0xff] (!%p140_p2)   ;;  %v3043_v19 = vld [vmem:[%s3817_s1 + $0xa0] sm:$0xff] (!%p140_p2)   ;;  %v3047_v23 = vld [vmem:[%s3817_s1 + $0xa8] sm:$0xff] (!%p140_p2)  }
   0xd   : > { %2678 = vmatpush3.bf16.msra.mxu1 %v3031_v7  ;;  %2591 = vmatprep.subr.bf16.mxu0 %v3032_v8  ;;  %s3821_s17 = smov (!%p165_p3, %s164_s17), 47  ;;  %v3048_v24 = vld [vmem:[%s3817_s1 + $0x70] sm:$0xff]   ;;  %v3052_v28 = vld [vmem:[%s3817_s1 + $0x78] sm:$0xff]   ;;  %v3062_v36 = vld [vmem:[%s3817_s1 + $0x140] sm:$0xff]  }
   0xe   : > { %2679 = vmatprep.subr.bf16.mxu1 %v3033_v9  ;;  %v3049_v25 = vld [vmem:[%s3817_s1 + $0xf0] sm:$0xff]   ;;  %s3015_s16 = smul.u32 36, %s3821_s17  ;;  %v3053_v29 = vld [vmem:[%s3817_s1 + $0xf8] sm:$0xff]   ;;  %v3063_v37 = vld [vmem:[%s3817_s1 + $0x1c0] sm:$0xff]  }
   0xf   : > { %v3050_v26 = vld [vmem:[%s3817_s1 + $0x30] sm:$0xff]   ;;  %v3054_v30 = vld [vmem:[%s3817_s1 + $0x38] sm:$0xff]   ;;  %v3064_v38 = vld [vmem:[%s3817_s1 + $0x100] sm:$0xff]  }
  0x10   : > { %2592 = vmatpush3.bf16.msra.mxu0 %v3034_v10  ;;  %v3051_v27 = vld [vmem:[%s3817_s1 + $0xb0] sm:$0xff]   ;;  %s3386_s27 = scalar_lea.vmem %s3816_s0, %s3015_s16  ;;  %v3055_v31 = vld [vmem:[%s3817_s1 + $0xb8] sm:$0xff]   ;;  %v3065_v39 = vld [vmem:[%s3817_s1 + $0x180] sm:$0xff]  }
  0x11   : > { %2680 = vmatpush3.bf16.msra.mxu1 %v3035_v11  ;;  %2593 = vmatprep.subr.bf16.mxu0 %v3036_v12  ;;  %v3056_v32 = vld [vmem:[%s3386_s27] ss:$36 sps:$4 sm:$0xff]   ;;  %v3059_v34 = vld [vmem:[%s3386_s27 + $0x8] ss:$36 sps:$4 sm:$0xff]   ;;  %v3068_v41 = vld [vmem:[%s3386_s27 + $0x54] ss:$36 sps:$4 sm:$0xff]  }
  0x12   : > { %2681 = vmatprep.subr.bf16.mxu1 %v3037_v13  ;;  %v3058_v33 = vld [vmem:[%s3386_s27 + $0x4] ss:$36 sps:$4 sm:$0xff]   ;;  %v3061_v35 = vld [vmem:[%s3386_s27 + $0xc] ss:$36 sps:$4 sm:$0xff]   ;;  %v3076_v48 = vld [vmem:[%s3386_s27 + $0x94] ss:$36 sps:$4 sm:$0xff]  }
  0x13   : > { %1465 = vmatprep.mubr.bf16.mxu0 %v3058_v33  ;;  %1594 = vmatprep.mubr.bf16.mxu1 %v3061_v35  ;;  %v3066_v40 = vld [vmem:[%s3386_s27 + $0x4c] ss:$36 sps:$4 sm:$0xff]   ;;  %v3078_v49 = vld [vmem:[%s3386_s27 + $0x9c] ss:$36 sps:$4 sm:$0xff]   ;;  %v3084_v53 = vld [vmem:[%s3386_s27 + $0xe4] ss:$36 sps:$4 sm:$0xff]  }
  0x14   : > { %2594 = vmatpush3.bf16.msra.mxu0 %v3038_v14  ;;  %v3070_v42 = vld [vmem:[%s3386_s27 + $0x48] ss:$36 sps:$4 sm:$0xff]   ;;  %v3071_v43 = vld [vmem:[%s3386_s27 + $0x50] ss:$36 sps:$4 sm:$0xff]   ;;  %v3081_v51 = vld [vmem:[%s3386_s27 + $0x98] ss:$36 sps:$4 sm:$0xff]  }
  0x15   : > { %2682 = vmatpush3.bf16.msra.mxu1 %v3039_v15  ;;  %2595 = vmatprep.subr.bf16.mxu0 %v3040_v16  ;;  %v3072_v44 = vld [vmem:[%s3817_s1 + $0x148] sm:$0xff]   ;;  %v3080_v50 = vld [vmem:[%s3386_s27 + $0x90] ss:$36 sps:$4 sm:$0xff]   ;;  %v3082_v52 = vld [vmem:[%s3386_s27 + $0xdc] ss:$36 sps:$4 sm:$0xff]  }
  0x16   : > { %2683 = vmatprep.subr.bf16.mxu1 %v3041_v17  ;;  %v3073_v45 = vld [vmem:[%s3817_s1 + $0x1c8] sm:$0xff]   ;;  %v3088_v54 = vld [vmem:[%s3817_s1 + $0x150] sm:$0xff]   ;;  %v3086_v58 = vld [vmem:[%s3386_s27 + $0xd8] ss:$36 sps:$4 sm:$0xff]  }
  0x17   : > { %v3074_v46 = vld [vmem:[%s3817_s1 + $0x108] sm:$0xff]   ;;  %v3089_v55 = vld [vmem:[%s3817_s1 + $0x1d0] sm:$0xff]   ;;  %v3087_v59 = vld [vmem:[%s3386_s27 + $0xe0] ss:$36 sps:$4 sm:$0xff]  }
  0x18   : > { %2596 = vmatpush3.bf16.msra.mxu0 %v3042_v18  ;;  %v3075_v47 = vld [vmem:[%s3817_s1 + $0x188] sm:$0xff]   ;;  %v3090_v56 = vld [vmem:[%s3817_s1 + $0x110] sm:$0xff]   ;;  %v3098_v62 = vld [vmem:[%s3817_s1 + $0x158] sm:$0xff]  }
  0x19   : > { %2684 = vmatpush3.bf16.msra.mxu1 %v3043_v19  ;;  %2597 = vmatprep.subr.bf16.mxu0 %v3044_v20  ;;  %v3091_v57 = vld [vmem:[%s3817_s1 + $0x190] sm:$0xff]   ;;  %v3092_v60 = vld [vmem:[%s3386_s27 + $0x124] ss:$36 sps:$4 sm:$0xff]   ;;  %v3099_v63 = vld [vmem:[%s3817_s1 + $0x1d8] sm:$0xff]  }
  0x1a   : > { %2685 = vmatprep.subr.bf16.mxu1 %v3045_v21  ;;  %v3094_v61 = vld [vmem:[%s3386_s27 + $0x12c] ss:$36 sps:$4 sm:$0xff]   ;;  %v3100_v0 = vld [vmem:[%s3817_s1 + $0x118] sm:$0xff]   ;;  %v3096_v2 = vld [vmem:[%s3386_s27 + $0x120] ss:$36 sps:$4 sm:$0xff]  }
  0x1b   : > { %v3101_v1 = vld [vmem:[%s3817_s1 + $0x198] sm:$0xff]   ;;  %v3097_v3 = vld [vmem:[%s3386_s27 + $0x128] ss:$36 sps:$4 sm:$0xff]   ;;  %v3114_v6 = vld [vmem:[%s3817_s1 + $0x160] sm:$0xff]  }
  0x1c   : > { %2598 = vmatpush3.bf16.msra.mxu0 %v3046_v22  ;;  %v3102_v4 = vld [vmem:[%s3386_s27 + $0x16c] ss:$36 sps:$4 sm:$0xff]   ;;  %v3104_v5 = vld [vmem:[%s3386_s27 + $0x174] ss:$36 sps:$4 sm:$0xff]   ;;  %v3115_v7 = vld [vmem:[%s3817_s1 + $0x1e0] sm:$0xff]  }
  0x1d   : > { %2686 = vmatpush3.bf16.msra.mxu1 %v3047_v23  ;;  %2599 = vmatprep.subr.bf16.mxu0 %v3048_v24  ;;  %v3116_v8 = vld [vmem:[%s3817_s1 + $0x120] sm:$0xff]   ;;  %v3106_v10 = vld [vmem:[%s3386_s27 + $0x168] ss:$36 sps:$4 sm:$0xff]   ;;  %v3107_v11 = vld [vmem:[%s3386_s27 + $0x170] ss:$36 sps:$4 sm:$0xff]  }
  0x1e   : > { %2687 = vmatprep.subr.bf16.mxu1 %v3049_v25  ;;  %v3117_v9 = vld [vmem:[%s3817_s1 + $0x1a0] sm:$0xff]   ;;  %v3108_v12 = vld [vmem:[%s3386_s27 + $0x1b4] ss:$36 sps:$4 sm:$0xff]   ;;  %v3124_v14 = vld [vmem:[%s3817_s1 + $0x168] sm:$0xff]  }
  0x1f   : > { %v3110_v13 = vld [vmem:[%s3386_s27 + $0x1bc] ss:$36 sps:$4 sm:$0xff]   ;;  %v3125_v15 = vld [vmem:[%s3817_s1 + $0x1e8] sm:$0xff]   ;;  %v3112_v18 = vld [vmem:[%s3386_s27 + $0x1b0] ss:$36 sps:$4 sm:$0xff]  }
  0x20   : > { %2600 = vmatpush3.bf16.msra.mxu0 %v3050_v26  ;;  %v3126_v16 = vld [vmem:[%s3817_s1 + $0x128] sm:$0xff]   ;;  %v3113_v19 = vld [vmem:[%s3386_s27 + $0x1b8] ss:$36 sps:$4 sm:$0xff]   ;;  %v3140_v22 = vld [vmem:[%s3817_s1 + $0x170] sm:$0xff]  }
  0x21   : > { %2688 = vmatpush3.bf16.msra.mxu1 %v3051_v27  ;;  %2601 = vmatprep.subr.bf16.mxu0 %v3052_v28  ;;  %v3127_v17 = vld [vmem:[%s3817_s1 + $0x1a8] sm:$0xff]   ;;  %v3118_v20 = vld [vmem:[%s3386_s27 + $0x1fc] ss:$36 sps:$4 sm:$0xff]   ;;  %v3141_v23 = vld [vmem:[%s3817_s1 + $0x1f0] sm:$0xff]  }
  0x22   : > { %2689 = vmatprep.subr.bf16.mxu1 %v3053_v29  ;;  %v3120_v21 = vld [vmem:[%s3386_s27 + $0x204] ss:$36 sps:$4 sm:$0xff]   ;;  %v3142_v24 = vld [vmem:[%s3817_s1 + $0x130] sm:$0xff]   ;;  %v3122_v26 = vld [vmem:[%s3386_s27 + $0x1f8] ss:$36 sps:$4 sm:$0xff]  }
  0x23   : > { %v3143_v25 = vld [vmem:[%s3817_s1 + $0x1b0] sm:$0xff]   ;;  %v3123_v27 = vld [vmem:[%s3386_s27 + $0x200] ss:$36 sps:$4 sm:$0xff]   ;;  %v3153_v33 = vld [vmem:[%s3817_s1 + $0x1b8] sm:$0xff]  }
  0x24   : > { %2602 = vmatpush3.bf16.msra.mxu0 %v3054_v30  ;;  %v3128_v28 = vld [vmem:[%s3386_s27 + $0x244] ss:$36 sps:$4 sm:$0xff]   ;;  %v3130_v29 = vld [vmem:[%s3386_s27 + $0x24c] ss:$36 sps:$4 sm:$0xff]   ;;  %v3150_v30 = vld [vmem:[%s3817_s1 + $0x178] sm:$0xff]  }
  0x25   : > { %2690 = vmatpush3.bf16.msra.mxu1 %v3055_v31  ;;  %2763 = vmatprep.subr.bf16.mxu0 %v3062_v36  ;;  %v3151_v31 = vld [vmem:[%s3817_s1 + $0x1f8] sm:$0xff]   ;;  %v3133_v35 = vld [vmem:[%s3386_s27 + $0x248] ss:$36 sps:$4 sm:$0xff]  }
  0x26   : > { %2851 = vmatprep.subr.bf16.mxu1 %v3063_v37  ;;  %v3134_v36 = vld [vmem:[%s3386_s27 + $0x28c] ss:$36 sps:$4 sm:$0xff]   ;;  %v3136_v37 = vld [vmem:[%s3386_s27 + $0x294] ss:$36 sps:$4 sm:$0xff]  }
  0x27   : > { %1466 = vmatmul.mubr.bf16.vlgmr.msra.gmra.mrb[0].mxu0 %v3056_v32  ;;  %v3152_v32 = vld [vmem:[%s3817_s1 + $0x138] sm:$0xff]  }
  0x28   : > { %1595 = vmatmul.mubr.bf16.vlgmr.msra.gmra.mrb[0].mxu1 %v3059_v34  ;;  %2764 = vmatpush3.bf16.msra.mxu0 %v3064_v38  ;;  %v3132_v34 = vld [vmem:[%s3386_s27 + $0x240] ss:$36 sps:$4 sm:$0xff]  }
  0x29   : > { %2852 = vmatpush3.bf16.msra.mxu1 %v3065_v39  ;;  %1473 = vmatprep.mubr.bf16.mxu0 %v3066_v40  ;;  %v3166_v38 = vld [vmem:[%s3817_s1 + $0x200] sm:$0xff]   ;;  %v3138_v39 = vld [vmem:[%s3386_s27 + $0x288] ss:$36 sps:$4 sm:$0xff]   ;;  %v3139_v40 = vld [vmem:[%s3386_s27 + $0x290] ss:$36 sps:$4 sm:$0xff]  }
  0x2a   : > { %1602 = vmatprep.mubr.bf16.mxu1 %v3068_v41  ;;  %2765 = vmatprep.subr.bf16.mxu0 %v3072_v44  ;;  %v3144_v41 = vld [vmem:[%s3386_s27 + $0x2d4] ss:$36 sps:$4 sm:$0xff]  }
  0x2b   : > { %2853 = vmatprep.subr.bf16.mxu1 %v3073_v45  ;;  %v3149_v44 = vld [vmem:[%s3386_s27 + $0x2d8] ss:$36 sps:$4 sm:$0xff]  }
  0x2c   : > { %2766 = vmatpush3.bf16.msra.mxu0 %v3074_v46  ;;  %v3154_v45 = vld [vmem:[%s3386_s27 + $0x31c] ss:$36 sps:$4 sm:$0xff]   ;;  %v3156_v46 = vld [vmem:[%s3386_s27 + $0x324] ss:$36 sps:$4 sm:$0xff]  }
  0x2d   : > { %2854 = vmatpush3.bf16.msra.mxu1 %v3075_v47  ;;  %2767 = vmatprep.subr.bf16.mxu0 %v3088_v54  ;;  %v3158_v47 = vld [vmem:[%s3386_s27 + $0x318] ss:$36 sps:$4 sm:$0xff]   ;;  %v3169_v54 = vld [vmem:[%s3386_s27 + $0x64] ss:$36 sps:$4 sm:$0xff]  }
  0x2e   : > { %2855 = vmatprep.subr.bf16.mxu1 %v3089_v55  ;;  %v3173_v55 = vld [vmem:[%s3817_s1 + $0x208] sm:$0xff]  }
  0x2f   : > { %1474 = vmatmul.mubr.bf16.gmra.mrb[4].mxu0 %v3070_v42  ;;  %v3146_v42 = vld [vmem:[%s3386_s27 + $0x2dc] ss:$36 sps:$4 sm:$0xff]  }
  0x30   : > { %1603 = vmatmul.mubr.bf16.gmra.mrb[4].mxu1 %v3071_v43  ;;  %1481 = vmatprep.mubr.bf16.mxu0 %v3076_v48  ;;  %v3148_v43 = vld [vmem:[%s3386_s27 + $0x2d0] ss:$36 sps:$4 sm:$0xff]   ;;  %v3159_v48 = vld [vmem:[%s3386_s27 + $0x320] ss:$36 sps:$4 sm:$0xff]  }
  0x31   : > { %1610 = vmatprep.mubr.bf16.mxu1 %v3078_v49  ;;  %2768 = vmatpush3.bf16.msra.mxu0 %v3090_v56  ;;  %v3162_v49 = vld [vmem:[%s3386_s27 + $0x14] ss:$36 sps:$4 sm:$0xff]  }
  0x32   : > { %2856 = vmatpush3.bf16.msra.mxu1 %v3091_v57  ;;  %2769 = vmatprep.subr.bf16.mxu0 %v3098_v62  ;;  %v3186_v56 = vld [vmem:[%s3817_s1 + $0x210] sm:$0xff]   ;;  %v3171_v57 = vld [vmem:[%s3386_s27 + $0x58] ss:$36 sps:$4 sm:$0xff]   ;;  %v3178_v62 = vld [vmem:[%s3386_s27 + $0xa0] ss:$36 sps:$4 sm:$0xff]  }
  0x33   : > { %2857 = vmatprep.subr.bf16.mxu1 %v3099_v63  ;;  %v3206_v63 = vld [vmem:[%s3817_s1 + $0x220] sm:$0xff]  }
  0x35   : > { %2770 = vmatpush3.bf16.msra.mxu0 %v3100_v0  ;;  %v3179_v0 = vld [vmem:[%s3386_s27 + $0xa8] ss:$36 sps:$4 sm:$0xff]  }
  0x36   : > { %2858 = vmatpush3.bf16.msra.mxu1 %v3101_v1  ;;  %2771 = vmatprep.subr.bf16.mxu0 %v3114_v6  ;;  %v3180_v1 = vld [vmem:[%s3386_s27 + $0xec] ss:$36 sps:$4 sm:$0xff]  }
  0x37   : > { %1482 = vmatmul.mubr.bf16.gmra.mrb[8].mxu0 %v3080_v50  ;;  %2859 = vmatprep.subr.bf16.mxu1 %v3115_v7  ;;  %v3165_v50 = vld [vmem:[%s3386_s27 + $0x1c] ss:$36 sps:$4 sm:$0xff]   ;;  %v3185_v6 = vld [vmem:[%s3386_s27 + $0xf0] ss:$36 sps:$4 sm:$0xff]  }
  0x38   : > { %1611 = vmatmul.mubr.bf16.gmra.mrb[8].mxu1 %v3081_v51  ;;  %1489 = vmatprep.mubr.bf16.mxu0 %v3082_v52  ;;  %v3160_v51 = vld [vmem:[%s3386_s27 + $0x10] ss:$36 sps:$4 sm:$0xff]   ;;  %v3163_v52 = vld [vmem:[%s3386_s27 + $0x18] ss:$36 sps:$4 sm:$0xff]  }
  0x39   : > { %1618 = vmatprep.mubr.bf16.mxu1 %v3084_v53  ;;  %2772 = vmatpush3.bf16.msra.mxu0 %v3116_v8  ;;  %v3167_v53 = vld [vmem:[%s3386_s27 + $0x5c] ss:$36 sps:$4 sm:$0xff]   ;;  %v3187_v7 = vld [vmem:[%s3386_s27 + $0x134] ss:$36 sps:$4 sm:$0xff]  }
  0x3a   : > { %2860 = vmatpush3.bf16.msra.mxu1 %v3117_v9  ;;  %2773 = vmatprep.subr.bf16.mxu0 %v3124_v14  ;;  %v3189_v8 = vld [vmem:[%s3386_s27 + $0x13c] ss:$36 sps:$4 sm:$0xff]  }
  0x3b   : > { %2861 = vmatprep.subr.bf16.mxu1 %v3125_v15  ;;  %v3233_v9 = vld [vmem:[%s3817_s1 + $0x238] sm:$0xff]   ;;  %v3199_v15 = vld [vmem:[%s3386_s27 + $0x180] ss:$36 sps:$4 sm:$0xff]  }
  0x3c   : > { %v3198_v14 = vld [vmem:[%s3386_s27 + $0x178] ss:$36 sps:$4 sm:$0xff]  }
  0x3d   : > { %2774 = vmatpush3.bf16.msra.mxu0 %v3126_v16  ;;  %v3200_v16 = vld [vmem:[%s3386_s27 + $0x1c4] ss:$36 sps:$4 sm:$0xff]  }
  0x3e   : > { %2862 = vmatpush3.bf16.msra.mxu1 %v3127_v17  ;;  %2775 = vmatprep.subr.bf16.mxu0 %v3140_v22  ;;  %v3202_v17 = vld [vmem:[%s3386_s27 + $0x1cc] ss:$36 sps:$4 sm:$0xff]  }
  0x3f   : > { %1490 = vmatmul.mubr.bf16.gmra.mrb[12].mxu0 %v3086_v58  ;;  %2863 = vmatprep.subr.bf16.mxu1 %v3141_v23  ;;  %v3172_v58 = vld [vmem:[%s3386_s27 + $0x60] ss:$36 sps:$4 sm:$0xff]   ;;  %v3211_v22 = vld [vmem:[%s3386_s27 + $0x208] ss:$36 sps:$4 sm:$0xff]   ;;  %v3212_v23 = vld [vmem:[%s3386_s27 + $0x210] ss:$36 sps:$4 sm:$0xff]  }
  0x40   : > { %1619 = vmatmul.mubr.bf16.gmra.mrb[12].mxu1 %v3087_v59  ;;  %1497 = vmatprep.mubr.bf16.mxu0 %v3092_v60  ;;  %v3174_v59 = vld [vmem:[%s3386_s27 + $0xa4] ss:$36 sps:$4 sm:$0xff]   ;;  %v3176_v60 = vld [vmem:[%s3386_s27 + $0xac] ss:$36 sps:$4 sm:$0xff]  }
  0x41   : > { %1626 = vmatprep.mubr.bf16.mxu1 %v3094_v61  ;;  %2776 = vmatpush3.bf16.msra.mxu0 %v3142_v24  ;;  %v3193_v61 = vld [vmem:[%s3817_s1 + $0x218] sm:$0xff]  }
  0x42   : > { %2864 = vmatpush3.bf16.msra.mxu1 %v3143_v25  ;;  %2777 = vmatprep.subr.bf16.mxu0 %v3150_v30  ;;  %v3214_v24 = vld [vmem:[%s3386_s27 + $0x254] ss:$36 sps:$4 sm:$0xff]   ;;  %v3216_v25 = vld [vmem:[%s3386_s27 + $0x25c] ss:$36 sps:$4 sm:$0xff]  }
  0x43   : > { %2865 = vmatprep.subr.bf16.mxu1 %v3151_v31  ;;  %v3224_v30 = vld [vmem:[%s3386_s27 + $0x298] ss:$36 sps:$4 sm:$0xff]   ;;  %v3225_v31 = vld [vmem:[%s3386_s27 + $0x2a0] ss:$36 sps:$4 sm:$0xff]  }
  0x45   : > { %2778 = vmatpush3.bf16.msra.mxu0 %v3152_v32  ;;  %v3227_v32 = vld [vmem:[%s3386_s27 + $0x2e4] ss:$36 sps:$4 sm:$0xff]  }
  0x46   : > { %2866 = vmatpush3.bf16.msra.mxu1 %v3153_v33  ;;  %2959 = vmatprep.subr.bf16.mxu0 %v3166_v38  ;;  %v3229_v33 = vld [vmem:[%s3386_s27 + $0x2ec] ss:$36 sps:$4 sm:$0xff]  }
  0x47   : > { %1498 = vmatmul.mubr.bf16.gmra.mrb[16].mxu0 %v3096_v2  ;;  %2999 = vmatprep.subr.bf16.mxu1 %v3166_v38  ;;  %v3182_v2 = vld [vmem:[%s3386_s27 + $0xf4] ss:$36 sps:$4 sm:$0xff]  }
  0x48   : > { %1627 = vmatmul.mubr.bf16.gmra.mrb[16].mxu1 %v3097_v3  ;;  %1505 = vmatprep.mubr.bf16.mxu0 %v3102_v4  ;;  %v3213_v3 = vld [vmem:[%s3817_s1 + $0x228] sm:$0xff]   ;;  %v3226_v4 = vld [vmem:[%s3817_s1 + $0x230] sm:$0xff]  }
  0x49   : > { %1634 = vmatprep.mubr.bf16.mxu1 %v3104_v5  ;;  %v3184_v5 = vld [vmem:[%s3386_s27 + $0xe8] ss:$36 sps:$4 sm:$0xff]  }
  0x4f   : > { %1506 = vmatmul.mubr.bf16.gmra.mrb[20].mxu0 %v3106_v10  ;;  %v3191_v10 = vld [vmem:[%s3386_s27 + $0x130] ss:$36 sps:$4 sm:$0xff]  }
  0x50   : > { %1635 = vmatmul.mubr.bf16.gmra.mrb[20].mxu1 %v3107_v11  ;;  %1513 = vmatprep.mubr.bf16.mxu0 %v3108_v12  ;;  %v3192_v11 = vld [vmem:[%s3386_s27 + $0x138] ss:$36 sps:$4 sm:$0xff]  }
  0x51   : > { %1642 = vmatprep.mubr.bf16.mxu1 %v3110_v13  ;;  %v3194_v12 = vld [vmem:[%s3386_s27 + $0x17c] ss:$36 sps:$4 sm:$0xff]   ;;  %v3196_v13 = vld [vmem:[%s3386_s27 + $0x184] ss:$36 sps:$4 sm:$0xff]  }
  0x57   : > { %1514 = vmatmul.mubr.bf16.gmra.mrb[24].mxu0 %v3112_v18  ;;  %v3204_v18 = vld [vmem:[%s3386_s27 + $0x1c0] ss:$36 sps:$4 sm:$0xff]  }
  0x58   : > { %1643 = vmatmul.mubr.bf16.gmra.mrb[24].mxu1 %v3113_v19  ;;  %1521 = vmatprep.mubr.bf16.mxu0 %v3118_v20  ;;  %v3205_v19 = vld [vmem:[%s3386_s27 + $0x1c8] ss:$36 sps:$4 sm:$0xff]  }
  0x59   : > { %1650 = vmatprep.mubr.bf16.mxu1 %v3120_v21  ;;  %v3207_v20 = vld [vmem:[%s3386_s27 + $0x20c] ss:$36 sps:$4 sm:$0xff]   ;;  %v3209_v21 = vld [vmem:[%s3386_s27 + $0x214] ss:$36 sps:$4 sm:$0xff]  }
  0x5f   : > { %1522 = vmatmul.mubr.bf16.gmra.mrb[28].mxu0 %v3122_v26  ;;  %v3218_v26 = vld [vmem:[%s3386_s27 + $0x250] ss:$36 sps:$4 sm:$0xff]  }
  0x60   : > { %1651 = vmatmul.mubr.bf16.gmra.mrb[28].mxu1 %v3123_v27  ;;  %1529 = vmatprep.mubr.bf16.mxu0 %v3128_v28  ;;  %v3219_v27 = vld [vmem:[%s3386_s27 + $0x258] ss:$36 sps:$4 sm:$0xff]  }
  0x61   : > { %1658 = vmatprep.mubr.bf16.mxu1 %v3130_v29  ;;  %v3220_v28 = vld [vmem:[%s3386_s27 + $0x29c] ss:$36 sps:$4 sm:$0xff]   ;;  %v3222_v29 = vld [vmem:[%s3386_s27 + $0x2a4] ss:$36 sps:$4 sm:$0xff]  }
  0x67   : > { %1530 = vmatmul.mubr.bf16.gmra.mrb[32].mxu0 %v3132_v34  ;;  %v3231_v34 = vld [vmem:[%s3386_s27 + $0x2e0] ss:$36 sps:$4 sm:$0xff]  }
  0x68   : > { %1659 = vmatmul.mubr.bf16.gmra.mrb[32].mxu1 %v3133_v35  ;;  %1537 = vmatprep.mubr.bf16.mxu0 %v3134_v36  ;;  %v3232_v35 = vld [vmem:[%s3386_s27 + $0x2e8] ss:$36 sps:$4 sm:$0xff]  }
  0x69   : > { %1666 = vmatprep.mubr.bf16.mxu1 %v3136_v37  ;;  %v3234_v36 = vld [vmem:[%s3386_s27 + $0x32c] ss:$36 sps:$4 sm:$0xff]   ;;  %v3236_v37 = vld [vmem:[%s3386_s27 + $0x334] ss:$36 sps:$4 sm:$0xff]  }
  0x6f   : > { %1538 = vmatmul.mubr.bf16.gmra.mrb[36].mxu0 %v3138_v39  ;;  %v3239_v39 = vld [vmem:[%s3386_s27 + $0x330] ss:$36 sps:$4 sm:$0xff]  }
  0x70   : > { %1667 = vmatmul.mubr.bf16.gmra.mrb[36].mxu1 %v3139_v40  ;;  %1545 = vmatprep.mubr.bf16.mxu0 %v3144_v41  ;;  %v3240_v40 = vld [vmem:[%s3386_s27 + $0x20] ss:$36 sps:$4 sm:$0xff]   ;;  %v3241_v41 = vld [vmem:[%s3386_s27 + $0x1d0] ss:$36 sps:$4 sm:$0xff]  }
  0x71   : > { %1674 = vmatprep.mubr.bf16.mxu1 %v3146_v42  ;;  %v3242_v42 = vld [vmem:[%s3386_s27 + $0x68] ss:$36 sps:$4 sm:$0xff]  }
  0x77   : > { %1546 = vmatmul.mubr.bf16.gmra.mrb[40].mxu0 %v3148_v43  ;;  %v3243_v43 = vld [vmem:[%s3386_s27 + $0x218] ss:$36 sps:$4 sm:$0xff]  }
  0x78   : > { %1675 = vmatmul.mubr.bf16.gmra.mrb[40].mxu1 %v3149_v44  ;;  %1553 = vmatprep.mubr.bf16.mxu0 %v3154_v45  ;;  %v3244_v44 = vld [vmem:[%s3386_s27 + $0xb0] ss:$36 sps:$4 sm:$0xff]   ;;  %v3245_v45 = vld [vmem:[%s3386_s27 + $0x260] ss:$36 sps:$4 sm:$0xff]  }
  0x79   : > { %1682 = vmatprep.mubr.bf16.mxu1 %v3156_v46  ;;  %v3246_v46 = vld [vmem:[%s3386_s27 + $0xf8] ss:$36 sps:$4 sm:$0xff]  }
  0x7f   : > { %1554 = vmatmul.mubr.bf16.gmra.mrb[44].mxu0 %v3158_v47  ;;  %v3247_v47 = vld [vmem:[%s3386_s27 + $0x2a8] ss:$36 sps:$4 sm:$0xff]  }
  0x80   : > { %1683 = vmatmul.mubr.bf16.gmra.mrb[44].mxu1 %v3159_v48  ;;  %1723 = vmatprep.mubr.bf16.mxu0 %v3162_v49  ;;  %v3248_v48 = vld [vmem:[%s3386_s27 + $0x140] ss:$36 sps:$4 sm:$0xff]   ;;  %v3249_v49 = vld [vmem:[%s3386_s27 + $0x2f0] ss:$36 sps:$4 sm:$0xff]  }
  0x81   : > { %1852 = vmatprep.mubr.bf16.mxu1 %v3165_v50  ;;  %v3250_v50 = vld [vmem:[%s3386_s27 + $0x188] ss:$36 sps:$4 sm:$0xff]  }
  0x87   : > { %1724 = vmatmul.mubr.bf16.vlgmr.msra.gmra.mrb[48].mxu0 %v3160_v51  ;;  %v3251_v51 = vld [vmem:[%s3386_s27 + $0x338] ss:$36 sps:$4 sm:$0xff]  }
  0x88   : > { %1853 = vmatmul.mubr.bf16.vlgmr.msra.gmra.mrb[48].mxu1 %v3163_v52  ;;  %2960 = vmatpush3.bf16.msra.mxu0 %v3166_v38 }
  0x89   : > { %3007 = vmatpush3.bf16.msra.mxu1 %v3166_v38  ;;  %1731 = vmatprep.mubr.bf16.mxu0 %v3167_v53  ;;  %v3238_v38 = vld [vmem:[%s3386_s27 + $0x328] ss:$36 sps:$4 sm:$0xff]   ;;  %s2284_s27 = sshll.u32 %s3821_s17, 2 }
  0x8a   : > { %1860 = vmatprep.mubr.bf16.mxu1 %v3169_v54  ;;  %2961 = vmatprep.subr.bf16.mxu0 %v3173_v55  ;;  %v3625_v54 = vld [vmem:[%s3818_s2] ss:$0 sm:$0xff]  ;;  %s3783_s20 = scalar_lea.vmem %s3819_s3, %s2284_s27 }
  0x8b   : > { %3000 = vmatprep.subr.bf16.mxu1 %v3173_v55 }
  0x8c   : > { %2962 = vmatpush3.bf16.msra.mxu0 %v3173_v55 }
  0x8d   : > { %3008 = vmatpush3.bf16.msra.mxu1 %v3173_v55  ;;  %2963 = vmatprep.subr.bf16.mxu0 %v3186_v56 }
  0x8e   : > { %3001 = vmatprep.subr.bf16.mxu1 %v3186_v56 }
  0x8f   : > { %1732 = vmatmul.mubr.bf16.gmra.mrb[52].mxu0 %v3171_v57 }
  0x90   : > { %1861 = vmatmul.mubr.bf16.gmra.mrb[52].mxu1 %v3172_v58  ;;  %1739 = vmatprep.mubr.bf16.mxu0 %v3174_v59 }
  0x91   : > { %1868 = vmatprep.mubr.bf16.mxu1 %v3176_v60  ;;  %2964 = vmatpush3.bf16.msra.mxu0 %v3186_v56 }
  0x92   : > { %3009 = vmatpush3.bf16.msra.mxu1 %v3186_v56  ;;  %2965 = vmatprep.subr.bf16.mxu0 %v3193_v61 }
  0x93   : > { %3002 = vmatprep.subr.bf16.mxu1 %v3193_v61 }
  0x95   : > { %2966 = vmatpush3.bf16.msra.mxu0 %v3193_v61 }
  0x96   : > { %3010 = vmatpush3.bf16.msra.mxu1 %v3193_v61  ;;  %2967 = vmatprep.subr.bf16.mxu0 %v3206_v63 }
  0x97   : > { %1740 = vmatmul.mubr.bf16.gmra.mrb[56].mxu0 %v3178_v62  ;;  %3003 = vmatprep.subr.bf16.mxu1 %v3206_v63 }
  0x98   : > { %1869 = vmatmul.mubr.bf16.gmra.mrb[56].mxu1 %v3179_v0  ;;  %1747 = vmatprep.mubr.bf16.mxu0 %v3180_v1 }
  0x99   : > { %1876 = vmatprep.mubr.bf16.mxu1 %v3182_v2  ;;  %2968 = vmatpush3.bf16.msra.mxu0 %v3206_v63 }
  0x9a   : > { %3011 = vmatpush3.bf16.msra.mxu1 %v3206_v63  ;;  %2969 = vmatprep.subr.bf16.mxu0 %v3213_v3 }
  0x9b   : > { %3004 = vmatprep.subr.bf16.mxu1 %v3213_v3 }
  0x9d   : > { %2970 = vmatpush3.bf16.msra.mxu0 %v3213_v3 }
  0x9e   : > { %3012 = vmatpush3.bf16.msra.mxu1 %v3213_v3  ;;  %2971 = vmatprep.subr.bf16.mxu0 %v3226_v4 }
  0x9f   : > { %1748 = vmatmul.mubr.bf16.gmra.mrb[60].mxu0 %v3184_v5  ;;  %3005 = vmatprep.subr.bf16.mxu1 %v3226_v4 }
  0xa0   : > { %1877 = vmatmul.mubr.bf16.gmra.mrb[60].mxu1 %v3185_v6  ;;  %1755 = vmatprep.mubr.bf16.mxu0 %v3187_v7 }
  0xa1   : > { %1884 = vmatprep.mubr.bf16.mxu1 %v3189_v8  ;;  %2972 = vmatpush3.bf16.msra.mxu0 %v3226_v4 }
  0xa2   : > { %3013 = vmatpush3.bf16.msra.mxu1 %v3226_v4  ;;  %2973 = vmatprep.subr.bf16.mxu0 %v3233_v9 }
  0xa3   : > { %3006 = vmatprep.subr.bf16.mxu1 %v3233_v9 }
  0xa5   : > { %2974 = vmatpush3.bf16.msra.mxu0 %v3233_v9 }
  0xa6   : > { %3014 = vmatpush3.bf16.msra.mxu1 %v3233_v9 }
  0xa7   : > { %1756 = vmatmul.mubr.bf16.gmra.mrb[64].mxu0 %v3191_v10 }
  0xa8   : > { %1885 = vmatmul.mubr.bf16.gmra.mrb[64].mxu1 %v3192_v11  ;;  %1763 = vmatprep.mubr.bf16.mxu0 %v3194_v12 }
  0xa9   : > { %1892 = vmatprep.mubr.bf16.mxu1 %v3196_v13 }
  0xaf   : > { %1764 = vmatmul.mubr.bf16.gmra.mrb[68].mxu0 %v3198_v14 }
  0xb0   : > { %1893 = vmatmul.mubr.bf16.gmra.mrb[68].mxu1 %v3199_v15  ;;  %1771 = vmatprep.mubr.bf16.mxu0 %v3200_v16 }
  0xb1   : > { %1900 = vmatprep.mubr.bf16.mxu1 %v3202_v17 }
  0xb7   : > { %1772 = vmatmul.mubr.bf16.gmra.mrb[72].mxu0 %v3204_v18 }
  0xb8   : > { %1901 = vmatmul.mubr.bf16.gmra.mrb[72].mxu1 %v3205_v19  ;;  %1779 = vmatprep.mubr.bf16.mxu0 %v3207_v20 }
  0xb9   : > { %1908 = vmatprep.mubr.bf16.mxu1 %v3209_v21 }
  0xbf   : > { %1780 = vmatmul.mubr.bf16.gmra.mrb[76].mxu0 %v3211_v22 }
  0xc0   : > { %1909 = vmatmul.mubr.bf16.gmra.mrb[76].mxu1 %v3212_v23  ;;  %1787 = vmatprep.mubr.bf16.mxu0 %v3214_v24 }
  0xc1   : > { %1916 = vmatprep.mubr.bf16.mxu1 %v3216_v25 }
  0xc7   : > { %1788 = vmatmul.mubr.bf16.gmra.mrb[80].mxu0 %v3218_v26 }
  0xc8   : > { %1917 = vmatmul.mubr.bf16.gmra.mrb[80].mxu1 %v3219_v27  ;;  %1795 = vmatprep.mubr.bf16.mxu0 %v3220_v28 }
  0xc9   : > { %1924 = vmatprep.mubr.bf16.mxu1 %v3222_v29 }
  0xcf   : > { %1796 = vmatmul.mubr.bf16.gmra.mrb[84].mxu0 %v3224_v30 }
  0xd0   : > { %1925 = vmatmul.mubr.bf16.gmra.mrb[84].mxu1 %v3225_v31  ;;  %1803 = vmatprep.mubr.bf16.mxu0 %v3227_v32 }
  0xd1   : > { %1932 = vmatprep.mubr.bf16.mxu1 %v3229_v33 }
  0xd7   : > { %1804 = vmatmul.mubr.bf16.gmra.mrb[88].mxu0 %v3231_v34 }
  0xd8   : > { %1933 = vmatmul.mubr.bf16.gmra.mrb[88].mxu1 %v3232_v35  ;;  %1811 = vmatprep.mubr.bf16.mxu0 %v3234_v36 }
  0xd9   : > { %1940 = vmatprep.mubr.bf16.mxu1 %v3236_v37 }
  0xdf   : > { %1812 = vmatmul.mubr.bf16.gmra.mrb[92].mxu0 %v3238_v38 }
  0xe0   : > { %1941 = vmatmul.mubr.bf16.gmra.mrb[92].mxu1 %v3239_v39  ;;  %2975 = vmatprep.mubr.bf16.mxu0 %v3240_v40 }
  0xe1   : > { %2987 = vmatprep.mubr.bf16.mxu1 %v3241_v41 }
  0xe7   : > { %2976 = vmatmul.mubr.bf16.vlgmr.msra.gmra.mrb[96].mxu0 %v3242_v42 }
  0xe8   : > { %2988 = vmatmul.mubr.bf16.vlgmr.msra.gmra.mrb[96].mxu1 %v3243_v43  ;;  %2979 = vmatprep.mubr.bf16.mxu0 %v3244_v44 }
  0xe9   : > { %2991 = vmatprep.mubr.bf16.mxu1 %v3245_v45 }
  0xef   : > { %2980 = vmatmul.mubr.bf16.gmra.mrb[100].mxu0 %v3246_v46 }
  0xf0   : > { %2992 = vmatmul.mubr.bf16.gmra.mrb[100].mxu1 %v3247_v47  ;;  %2983 = vmatprep.mubr.bf16.mxu0 %v3248_v48 }
  0xf1   : > { %2995 = vmatprep.mubr.bf16.mxu1 %v3249_v49 }
  0xf7   : > { %2984 = vmatmul.mubr.bf16.gmra.mrb[104].mxu0 %v3250_v50 }
  0xf8   : > { %2996 = vmatmul.mubr.bf16.gmra.mrb[104].mxu1 %v3251_v51 }
  0xfa   : > { %v2603_v52 = vpop.f32.mrb[0].mxu0 }
  0xfb   : > { %v2691_v53 = vpop.f32.mrb[0].mxu1  ;;  %v2604_v55 = vpop.f32.mrb[1].mxu0 }
  0xfc   : > { %v2605_v56 = vadd.f32 %v2604_v55, %v2603_v52  ;;  %v2692_v57 = vpop.f32.mrb[1].mxu1  ;;  %v2606_v58 = vpop.f32.mrb[2].mxu0 }
  0xfd   : > { %v2693_v59 = vadd.f32 %v2692_v57, %v2691_v53  ;;  %v2694_v60 = vpop.f32.mrb[2].mxu1  ;;  %v2607_v61 = vpop.f32.mrb[3].mxu0 }
  0xfe   : > { %v1468_v62 = vadd.f32 %v2605_v56, %v3625_v54  ;;  %v2608_v63 = vadd.f32 %v2607_v61, %v2606_v58  ;;  %v2695_v0 = vpop.f32.mrb[3].mxu1 }
  0xff   : > { %v2696_v1 = vadd.f32 %v2695_v0, %v2694_v60 }
 0x100   : > { %v3628_v2 = vadd.f32 %v2693_v59, %v1468_v62  ;;  %v1471_v3 = vadd.f32 %v2608_v63, %v3625_v54 }
 0x102   : > { %v3631_v4 = vadd.f32 %v2696_v1, %v1471_v3  ;;  %v2609_v5 = vpop.f32.mrb[4].mxu0 }
 0x103   : > { %v2697_v6 = vpop.f32.mrb[4].mxu1  ;;  %v2610_v7 = vpop.f32.mrb[5].mxu0 }
 0x104   : > { %v2611_v8 = vadd.f32 %v2610_v7, %v2609_v5  ;;  %v2698_v9 = vpop.f32.mrb[5].mxu1  ;;  %v2612_v10 = vpop.f32.mrb[6].mxu0 }
 0x105   : > { %v2699_v11 = vadd.f32 %v2698_v9, %v2697_v6  ;;  %v2700_v12 = vpop.f32.mrb[6].mxu1  ;;  %v2613_v13 = vpop.f32.mrb[7].mxu0 }
 0x106   : > { %v1476_v14 = vadd.f32 %v2611_v8, %v3625_v54  ;;  %v2614_v15 = vadd.f32 %v2613_v13, %v2612_v10  ;;  %v2701_v16 = vpop.f32.mrb[7].mxu1 }
 0x107   : > { %v2702_v17 = vadd.f32 %v2701_v16, %v2700_v12 }
 0x108   : > { %v3634_v18 = vadd.f32 %v2699_v11, %v1476_v14  ;;  %v1479_v19 = vadd.f32 %v2614_v15, %v3625_v54 }
 0x10a   : > { %v3637_v20 = vadd.f32 %v2702_v17, %v1479_v19  ;;  %v2615_v21 = vpop.f32.mrb[8].mxu0 }
 0x10b   : > { %v2703_v22 = vpop.f32.mrb[8].mxu1  ;;  %v2616_v23 = vpop.f32.mrb[9].mxu0 }
 0x10c   : > { %v2617_v24 = vadd.f32 %v2616_v23, %v2615_v21  ;;  %v2704_v25 = vpop.f32.mrb[9].mxu1  ;;  %v2618_v26 = vpop.f32.mrb[10].mxu0 }
 0x10d   : > { %v2705_v27 = vadd.f32 %v2704_v25, %v2703_v22  ;;  %v2706_v28 = vpop.f32.mrb[10].mxu1  ;;  %v2619_v29 = vpop.f32.mrb[11].mxu0 }
 0x10e   : > { %v1484_v30 = vadd.f32 %v2617_v24, %v3625_v54  ;;  %v2620_v31 = vadd.f32 %v2619_v29, %v2618_v26  ;;  %v2707_v32 = vpop.f32.mrb[11].mxu1 }
 0x10f   : > { %v2708_v33 = vadd.f32 %v2707_v32, %v2706_v28 }
 0x110   : > { %v3640_v34 = vadd.f32 %v2705_v27, %v1484_v30  ;;  %v1487_v35 = vadd.f32 %v2620_v31, %v3625_v54 }
 0x112   : > { %v3643_v36 = vadd.f32 %v2708_v33, %v1487_v35  ;;  %v2621_v37 = vpop.f32.mrb[12].mxu0 }
 0x113   : > { %v2709_v38 = vpop.f32.mrb[12].mxu1  ;;  %v2622_v39 = vpop.f32.mrb[13].mxu0 }
 0x114   : > { %v2623_v40 = vadd.f32 %v2622_v39, %v2621_v37  ;;  %v2710_v41 = vpop.f32.mrb[13].mxu1  ;;  %v2624_v42 = vpop.f32.mrb[14].mxu0 }
 0x115   : > { %v2711_v43 = vadd.f32 %v2710_v41, %v2709_v38  ;;  %v2712_v44 = vpop.f32.mrb[14].mxu1  ;;  %v2625_v45 = vpop.f32.mrb[15].mxu0 }
 0x116   : > { %v1492_v46 = vadd.f32 %v2623_v40, %v3625_v54  ;;  %v2626_v47 = vadd.f32 %v2625_v45, %v2624_v42  ;;  %v2713_v48 = vpop.f32.mrb[15].mxu1 }
 0x117   : > { %v2714_v49 = vadd.f32 %v2713_v48, %v2712_v44 }
 0x118   : > { %v3646_v50 = vadd.f32 %v2711_v43, %v1492_v46  ;;  %v1495_v51 = vadd.f32 %v2626_v47, %v3625_v54 }
 0x11a   : > { %v3649_v52 = vadd.f32 %v2714_v49, %v1495_v51  ;;  %v2627_v53 = vpop.f32.mrb[16].mxu0 }
 0x11b   : > { %v2715_v55 = vpop.f32.mrb[16].mxu1  ;;  %v2628_v56 = vpop.f32.mrb[17].mxu0 }
 0x11c   : > { %v2629_v57 = vadd.f32 %v2628_v56, %v2627_v53  ;;  %v2716_v58 = vpop.f32.mrb[17].mxu1  ;;  %v2630_v59 = vpop.f32.mrb[18].mxu0 }
 0x11d   : > { %v2717_v60 = vadd.f32 %v2716_v58, %v2715_v55  ;;  %v2718_v61 = vpop.f32.mrb[18].mxu1  ;;  %v2631_v62 = vpop.f32.mrb[19].mxu0 }
 0x11e   : > { %v1500_v63 = vadd.f32 %v2629_v57, %v3625_v54  ;;  %v2632_v0 = vadd.f32 %v2631_v62, %v2630_v59  ;;  %v2719_v1 = vpop.f32.mrb[19].mxu1 }
 0x11f   : > { %v2720_v3 = vadd.f32 %v2719_v1, %v2718_v61 }
 0x120   : > { %v3652_v5 = vadd.f32 %v2717_v60, %v1500_v63  ;;  %v1503_v6 = vadd.f32 %v2632_v0, %v3625_v54 }
 0x122   : > { %v3655_v7 = vadd.f32 %v2720_v3, %v1503_v6  ;;  %v2633_v8 = vpop.f32.mrb[20].mxu0 }
 0x123   : > { %v2721_v9 = vpop.f32.mrb[20].mxu1  ;;  %v2634_v10 = vpop.f32.mrb[21].mxu0 }
 0x124   : > { %v2635_v11 = vadd.f32 %v2634_v10, %v2633_v8  ;;  %v2722_v12 = vpop.f32.mrb[21].mxu1  ;;  %v2636_v13 = vpop.f32.mrb[22].mxu0 }
 0x125   : > { %v2723_v14 = vadd.f32 %v2722_v12, %v2721_v9  ;;  %v2724_v15 = vpop.f32.mrb[22].mxu1  ;;  %v2637_v16 = vpop.f32.mrb[23].mxu0 }
 0x126   : > { %v1508_v17 = vadd.f32 %v2635_v11, %v3625_v54  ;;  %v2638_v19 = vadd.f32 %v2637_v16, %v2636_v13  ;;  %v2725_v21 = vpop.f32.mrb[23].mxu1 }
 0x127   : > { %v2726_v22 = vadd.f32 %v2725_v21, %v2724_v15 }
 0x128   : > { %v3658_v23 = vadd.f32 %v2723_v14, %v1508_v17  ;;  %v1511_v24 = vadd.f32 %v2638_v19, %v3625_v54 }
 0x12a   : > { %v3661_v25 = vadd.f32 %v2726_v22, %v1511_v24  ;;  %v2639_v26 = vpop.f32.mrb[24].mxu0 }
 0x12b   : > { %v2727_v27 = vpop.f32.mrb[24].mxu1  ;;  %v2640_v28 = vpop.f32.mrb[25].mxu0 }
 0x12c   : > { %v2641_v29 = vadd.f32 %v2640_v28, %v2639_v26  ;;  %v2728_v30 = vpop.f32.mrb[25].mxu1  ;;  %v2642_v31 = vpop.f32.mrb[26].mxu0 }
 0x12d   : > { %v2729_v32 = vadd.f32 %v2728_v30, %v2727_v27  ;;  %v2730_v33 = vpop.f32.mrb[26].mxu1  ;;  %v2643_v35 = vpop.f32.mrb[27].mxu0 }
 0x12e   : > { %v1516_v37 = vadd.f32 %v2641_v29, %v3625_v54  ;;  %v2644_v38 = vadd.f32 %v2643_v35, %v2642_v31  ;;  %v2731_v39 = vpop.f32.mrb[27].mxu1 }
 0x12f   : > { %v2732_v40 = vadd.f32 %v2731_v39, %v2730_v33 }
 0x130   : > { %v3664_v41 = vadd.f32 %v2729_v32, %v1516_v37  ;;  %v1519_v42 = vadd.f32 %v2644_v38, %v3625_v54 }
 0x132   : > { %v3667_v43 = vadd.f32 %v2732_v40, %v1519_v42  ;;  %v2645_v44 = vpop.f32.mrb[28].mxu0 }
 0x133   : > { %v2733_v45 = vpop.f32.mrb[28].mxu1  ;;  %v2646_v46 = vpop.f32.mrb[29].mxu0 }
 0x134   : > { %v2647_v47 = vadd.f32 %v2646_v46, %v2645_v44  ;;  %v2734_v48 = vpop.f32.mrb[29].mxu1  ;;  %v2648_v49 = vpop.f32.mrb[30].mxu0 }
 0x135   : > { %v2735_v51 = vadd.f32 %v2734_v48, %v2733_v45  ;;  %v2736_v53 = vpop.f32.mrb[30].mxu1  ;;  %v2649_v55 = vpop.f32.mrb[31].mxu0 }
 0x136   : > { %v1524_v56 = vadd.f32 %v2647_v47, %v3625_v54  ;;  %v2650_v57 = vadd.f32 %v2649_v55, %v2648_v49  ;;  %v2737_v58 = vpop.f32.mrb[31].mxu1 }
 0x137   : > { %v2738_v59 = vadd.f32 %v2737_v58, %v2736_v53 }
 0x138   : > { %v3670_v60 = vadd.f32 %v2735_v51, %v1524_v56  ;;  %v1527_v61 = vadd.f32 %v2650_v57, %v3625_v54 }
 0x13a   : > { %v3673_v62 = vadd.f32 %v2738_v59, %v1527_v61  ;;  %v2651_v63 = vpop.f32.mrb[32].mxu0 }
 0x13b   : > { %v2739_v0 = vpop.f32.mrb[32].mxu1  ;;  %v2652_v1 = vpop.f32.mrb[33].mxu0 }
 0x13c   : > { %v2653_v3 = vadd.f32 %v2652_v1, %v2651_v63  ;;  %v2740_v6 = vpop.f32.mrb[33].mxu1  ;;  %v2654_v8 = vpop.f32.mrb[34].mxu0 }
 0x13d   : > { %v2741_v9 = vadd.f32 %v2740_v6, %v2739_v0  ;;  %v2742_v10 = vpop.f32.mrb[34].mxu1  ;;  %v2655_v11 = vpop.f32.mrb[35].mxu0 }
 0x13e   : > { %v1532_v12 = vadd.f32 %v2653_v3, %v3625_v54  ;;  %v2656_v13 = vadd.f32 %v2655_v11, %v2654_v8  ;;  %v2743_v14 = vpop.f32.mrb[35].mxu1 }
 0x13f   : > { %v2744_v15 = vadd.f32 %v2743_v14, %v2742_v10 }
 0x140   : > { %v3676_v16 = vadd.f32 %v2741_v9, %v1532_v12  ;;  %v1535_v17 = vadd.f32 %v2656_v13, %v3625_v54 }
 0x142   : > { %v3679_v19 = vadd.f32 %v2744_v15, %v1535_v17  ;;  %v2657_v21 = vpop.f32.mrb[36].mxu0 }
 0x143   : > { %v2745_v22 = vpop.f32.mrb[36].mxu1  ;;  %v2658_v24 = vpop.f32.mrb[37].mxu0 }
 0x144   : > { %v2659_v26 = vadd.f32 %v2658_v24, %v2657_v21  ;;  %v2746_v27 = vpop.f32.mrb[37].mxu1  ;;  %v2660_v28 = vpop.f32.mrb[38].mxu0 }
 0x145   : > { %v2747_v29 = vadd.f32 %v2746_v27, %v2745_v22  ;;  %v2748_v30 = vpop.f32.mrb[38].mxu1  ;;  %v2661_v31 = vpop.f32.mrb[39].mxu0 }
 0x146   : > { %v1540_v32 = vadd.f32 %v2659_v26, %v3625_v54  ;;  %v2662_v33 = vadd.f32 %v2661_v31, %v2660_v28  ;;  %v2749_v35 = vpop.f32.mrb[39].mxu1 }
 0x147   : > { %v2750_v37 = vadd.f32 %v2749_v35, %v2748_v30 }
 0x148   : > { %v3682_v38 = vadd.f32 %v2747_v29, %v1540_v32  ;;  %v1543_v39 = vadd.f32 %v2662_v33, %v3625_v54 }
 0x14a   : > { %v3685_v40 = vadd.f32 %v2750_v37, %v1543_v39  ;;  %v2663_v42 = vpop.f32.mrb[40].mxu0 }
 0x14b   : > { %v2751_v44 = vpop.f32.mrb[40].mxu1  ;;  %v2664_v45 = vpop.f32.mrb[41].mxu0 }
 0x14c   : > { %v2665_v46 = vadd.f32 %v2664_v45, %v2663_v42  ;;  %v2752_v47 = vpop.f32.mrb[41].mxu1  ;;  %v2666_v48 = vpop.f32.mrb[42].mxu0 }
 0x14d   : > { %v2753_v49 = vadd.f32 %v2752_v47, %v2751_v44  ;;  %v2754_v51 = vpop.f32.mrb[42].mxu1  ;;  %v2667_v53 = vpop.f32.mrb[43].mxu0 }
 0x14e   : > { %v1548_v55 = vadd.f32 %v2665_v46, %v3625_v54  ;;  %v2668_v56 = vadd.f32 %v2667_v53, %v2666_v48  ;;  %v2755_v57 = vpop.f32.mrb[43].mxu1 }
 0x14f   : > { %v2756_v58 = vadd.f32 %v2755_v57, %v2754_v51 }
 0x150   : > { %v3688_v59 = vadd.f32 %v2753_v49, %v1548_v55  ;;  %v1551_v61 = vadd.f32 %v2668_v56, %v3625_v54 }
 0x152   : > { %v3691_v63 = vadd.f32 %v2756_v58, %v1551_v61  ;;  %v2669_v0 = vpop.f32.mrb[44].mxu0 }
 0x153   : > { %v2757_v1 = vpop.f32.mrb[44].mxu1  ;;  %v2670_v3 = vpop.f32.mrb[45].mxu0 }
 0x154   : > { %v2671_v6 = vadd.f32 %v2670_v3, %v2669_v0  ;;  %v2758_v8 = vpop.f32.mrb[45].mxu1  ;;  %v2672_v9 = vpop.f32.mrb[46].mxu0 }
 0x155   : > { %v2759_v10 = vadd.f32 %v2758_v8, %v2757_v1  ;;  %v2760_v11 = vpop.f32.mrb[46].mxu1  ;;  %v2673_v12 = vpop.f32.mrb[47].mxu0 }
 0x156   : > { %v1556_v13 = vadd.f32 %v2671_v6, %v3625_v54  ;;  %v2674_v14 = vadd.f32 %v2673_v12, %v2672_v9  ;;  %v2761_v15 = vpop.f32.mrb[47].mxu1 }
 0x157   : > { %v2762_v17 = vadd.f32 %v2761_v15, %v2760_v11 }
 0x158   : > { %v3694_v21 = vadd.f32 %v2759_v10, %v1556_v13  ;;  %v1559_v22 = vadd.f32 %v2674_v14, %v3625_v54 }
 0x15a   : > { %v3697_v24 = vadd.f32 %v2762_v17, %v1559_v22  ;;  %v2779_v26 = vpop.f32.mrb[48].mxu0 }
 0x15b   : > { %v2867_v27 = vpop.f32.mrb[48].mxu1  ;;  %v2780_v28 = vpop.f32.mrb[49].mxu0 }
 0x15c   : > { %v2781_v29 = vadd.f32 %v2780_v28, %v2779_v26  ;;  %v2868_v30 = vpop.f32.mrb[49].mxu1  ;;  %v2782_v31 = vpop.f32.mrb[50].mxu0 }
 0x15d   : > { %v2869_v32 = vadd.f32 %v2868_v30, %v2867_v27  ;;  %v2870_v33 = vpop.f32.mrb[50].mxu1  ;;  %v2783_v35 = vpop.f32.mrb[51].mxu0 }
 0x15e   : > { %v1726_v37 = vadd.f32 %v2781_v29, %v3628_v2  ;;  %v2784_v39 = vadd.f32 %v2783_v35, %v2782_v31  ;;  %v2871_v42 = vpop.f32.mrb[51].mxu1 }
 0x15f   : > { %v2872_v44 = vadd.f32 %v2871_v42, %v2870_v33 }
 0x160   : > { %v1729_v45 = vadd.f32 %v2784_v39, %v3631_v4  ;;  %v3701_v46 = vadd.f32 %v2869_v32, %v1726_v37 }
 0x162   : > { %v2785_v54 = vpop.f32.mrb[52].mxu0  ;;  %v3703_v47 = vadd.f32 %v2872_v44, %v1729_v45 }
 0x163   : > { %v2873_v48 = vpop.f32.mrb[52].mxu1  ;;  %v2786_v49 = vpop.f32.mrb[53].mxu0 }
 0x164   : > { %v2787_v51 = vadd.f32 %v2786_v49, %v2785_v54  ;;  %v2874_v53 = vpop.f32.mrb[53].mxu1  ;;  %v2788_v55 = vpop.f32.mrb[54].mxu0 }
 0x165   : > { %v2875_v56 = vadd.f32 %v2874_v53, %v2873_v48  ;;  %v2876_v57 = vpop.f32.mrb[54].mxu1  ;;  %v2789_v58 = vpop.f32.mrb[55].mxu0 }
 0x166   : > { %v1734_v2 = vadd.f32 %v2787_v51, %v3634_v18  ;;  %v2790_v61 = vadd.f32 %v2789_v58, %v2788_v55  ;;  %v2877_v0 = vpop.f32.mrb[55].mxu1 }
 0x167   : > { %v2878_v1 = vadd.f32 %v2877_v0, %v2876_v57 }
 0x168   : > { %v1737_v4 = vadd.f32 %v2790_v61, %v3637_v20  ;;  %v3707_v3 = vadd.f32 %v2875_v56, %v1734_v2 }
 0x16a   : > { %v2791_v6 = vpop.f32.mrb[56].mxu0  ;;  %v3709_v8 = vadd.f32 %v2878_v1, %v1737_v4 }
 0x16b   : > { %v2879_v9 = vpop.f32.mrb[56].mxu1  ;;  %v2792_v10 = vpop.f32.mrb[57].mxu0 }
 0x16c   : > { %v2793_v11 = vadd.f32 %v2792_v10, %v2791_v6  ;;  %v2880_v12 = vpop.f32.mrb[57].mxu1  ;;  %v2794_v13 = vpop.f32.mrb[58].mxu0 }
 0x16d   : > { %v2881_v14 = vadd.f32 %v2880_v12, %v2879_v9  ;;  %v2882_v15 = vpop.f32.mrb[58].mxu1  ;;  %v2795_v17 = vpop.f32.mrb[59].mxu0 }
 0x16e   : > { %v1742_v18 = vadd.f32 %v2793_v11, %v3640_v34  ;;  %v2796_v22 = vadd.f32 %v2795_v17, %v2794_v13  ;;  %v2883_v26 = vpop.f32.mrb[59].mxu1 }
 0x16f   : > { %v2884_v27 = vadd.f32 %v2883_v26, %v2882_v15 }
 0x170   : > { %v1745_v20 = vadd.f32 %v2796_v22, %v3643_v36  ;;  %v3713_v28 = vadd.f32 %v2881_v14, %v1742_v18 }
 0x172   : > { %v2797_v29 = vpop.f32.mrb[60].mxu0  ;;  %v3715_v30 = vadd.f32 %v2884_v27, %v1745_v20 }
 0x173   : > { %v2885_v31 = vpop.f32.mrb[60].mxu1  ;;  %v2798_v32 = vpop.f32.mrb[61].mxu0 }
 0x174   : > { %v2799_v33 = vadd.f32 %v2798_v32, %v2797_v29  ;;  %v2886_v35 = vpop.f32.mrb[61].mxu1  ;;  %v2800_v37 = vpop.f32.mrb[62].mxu0 }
 0x175   : > { %v2887_v39 = vadd.f32 %v2886_v35, %v2885_v31  ;;  %v2888_v42 = vpop.f32.mrb[62].mxu1  ;;  %v2801_v44 = vpop.f32.mrb[63].mxu0 }
 0x176   : > { %v1750_v34 = vadd.f32 %v2799_v33, %v3646_v50  ;;  %v2802_v45 = vadd.f32 %v2801_v44, %v2800_v37  ;;  %v2889_v54 = vpop.f32.mrb[63].mxu1 }
 0x177   : > { %v2890_v48 = vadd.f32 %v2889_v54, %v2888_v42 }
 0x178   : > { %v1753_v36 = vadd.f32 %v2802_v45, %v3649_v52  ;;  %v3719_v49 = vadd.f32 %v2887_v39, %v1750_v34 }
 0x17a   : > { %v2803_v51 = vpop.f32.mrb[64].mxu0  ;;  %v3721_v53 = vadd.f32 %v2890_v48, %v1753_v36 }
 0x17b   : > { %v2891_v55 = vpop.f32.mrb[64].mxu1  ;;  %v2804_v56 = vpop.f32.mrb[65].mxu0 }
 0x17c   : > { %v2805_v57 = vadd.f32 %v2804_v56, %v2803_v51  ;;  %v2892_v58 = vpop.f32.mrb[65].mxu1  ;;  %v2806_v2 = vpop.f32.mrb[66].mxu0 }
 0x17d   : > { %v2893_v61 = vadd.f32 %v2892_v58, %v2891_v55  ;;  %v2894_v0 = vpop.f32.mrb[66].mxu1  ;;  %v2807_v1 = vpop.f32.mrb[67].mxu0 }
 0x17e   : > { %v1758_v50 = vadd.f32 %v2805_v57, %v3652_v5  ;;  %v2808_v4 = vadd.f32 %v2807_v1, %v2806_v2  ;;  %v2895_v6 = vpop.f32.mrb[67].mxu1 }
 0x17f   : > { %v2896_v9 = vadd.f32 %v2895_v6, %v2894_v0 }
 0x180   : > { %v1761_v52 = vadd.f32 %v2808_v4, %v3655_v7  ;;  %v3725_v10 = vadd.f32 %v2893_v61, %v1758_v50 }
 0x182   : > { %v2809_v11 = vpop.f32.mrb[68].mxu0  ;;  %v3727_v12 = vadd.f32 %v2896_v9, %v1761_v52 }
 0x183   : > { %v2897_v13 = vpop.f32.mrb[68].mxu1  ;;  %v2810_v14 = vpop.f32.mrb[69].mxu0 }
 0x184   : > { %v2811_v15 = vadd.f32 %v2810_v14, %v2809_v11  ;;  %v2898_v17 = vpop.f32.mrb[69].mxu1  ;;  %v2812_v18 = vpop.f32.mrb[70].mxu0 }
 0x185   : > { %v2899_v22 = vadd.f32 %v2898_v17, %v2897_v13  ;;  %v2900_v26 = vpop.f32.mrb[70].mxu1  ;;  %v2813_v27 = vpop.f32.mrb[71].mxu0 }
 0x186   : > { %v1766_v5 = vadd.f32 %v2811_v15, %v3658_v23  ;;  %v2814_v20 = vadd.f32 %v2813_v27, %v2812_v18  ;;  %v2901_v29 = vpop.f32.mrb[71].mxu1 }
 0x187   : > { %v2902_v31 = vadd.f32 %v2901_v29, %v2900_v26 }
 0x188   : > { %v1769_v7 = vadd.f32 %v2814_v20, %v3661_v25  ;;  %v3731_v32 = vadd.f32 %v2899_v22, %v1766_v5 }
 0x18a   : > { %v2815_v33 = vpop.f32.mrb[72].mxu0  ;;  %v3733_v35 = vadd.f32 %v2902_v31, %v1769_v7 }
 0x18b   : > { %v2903_v37 = vpop.f32.mrb[72].mxu1  ;;  %v2816_v39 = vpop.f32.mrb[73].mxu0 }
 0x18c   : > { %v2817_v42 = vadd.f32 %v2816_v39, %v2815_v33  ;;  %v2904_v44 = vpop.f32.mrb[73].mxu1  ;;  %v2818_v34 = vpop.f32.mrb[74].mxu0 }
 0x18d   : > { %v2905_v45 = vadd.f32 %v2904_v44, %v2903_v37  ;;  %v2906_v54 = vpop.f32.mrb[74].mxu1  ;;  %v2819_v48 = vpop.f32.mrb[75].mxu0 }
 0x18e   : > { %v1774_v23 = vadd.f32 %v2817_v42, %v3664_v41  ;;  %v2820_v36 = vadd.f32 %v2819_v48, %v2818_v34  ;;  %v2907_v51 = vpop.f32.mrb[75].mxu1 }
 0x18f   : > { %v2908_v55 = vadd.f32 %v2907_v51, %v2906_v54 }
 0x190   : > { %v1777_v25 = vadd.f32 %v2820_v36, %v3667_v43  ;;  %v3737_v56 = vadd.f32 %v2905_v45, %v1774_v23 }
 0x192   : > { %v2821_v57 = vpop.f32.mrb[76].mxu0  ;;  %v3739_v58 = vadd.f32 %v2908_v55, %v1777_v25 }
 0x193   : > { %v2909_v2 = vpop.f32.mrb[76].mxu1  ;;  %v2822_v61 = vpop.f32.mrb[77].mxu0 }
 0x194   : > { %v2823_v0 = vadd.f32 %v2822_v61, %v2821_v57  ;;  %v2910_v1 = vpop.f32.mrb[77].mxu1  ;;  %v2824_v50 = vpop.f32.mrb[78].mxu0 }
 0x195   : > { %v2911_v4 = vadd.f32 %v2910_v1, %v2909_v2  ;;  %v2912_v6 = vpop.f32.mrb[78].mxu1  ;;  %v2825_v9 = vpop.f32.mrb[79].mxu0 }
 0x196   : > { %v1782_v41 = vadd.f32 %v2823_v0, %v3670_v60  ;;  %v2826_v52 = vadd.f32 %v2825_v9, %v2824_v50  ;;  %v2913_v11 = vpop.f32.mrb[79].mxu1 }
 0x197   : > { %v2914_v13 = vadd.f32 %v2913_v11, %v2912_v6 }
 0x198   : > { %v1785_v43 = vadd.f32 %v2826_v52, %v3673_v62  ;;  %v3743_v14 = vadd.f32 %v2911_v4, %v1782_v41 }
 0x19a   : > { %v2827_v15 = vpop.f32.mrb[80].mxu0  ;;  %v3745_v17 = vadd.f32 %v2914_v13, %v1785_v43 }
 0x19b   : > { %v2915_v18 = vpop.f32.mrb[80].mxu1  ;;  %v2828_v22 = vpop.f32.mrb[81].mxu0 }
 0x19c   : > { %v2829_v26 = vadd.f32 %v2828_v22, %v2827_v15  ;;  %v2916_v27 = vpop.f32.mrb[81].mxu1  ;;  %v2830_v5 = vpop.f32.mrb[82].mxu0 }
 0x19d   : > { %v2917_v20 = vadd.f32 %v2916_v27, %v2915_v18  ;;  %v2918_v29 = vpop.f32.mrb[82].mxu1  ;;  %v2831_v31 = vpop.f32.mrb[83].mxu0 }
 0x19e   : > { %v1790_v60 = vadd.f32 %v2829_v26, %v3676_v16  ;;  %v2832_v7 = vadd.f32 %v2831_v31, %v2830_v5  ;;  %v2919_v33 = vpop.f32.mrb[83].mxu1 }
 0x19f   : > { %v2920_v37 = vadd.f32 %v2919_v33, %v2918_v29 }
 0x1a0   : > { %v1793_v62 = vadd.f32 %v2832_v7, %v3679_v19  ;;  %v3749_v39 = vadd.f32 %v2917_v20, %v1790_v60 }
 0x1a2   : > { %v2833_v42 = vpop.f32.mrb[84].mxu0  ;;  %v3751_v44 = vadd.f32 %v2920_v37, %v1793_v62 }
 0x1a3   : > { %v2921_v34 = vpop.f32.mrb[84].mxu1  ;;  %v2834_v45 = vpop.f32.mrb[85].mxu0 }
 0x1a4   : > { %v2835_v54 = vadd.f32 %v2834_v45, %v2833_v42  ;;  %v2922_v48 = vpop.f32.mrb[85].mxu1  ;;  %v2836_v23 = vpop.f32.mrb[86].mxu0 }
 0x1a5   : > { %v2923_v36 = vadd.f32 %v2922_v48, %v2921_v34  ;;  %v2924_v51 = vpop.f32.mrb[86].mxu1  ;;  %v2837_v55 = vpop.f32.mrb[87].mxu0 }
 0x1a6   : > { %v1798_v16 = vadd.f32 %v2835_v54, %v3682_v38  ;;  %v2838_v25 = vadd.f32 %v2837_v55, %v2836_v23  ;;  %v2925_v57 = vpop.f32.mrb[87].mxu1 }
 0x1a7   : > { %v2926_v2 = vadd.f32 %v2925_v57, %v2924_v51 }
 0x1a8   : > { %v1801_v19 = vadd.f32 %v2838_v25, %v3685_v40  ;;  %v3755_v61 = vadd.f32 %v2923_v36, %v1798_v16 }
 0x1aa   : > { %v2839_v0 = vpop.f32.mrb[88].mxu0  ;;  %v3757_v1 = vadd.f32 %v2926_v2, %v1801_v19 }
 0x1ab   : > { %v2927_v50 = vpop.f32.mrb[88].mxu1  ;;  %v2840_v4 = vpop.f32.mrb[89].mxu0 }
 0x1ac   : > { %v2841_v6 = vadd.f32 %v2840_v4, %v2839_v0  ;;  %v2928_v9 = vpop.f32.mrb[89].mxu1  ;;  %v2842_v41 = vpop.f32.mrb[90].mxu0 }
 0x1ad   : > { %v2929_v52 = vadd.f32 %v2928_v9, %v2927_v50  ;;  %v2930_v11 = vpop.f32.mrb[90].mxu1  ;;  %v2843_v13 = vpop.f32.mrb[91].mxu0 }
 0x1ae   : > { %v1806_v38 = vadd.f32 %v2841_v6, %v3688_v59  ;;  %v2844_v43 = vadd.f32 %v2843_v13, %v2842_v41  ;;  %v2931_v15 = vpop.f32.mrb[91].mxu1 }
 0x1af   : > { %v2932_v18 = vadd.f32 %v2931_v15, %v2930_v11 }
 0x1b0   : > { %v1809_v40 = vadd.f32 %v2844_v43, %v3691_v63  ;;  %v3761_v22 = vadd.f32 %v2929_v52, %v1806_v38 }
 0x1b2   : > { %v2845_v26 = vpop.f32.mrb[92].mxu0  ;;  %v3763_v27 = vadd.f32 %v2932_v18, %v1809_v40 }
 0x1b3   : > { %v2933_v5 = vpop.f32.mrb[92].mxu1  ;;  %v2846_v20 = vpop.f32.mrb[93].mxu0 }
 0x1b4   : > { %v2847_v29 = vadd.f32 %v2846_v20, %v2845_v26  ;;  %v2934_v31 = vpop.f32.mrb[93].mxu1  ;;  %v2848_v60 = vpop.f32.mrb[94].mxu0 }
 0x1b5   : > { %v2935_v7 = vadd.f32 %v2934_v31, %v2933_v5  ;;  %v2936_v33 = vpop.f32.mrb[94].mxu1  ;;  %v2849_v37 = vpop.f32.mrb[95].mxu0 }
 0x1b6   : > { %v1814_v59 = vadd.f32 %v2847_v29, %v3694_v21  ;;  %v2850_v62 = vadd.f32 %v2849_v37, %v2848_v60  ;;  %v2937_v42 = vpop.f32.mrb[95].mxu1 }
 0x1b7   : > { %v2938_v34 = vadd.f32 %v2937_v42, %v2936_v33 }
 0x1b8   : > { %v1817_v63 = vadd.f32 %v2850_v62, %v3697_v24  ;;  %v3767_v45 = vadd.f32 %v2935_v7, %v1814_v59 }
 0x1ba   : > { %v2977_v54 = vpop.f32.mrb[96].mxu0  ;;  %v3769_v48 = vadd.f32 %v2938_v34, %v1817_v63 }
 0x1bb   : > { %v1992_v23 = vadd.f32 %v2977_v54, %v3707_v3  ;;  %v2989_v36 = vpop.f32.mrb[96].mxu1  ;;  %v1983_v51 = vpop.f32.mrb[97].mxu0 }
 0x1bc   : > { %v2040_v55 = vadd.f32 %v2989_v36, %v3743_v14  ;;  %v1984_v16 = vadd.f32 %v1983_v51, %v3701_v46  ;;  %v2031_v21 = vpop.f32.mrb[97].mxu1  ;;  %v2978_v25 = vpop.f32.mrb[98].mxu0 }
 0x1bd   : > { %v2032_v57 = vadd.f32 %v2031_v21, %v3737_v56  ;;  %v1995_v24 = vadd.f32 %v2978_v25, %v3709_v8  ;;  %v2990_v2 = vpop.f32.mrb[98].mxu1  ;;  %v1986_v19 = vpop.f32.mrb[99].mxu0  ;;  %v2080_v4 = vmax.f32 %v1992_v23, 0.0 }
 0x1be   : > { %v2043_v0 = vadd.f32 %v2990_v2, %v3745_v17  ;;  %v1987_v50 = vadd.f32 %v1986_v19, %v3703_v47  ;;  %v2034_v3 = vpop.f32.mrb[99].mxu1  ;;  %v2092_v9 = vmax.f32 %v2040_v55, 0.0  ;;  %v2078_v46 = vmax.f32 %v1984_v16, 0.0 }
 0x1bf   : > { %v2081_v6 = vmax.f32 %v1995_v24, 0.0  ;;  %v2035_v14 = vadd.f32 %v2034_v3, %v3739_v58  ;;  %v2090_v17 = vmax.f32 %v2032_v57, 0.0 }
 0x1c0   : > { %v2093_v8 = vmax.f32 %v2043_v0, 0.0  ;;  %v2079_v56 = vmax.f32 %v1987_v50, 0.0 }
 0x1c1   : > { %v2524_v41 = vpack.c.bf16 %v2081_v6, %v2080_v4  ;;  %v2091_v47 = vmax.f32 %v2035_v14, 0.0 }
 0x1c2   : > { %v2554_v52 = vpack.c.bf16 %v2093_v8, %v2092_v9  ;;  %v2519_v11 = vpack.c.bf16 %v2079_v56, %v2078_v46  ;;  %v2981_v13 = vpop.f32.mrb[100].mxu0 }
 0x1c3   : > { %2576 = vst [vmem:[%s3783_s20 + $0x8] sm:$0xff] %v2524_v41   ;;  %v2549_v58 = vpack.c.bf16 %v2091_v47, %v2090_v17  ;;  %v2008_v38 = vadd.f32 %v2981_v13, %v3719_v49  ;;  %v2993_v43 = vpop.f32.mrb[100].mxu1  ;;  %v1999_v15 = vpop.f32.mrb[101].mxu0 }
 0x1c4   : > { %2582 = vst [vmem:[%s3783_s20 + $0x38] sm:$0xff] %v2554_v52   ;;  %2520 = vst [vmem:[%s3783_s20] sm:$0xff] %v2519_v11   ;;  %v2056_v18 = vadd.f32 %v2993_v43, %v3755_v61  ;;  %v2000_v40 = vadd.f32 %v1999_v15, %v3713_v28  ;;  %v2047_v26 = vpop.f32.mrb[101].mxu1  ;;  %v2982_v5 = vpop.f32.mrb[102].mxu0 }
 0x1c5   : > { %2581 = vst [vmem:[%s3783_s20 + $0x30] sm:$0xff] %v2549_v58   ;;  %v2048_v20 = vadd.f32 %v2047_v26, %v3749_v39  ;;  %v2011_v29 = vadd.f32 %v2982_v5, %v3721_v53  ;;  %v2994_v31 = vpop.f32.mrb[102].mxu1  ;;  %v2002_v60 = vpop.f32.mrb[103].mxu0  ;;  %v2084_v37 = vmax.f32 %v2008_v38, 0.0 }
 0x1c6   : > { %v2059_v7 = vadd.f32 %v2994_v31, %v3757_v1  ;;  %v2003_v49 = vadd.f32 %v2002_v60, %v3715_v30  ;;  %v2050_v33 = vpop.f32.mrb[103].mxu1  ;;  %v2096_v28 = vmax.f32 %v2056_v18, 0.0  ;;  %v2082_v62 = vmax.f32 %v2000_v40, 0.0 }
 0x1c7   : > { %v2085_v59 = vmax.f32 %v2011_v29, 0.0  ;;  %v2051_v61 = vadd.f32 %v2050_v33, %v3751_v44  ;;  %v2094_v34 = vmax.f32 %v2048_v20, 0.0 }
 0x1c8   : > { %v2097_v42 = vmax.f32 %v2059_v7, 0.0  ;;  %v2083_v39 = vmax.f32 %v2003_v49, 0.0 }
 0x1c9   : > { %v2534_v53 = vpack.c.bf16 %v2085_v59, %v2084_v37  ;;  %v2095_v63 = vmax.f32 %v2051_v61, 0.0 }
 0x1ca   : > { %v2564_v54 = vpack.c.bf16 %v2097_v42, %v2096_v28  ;;  %v2529_v1 = vpack.c.bf16 %v2083_v39, %v2082_v62  ;;  %v2985_v23 = vpop.f32.mrb[104].mxu0 }
 0x1cb   : > { %2578 = vst [vmem:[%s3783_s20 + $0x18] sm:$0xff] %v2534_v53   ;;  %v2559_v30 = vpack.c.bf16 %v2095_v63, %v2094_v34  ;;  %v2024_v36 = vadd.f32 %v2985_v23, %v3731_v32  ;;  %v2997_v51 = vpop.f32.mrb[104].mxu1  ;;  %v2015_v55 = vpop.f32.mrb[105].mxu0 }
 0x1cc   : > { %2584 = vst [vmem:[%s3783_s20 + $0x48] sm:$0xff] %v2564_v54   ;;  %2577 = vst [vmem:[%s3783_s20 + $0x10] sm:$0xff] %v2529_v1   ;;  %v2072_v44 = vadd.f32 %v2997_v51, %v3767_v45  ;;  %v2016_v16 = vadd.f32 %v2015_v55, %v3725_v10  ;;  %v2063_v21 = vpop.f32.mrb[105].mxu1  ;;  %v2986_v25 = vpop.f32.mrb[106].mxu0 }
 0x1cd   : > { %2583 = vst [vmem:[%s3783_s20 + $0x40] sm:$0xff] %v2559_v30   ;;  %v2064_v57 = vadd.f32 %v2063_v21, %v3761_v22  ;;  %v2027_v24 = vadd.f32 %v2986_v25, %v3733_v35  ;;  %v2998_v2 = vpop.f32.mrb[106].mxu1  ;;  %v2018_v19 = vpop.f32.mrb[107].mxu0  ;;  %v2088_v45 = vmax.f32 %v2024_v36, 0.0 }
 0x1ce   : > { %v2075_v32 = vadd.f32 %v2998_v2, %v3769_v48  ;;  %v2019_v0 = vadd.f32 %v2018_v19, %v3727_v12  ;;  %v2066_v50 = vpop.f32.mrb[107].mxu1  ;;  %v2100_v4 = vmax.f32 %v2072_v44, 0.0  ;;  %v2086_v6 = vmax.f32 %v2016_v16, 0.0 }
 0x1cf   : > { %v2089_v10 = vmax.f32 %v2027_v24, 0.0  ;;  %v2067_v3 = vadd.f32 %v2066_v50, %v3763_v27  ;;  %v2098_v35 = vmax.f32 %v2064_v57, 0.0 }
 0x1d0   : > { %v2101_v22 = vmax.f32 %v2075_v32, 0.0  ;;  %v2087_v14 = vmax.f32 %v2019_v0, 0.0 }
 0x1d1   : > { %v2544_v9 = vpack.c.bf16 %v2089_v10, %v2088_v45  ;;  %v2099_v46 = vmax.f32 %v2067_v3, 0.0 }
 0x1d2   : > { %v2574_v8 = vpack.c.bf16 %v2101_v22, %v2100_v4  ;;  %v2539_v56 = vpack.c.bf16 %v2087_v14, %v2086_v6 }
 0x1d3   : > { %2580 = vst [vmem:[%s3783_s20 + $0x28] sm:$0xff] %v2544_v9   ;;  %v2569_v48 = vpack.c.bf16 %v2099_v46, %v2098_v35 }
 0x1d4   : > { %2586 = vst [vmem:[%s3783_s20 + $0x58] sm:$0xff] %v2574_v8   ;;  %2579 = vst [vmem:[%s3783_s20 + $0x20] sm:$0xff] %v2539_v56  }
 0x1d5   : > { %2585 = vst [vmem:[%s3783_s20 + $0x50] sm:$0xff] %v2569_v48  }
 0x1d6 PF: > { %s13_s12 = sadd.s32 1, %s3258_s12  }
 0x1d7   : > { %p10_p4 = scmp.ge.s32.totalorder %s13_s12, 4  }
 0x1d9   :  { %12 = sbr.rel (!%p10_p4) target bundleno = 1 (0x1), region = 62 }

// kernel: pcb_forward.27
= control target key start
LH: loop header
LB: loop body
LE: loop exit
PB: predicated region body
PF: predicated region fallthrough
CT: control target
= control target key end

     0   :  { %s1787_s12 = smov 0   ;;  %s2080_s0 = inlined_call_operand.vmem [shape: bf16[96,1152], index: 0, kind: input, shape index: {}]   ;;  %s2081_s1 = inlined_call_operand.vmem [shape: bf16[1152,128], index: 1, kind: input, shape index: {}]   ;;  %s2082_s2 = inlined_call_operand.vmem [shape: f32[1,128], index: 2, kind: input, shape index: {}]   ;;  %s2083_s3 = inlined_call_operand.vmem [shape: bf16[96,128], index: 3, kind: output, shape index: {}]  }
   0x1 LB: > { %s1306_s13 = sadd.s32 4294967295, %s1763_s12   ;;  %p1310_p0 = scmp.ge.s32.totalorder %s1763_s12, 1  ;;  %s1763_s12 = sphi %s1787_s12, %s13_s12  }
   0x2   : > { %p139_p1 = scmp.lt.s32.totalorder %s1763_s12, 3 }
   0x4   : > { %p140_p2 = pnand %p1310_p0, %p139_p1 }
   0x5   : > { %v1646_v0 = vld [vmem:[%s2081_s1 + $0x40] sm:$0xff] (!%p140_p2)   ;;  %v1650_v4 = vld [vmem:[%s2081_s1 + $0x48] sm:$0xff] (!%p140_p2)   ;;  %v1654_v8 = vld [vmem:[%s2081_s1 + $0x50] sm:$0xff] (!%p140_p2)   ;;  %s164_s17 = smul.u32 (!%p140_p2), 6, %s1306_s13  ;;  %vm1766_vm0 = vmmov (!%p140_p2), 0  }
   0x6   : > { %143 = sbr.rel (%p140_p2) target bundleno = 333 (0x14d), region = 32  ;;  %v1647_v1 = vld [vmem:[%s2081_s1 + $0xc0] sm:$0xff] (!%p140_p2)   ;;  %1444 = vmatprep.subr.bf16.mxu0 (!%p140_p2), %v1646_v0  ;;  %v1651_v5 = vld [vmem:[%s2081_s1 + $0xc8] sm:$0xff] (!%p140_p2)   ;;  %v1655_v9 = vld [vmem:[%s2081_s1 + $0xd0] sm:$0xff] (!%p140_p2)  }
   0x7   : > { %v1648_v2 = vld [vmem:[%s2081_s1] sm:$0xff] (!%p140_p2)   ;;  %1478 = vmatprep.subr.bf16.mxu1 (!%p140_p2), %v1647_v1  ;;  %v1652_v6 = vld [vmem:[%s2081_s1 + $0x8] sm:$0xff] (!%p140_p2)   ;;  %v1656_v10 = vld [vmem:[%s2081_s1 + $0x10] sm:$0xff] (!%p140_p2)   ;;  %p165_p3 = scmp.lt.s32.totalorder (!%p140_p2), %s164_s17, 11 }
   0x8   : > { %v1649_v3 = vld [vmem:[%s2081_s1 + $0x80] sm:$0xff] (!%p140_p2)   ;;  %1445 = vmatpush3.bf16.msra.mxu0 (!%p140_p2), %v1648_v2  ;;  %v1653_v7 = vld [vmem:[%s2081_s1 + $0x88] sm:$0xff] (!%p140_p2)   ;;  %v1657_v11 = vld [vmem:[%s2081_s1 + $0x90] sm:$0xff] (!%p140_p2)  }
   0x9   : > { %1479 = vmatpush3.bf16.msra.mxu1 (!%p140_p2), %v1649_v3  ;;  %1446 = vmatprep.subr.bf16.mxu0 (!%p140_p2), %v1650_v4  ;;  %v1658_v12 = vld [vmem:[%s2081_s1 + $0x58] sm:$0xff] (!%p140_p2)   ;;  %v1662_v16 = vld [vmem:[%s2081_s1 + $0x60] sm:$0xff] (!%p140_p2)   ;;  %v1666_v20 = vld [vmem:[%s2081_s1 + $0x68] sm:$0xff] (!%p140_p2)  }
   0xa   : > { %1480 = vmatprep.subr.bf16.mxu1 (!%p140_p2), %v1651_v5  ;;  %v1659_v13 = vld [vmem:[%s2081_s1 + $0xd8] sm:$0xff] (!%p140_p2)   ;;  %v1663_v17 = vld [vmem:[%s2081_s1 + $0xe0] sm:$0xff] (!%p140_p2)   ;;  %v1667_v21 = vld [vmem:[%s2081_s1 + $0xe8] sm:$0xff] (!%p140_p2)  }
   0xb   : > { %v1660_v14 = vld [vmem:[%s2081_s1 + $0x18] sm:$0xff] (!%p140_p2)   ;;  %v1664_v18 = vld [vmem:[%s2081_s1 + $0x20] sm:$0xff] (!%p140_p2)   ;;  %v1668_v22 = vld [vmem:[%s2081_s1 + $0x28] sm:$0xff] (!%p140_p2)  }
   0xc   : > { %1447 = vmatpush3.bf16.msra.mxu0 (!%p140_p2), %v1652_v6  ;;  %v1661_v15 = vld [vmem:[%s2081_s1 + $0x98] sm:$0xff] (!%p140_p2)   ;;  %v1665_v19 = vld [vmem:[%s2081_s1 + $0xa0] sm:$0xff] (!%p140_p2)   ;;  %v1669_v23 = vld [vmem:[%s2081_s1 + $0xa8] sm:$0xff] (!%p140_p2)  }
   0xd   : > { %1481 = vmatpush3.bf16.msra.mxu1 %v1653_v7  ;;  %1448 = vmatprep.subr.bf16.mxu0 %v1654_v8  ;;  %s2085_s17 = smov (!%p165_p3, %s164_s17), 11  ;;  %v1670_v24 = vld [vmem:[%s2081_s1 + $0x70] sm:$0xff]   ;;  %v1674_v28 = vld [vmem:[%s2081_s1 + $0x78] sm:$0xff]   ;;  %v1684_v36 = vld [vmem:[%s2081_s1 + $0x140] sm:$0xff]  }
   0xe   : > { %1482 = vmatprep.subr.bf16.mxu1 %v1655_v9  ;;  %v1671_v25 = vld [vmem:[%s2081_s1 + $0xf0] sm:$0xff]   ;;  %s1635_s16 = smul.u32 36, %s2085_s17  ;;  %v1675_v29 = vld [vmem:[%s2081_s1 + $0xf8] sm:$0xff]   ;;  %v1685_v37 = vld [vmem:[%s2081_s1 + $0x1c0] sm:$0xff]  }
   0xf   : > { %v1672_v26 = vld [vmem:[%s2081_s1 + $0x30] sm:$0xff]   ;;  %v1676_v30 = vld [vmem:[%s2081_s1 + $0x38] sm:$0xff]   ;;  %v1686_v38 = vld [vmem:[%s2081_s1 + $0x100] sm:$0xff]  }
  0x10   : > { %1449 = vmatpush3.bf16.msra.mxu0 %v1656_v10  ;;  %v1673_v27 = vld [vmem:[%s2081_s1 + $0xb0] sm:$0xff]   ;;  %s1893_s27 = scalar_lea.vmem %s2080_s0, %s1635_s16  ;;  %v1677_v31 = vld [vmem:[%s2081_s1 + $0xb8] sm:$0xff]   ;;  %v1687_v39 = vld [vmem:[%s2081_s1 + $0x180] sm:$0xff]  }
  0x11   : > { %1483 = vmatpush3.bf16.msra.mxu1 %v1657_v11  ;;  %1450 = vmatprep.subr.bf16.mxu0 %v1658_v12  ;;  %v1678_v32 = vld [vmem:[%s1893_s27] ss:$36 sps:$4 sm:$0xff]   ;;  %v1681_v34 = vld [vmem:[%s1893_s27 + $0x8] ss:$36 sps:$4 sm:$0xff]   ;;  %v1692_v44 = vld [vmem:[%s2081_s1 + $0x150] sm:$0xff]  }
  0x12   : > { %1484 = vmatprep.subr.bf16.mxu1 %v1659_v13  ;;  %v1680_v33 = vld [vmem:[%s1893_s27 + $0x4] ss:$36 sps:$4 sm:$0xff]   ;;  %v1683_v35 = vld [vmem:[%s1893_s27 + $0xc] ss:$36 sps:$4 sm:$0xff]   ;;  %v1699_v50 = vld [vmem:[%s2081_s1 + $0x158] sm:$0xff]  }
  0x13   : > { %961 = vmatprep.mubr.bf16.mxu0 %v1680_v33  ;;  %1018 = vmatprep.mubr.bf16.mxu1 %v1683_v35  ;;  %v1688_v40 = vld [vmem:[%s2081_s1 + $0x148] sm:$0xff]   ;;  %v1693_v45 = vld [vmem:[%s2081_s1 + $0x1d0] sm:$0xff]   ;;  %v1700_v51 = vld [vmem:[%s2081_s1 + $0x1d8] sm:$0xff]  }
  0x14   : > { %1451 = vmatpush3.bf16.msra.mxu0 %v1660_v14  ;;  %v1689_v41 = vld [vmem:[%s2081_s1 + $0x1c8] sm:$0xff]   ;;  %v1694_v46 = vld [vmem:[%s2081_s1 + $0x110] sm:$0xff]   ;;  %v1703_v53 = vld [vmem:[%s2081_s1 + $0x118] sm:$0xff]   ;;  %v1765_v14 = vmov 0.0  }
  0x15   : > { %1485 = vmatpush3.bf16.msra.mxu1 %v1661_v15  ;;  %1452 = vmatprep.subr.bf16.mxu0 %v1662_v16  ;;  %v1690_v42 = vld [vmem:[%s2081_s1 + $0x108] sm:$0xff]   ;;  %v1695_v47 = vld [vmem:[%s2081_s1 + $0x190] sm:$0xff]   ;;  %v1704_v54 = vld [vmem:[%s2081_s1 + $0x198] sm:$0xff]  }
  0x16   : > { %1486 = vmatprep.subr.bf16.mxu1 %v1663_v17  ;;  %v1691_v43 = vld [vmem:[%s2081_s1 + $0x188] sm:$0xff]   ;;  %v1701_v52 = vld [vmem:[%s1893_s27 + $0x54] ss:$36 sps:$4 sm:$0xff]   ;;  %v1706_v56 = vld [vmem:[%s2081_s1 + $0x160] sm:$0xff]  }
  0x17   : > { %v1696_v48 = vld [vmem:[%s1893_s27 + $0x4c] ss:$36 sps:$4 sm:$0xff]   ;;  %v1707_v57 = vld [vmem:[%s2081_s1 + $0x1e0] sm:$0xff]   ;;  %v1710_v60 = vld [vmem:[%s1893_s27 + $0x94] ss:$36 sps:$4 sm:$0xff]  }
  0x18   : > { %1453 = vmatpush3.bf16.msra.mxu0 %v1664_v18  ;;  %v1698_v49 = vld [vmem:[%s1893_s27 + $0x48] ss:$36 sps:$4 sm:$0xff]   ;;  %v1705_v55 = vld [vmem:[%s1893_s27 + $0x50] ss:$36 sps:$4 sm:$0xff]   ;;  %v1708_v58 = vld [vmem:[%s2081_s1 + $0x120] sm:$0xff]  }
  0x19   : > { %1487 = vmatpush3.bf16.msra.mxu1 %v1665_v19  ;;  %1454 = vmatprep.subr.bf16.mxu0 %v1666_v20  ;;  %v1709_v59 = vld [vmem:[%s2081_s1 + $0x1a0] sm:$0xff]   ;;  %v1712_v61 = vld [vmem:[%s1893_s27 + $0x90] ss:$36 sps:$4 sm:$0xff]   ;;  %v1713_v62 = vld [vmem:[%s2081_s1 + $0x168] sm:$0xff]  }
  0x1a   : > { %1488 = vmatprep.subr.bf16.mxu1 %v1667_v21  ;;  %v1714_v63 = vld [vmem:[%s2081_s1 + $0x1e8] sm:$0xff]   ;;  %v1715_v0 = vld [vmem:[%s1893_s27 + $0x9c] ss:$36 sps:$4 sm:$0xff]   ;;  %v1720_v4 = vld [vmem:[%s2081_s1 + $0x170] sm:$0xff]  }
  0x1b   : > { %v1717_v1 = vld [vmem:[%s2081_s1 + $0x128] sm:$0xff]   ;;  %v1719_v3 = vld [vmem:[%s1893_s27 + $0x98] ss:$36 sps:$4 sm:$0xff]   ;;  %v1721_v5 = vld [vmem:[%s2081_s1 + $0x1f0] sm:$0xff]  }
  0x1c   : > { %1455 = vmatpush3.bf16.msra.mxu0 %v1668_v22  ;;  %v1718_v2 = vld [vmem:[%s2081_s1 + $0x1a8] sm:$0xff]   ;;  %v1722_v6 = vld [vmem:[%s2081_s1 + $0x130] sm:$0xff]   ;;  %v1724_v8 = vld [vmem:[%s2081_s1 + $0x178] sm:$0xff]  }
  0x1d   : > { %1489 = vmatpush3.bf16.msra.mxu1 %v1669_v23  ;;  %1456 = vmatprep.subr.bf16.mxu0 %v1670_v24  ;;  %v1723_v7 = vld [vmem:[%s2081_s1 + $0x1b0] sm:$0xff]   ;;  %v1725_v9 = vld [vmem:[%s2081_s1 + $0x1f8] sm:$0xff]   ;;  %v1734_v17 = vld [vmem:[%s2081_s1 + $0x200] sm:$0xff]  }
  0x1e   : > { %1490 = vmatprep.subr.bf16.mxu1 %v1671_v25  ;;  %v1726_v10 = vld [vmem:[%s2081_s1 + $0x138] sm:$0xff]   ;;  %v1728_v12 = vld [vmem:[%s1893_s27 + $0x10] ss:$36 sps:$4 sm:$0xff]   ;;  %v1735_v18 = vld [vmem:[%s2081_s1 + $0x208] sm:$0xff]  }
  0x1f   : > { %v1727_v11 = vld [vmem:[%s2081_s1 + $0x1b8] sm:$0xff]   ;;  %v1739_v20 = vld [vmem:[%s1893_s27 + $0x64] ss:$36 sps:$4 sm:$0xff]   ;;  %v1741_v22 = vld [vmem:[%s2081_s1 + $0x210] sm:$0xff]  }
  0x20   : > { %1457 = vmatpush3.bf16.msra.mxu0 %v1672_v26  ;;  %v1730_v13 = vld [vmem:[%s1893_s27 + $0x14] ss:$36 sps:$4 sm:$0xff]   ;;  %v1733_v16 = vld [vmem:[%s1893_s27 + $0x1c] ss:$36 sps:$4 sm:$0xff]   ;;  %v1744_v24 = vld [vmem:[%s1893_s27 + $0xa4] ss:$36 sps:$4 sm:$0xff]  }
  0x21   : > { %1491 = vmatpush3.bf16.msra.mxu1 %v1673_v27  ;;  %1458 = vmatprep.subr.bf16.mxu0 %v1674_v28  ;;  %v1731_v15 = vld [vmem:[%s1893_s27 + $0x18] ss:$36 sps:$4 sm:$0xff]   ;;  %v1742_v23 = vld [vmem:[%s1893_s27 + $0x60] ss:$36 sps:$4 sm:$0xff]   ;;  %v1747_v25 = vld [vmem:[%s1893_s27 + $0xac] ss:$36 sps:$4 sm:$0xff]  }
  0x22   : > { %1492 = vmatprep.subr.bf16.mxu1 %v1675_v29  ;;  %v1736_v19 = vld [vmem:[%s1893_s27 + $0x5c] ss:$36 sps:$4 sm:$0xff]   ;;  %v1750_v29 = vld [vmem:[%s1893_s27 + $0xa8] ss:$36 sps:$4 sm:$0xff]   ;;  %v1756_v35 = vld [vmem:[%s1893_s27 + $0xb0] ss:$36 sps:$4 sm:$0xff]  }
  0x23   : > { %v1738_v21 = vld [vmem:[%s1893_s27 + $0x58] ss:$36 sps:$4 sm:$0xff]   ;;  %v1746_v27 = vld [vmem:[%s1893_s27 + $0xa0] ss:$36 sps:$4 sm:$0xff]  }
  0x24   : > { %1459 = vmatpush3.bf16.msra.mxu0 %v1676_v30  ;;  %v1743_v26 = vld [vmem:[%s2081_s1 + $0x218] sm:$0xff]   ;;  %v1749_v28 = vld [vmem:[%s2081_s1 + $0x220] sm:$0xff]   ;;  %v1751_v30 = vld [vmem:[%s2081_s1 + $0x228] sm:$0xff]  }
  0x25   : > { %1493 = vmatpush3.bf16.msra.mxu1 %v1677_v31  ;;  %1512 = vmatprep.subr.bf16.mxu0 %v1684_v36  ;;  %v1752_v31 = vld [vmem:[%s2081_s1 + $0x230] sm:$0xff]   ;;  %v1754_v33 = vld [vmem:[%s1893_s27 + $0x20] ss:$36 sps:$4 sm:$0xff]  }
  0x26   : > { %1546 = vmatprep.subr.bf16.mxu1 %v1685_v37 }
  0x27   : > { %962 = vmatmul.mubr.bf16.vlgmr.msra.gmra.mrb[0].mxu0 %v1678_v32  ;;  %v1753_v32 = vld [vmem:[%s2081_s1 + $0x238] sm:$0xff]  }
  0x28   : > { %1019 = vmatmul.mubr.bf16.vlgmr.msra.gmra.mrb[0].mxu1 %v1681_v34  ;;  %1513 = vmatpush3.bf16.msra.mxu0 %v1686_v38  ;;  %v1755_v34 = vld [vmem:[%s1893_s27 + $0x68] ss:$36 sps:$4 sm:$0xff]   ;;  %v1313_v38 = vld [vmem:[%s2082_s2] ss:$0 sm:$0xff]  ;;  %s1312_s27 = sshll.u32 %s2085_s17, 2 }
  0x29   : > { %1547 = vmatpush3.bf16.msra.mxu1 %v1687_v39  ;;  %1514 = vmatprep.subr.bf16.mxu0 %v1688_v40  ;;  %s175_s20 = scalar_lea.vmem %s2083_s3, %s1312_s27 }
  0x2a   : > { %1548 = vmatprep.subr.bf16.mxu1 %v1689_v41  ;;  %969 = vmatprep.mubr.bf16.mxu0 %v1696_v48 }
  0x2b   : > { %1026 = vmatprep.mubr.bf16.mxu1 %v1701_v52 }
  0x2c   : > { %1515 = vmatpush3.bf16.msra.mxu0 %v1690_v42 }
  0x2d   : > { %1549 = vmatpush3.bf16.msra.mxu1 %v1691_v43  ;;  %1516 = vmatprep.subr.bf16.mxu0 %v1692_v44 }
  0x2e   : > { %1550 = vmatprep.subr.bf16.mxu1 %v1693_v45 }
  0x2f   : > { %970 = vmatmul.mubr.bf16.gmra.mrb[4].mxu0 %v1698_v49 }
  0x30   : > { %1517 = vmatpush3.bf16.msra.mxu0 %v1694_v46  ;;  %1027 = vmatmul.mubr.bf16.gmra.mrb[4].mxu1 %v1705_v55 }
  0x31   : > { %1551 = vmatpush3.bf16.msra.mxu1 %v1695_v47  ;;  %1518 = vmatprep.subr.bf16.mxu0 %v1699_v50 }
  0x32   : > { %1552 = vmatprep.subr.bf16.mxu1 %v1700_v51  ;;  %977 = vmatprep.mubr.bf16.mxu0 %v1710_v60 }
  0x33   : > { %1034 = vmatprep.mubr.bf16.mxu1 %v1715_v0 }
  0x34   : > { %1519 = vmatpush3.bf16.msra.mxu0 %v1703_v53 }
  0x35   : > { %1553 = vmatpush3.bf16.msra.mxu1 %v1704_v54  ;;  %1520 = vmatprep.subr.bf16.mxu0 %v1706_v56 }
  0x36   : > { %1554 = vmatprep.subr.bf16.mxu1 %v1707_v57 }
  0x37   : > { %978 = vmatmul.mubr.bf16.gmra.mrb[8].mxu0 %v1712_v61 }
  0x38   : > { %1521 = vmatpush3.bf16.msra.mxu0 %v1708_v58  ;;  %1035 = vmatmul.mubr.bf16.gmra.mrb[8].mxu1 %v1719_v3 }
  0x39   : > { %1555 = vmatpush3.bf16.msra.mxu1 %v1709_v59  ;;  %1522 = vmatprep.subr.bf16.mxu0 %v1713_v62 }
  0x3a   : > { %1556 = vmatprep.subr.bf16.mxu1 %v1714_v63  ;;  %1075 = vmatprep.mubr.bf16.mxu0 %v1730_v13 }
  0x3b   : > { %1132 = vmatprep.mubr.bf16.mxu1 %v1733_v16 }
  0x3c   : > { %1523 = vmatpush3.bf16.msra.mxu0 %v1717_v1 }
  0x3d   : > { %1557 = vmatpush3.bf16.msra.mxu1 %v1718_v2  ;;  %1524 = vmatprep.subr.bf16.mxu0 %v1720_v4 }
  0x3e   : > { %1558 = vmatprep.subr.bf16.mxu1 %v1721_v5 }
  0x40   : > { %1525 = vmatpush3.bf16.msra.mxu0 %v1722_v6 }
  0x41   : > { %1559 = vmatpush3.bf16.msra.mxu1 %v1723_v7  ;;  %1526 = vmatprep.subr.bf16.mxu0 %v1724_v8 }
  0x42   : > { %1560 = vmatprep.subr.bf16.mxu1 %v1725_v9 }
  0x44   : > { %1527 = vmatpush3.bf16.msra.mxu0 %v1726_v10 }
  0x45   : > { %1561 = vmatpush3.bf16.msra.mxu1 %v1727_v11  ;;  %1591 = vmatprep.subr.bf16.mxu0 %v1765_v14 }
  0x46   : > { %1619 = vmatprep.subr.bf16.mxu1 %v1765_v14 }
  0x47   : > { %1076 = vmatmul.mubr.bf16.vlgmr.msra.gmra.mrb[12].mxu0 %v1728_v12 }
  0x48   : > { %1133 = vmatmul.mubr.bf16.vlgmr.msra.gmra.mrb[12].mxu1 %v1731_v15  ;;  %1592 = vmatpush3.bf16.msra.mxu0 %v1734_v17 }
  0x49   : > { %1627 = vmatpush3.bf16.msra.mxu1 %v1734_v17  ;;  %1593 = vmatprep.subr.bf16.mxu0 %v1765_v14 }
  0x4a   : > { %1620 = vmatprep.subr.bf16.mxu1 %v1765_v14  ;;  %1083 = vmatprep.mubr.bf16.mxu0 %v1736_v19 }
  0x4b   : > { %1140 = vmatprep.mubr.bf16.mxu1 %v1739_v20 }
  0x4c   : > { %1594 = vmatpush3.bf16.msra.mxu0 %v1735_v18 }
  0x4d   : > { %1628 = vmatpush3.bf16.msra.mxu1 %v1735_v18  ;;  %1595 = vmatprep.subr.bf16.mxu0 %v1765_v14 }
  0x4e   : > { %1621 = vmatprep.subr.bf16.mxu1 %v1765_v14 }
  0x4f   : > { %1084 = vmatmul.mubr.bf16.gmra.mrb[16].mxu0 %v1738_v21 }
  0x50   : > { %1596 = vmatpush3.bf16.msra.mxu0 %v1741_v22  ;;  %1141 = vmatmul.mubr.bf16.gmra.mrb[16].mxu1 %v1742_v23 }
  0x51   : > { %1629 = vmatpush3.bf16.msra.mxu1 %v1741_v22  ;;  %1597 = vmatprep.subr.bf16.mxu0 %v1765_v14 }
  0x52   : > { %1622 = vmatprep.subr.bf16.mxu1 %v1765_v14  ;;  %1091 = vmatprep.mubr.bf16.mxu0 %v1744_v24 }
  0x53   : > { %1148 = vmatprep.mubr.bf16.mxu1 %v1747_v25 }
  0x54   : > { %1598 = vmatpush3.bf16.msra.mxu0 %v1743_v26 }
  0x55   : > { %1630 = vmatpush3.bf16.msra.mxu1 %v1743_v26  ;;  %1599 = vmatprep.subr.bf16.mxu0 %v1765_v14 }
  0x56   : > { %1623 = vmatprep.subr.bf16.mxu1 %v1765_v14 }
  0x57   : > { %1092 = vmatmul.mubr.bf16.gmra.mrb[20].mxu0 %v1746_v27 }
  0x58   : > { %1600 = vmatpush3.bf16.msra.mxu0 %v1749_v28  ;;  %1149 = vmatmul.mubr.bf16.gmra.mrb[20].mxu1 %v1750_v29 }
  0x59   : > { %1631 = vmatpush3.bf16.msra.mxu1 %v1749_v28  ;;  %1601 = vmatprep.subr.bf16.mxu0 %v1765_v14 }
  0x5a   : > { %1624 = vmatprep.subr.bf16.mxu1 %v1765_v14  ;;  %1607 = vmatprep.mubr.msk.bf16.mxu0 %vm1766_vm0, %v1765_v14 }
  0x5b   : > { %1611 = vmatprep.mubr.msk.bf16.mxu1 %vm1766_vm0, %v1765_v14 }
  0x5c   : > { %1602 = vmatpush3.bf16.msra.mxu0 %v1751_v30 }
  0x5d   : > { %1632 = vmatpush3.bf16.msra.mxu1 %v1751_v30  ;;  %1603 = vmatprep.subr.bf16.mxu0 %v1765_v14 }
  0x5e   : > { %1625 = vmatprep.subr.bf16.mxu1 %v1765_v14 }
  0x60   : > { %1604 = vmatpush3.bf16.msra.mxu0 %v1752_v31 }
  0x61   : > { %1633 = vmatpush3.bf16.msra.mxu1 %v1752_v31  ;;  %1605 = vmatprep.subr.bf16.mxu0 %v1765_v14 }
  0x62   : > { %1626 = vmatprep.subr.bf16.mxu1 %v1765_v14 }
  0x64   : > { %1606 = vmatpush3.bf16.msra.mxu0 %v1753_v32 }
  0x65   : > { %1634 = vmatpush3.bf16.msra.mxu1 %v1753_v32 }
  0x67   : > { %1608 = vmatmul.mubr.bf16.vlgmr.msra.gmra.mrb[24].mxu0 %v1754_v33 }
  0x68   : > { %1612 = vmatmul.mubr.bf16.vlgmr.msra.gmra.mrb[24].mxu1 %v1755_v34 }
  0x69   : > { %1615 = vmatprep.mubr.msk.bf16.mxu1 %vm1766_vm0, %v1765_v14 }
  0x70   : > { %1616 = vmatmul.mubr.bf16.gmra.mrb[28].mxu1 %v1756_v35 }
  0xfa   : > { %v1460_v36 = vpop.f32.mrb[0].mxu0 }
  0xfb   : > { %v1494_v37 = vpop.f32.mrb[0].mxu1  ;;  %v1461_v39 = vpop.f32.mrb[1].mxu0 }
  0xfc   : > { %v1462_v40 = vadd.f32 %v1461_v39, %v1460_v36  ;;  %v1495_v41 = vpop.f32.mrb[1].mxu1  ;;  %v1463_v42 = vpop.f32.mrb[2].mxu0 }
  0xfd   : > { %v1496_v43 = vadd.f32 %v1495_v41, %v1494_v37  ;;  %v1497_v44 = vpop.f32.mrb[2].mxu1  ;;  %v1464_v45 = vpop.f32.mrb[3].mxu0 }
  0xfe   : > { %v964_v46 = vadd.f32 %v1462_v40, %v1313_v38  ;;  %v1465_v47 = vadd.f32 %v1464_v45, %v1463_v42  ;;  %v1498_v48 = vpop.f32.mrb[3].mxu1 }
  0xff   : > { %v1499_v49 = vadd.f32 %v1498_v48, %v1497_v44 }
 0x100   : > { %v1021_v50 = vadd.f32 %v1496_v43, %v964_v46  ;;  %v967_v51 = vadd.f32 %v1465_v47, %v1313_v38 }
 0x102   : > { %v1024_v52 = vadd.f32 %v1499_v49, %v967_v51  ;;  %v1466_v53 = vpop.f32.mrb[4].mxu0 }
 0x103   : > { %v1467_v54 = vpop.f32.mrb[5].mxu0  ;;  %v1500_v60 = vpop.f32.mrb[4].mxu1 }
 0x104   : > { %v1468_v55 = vadd.f32 %v1467_v54, %v1466_v53  ;;  %v1469_v56 = vpop.f32.mrb[6].mxu0  ;;  %v1501_v61 = vpop.f32.mrb[5].mxu1 }
 0x105   : > { %v1470_v57 = vpop.f32.mrb[7].mxu0  ;;  %v1502_v63 = vadd.f32 %v1501_v61, %v1500_v60  ;;  %v1503_v0 = vpop.f32.mrb[6].mxu1 }
 0x106   : > { %v1471_v58 = vadd.f32 %v1470_v57, %v1469_v56  ;;  %v972_v59 = vadd.f32 %v1468_v55, %v1313_v38  ;;  %v1504_v1 = vpop.f32.mrb[7].mxu1 }
 0x107   : > { %v1505_v3 = vadd.f32 %v1504_v1, %v1503_v0 }
 0x108   : > { %v975_v62 = vadd.f32 %v1471_v58, %v1313_v38  ;;  %v1029_v2 = vadd.f32 %v1502_v63, %v972_v59 }
 0x10a   : > { %v1032_v4 = vadd.f32 %v1505_v3, %v975_v62  ;;  %v1472_v5 = vpop.f32.mrb[8].mxu0 }
 0x10b   : > { %v1473_v6 = vpop.f32.mrb[9].mxu0  ;;  %v1506_v12 = vpop.f32.mrb[8].mxu1 }
 0x10c   : > { %v1474_v7 = vadd.f32 %v1473_v6, %v1472_v5  ;;  %v1475_v8 = vpop.f32.mrb[10].mxu0  ;;  %v1507_v13 = vpop.f32.mrb[9].mxu1 }
 0x10d   : > { %v1476_v9 = vpop.f32.mrb[11].mxu0  ;;  %v1508_v15 = vadd.f32 %v1507_v13, %v1506_v12  ;;  %v1509_v16 = vpop.f32.mrb[10].mxu1 }
 0x10e   : > { %v1477_v10 = vadd.f32 %v1476_v9, %v1475_v8  ;;  %v980_v11 = vadd.f32 %v1474_v7, %v1313_v38  ;;  %v1510_v17 = vpop.f32.mrb[11].mxu1 }
 0x10f   : > { %v1511_v19 = vadd.f32 %v1510_v17, %v1509_v16 }
 0x110   : > { %v983_v14 = vadd.f32 %v1477_v10, %v1313_v38  ;;  %v1037_v18 = vadd.f32 %v1508_v15, %v980_v11 }
 0x112   : > { %v1040_v20 = vadd.f32 %v1511_v19, %v983_v14 }
 0x11a   : > { %v1528_v21 = vpop.f32.mrb[12].mxu0 }
 0x11b   : > { %v1562_v22 = vpop.f32.mrb[12].mxu1  ;;  %v1529_v23 = vpop.f32.mrb[13].mxu0 }
 0x11c   : > { %v1530_v24 = vadd.f32 %v1529_v23, %v1528_v21  ;;  %v1563_v25 = vpop.f32.mrb[13].mxu1  ;;  %v1531_v26 = vpop.f32.mrb[14].mxu0 }
 0x11d   : > { %v1564_v27 = vadd.f32 %v1563_v25, %v1562_v22  ;;  %v1565_v28 = vpop.f32.mrb[14].mxu1  ;;  %v1532_v29 = vpop.f32.mrb[15].mxu0 }
 0x11e   : > { %v1078_v30 = vadd.f32 %v1530_v24, %v1021_v50  ;;  %v1533_v31 = vadd.f32 %v1532_v29, %v1531_v26  ;;  %v1566_v32 = vpop.f32.mrb[15].mxu1 }
 0x11f   : > { %v1567_v33 = vadd.f32 %v1566_v32, %v1565_v28 }
 0x120   : > { %v1081_v34 = vadd.f32 %v1533_v31, %v1024_v52  ;;  %v1135_v35 = vadd.f32 %v1564_v27, %v1078_v30 }
 0x122   : > { %v1534_v36 = vpop.f32.mrb[16].mxu0  ;;  %v1138_v37 = vadd.f32 %v1567_v33, %v1081_v34 }
 0x123   : > { %v1535_v38 = vpop.f32.mrb[17].mxu0  ;;  %v1568_v39 = vpop.f32.mrb[16].mxu1 }
 0x124   : > { %v1536_v40 = vadd.f32 %v1535_v38, %v1534_v36  ;;  %v1537_v41 = vpop.f32.mrb[18].mxu0  ;;  %v1569_v42 = vpop.f32.mrb[17].mxu1 }
 0x125   : > { %v1538_v43 = vpop.f32.mrb[19].mxu0  ;;  %v1570_v44 = vadd.f32 %v1569_v42, %v1568_v39  ;;  %v1571_v45 = vpop.f32.mrb[18].mxu1 }
 0x126   : > { %v1086_v46 = vadd.f32 %v1536_v40, %v1029_v2  ;;  %v1539_v47 = vadd.f32 %v1538_v43, %v1537_v41  ;;  %v1572_v48 = vpop.f32.mrb[19].mxu1 }
 0x127   : > { %v1573_v49 = vadd.f32 %v1572_v48, %v1571_v45 }
 0x128   : > { %v1089_v50 = vadd.f32 %v1539_v47, %v1032_v4  ;;  %v1143_v51 = vadd.f32 %v1570_v44, %v1086_v46 }
 0x12a   : > { %v1540_v53 = vpop.f32.mrb[20].mxu0  ;;  %v1146_v54 = vadd.f32 %v1573_v49, %v1089_v50 }
 0x12b   : > { %v1541_v52 = vpop.f32.mrb[21].mxu0  ;;  %v1574_v55 = vpop.f32.mrb[20].mxu1 }
 0x12c   : > { %v1542_v56 = vadd.f32 %v1541_v52, %v1540_v53  ;;  %v1543_v57 = vpop.f32.mrb[22].mxu0  ;;  %v1575_v58 = vpop.f32.mrb[21].mxu1 }
 0x12d   : > { %v1544_v59 = vpop.f32.mrb[23].mxu0  ;;  %v1576_v60 = vadd.f32 %v1575_v58, %v1574_v55  ;;  %v1577_v61 = vpop.f32.mrb[22].mxu1 }
 0x12e   : > { %v1094_v62 = vadd.f32 %v1542_v56, %v1037_v18  ;;  %v1545_v63 = vadd.f32 %v1544_v59, %v1543_v57  ;;  %v1578_v0 = vpop.f32.mrb[23].mxu1 }
 0x12f   : > { %v1579_v1 = vadd.f32 %v1578_v0, %v1577_v61 }
 0x130   : > { %v1097_v2 = vadd.f32 %v1545_v63, %v1040_v20  ;;  %v1151_v3 = vadd.f32 %v1576_v60, %v1094_v62 }
 0x132   : > { %v1154_v5 = vadd.f32 %v1579_v1, %v1097_v2 }
 0x13a   : > { %v1191_v4 = vpop.f32.mrb[24].mxu0 }
 0x13b   : > { %v1192_v6 = vadd.f32 %v1191_v4, %v1135_v35  ;;  %v1199_v7 = vpop.f32.mrb[24].mxu1  ;;  %v1609_v8 = vpop.f32.mrb[25].mxu0 }
 0x13c   : > { %v1200_v9 = vadd.f32 %v1199_v7, %v1143_v51  ;;  %v1613_v10 = vpop.f32.mrb[25].mxu1  ;;  %v1194_v11 = vpop.f32.mrb[26].mxu0 }
 0x13d   : > { %v1195_v12 = vadd.f32 %v1194_v11, %v1138_v37  ;;  %v1202_v13 = vpop.f32.mrb[26].mxu1  ;;  %v1610_v14 = vpop.f32.mrb[27].mxu0  ;;  %v1214_v17 = vmax.f32 %v1192_v6, 0.0 }
 0x13e   : > { %v1203_v15 = vadd.f32 %v1202_v13, %v1146_v54  ;;  %v1614_v16 = vpop.f32.mrb[27].mxu1  ;;  %v1216_v19 = vmax.f32 %v1200_v9, 0.0 }
 0x13f   : > { %v1215_v18 = vmax.f32 %v1195_v12, 0.0 }
 0x140   : > { %v1217_v20 = vmax.f32 %v1203_v15, 0.0 }
 0x141   : > { %v1430_v21 = vpack.c.bf16 %v1215_v18, %v1214_v17 }
 0x142   : > { %v1435_v22 = vpack.c.bf16 %v1217_v20, %v1216_v19 }
 0x143   : > { %1431 = vst [vmem:[%s175_s20] sm:$0xff] %v1430_v21   ;;  %v1207_v23 = vpop.f32.mrb[28].mxu1 }
 0x144   : > { %1442 = vst [vmem:[%s175_s20 + $0x8] sm:$0xff] %v1435_v22   ;;  %v1208_v24 = vadd.f32 %v1207_v23, %v1151_v3  ;;  %v1617_v25 = vpop.f32.mrb[29].mxu1 }
 0x145   : > { %v1210_v26 = vpop.f32.mrb[30].mxu1 }
 0x146   : > { %v1211_v27 = vadd.f32 %v1210_v26, %v1154_v5  ;;  %v1618_v28 = vpop.f32.mrb[31].mxu1  ;;  %v1218_v29 = vmax.f32 %v1208_v24, 0.0 }
 0x148   : > { %v1219_v30 = vmax.f32 %v1211_v27, 0.0 }
 0x14a   : > { %v1440_v31 = vpack.c.bf16 %v1219_v30, %v1218_v29 }
 0x14c   : > { %1443 = vst [vmem:[%s175_s20 + $0x10] sm:$0xff] %v1440_v31  }
 0x14d PF: > { %s13_s12 = sadd.s32 1, %s1763_s12  }
 0x14e   : > { %p10_p4 = scmp.ge.s32.totalorder %s13_s12, 4  }
 0x150   :  { %12 = sbr.rel (!%p10_p4) target bundleno = 1 (0x1), region = 62 }

// kernel: pcb_forward.28
= control target key start
LH: loop header
LB: loop body
LE: loop exit
PB: predicated region body
PF: predicated region fallthrough
CT: control target
= control target key end

     0   :  { %s569_s12 = smov 0   ;;  %s628_s0 = inlined_call_operand.vmem [shape: bf16[96,128], index: 0, kind: input, shape index: {}]   ;;  %s629_s1 = inlined_call_operand.vmem [shape: bf16[128,128], index: 1, kind: input, shape index: {}]   ;;  %s630_s2 = inlined_call_operand.vmem [shape: f32[1,128], index: 2, kind: input, shape index: {}]   ;;  %s631_s3 = inlined_call_operand.vmem [shape: bf16[96,128], index: 3, kind: output, shape index: {}]  }
   0x1 LB: > { %s413_s13 = sadd.s32 4294967295, %s545_s12   ;;  %p417_p0 = scmp.ge.s32.totalorder %s545_s12, 1  ;;  %s545_s12 = sphi %s569_s12, %s13_s12  }
   0x2   : > { %p138_p1 = scmp.lt.s32.totalorder %s545_s12, 3 }
   0x4   : > { %p139_p2 = pnand %p417_p0, %p138_p1 }
   0x5   : > { %v528_v0 = vld [vmem:[%s629_s1] sm:$0xff] (!%p139_p2)   ;;  %v547_v1 = vmov (!%p139_p2), 0.0   ;;  %v529_v2 = vld [vmem:[%s629_s1 + $0x8] sm:$0xff] (!%p139_p2)   ;;  %s162_s18 = smul.u32 (!%p139_p2), 6, %s413_s13  ;;  %vm548_vm0 = vmmov (!%p139_p2), 0   ;;  %v530_v3 = vld [vmem:[%s629_s1 + $0x10] sm:$0xff] (!%p139_p2)  }
   0x6   : > { %142 = sbr.rel (%p139_p2) target bundleno = 265 (0x109), region = 32  ;;  %502 = vmatprep.subr.bf16.mxu1 (!%p139_p2), %v547_v1  ;;  %474 = vmatprep.subr.bf16.mxu0 (!%p139_p2), %v547_v1  ;;  %v531_v4 = vld [vmem:[%s629_s1 + $0x18] sm:$0xff] (!%p139_p2)   ;;  %v532_v5 = vld [vmem:[%s629_s1 + $0x20] sm:$0xff] (!%p139_p2)   ;;  %v533_v6 = vld [vmem:[%s629_s1 + $0x28] sm:$0xff] (!%p139_p2)  }
   0x7   : > { %510 = vmatpush3.bf16.msra.mxu1 (!%p139_p2), %v528_v0  ;;  %475 = vmatpush3.bf16.msra.mxu0 (!%p139_p2), %v528_v0  ;;  %p163_p3 = scmp.lt.s32.totalorder (!%p139_p2), %s162_s18, 11  ;;  %v534_v7 = vld [vmem:[%s629_s1 + $0x30] sm:$0xff] (!%p139_p2)   ;;  %v535_v8 = vld [vmem:[%s629_s1 + $0x38] sm:$0xff] (!%p139_p2)   ;;  %v420_v12 = vld [vmem:[%s630_s2] ss:$0 sm:$0xff] (!%p139_p2) }
   0x8   : > { %503 = vmatprep.subr.bf16.mxu1 (!%p139_p2), %v547_v1  ;;  %476 = vmatprep.subr.bf16.mxu0 (!%p139_p2), %v547_v1 }
   0x9   : > { %494 = vmatprep.mubr.msk.bf16.mxu1 (!%p139_p2), %vm548_vm0, %v547_v1  ;;  %490 = vmatprep.mubr.msk.bf16.mxu0 (!%p139_p2), %vm548_vm0, %v547_v1 }
   0xb   : > { %511 = vmatpush3.bf16.msra.mxu1 (!%p139_p2), %v529_v2  ;;  %477 = vmatpush3.bf16.msra.mxu0 (!%p139_p2), %v529_v2 }
   0xc   : > { %504 = vmatprep.subr.bf16.mxu1 (!%p139_p2), %v547_v1  ;;  %478 = vmatprep.subr.bf16.mxu0 (!%p139_p2), %v547_v1 }
   0xd   : > { %s633_s18 = smov (!%p163_p3, %s162_s18), 11 }
   0xe   : > { %s418_s21 = sshll.u32 %s633_s18, 2 }
   0xf   : > { %s596_s24 = scalar_lea.vmem %s628_s0, %s418_s21  ;;  %512 = vmatpush3.bf16.msra.mxu1 %v530_v3  ;;  %479 = vmatpush3.bf16.msra.mxu0 %v530_v3  ;;  %s172_s13 = scalar_lea.vmem %s631_s3, %s418_s21 }
  0x10   : > { %505 = vmatprep.subr.bf16.mxu1 %v547_v1  ;;  %480 = vmatprep.subr.bf16.mxu0 %v547_v1  ;;  %v536_v9 = vld [vmem:[%s596_s24 + $0x8] sm:$0xff]   ;;  %v537_v10 = vld [vmem:[%s596_s24] sm:$0xff]   ;;  %v538_v11 = vld [vmem:[%s596_s24 + $0x10] sm:$0xff]  }
  0x13   : > { %513 = vmatpush3.bf16.msra.mxu1 %v531_v4  ;;  %481 = vmatpush3.bf16.msra.mxu0 %v531_v4 }
  0x14   : > { %506 = vmatprep.subr.bf16.mxu1 %v547_v1  ;;  %482 = vmatprep.subr.bf16.mxu0 %v547_v1 }
  0x17   : > { %514 = vmatpush3.bf16.msra.mxu1 %v532_v5  ;;  %483 = vmatpush3.bf16.msra.mxu0 %v532_v5 }
  0x18   : > { %507 = vmatprep.subr.bf16.mxu1 %v547_v1  ;;  %484 = vmatprep.subr.bf16.mxu0 %v547_v1 }
  0x1b   : > { %515 = vmatpush3.bf16.msra.mxu1 %v533_v6  ;;  %485 = vmatpush3.bf16.msra.mxu0 %v533_v6 }
  0x1c   : > { %508 = vmatprep.subr.bf16.mxu1 %v547_v1  ;;  %486 = vmatprep.subr.bf16.mxu0 %v547_v1 }
  0x1f   : > { %516 = vmatpush3.bf16.msra.mxu1 %v534_v7  ;;  %487 = vmatpush3.bf16.msra.mxu0 %v534_v7 }
  0x20   : > { %509 = vmatprep.subr.bf16.mxu1 %v547_v1  ;;  %488 = vmatprep.subr.bf16.mxu0 %v547_v1 }
  0x23   : > { %517 = vmatpush3.bf16.msra.mxu1 %v535_v8  ;;  %489 = vmatpush3.bf16.msra.mxu0 %v535_v8 }
  0x26   : > { %495 = vmatmul.mubr.bf16.vlgmr.msra.gmra.mrb[0].mxu1 %v536_v9  ;;  %491 = vmatmul.mubr.bf16.vlgmr.msra.gmra.mrb[0].mxu0 %v537_v10 }
  0x27   : > { %498 = vmatprep.mubr.msk.bf16.mxu1 %vm548_vm0, %v547_v1 }
  0x2e   : > { %499 = vmatmul.mubr.bf16.gmra.mrb[4].mxu1 %v538_v11 }
  0xf9   : > { %v312_v13 = vpop.f32.mrb[0].mxu1  ;;  %v304_v14 = vpop.f32.mrb[0].mxu0 }
  0xfa   : > { %v496_v15 = vpop.f32.mrb[1].mxu1  ;;  %v305_v16 = vadd.f32 %v420_v12, %v304_v14  ;;  %v492_v17 = vpop.f32.mrb[1].mxu0  ;;  %v313_v20 = vadd.f32 %v420_v12, %v312_v13 }
  0xfb   : > { %v315_v18 = vpop.f32.mrb[2].mxu1  ;;  %v307_v19 = vpop.f32.mrb[2].mxu0 }
  0xfc   : > { %v316_v21 = vadd.f32 %v420_v12, %v315_v18  ;;  %v497_v22 = vpop.f32.mrb[3].mxu1  ;;  %v308_v23 = vadd.f32 %v420_v12, %v307_v19  ;;  %v493_v24 = vpop.f32.mrb[3].mxu0 }
  0xfe   : > { %v454_v25 = vpack.c.bf16 %v316_v21, %v313_v20  ;;  %v449_v26 = vpack.c.bf16 %v308_v23, %v305_v16 }
 0x100   : > { %461 = vst [vmem:[%s172_s13 + $0x8] sm:$0xff] %v454_v25   ;;  %450 = vst [vmem:[%s172_s13] sm:$0xff] %v449_v26  }
 0x101   : > { %v320_v27 = vpop.f32.mrb[4].mxu1 }
 0x102   : > { %v500_v28 = vpop.f32.mrb[5].mxu1  ;;  %v321_v30 = vadd.f32 %v420_v12, %v320_v27 }
 0x103   : > { %v323_v29 = vpop.f32.mrb[6].mxu1 }
 0x104   : > { %v324_v31 = vadd.f32 %v420_v12, %v323_v29  ;;  %v501_v32 = vpop.f32.mrb[7].mxu1 }
 0x106   : > { %v459_v33 = vpack.c.bf16 %v324_v31, %v321_v30 }
 0x108   : > { %462 = vst [vmem:[%s172_s13 + $0x10] sm:$0xff] %v459_v33  }
 0x109 PF: > { %s13_s12 = sadd.s32 1, %s545_s12  }
 0x10a   : > { %p10_p4 = scmp.ge.s32.totalorder %s13_s12, 4  }
 0x10c   :  { %12 = sbr.rel (!%p10_p4) target bundleno = 1 (0x1), region = 62 }

// kernel: pcb_forward.29
= control target key start
LH: loop header
LB: loop body
LE: loop exit
PB: predicated region body
PF: predicated region fallthrough
CT: control target
= control target key end

     0   :  { %s674_s15 = smov 0   ;;  %s734_s0 = inlined_call_operand.vmem [shape: bf16[96,128], index: 0, kind: input, shape index: {}]   ;;  %s735_s1 = inlined_call_operand.vmem [shape: bf16[128,128], index: 1, kind: input, shape index: {}]   ;;  %s736_s2 = inlined_call_operand.vmem [shape: f32[1,128], index: 2, kind: input, shape index: {}]   ;;  %s737_s3 = inlined_call_operand.vmem [shape: bf16[96,128], index: 3, kind: input, shape index: {}]   ;;  %s738_s4 = inlined_call_operand.vmem [shape: bf16[96,128], index: 4, kind: output, shape index: {}]  }
   0x1 LB: > { %s498_s16 = sadd.s32 4294967295, %s645_s15   ;;  %p502_p0 = scmp.ge.s32.totalorder %s645_s15, 1  ;;  %s645_s15 = sphi %s674_s15, %s14_s15  }
   0x2   : > { %p174_p1 = scmp.lt.s32.totalorder %s645_s15, 3 }
   0x4   : > { %p175_p2 = pnand %p502_p0, %p174_p1 }
   0x5   : > { %v628_v0 = vld [vmem:[%s735_s1] sm:$0xff] (!%p175_p2)   ;;  %v647_v1 = vmov (!%p175_p2), 0.0   ;;  %v629_v2 = vld [vmem:[%s735_s1 + $0x8] sm:$0xff] (!%p175_p2)   ;;  %s205_s21 = smul.u32 (!%p175_p2), 6, %s498_s16  ;;  %vm648_vm0 = vmmov (!%p175_p2), 0   ;;  %v630_v3 = vld [vmem:[%s735_s1 + $0x10] sm:$0xff] (!%p175_p2)  }
   0x6   : > { %178 = sbr.rel (%p175_p2) target bundleno = 269 (0x10d), region = 36  ;;  %602 = vmatprep.subr.bf16.mxu1 (!%p175_p2), %v647_v1  ;;  %574 = vmatprep.subr.bf16.mxu0 (!%p175_p2), %v647_v1  ;;  %v631_v4 = vld [vmem:[%s735_s1 + $0x18] sm:$0xff] (!%p175_p2)   ;;  %v632_v5 = vld [vmem:[%s735_s1 + $0x20] sm:$0xff] (!%p175_p2)   ;;  %v633_v6 = vld [vmem:[%s735_s1 + $0x28] sm:$0xff] (!%p175_p2)  }
   0x7   : > { %610 = vmatpush3.bf16.msra.mxu1 (!%p175_p2), %v628_v0  ;;  %575 = vmatpush3.bf16.msra.mxu0 (!%p175_p2), %v628_v0  ;;  %p206_p3 = scmp.lt.s32.totalorder (!%p175_p2), %s205_s21, 11  ;;  %v634_v7 = vld [vmem:[%s735_s1 + $0x30] sm:$0xff] (!%p175_p2)   ;;  %v635_v8 = vld [vmem:[%s735_s1 + $0x38] sm:$0xff] (!%p175_p2)   ;;  %v506_v14 = vld [vmem:[%s736_s2] ss:$0 sm:$0xff] (!%p175_p2) }
   0x8   : > { %603 = vmatprep.subr.bf16.mxu1 (!%p175_p2), %v647_v1  ;;  %576 = vmatprep.subr.bf16.mxu0 (!%p175_p2), %v647_v1 }
   0x9   : > { %594 = vmatprep.mubr.msk.bf16.mxu1 (!%p175_p2), %vm648_vm0, %v647_v1  ;;  %590 = vmatprep.mubr.msk.bf16.mxu0 (!%p175_p2), %vm648_vm0, %v647_v1 }
   0xb   : > { %611 = vmatpush3.bf16.msra.mxu1 (!%p175_p2), %v629_v2  ;;  %577 = vmatpush3.bf16.msra.mxu0 (!%p175_p2), %v629_v2 }
   0xc   : > { %604 = vmatprep.subr.bf16.mxu1 (!%p175_p2), %v647_v1  ;;  %578 = vmatprep.subr.bf16.mxu0 (!%p175_p2), %v647_v1 }
   0xd   : > { %s740_s21 = smov (!%p206_p3, %s205_s21), 11 }
   0xe   : > { %s693_s24 = sshll.u32 %s740_s21, 2 }
   0xf   : > { %s699_s27 = scalar_lea.vmem %s734_s0, %s693_s24  ;;  %612 = vmatpush3.bf16.msra.mxu1 %v630_v3  ;;  %579 = vmatpush3.bf16.msra.mxu0 %v630_v3  ;;  %s215_s14 = scalar_lea.vmem %s737_s3, %s693_s24 }
  0x10   : > { %605 = vmatprep.subr.bf16.mxu1 %v647_v1  ;;  %580 = vmatprep.subr.bf16.mxu0 %v647_v1  ;;  %v636_v9 = vld [vmem:[%s699_s27 + $0x8] sm:$0xff]   ;;  %v637_v10 = vld [vmem:[%s699_s27] sm:$0xff]   ;;  %v638_v11 = vld [vmem:[%s699_s27 + $0x10] sm:$0xff]   ;;  %s221_s20 = scalar_lea.vmem %s738_s4, %s693_s24 }
  0x11   : > { %v559_v12 = vld [vmem:[%s215_s14 + $0x8] sm:$0xff]   ;;  %v533_v13 = vld [vmem:[%s215_s14] sm:$0xff]   ;;  %v560_v33 = vld [vmem:[%s215_s14 + $0x10] sm:$0xff]  }
  0x12   : > { %v538_v15 = vunpack.c.l.bf16 %v559_v12  ;;  %v534_v16 = vunpack.c.l.bf16 %v533_v13  ;;  %v539_v21 = vunpack.c.h.bf16 %v559_v12  ;;  %v535_v24 = vunpack.c.h.bf16 %v533_v13 }
  0x13   : > { %613 = vmatpush3.bf16.msra.mxu1 %v631_v4  ;;  %581 = vmatpush3.bf16.msra.mxu0 %v631_v4  ;;  %v542_v40 = vunpack.c.l.bf16 %v560_v33  ;;  %v543_v46 = vunpack.c.h.bf16 %v560_v33 }
  0x14   : > { %606 = vmatprep.subr.bf16.mxu1 %v647_v1  ;;  %582 = vmatprep.subr.bf16.mxu0 %v647_v1 }
  0x17   : > { %614 = vmatpush3.bf16.msra.mxu1 %v632_v5  ;;  %583 = vmatpush3.bf16.msra.mxu0 %v632_v5 }
  0x18   : > { %607 = vmatprep.subr.bf16.mxu1 %v647_v1  ;;  %584 = vmatprep.subr.bf16.mxu0 %v647_v1 }
  0x1b   : > { %615 = vmatpush3.bf16.msra.mxu1 %v633_v6  ;;  %585 = vmatpush3.bf16.msra.mxu0 %v633_v6 }
  0x1c   : > { %608 = vmatprep.subr.bf16.mxu1 %v647_v1  ;;  %586 = vmatprep.subr.bf16.mxu0 %v647_v1 }
  0x1f   : > { %616 = vmatpush3.bf16.msra.mxu1 %v634_v7  ;;  %587 = vmatpush3.bf16.msra.mxu0 %v634_v7 }
  0x20   : > { %609 = vmatprep.subr.bf16.mxu1 %v647_v1  ;;  %588 = vmatprep.subr.bf16.mxu0 %v647_v1 }
  0x23   : > { %617 = vmatpush3.bf16.msra.mxu1 %v635_v8  ;;  %589 = vmatpush3.bf16.msra.mxu0 %v635_v8 }
  0x26   : > { %595 = vmatmul.mubr.bf16.vlgmr.msra.gmra.mrb[0].mxu1 %v636_v9  ;;  %591 = vmatmul.mubr.bf16.vlgmr.msra.gmra.mrb[0].mxu0 %v637_v10 }
  0x27   : > { %598 = vmatprep.mubr.msk.bf16.mxu1 %vm648_vm0, %v647_v1 }
  0x2e   : > { %599 = vmatmul.mubr.bf16.gmra.mrb[4].mxu1 %v638_v11 }
  0xf9   : > { %v361_v17 = vpop.f32.mrb[0].mxu1  ;;  %v353_v18 = vpop.f32.mrb[0].mxu0 }
  0xfa   : > { %v362_v19 = vadd.f32 %v506_v14, %v361_v17  ;;  %v596_v20 = vpop.f32.mrb[1].mxu1  ;;  %v354_v22 = vadd.f32 %v506_v14, %v353_v18  ;;  %v592_v23 = vpop.f32.mrb[1].mxu0 }
  0xfb   : > { %v364_v25 = vpop.f32.mrb[2].mxu1  ;;  %v356_v26 = vpop.f32.mrb[2].mxu0 }
  0xfc   : > { %v390_v27 = vadd.f32 %v538_v15, %v362_v19  ;;  %v365_v28 = vadd.f32 %v506_v14, %v364_v25  ;;  %v597_v29 = vpop.f32.mrb[3].mxu1  ;;  %v388_v30 = vadd.f32 %v534_v16, %v354_v22  ;;  %v357_v31 = vadd.f32 %v506_v14, %v356_v26  ;;  %v593_v32 = vpop.f32.mrb[3].mxu0 }
  0xfe   : > { %v391_v34 = vadd.f32 %v539_v21, %v365_v28  ;;  %v394_v35 = vmax.f32 %v388_v30, 0.0  ;;  %v389_v36 = vadd.f32 %v535_v24, %v357_v31  ;;  %v396_v37 = vmax.f32 %v390_v27, 0.0 }
 0x100   : > { %v397_v38 = vmax.f32 %v391_v34, 0.0  ;;  %v395_v39 = vmax.f32 %v389_v36, 0.0 }
 0x101   : > { %v369_v41 = vpop.f32.mrb[4].mxu1 }
 0x102   : > { %v552_v42 = vpack.c.bf16 %v397_v38, %v396_v37  ;;  %v547_v43 = vpack.c.bf16 %v395_v39, %v394_v35  ;;  %v370_v44 = vadd.f32 %v506_v14, %v369_v41  ;;  %v600_v45 = vpop.f32.mrb[5].mxu1 }
 0x103   : > { %v372_v47 = vpop.f32.mrb[6].mxu1 }
 0x104   : > { %561 = vst [vmem:[%s221_s20 + $0x8] sm:$0xff] %v552_v42   ;;  %548 = vst [vmem:[%s221_s20] sm:$0xff] %v547_v43   ;;  %v392_v48 = vadd.f32 %v542_v40, %v370_v44  ;;  %v373_v49 = vadd.f32 %v506_v14, %v372_v47  ;;  %v601_v50 = vpop.f32.mrb[7].mxu1 }
 0x106   : > { %v393_v51 = vadd.f32 %v543_v46, %v373_v49  ;;  %v398_v52 = vmax.f32 %v392_v48, 0.0 }
 0x108   : > { %v399_v53 = vmax.f32 %v393_v51, 0.0 }
 0x10a   : > { %v557_v54 = vpack.c.bf16 %v399_v53, %v398_v52 }
 0x10c   : > { %562 = vst [vmem:[%s221_s20 + $0x10] sm:$0xff] %v557_v54  }
 0x10d PF: > { %s14_s15 = sadd.s32 1, %s645_s15  }
 0x10e   : > { %p11_p4 = scmp.ge.s32.totalorder %s14_s15, 4  }
 0x110   :  { %13 = sbr.rel (!%p11_p4) target bundleno = 1 (0x1), region = 69 }

// kernel: pcb_forward.30
= control target key start
LH: loop header
LB: loop body
LE: loop exit
PB: predicated region body
PF: predicated region fallthrough
CT: control target
= control target key end

     0   :  { %s575_s12 = smov 0   ;;  %s634_s0 = inlined_call_operand.vmem [shape: bf16[96,128], index: 0, kind: input, shape index: {}]   ;;  %s635_s1 = inlined_call_operand.vmem [shape: bf16[128,128], index: 1, kind: input, shape index: {}]   ;;  %s636_s2 = inlined_call_operand.vmem [shape: f32[1,128], index: 2, kind: input, shape index: {}]   ;;  %s637_s3 = inlined_call_operand.vmem [shape: bf16[96,128], index: 3, kind: output, shape index: {}]  }
   0x1 LB: > { %s419_s13 = sadd.s32 4294967295, %s551_s12   ;;  %p423_p0 = scmp.ge.s32.totalorder %s551_s12, 1  ;;  %s551_s12 = sphi %s575_s12, %s13_s12  }
   0x2   : > { %p138_p1 = scmp.lt.s32.totalorder %s551_s12, 3 }
   0x4   : > { %p139_p2 = pnand %p423_p0, %p138_p1 }
   0x5   : > { %v534_v0 = vld [vmem:[%s635_s1] sm:$0xff] (!%p139_p2)   ;;  %v553_v1 = vmov (!%p139_p2), 0.0   ;;  %v535_v2 = vld [vmem:[%s635_s1 + $0x8] sm:$0xff] (!%p139_p2)   ;;  %s162_s18 = smul.u32 (!%p139_p2), 6, %s419_s13  ;;  %vm554_vm0 = vmmov (!%p139_p2), 0   ;;  %v536_v3 = vld [vmem:[%s635_s1 + $0x10] sm:$0xff] (!%p139_p2)  }
   0x6   : > { %142 = sbr.rel (%p139_p2) target bundleno = 267 (0x10b), region = 32  ;;  %508 = vmatprep.subr.bf16.mxu1 (!%p139_p2), %v553_v1  ;;  %480 = vmatprep.subr.bf16.mxu0 (!%p139_p2), %v553_v1  ;;  %v537_v4 = vld [vmem:[%s635_s1 + $0x18] sm:$0xff] (!%p139_p2)   ;;  %v538_v5 = vld [vmem:[%s635_s1 + $0x20] sm:$0xff] (!%p139_p2)   ;;  %v539_v6 = vld [vmem:[%s635_s1 + $0x28] sm:$0xff] (!%p139_p2)  }
   0x7   : > { %516 = vmatpush3.bf16.msra.mxu1 (!%p139_p2), %v534_v0  ;;  %481 = vmatpush3.bf16.msra.mxu0 (!%p139_p2), %v534_v0  ;;  %p163_p3 = scmp.lt.s32.totalorder (!%p139_p2), %s162_s18, 11  ;;  %v540_v7 = vld [vmem:[%s635_s1 + $0x30] sm:$0xff] (!%p139_p2)   ;;  %v541_v8 = vld [vmem:[%s635_s1 + $0x38] sm:$0xff] (!%p139_p2)   ;;  %v426_v12 = vld [vmem:[%s636_s2] ss:$0 sm:$0xff] (!%p139_p2) }
   0x8   : > { %509 = vmatprep.subr.bf16.mxu1 (!%p139_p2), %v553_v1  ;;  %482 = vmatprep.subr.bf16.mxu0 (!%p139_p2), %v553_v1 }
   0x9   : > { %500 = vmatprep.mubr.msk.bf16.mxu1 (!%p139_p2), %vm554_vm0, %v553_v1  ;;  %496 = vmatprep.mubr.msk.bf16.mxu0 (!%p139_p2), %vm554_vm0, %v553_v1 }
   0xb   : > { %517 = vmatpush3.bf16.msra.mxu1 (!%p139_p2), %v535_v2  ;;  %483 = vmatpush3.bf16.msra.mxu0 (!%p139_p2), %v535_v2 }
   0xc   : > { %510 = vmatprep.subr.bf16.mxu1 (!%p139_p2), %v553_v1  ;;  %484 = vmatprep.subr.bf16.mxu0 (!%p139_p2), %v553_v1 }
   0xd   : > { %s639_s18 = smov (!%p163_p3, %s162_s18), 11 }
   0xe   : > { %s424_s21 = sshll.u32 %s639_s18, 2 }
   0xf   : > { %s602_s24 = scalar_lea.vmem %s634_s0, %s424_s21  ;;  %518 = vmatpush3.bf16.msra.mxu1 %v536_v3  ;;  %485 = vmatpush3.bf16.msra.mxu0 %v536_v3  ;;  %s172_s13 = scalar_lea.vmem %s637_s3, %s424_s21 }
  0x10   : > { %511 = vmatprep.subr.bf16.mxu1 %v553_v1  ;;  %486 = vmatprep.subr.bf16.mxu0 %v553_v1  ;;  %v542_v9 = vld [vmem:[%s602_s24 + $0x8] sm:$0xff]   ;;  %v543_v10 = vld [vmem:[%s602_s24] sm:$0xff]   ;;  %v544_v11 = vld [vmem:[%s602_s24 + $0x10] sm:$0xff]  }
  0x13   : > { %519 = vmatpush3.bf16.msra.mxu1 %v537_v4  ;;  %487 = vmatpush3.bf16.msra.mxu0 %v537_v4 }
  0x14   : > { %512 = vmatprep.subr.bf16.mxu1 %v553_v1  ;;  %488 = vmatprep.subr.bf16.mxu0 %v553_v1 }
  0x17   : > { %520 = vmatpush3.bf16.msra.mxu1 %v538_v5  ;;  %489 = vmatpush3.bf16.msra.mxu0 %v538_v5 }
  0x18   : > { %513 = vmatprep.subr.bf16.mxu1 %v553_v1  ;;  %490 = vmatprep.subr.bf16.mxu0 %v553_v1 }
  0x1b   : > { %521 = vmatpush3.bf16.msra.mxu1 %v539_v6  ;;  %491 = vmatpush3.bf16.msra.mxu0 %v539_v6 }
  0x1c   : > { %514 = vmatprep.subr.bf16.mxu1 %v553_v1  ;;  %492 = vmatprep.subr.bf16.mxu0 %v553_v1 }
  0x1f   : > { %522 = vmatpush3.bf16.msra.mxu1 %v540_v7  ;;  %493 = vmatpush3.bf16.msra.mxu0 %v540_v7 }
  0x20   : > { %515 = vmatprep.subr.bf16.mxu1 %v553_v1  ;;  %494 = vmatprep.subr.bf16.mxu0 %v553_v1 }
  0x23   : > { %523 = vmatpush3.bf16.msra.mxu1 %v541_v8  ;;  %495 = vmatpush3.bf16.msra.mxu0 %v541_v8 }
  0x26   : > { %501 = vmatmul.mubr.bf16.vlgmr.msra.gmra.mrb[0].mxu1 %v542_v9  ;;  %497 = vmatmul.mubr.bf16.vlgmr.msra.gmra.mrb[0].mxu0 %v543_v10 }
  0x27   : > { %504 = vmatprep.mubr.msk.bf16.mxu1 %vm554_vm0, %v553_v1 }
  0x2e   : > { %505 = vmatmul.mubr.bf16.gmra.mrb[4].mxu1 %v544_v11 }
  0xf9   : > { %v312_v13 = vpop.f32.mrb[0].mxu1  ;;  %v304_v14 = vpop.f32.mrb[0].mxu0 }
  0xfa   : > { %v313_v15 = vadd.f32 %v426_v12, %v312_v13  ;;  %v502_v16 = vpop.f32.mrb[1].mxu1  ;;  %v305_v17 = vadd.f32 %v426_v12, %v304_v14  ;;  %v498_v18 = vpop.f32.mrb[1].mxu0 }
  0xfb   : > { %v315_v19 = vpop.f32.mrb[2].mxu1  ;;  %v307_v20 = vpop.f32.mrb[2].mxu0 }
  0xfc   : > { %v316_v21 = vadd.f32 %v426_v12, %v315_v19  ;;  %v503_v22 = vpop.f32.mrb[3].mxu1  ;;  %v327_v23 = vmax.f32 %v305_v17, 0.0  ;;  %v308_v24 = vadd.f32 %v426_v12, %v307_v20  ;;  %v499_v25 = vpop.f32.mrb[3].mxu0  ;;  %v329_v26 = vmax.f32 %v313_v15, 0.0 }
  0xfe   : > { %v330_v27 = vmax.f32 %v316_v21, 0.0  ;;  %v328_v28 = vmax.f32 %v308_v24, 0.0 }
 0x100   : > { %v460_v29 = vpack.c.bf16 %v330_v27, %v329_v26  ;;  %v455_v30 = vpack.c.bf16 %v328_v28, %v327_v23 }
 0x101   : > { %v320_v31 = vpop.f32.mrb[4].mxu1 }
 0x102   : > { %467 = vst [vmem:[%s172_s13 + $0x8] sm:$0xff] %v460_v29   ;;  %456 = vst [vmem:[%s172_s13] sm:$0xff] %v455_v30   ;;  %v321_v32 = vadd.f32 %v426_v12, %v320_v31  ;;  %v506_v33 = vpop.f32.mrb[5].mxu1 }
 0x103   : > { %v323_v34 = vpop.f32.mrb[6].mxu1 }
 0x104   : > { %v324_v35 = vadd.f32 %v426_v12, %v323_v34  ;;  %v507_v36 = vpop.f32.mrb[7].mxu1  ;;  %v331_v37 = vmax.f32 %v321_v32, 0.0 }
 0x106   : > { %v332_v38 = vmax.f32 %v324_v35, 0.0 }
 0x108   : > { %v465_v39 = vpack.c.bf16 %v332_v38, %v331_v37 }
 0x10a   : > { %468 = vst [vmem:[%s172_s13 + $0x10] sm:$0xff] %v465_v39  }
 0x10b PF: > { %s13_s12 = sadd.s32 1, %s551_s12  }
 0x10c   : > { %p10_p4 = scmp.ge.s32.totalorder %s13_s12, 4  }
 0x10e   :  { %12 = sbr.rel (!%p10_p4) target bundleno = 1 (0x1), region = 62 }

// kernel: pcb_forward.32
= control target key start
LH: loop header
LB: loop body
LE: loop exit
PB: predicated region body
PF: predicated region fallthrough
CT: control target
= control target key end

     0   :  { %s825_s12 = smov 0   ;;  %s827_s13 = smov 0   ;;  %s934_s0 = inlined_call_operand.vmem [shape: bf16[24,128], index: 0, kind: input, shape index: {}]   ;;  %s935_s1 = inlined_call_operand.vmem [shape: bf16[128,128], index: 1, kind: input, shape index: {}]   ;;  %s936_s2 = inlined_call_operand.vmem [shape: f32[1,128], index: 2, kind: input, shape index: {}]   ;;  %s937_s3 = inlined_call_operand.vmem [shape: bf16[24,128], index: 3, kind: output, shape index: {}]  }
   0x1   :  { %s829_s14 = smov 0  }
   0x2 LB: > { %s838_s15 = sadd.s32 4294967295, %s769_s14   ;;  %s840_s16 = sadd.s32 1, %s769_s14   ;;  %s769_s14 = sphi %s829_s14, %s941_s14   ;;  %s765_s13 = sphi %s827_s13, %s940_s13   ;;  %s761_s12 = sphi %s825_s12, %s939_s12  }
   0x3   : > { %s85_s17 = ssub.s32 %s769_s14, %s840_s16  ;;  %s88_s18 = sadd.s32 1, %s765_s13 }
   0x4   : > { %p86_p0 = scmp.eq.s32.totalorder %s85_s17, 0  ;;  %p98_p1 = scmp.ne.s32.totalorder %s765_s13, %s761_s12 }
   0x5   : > { %p99_p2 = scmp.eq.s32.totalorder %s838_s15, 1  ;;  %p544_p3 = scmp.ge.s32.totalorder %s769_s14, 1 }
   0x6   : > { %s848_s19 = scalar_select %p86_p0, %s765_s13, %s88_s18  }
   0x7   : > { %p850_p4 = por %p99_p2, %p98_p1  ;;  %p146_p5 = scmp.lt.s32.totalorder %s769_s14, 3 }
   0x9   : > { %p147_p6 = pnand %p544_p3, %p146_p5 }
   0xa   : > { %v706_v0 = vld [vmem:[%s935_s1] sm:$0xff] (!%p147_p6)   ;;  %v803_v1 = vmov (!%p147_p6), 0.0   ;;  %v707_v2 = vld [vmem:[%s935_s1 + $0x8] sm:$0xff] (!%p147_p6)   ;;  %vm804_vm0 = vmmov (!%p147_p6), 0   ;;  %s861_s25 = sshll.u32 (!%p147_p6), %s838_s15, 1  ;;  %v708_v3 = vld [vmem:[%s935_s1 + $0x10] sm:$0xff] (!%p147_p6)  }
   0xb   : > { %150 = sbr.rel (%p147_p6) target bundleno = 311 (0x137), region = 32  ;;  %596 = vmatprep.subr.bf16.mxu0 (!%p147_p6), %v803_v1  ;;  %612 = vmatprep.mubr.msk.bf16.mxu0 (!%p147_p6), %vm804_vm0, %v803_v1  ;;  %p178_p7 = scmp.lt.s32.totalorder (!%p147_p6), %s861_s25, 2  ;;  %v709_v4 = vld [vmem:[%s935_s1 + $0x18] sm:$0xff] (!%p147_p6)   ;;  %v710_v5 = vld [vmem:[%s935_s1 + $0x20] sm:$0xff] (!%p147_p6)   ;;  %v711_v6 = vld [vmem:[%s935_s1 + $0x28] sm:$0xff] (!%p147_p6)  }
   0xc   : > { %597 = vmatpush3.bf16.msra.mxu0 (!%p147_p6), %v706_v0  ;;  %v712_v7 = vld [vmem:[%s935_s1 + $0x30] sm:$0xff] (!%p147_p6)   ;;  %v713_v8 = vld [vmem:[%s935_s1 + $0x38] sm:$0xff] (!%p147_p6)   ;;  %s170_s22 = sand.u32 (!%p147_p6), 1, %s761_s12   ;;  %v548_v10 = vld [vmem:[%s936_s2] ss:$0 sm:$0xff] (!%p147_p6) }
   0xd   : > { %598 = vmatprep.subr.bf16.mxu0 (!%p147_p6), %v803_v1 }
  0x10   : > { %599 = vmatpush3.bf16.msra.mxu0 (!%p147_p6), %v707_v2 }
  0x11   : > { %600 = vmatprep.subr.bf16.mxu0 (!%p147_p6), %v803_v1 }
  0x12   : > { %s179_s26 = scalar_select %p178_p7, %s861_s25, 2 }
  0x13   : > { %s331_s12 = ssub.s32 (%p850_p4), 3, %s861_s25  ;;  %s579_s28 = sshll.u32 (%p850_p4), %s838_s15, 3 }
  0x14   : > { %s547_s29 = sshll.u32 %s179_s26, 2  ;;  %601 = vmatpush3.bf16.msra.mxu0 %v708_v3  ;;  %s545_s26 = sshll.u32 %s170_s22, 3 }
  0x15   : > { %s181_s5 = scalar_lea.vmem %s934_s0, %s547_s29  ;;  %602 = vmatprep.subr.bf16.mxu0 %v803_v1  ;;  %s890_s27 = scalar_lea.vmem [#allocation2], %s545_s26  }
  0x16   : > { %v714_v9 = vld [vmem:[%s181_s5] sm:$0xff]   ;;  %p332_p8 = scmp.lt.s32.totalorder (%p850_p4), %s331_s12, 2  ;;  %s900_s4 = scalar_lea.vmem (%p850_p4), %s937_s3, %s579_s28  }
  0x18   : > { %603 = vmatpush3.bf16.msra.mxu0 %v709_v4 }
  0x19   : > { %604 = vmatprep.subr.bf16.mxu0 %v803_v1 }
  0x1c   : > { %605 = vmatpush3.bf16.msra.mxu0 %v710_v5 }
  0x1d   : > { %606 = vmatprep.subr.bf16.mxu0 %v803_v1 }
  0x20   : > { %607 = vmatpush3.bf16.msra.mxu0 %v711_v6 }
  0x21   : > { %608 = vmatprep.subr.bf16.mxu0 %v803_v1 }
  0x24   : > { %609 = vmatpush3.bf16.msra.mxu0 %v712_v7 }
  0x25   : > { %610 = vmatprep.subr.bf16.mxu0 %v803_v1 }
  0x28   : > { %611 = vmatpush3.bf16.msra.mxu0 %v713_v8 }
  0x2b   : > { %613 = vmatmul.mubr.bf16.vlgmr.msra.gmra.mrb[0].mxu0 %v714_v9 }
  0xfe   : > { %v306_v11 = vpop.f32.mrb[0].mxu0 }
  0xff   : > { %v614_v12 = vpop.f32.mrb[1].mxu0  ;;  %v307_v14 = vadd.f32 %v548_v10, %v306_v11  ;;  %329 = sbr.rel (!%p850_p4) target bundleno = 311 (0x137), region = 36 }
 0x100   : > { %v309_v13 = vpop.f32.mrb[2].mxu0 }
 0x101   : > { %v310_v15 = vadd.f32 %v548_v10, %v309_v13  ;;  %v615_v16 = vpop.f32.mrb[3].mxu0 }
 0x103   : > { %v585_v17 = vpack.c.bf16 %v310_v15, %v307_v14 }
 0x105   : > { %586 = vst [vmem:[%s890_s27] sm:$0xff] %v585_v17  }
 0x106   : > { %s943_s12 = smov (!%p332_p8, %s331_s12), 2 }
 0x107   : > { %s562_s5 = sshll.u32 %s943_s12, 6 }
 0x108   : > { %p565_p9 = scmp.eq.s32.totalorder %s562_s5, 0 }
 0x109   : > { %s906_s6 = sshrl.u32 (!%p565_p9), %s943_s12, 1 }
 0x10a   : > { %340 = sbr.rel (%p565_p9) target bundleno = 311 (0x137), region = 40  ;;  %p566_p10 = scmp.le.s32.totalorder (!%p565_p9), %s906_s6, 0 }
 0x111   : > { %497 = sbr.rel (%p566_p10) target bundleno = 290 (0x122), region = 112  ;;  %s771_s15 = smov (!%p566_p10), %s900_s4  }
 0x112   : > { %s775_s20 = smov (!%p566_p10), %s890_s27   ;;  %s779_s25 = smov (!%p566_p10), 0  }
 0x113   : > { %s783_s7 = smov (!%p566_p10), 0  }
 0x118 LB: >> { %v356_v18 = vld [vmem:[%s777_s20] sm:$0xf]  ;;  %v358_v19 = vld [vmem:[%s777_s20 + $0x4] sm:$0xf]  ;;  %s360_s8 = sadd.s32 1, %s781_s25  ;;  %s350_s7 = sadd.s32 1, %s785_s7   ;;  %s785_s7 = sphi %s783_s7, %s350_s7   ;;  %s781_s25 = sphi %s779_s25, %s780_s25   ;;  %s777_s20 = sphi %s775_s20, %s365_s20   ;;  %s773_s15 = sphi %s771_s15, %s366_s15  }
 0x119   : >> { %357 = vst [vmem:[%s773_s15] sm:$0xf] %v356_v18  ;;  %359 = vst [vmem:[%s773_s15 + $0x4] sm:$0xf] %v358_v19  ;;  %p361_p11 = scmp.ge.s32.totalorder %s360_s8, %s906_s6  ;;  %p349_p12 = scmp.ge.s32.totalorder %s350_s7, %s906_s6 }
 0x11b   : >> { %s945_s8 = smov (%p361_p11, %s360_s8), 0  ;;  %352 = sbr.rel (!%p349_p12) target bundleno = 280 (0x118), region = 118 }
 0x11c   : >> { %s567_s9 = sshll.u32 %s945_s8, 3  ;;  %s780_s25 = smov %s945_s8  }
 0x11d   : >> { %s365_s20 = scalar_lea.vmem %s890_s27, %s567_s9 [#allocation2]   ;;  %s366_s15 = scalar_lea.vmem %s900_s4, %s567_s9  }
 0x122 PF: > { %s916_s10 = sand.u32 1, %s943_s12   ;;  %s580_s11 = sshll.u32 %s906_s6, 3 }
 0x123   : > { %s371_s14 = scalar_lea.vmem %s890_s27, %s580_s11 [#allocation2]   ;;  %s373_s17 = scalar_lea.vmem %s900_s4, %s580_s11  }
 0x124   : > { %p572_p13 = scmp.le.s32.totalorder %s916_s10, 0 }
 0x125   : > { %s787_s18 = smov (!%p572_p13), %s373_s17   ;;  %s791_s21 = smov (!%p572_p13), %s371_s14  }
 0x126   : > { %511 = sbr.rel (%p572_p13) target bundleno = 311 (0x137), region = 123  ;;  %s795_s22 = smov (!%p572_p13), 0  }
 0x127   : > { %s799_s23 = smov (!%p572_p13), 0  }
 0x12d LB: >> { %v383_v20 = vld [vmem:[%s793_s21] sm:$0xf]  ;;  %s385_s24 = sadd.s32 1, %s797_s22  ;;  %s377_s23 = sadd.s32 1, %s801_s23   ;;  %s801_s23 = sphi %s799_s23, %s377_s23   ;;  %s797_s22 = sphi %s795_s22, %s796_s22   ;;  %s793_s21 = sphi %s791_s21, %s390_s21   ;;  %s789_s18 = sphi %s787_s18, %s391_s18  }
 0x12e   : >> { %384 = vst [vmem:[%s789_s18] sm:$0xf] %v383_v20  ;;  %p386_p0 = scmp.ge.s32.totalorder %s385_s24, %s916_s10  ;;  %p376_p1 = scmp.ge.s32.totalorder %s377_s23, %s916_s10 }
 0x130   : >> { %s947_s24 = smov (%p386_p0, %s385_s24), 0  ;;  %379 = sbr.rel (!%p376_p1) target bundleno = 301 (0x12d), region = 129 }
 0x131   : >> { %s573_s26 = sshll.u32 %s947_s24, 2  ;;  %s796_s22 = smov %s947_s24  }
 0x132   : >> { %s390_s21 = scalar_lea.vmem %s371_s14, %s573_s26 [#allocation2]   ;;  %s391_s18 = scalar_lea.vmem %s373_s17, %s573_s26  }
 0x137 PF: > { %p10_p2 = scmp.ge.s32.totalorder %s840_s16, 4   ;;  %s939_s12 = smov %s765_s13 }
 0x138   : > { %s940_s13 = smov %s848_s19  ;;  %s941_s14 = smov %s840_s16 }
 0x139   :  { %12 = sbr.rel (!%p10_p2) target bundleno = 2 (0x2), region = 140 }

// kernel: pcb_forward.31
= control target key start
LH: loop header
LB: loop body
LE: loop exit
PB: predicated region body
PF: predicated region fallthrough
CT: control target
= control target key end

     0   :  { %s1796_s12 = smov 0   ;;  %s1798_s13 = smov 0   ;;  %s2108_s0 = inlined_call_operand.vmem [shape: bf16[24,1152], index: 0, kind: input, shape index: {}]   ;;  %s2109_s1 = inlined_call_operand.vmem [shape: bf16[1152,128], index: 1, kind: input, shape index: {}]   ;;  %s2110_s2 = inlined_call_operand.vmem [shape: f32[1,128], index: 2, kind: input, shape index: {}]   ;;  %s2111_s3 = inlined_call_operand.vmem [shape: bf16[24,128], index: 3, kind: output, shape index: {}]  }
   0x1   :  { %s1800_s14 = smov 0  }
   0x2 LB: > { %s1809_s15 = sadd.s32 4294967295, %s1740_s14   ;;  %s1811_s16 = sadd.s32 1, %s1740_s14   ;;  %s1740_s14 = sphi %s1800_s14, %s2115_s14   ;;  %s1736_s13 = sphi %s1798_s13, %s2114_s13   ;;  %s1732_s12 = sphi %s1796_s12, %s2113_s12  }
   0x3   : > { %s85_s17 = ssub.s32 %s1740_s14, %s1811_s16  ;;  %s88_s18 = sadd.s32 1, %s1736_s13 }
   0x4   : > { %p86_p0 = scmp.eq.s32.totalorder %s85_s17, 0  ;;  %p98_p1 = scmp.ne.s32.totalorder %s1736_s13, %s1732_s12 }
   0x5   : > { %p99_p2 = scmp.eq.s32.totalorder %s1809_s15, 1  ;;  %p1278_p3 = scmp.ge.s32.totalorder %s1740_s14, 1 }
   0x6   : > { %s1819_s19 = scalar_select %p86_p0, %s1736_s13, %s88_s18  }
   0x7   : > { %p1821_p4 = por %p99_p2, %p98_p1  ;;  %p149_p5 = scmp.lt.s32.totalorder %s1740_s14, 3 }
   0x9   : > { %p150_p6 = pnand %p1278_p3, %p149_p5 }
   0xa   : > { %v1601_v0 = vld [vmem:[%s2109_s1 + $0x40] sm:$0xff] (!%p150_p6)   ;;  %v1605_v4 = vld [vmem:[%s2109_s1 + $0x48] sm:$0xff] (!%p150_p6)   ;;  %v1609_v8 = vld [vmem:[%s2109_s1 + $0x50] sm:$0xff] (!%p150_p6)   ;;  %s1868_s28 = sshll.u32 (!%p150_p6), %s1809_s15, 1  ;;  %vm1775_vm0 = vmmov (!%p150_p6), 0  }
   0xb   : > { %153 = sbr.rel (%p150_p6) target bundleno = 377 (0x179), region = 32  ;;  %v1602_v1 = vld [vmem:[%s2109_s1] sm:$0xff] (!%p150_p6)   ;;  %1393 = vmatprep.subr.bf16.mxu0 (!%p150_p6), %v1601_v0  ;;  %v1606_v5 = vld [vmem:[%s2109_s1 + $0x8] sm:$0xff] (!%p150_p6)   ;;  %v1610_v9 = vld [vmem:[%s2109_s1 + $0x10] sm:$0xff] (!%p150_p6)   ;;  %p184_p7 = scmp.lt.s32.totalorder (!%p150_p6), %s1868_s28, 2 }
   0xc   : > { %v1603_v2 = vld [vmem:[%s2109_s1 + $0xc0] sm:$0xff] (!%p150_p6)   ;;  %1394 = vmatpush3.bf16.msra.mxu0 (!%p150_p6), %v1602_v1  ;;  %v1607_v6 = vld [vmem:[%s2109_s1 + $0xc8] sm:$0xff] (!%p150_p6)   ;;  %v1611_v10 = vld [vmem:[%s2109_s1 + $0xd0] sm:$0xff] (!%p150_p6)  }
   0xd   : > { %v1604_v3 = vld [vmem:[%s2109_s1 + $0x80] sm:$0xff] (!%p150_p6)   ;;  %1415 = vmatprep.subr.bf16.mxu1 (!%p150_p6), %v1603_v2  ;;  %1395 = vmatprep.subr.bf16.mxu0 (!%p150_p6), %v1605_v4  ;;  %v1608_v7 = vld [vmem:[%s2109_s1 + $0x88] sm:$0xff] (!%p150_p6)   ;;  %v1612_v11 = vld [vmem:[%s2109_s1 + $0x90] sm:$0xff] (!%p150_p6)  }
   0xe   : > { %1416 = vmatpush3.bf16.msra.mxu1 (!%p150_p6), %v1604_v3  ;;  %v1613_v12 = vld [vmem:[%s2109_s1 + $0x58] sm:$0xff] (!%p150_p6)   ;;  %v1617_v16 = vld [vmem:[%s2109_s1 + $0x60] sm:$0xff] (!%p150_p6)   ;;  %v1621_v20 = vld [vmem:[%s2109_s1 + $0x68] sm:$0xff] (!%p150_p6)  }
   0xf   : > { %1417 = vmatprep.subr.bf16.mxu1 (!%p150_p6), %v1607_v6  ;;  %v1614_v13 = vld [vmem:[%s2109_s1 + $0x18] sm:$0xff] (!%p150_p6)   ;;  %v1618_v17 = vld [vmem:[%s2109_s1 + $0x20] sm:$0xff] (!%p150_p6)   ;;  %v1622_v21 = vld [vmem:[%s2109_s1 + $0x28] sm:$0xff] (!%p150_p6)   ;;  %v1774_v6 = vmov (!%p150_p6), 0.0  }
  0x10   : > { %1396 = vmatpush3.bf16.msra.mxu0 (!%p150_p6), %v1606_v5  ;;  %v1615_v14 = vld [vmem:[%s2109_s1 + $0xd8] sm:$0xff] (!%p150_p6)   ;;  %v1619_v18 = vld [vmem:[%s2109_s1 + $0xe0] sm:$0xff] (!%p150_p6)   ;;  %v1623_v22 = vld [vmem:[%s2109_s1 + $0xe8] sm:$0xff] (!%p150_p6)  }
  0x11   : > { %1397 = vmatprep.subr.bf16.mxu0 (!%p150_p6), %v1609_v8  ;;  %v1616_v15 = vld [vmem:[%s2109_s1 + $0x98] sm:$0xff] (!%p150_p6)   ;;  %v1620_v19 = vld [vmem:[%s2109_s1 + $0xa0] sm:$0xff] (!%p150_p6)   ;;  %v1624_v23 = vld [vmem:[%s2109_s1 + $0xa8] sm:$0xff] (!%p150_p6)  }
  0x12   : > { %1418 = vmatpush3.bf16.msra.mxu1 %v1608_v7  ;;  %s185_s22 = scalar_select %p184_p7, %s1868_s28, 2  ;;  %v1625_v24 = vld [vmem:[%s2109_s1 + $0x70] sm:$0xff]   ;;  %v1629_v28 = vld [vmem:[%s2109_s1 + $0x78] sm:$0xff]   ;;  %v1636_v34 = vld [vmem:[%s2109_s1 + $0x140] sm:$0xff]  }
  0x13   : > { %1419 = vmatprep.subr.bf16.mxu1 %v1611_v10  ;;  %v1626_v25 = vld [vmem:[%s2109_s1 + $0x30] sm:$0xff]   ;;  %v1630_v29 = vld [vmem:[%s2109_s1 + $0x38] sm:$0xff]   ;;  %v1640_v37 = vld [vmem:[%s2109_s1 + $0x100] sm:$0xff]   ;;  %s1065_s11 = ssub.s32 (%p1821_p4), 3, %s1868_s28 }
  0x14   : > { %1398 = vmatpush3.bf16.msra.mxu0 %v1610_v9  ;;  %s1510_s5 = smul.u32 36, %s185_s22  ;;  %v1627_v26 = vld [vmem:[%s2109_s1 + $0xf0] sm:$0xff]   ;;  %v1631_v30 = vld [vmem:[%s2109_s1 + $0xf8] sm:$0xff]   ;;  %v1641_v38 = vld [vmem:[%s2109_s1 + $0x1c0] sm:$0xff]   ;;  %p1066_p8 = scmp.lt.s32.totalorder (%p1821_p4), %s1065_s11, 2 }
  0x15   : > { %1399 = vmatprep.subr.bf16.mxu0 %v1613_v12  ;;  %v1628_v27 = vld [vmem:[%s2109_s1 + $0xb0] sm:$0xff]   ;;  %v1635_v33 = vld [vmem:[%s2109_s1 + $0xb8] sm:$0xff]   ;;  %v1642_v39 = vld [vmem:[%s2109_s1 + $0x180] sm:$0xff]  }
  0x16   : > { %1420 = vmatpush3.bf16.msra.mxu1 %v1612_v11  ;;  %s1920_s22 = scalar_lea.vmem %s2108_s0, %s1510_s5  ;;  %v1643_v40 = vld [vmem:[%s2109_s1 + $0x148] sm:$0xff]   ;;  %v1647_v44 = vld [vmem:[%s2109_s1 + $0x150] sm:$0xff]   ;;  %v1651_v48 = vld [vmem:[%s2109_s1 + $0x158] sm:$0xff]  }
  0x17   : > { %1421 = vmatprep.subr.bf16.mxu1 %v1615_v14  ;;  %v1632_v31 = vld [vmem:[%s1920_s22] ss:$36 sps:$4 sm:$0xff]   ;;  %v1637_v35 = vld [vmem:[%s1920_s22 + $0x8] ss:$36 sps:$4 sm:$0xff]   ;;  %v1648_v45 = vld [vmem:[%s2109_s1 + $0x110] sm:$0xff]  }
  0x18   : > { %1400 = vmatpush3.bf16.msra.mxu0 %v1614_v13  ;;  %v1634_v32 = vld [vmem:[%s1920_s22 + $0x4] ss:$36 sps:$4 sm:$0xff]   ;;  %v1639_v36 = vld [vmem:[%s1920_s22 + $0xc] ss:$36 sps:$4 sm:$0xff]   ;;  %v1652_v49 = vld [vmem:[%s2109_s1 + $0x118] sm:$0xff]  }
  0x19   : > { %1401 = vmatprep.subr.bf16.mxu0 %v1617_v16  ;;  %872 = vmatprep.mubr.bf16.mxu0 %v1634_v32  ;;  %v1644_v41 = vld [vmem:[%s2109_s1 + $0x108] sm:$0xff]   ;;  %v1649_v46 = vld [vmem:[%s2109_s1 + $0x1d0] sm:$0xff]   ;;  %v1653_v50 = vld [vmem:[%s2109_s1 + $0x1d8] sm:$0xff]  }
  0x1a   : > { %1422 = vmatpush3.bf16.msra.mxu1 %v1616_v15  ;;  %913 = vmatprep.mubr.bf16.mxu1 %v1639_v36  ;;  %v1645_v42 = vld [vmem:[%s2109_s1 + $0x1c8] sm:$0xff]   ;;  %v1650_v47 = vld [vmem:[%s2109_s1 + $0x190] sm:$0xff]   ;;  %v1654_v51 = vld [vmem:[%s2109_s1 + $0x198] sm:$0xff]  }
  0x1b   : > { %1423 = vmatprep.subr.bf16.mxu1 %v1619_v18  ;;  %v1646_v43 = vld [vmem:[%s2109_s1 + $0x188] sm:$0xff]   ;;  %v1655_v52 = vld [vmem:[%s2109_s1 + $0x160] sm:$0xff]   ;;  %v1663_v60 = vld [vmem:[%s2109_s1 + $0x170] sm:$0xff]  }
  0x1c   : > { %1402 = vmatpush3.bf16.msra.mxu0 %v1618_v17  ;;  %v1656_v53 = vld [vmem:[%s2109_s1 + $0x120] sm:$0xff]   ;;  %v1659_v56 = vld [vmem:[%s2109_s1 + $0x168] sm:$0xff]   ;;  %v1664_v61 = vld [vmem:[%s2109_s1 + $0x130] sm:$0xff]  }
  0x1d   : > { %1403 = vmatprep.subr.bf16.mxu0 %v1621_v20  ;;  %v1657_v54 = vld [vmem:[%s2109_s1 + $0x1e0] sm:$0xff]   ;;  %v1660_v57 = vld [vmem:[%s2109_s1 + $0x128] sm:$0xff]   ;;  %v1665_v62 = vld [vmem:[%s2109_s1 + $0x1f0] sm:$0xff]  }
  0x1e   : > { %1424 = vmatpush3.bf16.msra.mxu1 %v1620_v19  ;;  %v1658_v55 = vld [vmem:[%s2109_s1 + $0x1a0] sm:$0xff]   ;;  %v1661_v58 = vld [vmem:[%s2109_s1 + $0x1e8] sm:$0xff]   ;;  %v1666_v63 = vld [vmem:[%s2109_s1 + $0x1b0] sm:$0xff]  }
  0x1f   : > { %1425 = vmatprep.subr.bf16.mxu1 %v1623_v22  ;;  %v1662_v59 = vld [vmem:[%s2109_s1 + $0x1a8] sm:$0xff]   ;;  %v1667_v0 = vld [vmem:[%s2109_s1 + $0x178] sm:$0xff]   ;;  %v1670_v3 = vld [vmem:[%s1920_s22 + $0x10] ss:$36 sps:$4 sm:$0xff]  }
  0x20   : > { %1404 = vmatpush3.bf16.msra.mxu0 %v1622_v21  ;;  %v1668_v1 = vld [vmem:[%s2109_s1 + $0x138] sm:$0xff]   ;;  %v1677_v9 = vld [vmem:[%s2109_s1 + $0x200] sm:$0xff]   ;;  %v1678_v10 = vld [vmem:[%s2109_s1 + $0x208] sm:$0xff]  }
  0x21   : > { %1405 = vmatprep.subr.bf16.mxu0 %v1625_v24  ;;  %v1669_v2 = vld [vmem:[%s2109_s1 + $0x1f8] sm:$0xff]   ;;  %v1679_v11 = vld [vmem:[%s2109_s1 + $0x210] sm:$0xff]   ;;  %v1681_v13 = vld [vmem:[%s2109_s1 + $0x220] sm:$0xff]  }
  0x22   : > { %1426 = vmatpush3.bf16.msra.mxu1 %v1624_v23  ;;  %v1672_v4 = vld [vmem:[%s1920_s22 + $0x14] ss:$36 sps:$4 sm:$0xff]   ;;  %v1676_v8 = vld [vmem:[%s1920_s22 + $0x1c] ss:$36 sps:$4 sm:$0xff]   ;;  %v1682_v14 = vld [vmem:[%s2109_s1 + $0x228] sm:$0xff]  }
  0x23   : > { %1427 = vmatprep.subr.bf16.mxu1 %v1627_v26  ;;  %v1673_v5 = vld [vmem:[%s2109_s1 + $0x1b8] sm:$0xff]   ;;  %v1683_v15 = vld [vmem:[%s2109_s1 + $0x230] sm:$0xff]   ;;  %v1685_v17 = vld [vmem:[%s1920_s22 + $0x20] ss:$36 sps:$4 sm:$0xff]  }
  0x24   : > { %1406 = vmatpush3.bf16.msra.mxu0 %v1626_v25  ;;  %v1674_v7 = vld [vmem:[%s1920_s22 + $0x18] ss:$36 sps:$4 sm:$0xff]   ;;  %v1282_v19 = vld [vmem:[%s2110_s2] ss:$0 sm:$0xff]  ;;  %s175_s22 = sand.u32 1, %s1732_s12   ;;  %s1385_s12 = sshll.u32 (%p1821_p4), %s1809_s15, 3 }
  0x25   : > { %1407 = vmatprep.subr.bf16.mxu0 %v1629_v28  ;;  %v1680_v12 = vld [vmem:[%s2109_s1 + $0x218] sm:$0xff]   ;;  %s1279_s9 = sshll.u32 %s175_s22, 3  ;;  %s2074_s18 = scalar_lea.vmem (%p1821_p4), %s2111_s3, %s1385_s12  }
  0x26   : > { %1428 = vmatpush3.bf16.msra.mxu1 %v1628_v27  ;;  %v1684_v16 = vld [vmem:[%s2109_s1 + $0x238] sm:$0xff]   ;;  %s2064_s10 = scalar_lea.vmem [#allocation2], %s1279_s9  }
  0x27   : > { %1429 = vmatprep.subr.bf16.mxu1 %v1631_v30 }
  0x28   : > { %1408 = vmatpush3.bf16.msra.mxu0 %v1630_v29 }
  0x29   : > { %1437 = vmatprep.subr.bf16.mxu0 %v1636_v34 }
  0x2a   : > { %1430 = vmatpush3.bf16.msra.mxu1 %v1635_v33 }
  0x2b   : > { %873 = vmatmul.mubr.bf16.vlgmr.msra.gmra.mrb[0].mxu0 %v1632_v31  ;;  %1459 = vmatprep.subr.bf16.mxu1 %v1641_v38 }
  0x2c   : > { %1438 = vmatpush3.bf16.msra.mxu0 %v1640_v37  ;;  %954 = vmatprep.mubr.bf16.mxu0 %v1672_v4 }
  0x2d   : > { %914 = vmatmul.mubr.bf16.vlgmr.msra.gmra.mrb[0].mxu1 %v1637_v35  ;;  %1439 = vmatprep.subr.bf16.mxu0 %v1643_v40 }
  0x2e   : > { %1460 = vmatpush3.bf16.msra.mxu1 %v1642_v39  ;;  %995 = vmatprep.mubr.bf16.mxu1 %v1676_v8 }
  0x2f   : > { %1461 = vmatprep.subr.bf16.mxu1 %v1645_v42 }
  0x30   : > { %1440 = vmatpush3.bf16.msra.mxu0 %v1644_v41 }
  0x31   : > { %1441 = vmatprep.subr.bf16.mxu0 %v1647_v44 }
  0x32   : > { %1462 = vmatpush3.bf16.msra.mxu1 %v1646_v43 }
  0x33   : > { %1463 = vmatprep.subr.bf16.mxu1 %v1649_v46 }
  0x34   : > { %1442 = vmatpush3.bf16.msra.mxu0 %v1648_v45 }
  0x35   : > { %1443 = vmatprep.subr.bf16.mxu0 %v1651_v48 }
  0x36   : > { %1464 = vmatpush3.bf16.msra.mxu1 %v1650_v47 }
  0x37   : > { %1465 = vmatprep.subr.bf16.mxu1 %v1653_v50 }
  0x38   : > { %1444 = vmatpush3.bf16.msra.mxu0 %v1652_v49 }
  0x39   : > { %1445 = vmatprep.subr.bf16.mxu0 %v1655_v52 }
  0x3a   : > { %1466 = vmatpush3.bf16.msra.mxu1 %v1654_v51 }
  0x3b   : > { %1467 = vmatprep.subr.bf16.mxu1 %v1657_v54 }
  0x3c   : > { %1446 = vmatpush3.bf16.msra.mxu0 %v1656_v53 }
  0x3d   : > { %1447 = vmatprep.subr.bf16.mxu0 %v1659_v56 }
  0x3e   : > { %1468 = vmatpush3.bf16.msra.mxu1 %v1658_v55 }
  0x3f   : > { %1469 = vmatprep.subr.bf16.mxu1 %v1661_v58 }
  0x40   : > { %1448 = vmatpush3.bf16.msra.mxu0 %v1660_v57 }
  0x41   : > { %1449 = vmatprep.subr.bf16.mxu0 %v1663_v60 }
  0x42   : > { %1470 = vmatpush3.bf16.msra.mxu1 %v1662_v59 }
  0x43   : > { %1471 = vmatprep.subr.bf16.mxu1 %v1665_v62 }
  0x44   : > { %1450 = vmatpush3.bf16.msra.mxu0 %v1664_v61 }
  0x45   : > { %1451 = vmatprep.subr.bf16.mxu0 %v1667_v0 }
  0x46   : > { %1472 = vmatpush3.bf16.msra.mxu1 %v1666_v63 }
  0x47   : > { %1473 = vmatprep.subr.bf16.mxu1 %v1669_v2 }
  0x48   : > { %1452 = vmatpush3.bf16.msra.mxu0 %v1668_v1 }
  0x49   : > { %1490 = vmatprep.subr.bf16.mxu0 %v1774_v6 }
  0x4a   : > { %1474 = vmatpush3.bf16.msra.mxu1 %v1673_v5 }
  0x4b   : > { %955 = vmatmul.mubr.bf16.vlgmr.msra.gmra.mrb[4].mxu0 %v1670_v3 }
  0x4c   : > { %1506 = vmatprep.mubr.msk.bf16.mxu0 %vm1775_vm0, %v1774_v6  ;;  %1491 = vmatpush3.bf16.msra.mxu0 %v1677_v9 }
  0x4d   : > { %996 = vmatmul.mubr.bf16.vlgmr.msra.gmra.mrb[4].mxu1 %v1674_v7  ;;  %1492 = vmatprep.subr.bf16.mxu0 %v1774_v6 }
  0x50   : > { %1493 = vmatpush3.bf16.msra.mxu0 %v1678_v10 }
  0x51   : > { %1494 = vmatprep.subr.bf16.mxu0 %v1774_v6 }
  0x54   : > { %1495 = vmatpush3.bf16.msra.mxu0 %v1679_v11 }
  0x55   : > { %1496 = vmatprep.subr.bf16.mxu0 %v1774_v6 }
  0x58   : > { %1497 = vmatpush3.bf16.msra.mxu0 %v1680_v12 }
  0x59   : > { %1498 = vmatprep.subr.bf16.mxu0 %v1774_v6 }
  0x5c   : > { %1499 = vmatpush3.bf16.msra.mxu0 %v1681_v13 }
  0x5d   : > { %1500 = vmatprep.subr.bf16.mxu0 %v1774_v6 }
  0x60   : > { %1501 = vmatpush3.bf16.msra.mxu0 %v1682_v14 }
  0x61   : > { %1502 = vmatprep.subr.bf16.mxu0 %v1774_v6 }
  0x64   : > { %1503 = vmatpush3.bf16.msra.mxu0 %v1683_v15 }
  0x65   : > { %1504 = vmatprep.subr.bf16.mxu0 %v1774_v6 }
  0x68   : > { %1505 = vmatpush3.bf16.msra.mxu0 %v1684_v16 }
  0x6b   : > { %1507 = vmatmul.mubr.bf16.vlgmr.msra.gmra.mrb[8].mxu0 %v1685_v17 }
  0xfe   : > { %v1409_v18 = vpop.f32.mrb[0].mxu0 }
  0xff   : > { %v1410_v20 = vpop.f32.mrb[1].mxu0 }
 0x100   : > { %v1411_v21 = vadd.f32 %v1410_v20, %v1409_v18  ;;  %v1412_v22 = vpop.f32.mrb[2].mxu0  ;;  %v1431_v23 = vpop.f32.mrb[0].mxu1 }
 0x101   : > { %v1413_v24 = vpop.f32.mrb[3].mxu0  ;;  %v1432_v27 = vpop.f32.mrb[1].mxu1 }
 0x102   : > { %v875_v25 = vadd.f32 %v1411_v21, %v1282_v19  ;;  %v1414_v26 = vadd.f32 %v1413_v24, %v1412_v22  ;;  %v1433_v28 = vadd.f32 %v1432_v27, %v1431_v23  ;;  %v1434_v29 = vpop.f32.mrb[2].mxu1 }
 0x103   : > { %v1435_v31 = vpop.f32.mrb[3].mxu1 }
 0x104   : > { %v878_v30 = vadd.f32 %v1414_v26, %v1282_v19  ;;  %v916_v32 = vadd.f32 %v1433_v28, %v875_v25  ;;  %v1436_v33 = vadd.f32 %v1435_v31, %v1434_v29 }
 0x106   : > { %v919_v34 = vadd.f32 %v1436_v33, %v878_v30 }
 0x11e   : > { %v1453_v35 = vpop.f32.mrb[4].mxu0 }
 0x11f   : > { %v1454_v36 = vpop.f32.mrb[5].mxu0 }
 0x120   : > { %v1455_v37 = vadd.f32 %v1454_v36, %v1453_v35  ;;  %v1456_v38 = vpop.f32.mrb[6].mxu0  ;;  %v1475_v39 = vpop.f32.mrb[4].mxu1 }
 0x121   : > { %v1457_v40 = vpop.f32.mrb[7].mxu0  ;;  %v1476_v43 = vpop.f32.mrb[5].mxu1 }
 0x122   : > { %v957_v41 = vadd.f32 %v1455_v37, %v916_v32  ;;  %v1458_v42 = vadd.f32 %v1457_v40, %v1456_v38  ;;  %v1477_v44 = vadd.f32 %v1476_v43, %v1475_v39  ;;  %v1478_v45 = vpop.f32.mrb[6].mxu1 }
 0x123   : > { %v1479_v47 = vpop.f32.mrb[7].mxu1 }
 0x124   : > { %v960_v46 = vadd.f32 %v1458_v42, %v919_v34  ;;  %v1480_v48 = vadd.f32 %v1479_v47, %v1478_v45  ;;  %v998_v49 = vadd.f32 %v1477_v44, %v957_v41 }
 0x126   : > { %v1001_v50 = vadd.f32 %v1480_v48, %v960_v46 }
 0x13e   : > { %v1038_v51 = vpop.f32.mrb[8].mxu0 }
 0x13f   : > { %v1039_v52 = vadd.f32 %v1038_v51, %v998_v49  ;;  %v1508_v53 = vpop.f32.mrb[9].mxu0 }
 0x140   : > { %v1041_v54 = vpop.f32.mrb[10].mxu0 }
 0x141   : > { %v1042_v55 = vadd.f32 %v1041_v54, %v1001_v50  ;;  %v1509_v56 = vpop.f32.mrb[11].mxu0  ;;  %v1045_v57 = vmax.f32 %v1039_v52, 0.0  ;;  %1063 = sbr.rel (!%p1821_p4) target bundleno = 377 (0x179), region = 36 }
 0x143   : > { %v1046_v58 = vmax.f32 %v1042_v55, 0.0 }
 0x145   : > { %v1391_v59 = vpack.c.bf16 %v1046_v58, %v1045_v57 }
 0x147   : > { %1392 = vst [vmem:[%s2064_s10] sm:$0xff] %v1391_v59  }
 0x148   : > { %s2117_s11 = smov (!%p1066_p8, %s1065_s11), 2 }
 0x149   : > { %s1368_s21 = sshll.u32 %s2117_s11, 6 }
 0x14a   : > { %p1371_p9 = scmp.eq.s32.totalorder %s1368_s21, 0 }
 0x14b   : > { %s2080_s23 = sshrl.u32 (!%p1371_p9), %s2117_s11, 1 }
 0x14c   : > { %1074 = sbr.rel (%p1371_p9) target bundleno = 377 (0x179), region = 40  ;;  %p1372_p10 = scmp.le.s32.totalorder (!%p1371_p9), %s2080_s23, 0 }
 0x153   : > { %1231 = sbr.rel (%p1372_p10) target bundleno = 356 (0x164), region = 112  ;;  %s1742_s15 = smov (!%p1372_p10), %s2074_s18  }
 0x154   : > { %s1746_s20 = smov (!%p1372_p10), %s2064_s10   ;;  %s1750_s28 = smov (!%p1372_p10), 0  }
 0x155   : > { %s1754_s24 = smov (!%p1372_p10), 0  }
 0x15a LB: >> { %v1090_v60 = vld [vmem:[%s1748_s20] sm:$0xf]  ;;  %v1092_v61 = vld [vmem:[%s1748_s20 + $0x4] sm:$0xf]  ;;  %s1094_s25 = sadd.s32 1, %s1752_s28  ;;  %s1084_s24 = sadd.s32 1, %s1756_s24   ;;  %s1756_s24 = sphi %s1754_s24, %s1084_s24   ;;  %s1752_s28 = sphi %s1750_s28, %s1751_s28   ;;  %s1748_s20 = sphi %s1746_s20, %s1099_s20   ;;  %s1744_s15 = sphi %s1742_s15, %s1100_s15  }
 0x15b   : >> { %1091 = vst [vmem:[%s1744_s15] sm:$0xf] %v1090_v60  ;;  %1093 = vst [vmem:[%s1744_s15 + $0x4] sm:$0xf] %v1092_v61  ;;  %p1095_p11 = scmp.ge.s32.totalorder %s1094_s25, %s2080_s23  ;;  %p1083_p12 = scmp.ge.s32.totalorder %s1084_s24, %s2080_s23 }
 0x15d   : >> { %s2119_s25 = smov (%p1095_p11, %s1094_s25), 0  ;;  %1086 = sbr.rel (!%p1083_p12) target bundleno = 346 (0x15a), region = 118 }
 0x15e   : >> { %s1373_s26 = sshll.u32 %s2119_s25, 3  ;;  %s1751_s28 = smov %s2119_s25  }
 0x15f   : >> { %s1099_s20 = scalar_lea.vmem %s2064_s10, %s1373_s26 [#allocation2]   ;;  %s1100_s15 = scalar_lea.vmem %s2074_s18, %s1373_s26  }
 0x164 PF: > { %s2090_s27 = sand.u32 1, %s2117_s11   ;;  %s1386_s29 = sshll.u32 %s2080_s23, 3 }
 0x165   : > { %s1105_s30 = scalar_lea.vmem %s2064_s10, %s1386_s29 [#allocation2]   ;;  %s1107_s4 = scalar_lea.vmem %s2074_s18, %s1386_s29  }
 0x166   : > { %p1378_p13 = scmp.le.s32.totalorder %s2090_s27, 0 }
 0x167   : > { %s1758_s5 = smov (!%p1378_p13), %s1107_s4   ;;  %s1762_s6 = smov (!%p1378_p13), %s1105_s30  }
 0x168   : > { %1245 = sbr.rel (%p1378_p13) target bundleno = 377 (0x179), region = 123  ;;  %s1766_s7 = smov (!%p1378_p13), 0  }
 0x169   : > { %s1770_s8 = smov (!%p1378_p13), 0  }
 0x16f LB: >> { %v1117_v62 = vld [vmem:[%s1764_s6] sm:$0xf]  ;;  %s1119_s22 = sadd.s32 1, %s1768_s7  ;;  %s1111_s8 = sadd.s32 1, %s1772_s8   ;;  %s1772_s8 = sphi %s1770_s8, %s1111_s8   ;;  %s1768_s7 = sphi %s1766_s7, %s1767_s7   ;;  %s1764_s6 = sphi %s1762_s6, %s1124_s6   ;;  %s1760_s5 = sphi %s1758_s5, %s1125_s5  }
 0x170   : >> { %1118 = vst [vmem:[%s1760_s5] sm:$0xf] %v1117_v62  ;;  %p1120_p0 = scmp.ge.s32.totalorder %s1119_s22, %s2090_s27  ;;  %p1110_p1 = scmp.ge.s32.totalorder %s1111_s8, %s2090_s27 }
 0x172   : >> { %s2121_s22 = smov (%p1120_p0, %s1119_s22), 0  ;;  %1113 = sbr.rel (!%p1110_p1) target bundleno = 367 (0x16f), region = 129 }
 0x173   : >> { %s1379_s9 = sshll.u32 %s2121_s22, 2  ;;  %s1767_s7 = smov %s2121_s22  }
 0x174   : >> { %s1124_s6 = scalar_lea.vmem %s1105_s30, %s1379_s9 [#allocation2]   ;;  %s1125_s5 = scalar_lea.vmem %s1107_s4, %s1379_s9  }
 0x179 PF: > { %p10_p2 = scmp.ge.s32.totalorder %s1811_s16, 4   ;;  %s2113_s12 = smov %s1736_s13 }
 0x17a   : > { %s2114_s13 = smov %s1819_s19  ;;  %s2115_s14 = smov %s1811_s16 }
 0x17b   :  { %12 = sbr.rel (!%p10_p2) target bundleno = 2 (0x2), region = 140 }

// kernel: pcb_forward.33
= control target key start
LH: loop header
LB: loop body
LE: loop exit
PB: predicated region body
PF: predicated region fallthrough
CT: control target
= control target key end

     0   :  { %s925_s15 = smov 0   ;;  %s927_s16 = smov 0   ;;  %s1037_s0 = inlined_call_operand.vmem [shape: bf16[24,128], index: 0, kind: input, shape index: {}]   ;;  %s1038_s1 = inlined_call_operand.vmem [shape: bf16[128,128], index: 1, kind: input, shape index: {}]   ;;  %s1039_s2 = inlined_call_operand.vmem [shape: f32[1,128], index: 2, kind: input, shape index: {}]   ;;  %s1040_s3 = inlined_call_operand.vmem [shape: bf16[24,128], index: 3, kind: input, shape index: {}]   ;;  %s1041_s4 = inlined_call_operand.vmem [shape: bf16[24,128], index: 4, kind: output, shape index: {}]  }
   0x1   :  { %s929_s17 = smov 0  }
   0x2 LB: > { %s938_s18 = sadd.s32 4294967295, %s864_s17   ;;  %s940_s19 = sadd.s32 1, %s864_s17   ;;  %s864_s17 = sphi %s929_s17, %s1045_s17   ;;  %s860_s16 = sphi %s927_s16, %s1044_s16   ;;  %s856_s15 = sphi %s925_s15, %s1043_s15  }
   0x3   : > { %s112_s20 = ssub.s32 %s864_s17, %s940_s19  ;;  %s115_s21 = sadd.s32 1, %s860_s16 }
   0x4   : > { %p113_p0 = scmp.eq.s32.totalorder %s112_s20, 0  ;;  %p125_p1 = scmp.ne.s32.totalorder %s860_s16, %s856_s15 }
   0x5   : > { %p126_p2 = scmp.eq.s32.totalorder %s938_s18, 1  ;;  %p633_p3 = scmp.ge.s32.totalorder %s864_s17, 1 }
   0x6   : > { %s948_s22 = scalar_select %p113_p0, %s860_s16, %s115_s21  }
   0x7   : > { %p950_p4 = por %p126_p2, %p125_p1  ;;  %p190_p5 = scmp.lt.s32.totalorder %s864_s17, 3 }
   0x9   : > { %p191_p6 = pnand %p633_p3, %p190_p5 }
   0xa   : > { %v801_v0 = vld [vmem:[%s1038_s1] sm:$0xff] (!%p191_p6)   ;;  %v898_v1 = vmov (!%p191_p6), 0.0   ;;  %v802_v2 = vld [vmem:[%s1038_s1 + $0x8] sm:$0xff] (!%p191_p6)   ;;  %vm899_vm0 = vmmov (!%p191_p6), 0   ;;  %s961_s28 = sshll.u32 (!%p191_p6), %s938_s18, 1  ;;  %v803_v3 = vld [vmem:[%s1038_s1 + $0x10] sm:$0xff] (!%p191_p6)  }
   0xb   : > { %194 = sbr.rel (%p191_p6) target bundleno = 315 (0x13b), region = 36  ;;  %691 = vmatprep.subr.bf16.mxu0 (!%p191_p6), %v898_v1  ;;  %707 = vmatprep.mubr.msk.bf16.mxu0 (!%p191_p6), %vm899_vm0, %v898_v1  ;;  %p233_p7 = scmp.lt.s32.totalorder (!%p191_p6), %s961_s28, 2  ;;  %v804_v4 = vld [vmem:[%s1038_s1 + $0x18] sm:$0xff] (!%p191_p6)   ;;  %v805_v5 = vld [vmem:[%s1038_s1 + $0x20] sm:$0xff] (!%p191_p6)   ;;  %v806_v6 = vld [vmem:[%s1038_s1 + $0x28] sm:$0xff] (!%p191_p6)  }
   0xc   : > { %692 = vmatpush3.bf16.msra.mxu0 (!%p191_p6), %v801_v0  ;;  %v807_v7 = vld [vmem:[%s1038_s1 + $0x30] sm:$0xff] (!%p191_p6)   ;;  %v808_v8 = vld [vmem:[%s1038_s1 + $0x38] sm:$0xff] (!%p191_p6)   ;;  %v639_v11 = vld [vmem:[%s1039_s2] ss:$0 sm:$0xff] (!%p191_p6)  ;;  %s225_s7 = sand.u32 (!%p191_p6), 1, %s856_s15  }
   0xd   : > { %693 = vmatprep.subr.bf16.mxu0 (!%p191_p6), %v898_v1  ;;  %s634_s8 = sshll.u32 (!%p191_p6), %s225_s7, 3 }
  0x10   : > { %694 = vmatpush3.bf16.msra.mxu0 (!%p191_p6), %v802_v2 }
  0x11   : > { %695 = vmatprep.subr.bf16.mxu0 (!%p191_p6), %v898_v1 }
  0x12   : > { %s234_s29 = scalar_select %p233_p7, %s961_s28, 2 }
  0x13   : > { %s670_s15 = sshll.u32 (%p950_p4), %s938_s18, 3 }
  0x14   : > { %s636_s6 = sshll.u32 %s234_s29, 2  ;;  %696 = vmatpush3.bf16.msra.mxu0 %v803_v3  ;;  %s1003_s12 = scalar_lea.vmem (%p950_p4), %s1041_s4, %s670_s15  }
  0x15   : > { %s236_s9 = scalar_lea.vmem %s1037_s0, %s636_s6  ;;  %697 = vmatprep.subr.bf16.mxu0 %v898_v1  ;;  %s250_s29 = scalar_lea.vmem %s1040_s3, %s636_s6 }
  0x16   : > { %v809_v9 = vld [vmem:[%s236_s9] sm:$0xff]   ;;  %s993_s6 = scalar_lea.vmem [#allocation2], %s634_s8   ;;  %s408_s9 = ssub.s32 (%p950_p4), 3, %s961_s28 }
  0x17   : > { %v674_v10 = vld [vmem:[%s250_s29] sm:$0xff]   ;;  %p409_p8 = scmp.lt.s32.totalorder (%p950_p4), %s408_s9, 2 }
  0x18   : > { %698 = vmatpush3.bf16.msra.mxu0 %v804_v4  ;;  %v675_v12 = vunpack.c.l.bf16 %v674_v10  ;;  %v676_v16 = vunpack.c.h.bf16 %v674_v10 }
  0x19   : > { %699 = vmatprep.subr.bf16.mxu0 %v898_v1 }
  0x1c   : > { %700 = vmatpush3.bf16.msra.mxu0 %v805_v5 }
  0x1d   : > { %701 = vmatprep.subr.bf16.mxu0 %v898_v1 }
  0x20   : > { %702 = vmatpush3.bf16.msra.mxu0 %v806_v6 }
  0x21   : > { %703 = vmatprep.subr.bf16.mxu0 %v898_v1 }
  0x24   : > { %704 = vmatpush3.bf16.msra.mxu0 %v807_v7 }
  0x25   : > { %705 = vmatprep.subr.bf16.mxu0 %v898_v1 }
  0x28   : > { %706 = vmatpush3.bf16.msra.mxu0 %v808_v8 }
  0x2b   : > { %708 = vmatmul.mubr.bf16.vlgmr.msra.gmra.mrb[0].mxu0 %v809_v9 }
  0xfe   : > { %v375_v13 = vpop.f32.mrb[0].mxu0 }
  0xff   : > { %v376_v14 = vadd.f32 %v639_v11, %v375_v13  ;;  %v709_v15 = vpop.f32.mrb[1].mxu0 }
 0x100   : > { %v378_v17 = vpop.f32.mrb[2].mxu0 }
 0x101   : > { %v386_v18 = vadd.f32 %v675_v12, %v376_v14  ;;  %v379_v19 = vadd.f32 %v639_v11, %v378_v17  ;;  %v710_v20 = vpop.f32.mrb[3].mxu0 }
 0x103   : > { %v387_v21 = vadd.f32 %v676_v16, %v379_v19  ;;  %v388_v22 = vmax.f32 %v386_v18, 0.0  ;;  %406 = sbr.rel (!%p950_p4) target bundleno = 315 (0x13b), region = 40 }
 0x105   : > { %v389_v23 = vmax.f32 %v387_v21, 0.0 }
 0x107   : > { %v680_v24 = vpack.c.bf16 %v389_v23, %v388_v22 }
 0x109   : > { %681 = vst [vmem:[%s993_s6] sm:$0xff] %v680_v24  }
 0x10a   : > { %s1047_s9 = smov (!%p409_p8, %s408_s9), 2 }
 0x10b   : > { %s653_s13 = sshll.u32 %s1047_s9, 6 }
 0x10c   : > { %p656_p9 = scmp.eq.s32.totalorder %s653_s13, 0 }
 0x10d   : > { %s1009_s14 = sshrl.u32 (!%p656_p9), %s1047_s9, 1 }
 0x10e   : > { %417 = sbr.rel (%p656_p9) target bundleno = 315 (0x13b), region = 44  ;;  %p657_p10 = scmp.le.s32.totalorder (!%p656_p9), %s1009_s14, 0 }
 0x115   : > { %580 = sbr.rel (%p657_p10) target bundleno = 294 (0x126), region = 119  ;;  %s866_s18 = smov (!%p657_p10), %s1003_s12  }
 0x116   : > { %s870_s23 = smov (!%p657_p10), %s993_s6   ;;  %s874_s28 = smov (!%p657_p10), 0  }
 0x117   : > { %s878_s17 = smov (!%p657_p10), 0  }
 0x11c LB: >> { %v433_v25 = vld [vmem:[%s872_s23] sm:$0xf]  ;;  %v435_v26 = vld [vmem:[%s872_s23 + $0x4] sm:$0xf]  ;;  %s437_s20 = sadd.s32 1, %s876_s28  ;;  %s427_s17 = sadd.s32 1, %s880_s17   ;;  %s880_s17 = sphi %s878_s17, %s427_s17   ;;  %s876_s28 = sphi %s874_s28, %s875_s28   ;;  %s872_s23 = sphi %s870_s23, %s442_s23   ;;  %s868_s18 = sphi %s866_s18, %s443_s18  }
 0x11d   : >> { %434 = vst [vmem:[%s868_s18] sm:$0xf] %v433_v25  ;;  %436 = vst [vmem:[%s868_s18 + $0x4] sm:$0xf] %v435_v26  ;;  %p438_p11 = scmp.ge.s32.totalorder %s437_s20, %s1009_s14  ;;  %p426_p12 = scmp.ge.s32.totalorder %s427_s17, %s1009_s14 }
 0x11f   : >> { %s1049_s20 = smov (%p438_p11, %s437_s20), 0  ;;  %429 = sbr.rel (!%p426_p12) target bundleno = 284 (0x11c), region = 125 }
 0x120   : >> { %s658_s21 = sshll.u32 %s1049_s20, 3  ;;  %s875_s28 = smov %s1049_s20  }
 0x121   : >> { %s442_s23 = scalar_lea.vmem %s993_s6, %s658_s21 [#allocation2]   ;;  %s443_s18 = scalar_lea.vmem %s1003_s12, %s658_s21  }
 0x126 PF: > { %s1019_s24 = sand.u32 1, %s1047_s9   ;;  %s671_s25 = sshll.u32 %s1009_s14, 3 }
 0x127   : > { %s448_s26 = scalar_lea.vmem %s993_s6, %s671_s25 [#allocation2]   ;;  %s450_s27 = scalar_lea.vmem %s1003_s12, %s671_s25  }
 0x128   : > { %p663_p13 = scmp.le.s32.totalorder %s1019_s24, 0 }
 0x129   : > { %s882_s29 = smov (!%p663_p13), %s450_s27   ;;  %s886_s30 = smov (!%p663_p13), %s448_s26  }
 0x12a   : > { %594 = sbr.rel (%p663_p13) target bundleno = 315 (0x13b), region = 130  ;;  %s890_s5 = smov (!%p663_p13), 0  }
 0x12b   : > { %s894_s7 = smov (!%p663_p13), 0  }
 0x131 LB: >> { %v460_v27 = vld [vmem:[%s888_s30] sm:$0xf]  ;;  %s462_s8 = sadd.s32 1, %s892_s5  ;;  %s454_s7 = sadd.s32 1, %s896_s7   ;;  %s896_s7 = sphi %s894_s7, %s454_s7   ;;  %s892_s5 = sphi %s890_s5, %s891_s5   ;;  %s888_s30 = sphi %s886_s30, %s467_s30   ;;  %s884_s29 = sphi %s882_s29, %s468_s29  }
 0x132   : >> { %461 = vst [vmem:[%s884_s29] sm:$0xf] %v460_v27  ;;  %p463_p0 = scmp.ge.s32.totalorder %s462_s8, %s1019_s24  ;;  %p453_p1 = scmp.ge.s32.totalorder %s454_s7, %s1019_s24 }
 0x134   : >> { %s1051_s8 = smov (%p463_p0, %s462_s8), 0  ;;  %456 = sbr.rel (!%p453_p1) target bundleno = 305 (0x131), region = 136 }
 0x135   : >> { %s664_s6 = sshll.u32 %s1051_s8, 2  ;;  %s891_s5 = smov %s1051_s8  }
 0x136   : >> { %s467_s30 = scalar_lea.vmem %s448_s26, %s664_s6 [#allocation2]   ;;  %s468_s29 = scalar_lea.vmem %s450_s27, %s664_s6  }
 0x13b PF: > { %p11_p2 = scmp.ge.s32.totalorder %s940_s19, 4   ;;  %s1043_s15 = smov %s860_s16 }
 0x13c   : > { %s1044_s16 = smov %s948_s22  ;;  %s1045_s17 = smov %s940_s19 }
 0x13d   :  { %13 = sbr.rel (!%p11_p2) target bundleno = 2 (0x2), region = 147 }

// kernel: pcb_forward.34
= control target key start
LH: loop header
LB: loop body
LE: loop exit
PB: predicated region body
PF: predicated region fallthrough
CT: control target
= control target key end

     0   :  { %s827_s12 = smov 0   ;;  %s829_s13 = smov 0   ;;  %s936_s0 = inlined_call_operand.vmem [shape: bf16[24,128], index: 0, kind: input, shape index: {}]   ;;  %s937_s1 = inlined_call_operand.vmem [shape: bf16[128,128], index: 1, kind: input, shape index: {}]   ;;  %s938_s2 = inlined_call_operand.vmem [shape: f32[1,128], index: 2, kind: input, shape index: {}]   ;;  %s939_s3 = inlined_call_operand.vmem [shape: bf16[24,128], index: 3, kind: output, shape index: {}]  }
   0x1   :  { %s831_s14 = smov 0  }
   0x2 LB: > { %s840_s15 = sadd.s32 4294967295, %s771_s14   ;;  %s842_s16 = sadd.s32 1, %s771_s14   ;;  %s771_s14 = sphi %s831_s14, %s943_s14   ;;  %s767_s13 = sphi %s829_s13, %s942_s13   ;;  %s763_s12 = sphi %s827_s12, %s941_s12  }
   0x3   : > { %s85_s17 = ssub.s32 %s771_s14, %s842_s16  ;;  %s88_s18 = sadd.s32 1, %s767_s13 }
   0x4   : > { %p86_p0 = scmp.eq.s32.totalorder %s85_s17, 0  ;;  %p98_p1 = scmp.ne.s32.totalorder %s767_s13, %s763_s12 }
   0x5   : > { %p99_p2 = scmp.eq.s32.totalorder %s840_s15, 1  ;;  %p546_p3 = scmp.ge.s32.totalorder %s771_s14, 1 }
   0x6   : > { %s850_s19 = scalar_select %p86_p0, %s767_s13, %s88_s18  }
   0x7   : > { %p852_p4 = por %p99_p2, %p98_p1  ;;  %p146_p5 = scmp.lt.s32.totalorder %s771_s14, 3 }
   0x9   : > { %p147_p6 = pnand %p546_p3, %p146_p5 }
   0xa   : > { %v708_v0 = vld [vmem:[%s937_s1] sm:$0xff] (!%p147_p6)   ;;  %v805_v1 = vmov (!%p147_p6), 0.0   ;;  %v709_v2 = vld [vmem:[%s937_s1 + $0x8] sm:$0xff] (!%p147_p6)   ;;  %vm806_vm0 = vmmov (!%p147_p6), 0   ;;  %s863_s25 = sshll.u32 (!%p147_p6), %s840_s15, 1  ;;  %v710_v3 = vld [vmem:[%s937_s1 + $0x10] sm:$0xff] (!%p147_p6)  }
   0xb   : > { %150 = sbr.rel (%p147_p6) target bundleno = 313 (0x139), region = 32  ;;  %598 = vmatprep.subr.bf16.mxu0 (!%p147_p6), %v805_v1  ;;  %614 = vmatprep.mubr.msk.bf16.mxu0 (!%p147_p6), %vm806_vm0, %v805_v1  ;;  %p178_p7 = scmp.lt.s32.totalorder (!%p147_p6), %s863_s25, 2  ;;  %v711_v4 = vld [vmem:[%s937_s1 + $0x18] sm:$0xff] (!%p147_p6)   ;;  %v712_v5 = vld [vmem:[%s937_s1 + $0x20] sm:$0xff] (!%p147_p6)   ;;  %v713_v6 = vld [vmem:[%s937_s1 + $0x28] sm:$0xff] (!%p147_p6)  }
   0xc   : > { %599 = vmatpush3.bf16.msra.mxu0 (!%p147_p6), %v708_v0  ;;  %v714_v7 = vld [vmem:[%s937_s1 + $0x30] sm:$0xff] (!%p147_p6)   ;;  %v715_v8 = vld [vmem:[%s937_s1 + $0x38] sm:$0xff] (!%p147_p6)   ;;  %v550_v10 = vld [vmem:[%s938_s2] ss:$0 sm:$0xff] (!%p147_p6)  ;;  %s170_s24 = sand.u32 (!%p147_p6), 1, %s763_s12  }
   0xd   : > { %600 = vmatprep.subr.bf16.mxu0 (!%p147_p6), %v805_v1 }
  0x10   : > { %601 = vmatpush3.bf16.msra.mxu0 (!%p147_p6), %v709_v2 }
  0x11   : > { %602 = vmatprep.subr.bf16.mxu0 (!%p147_p6), %v805_v1 }
  0x12   : > { %s179_s26 = scalar_select %p178_p7, %s863_s25, 2 }
  0x13   : > { %s333_s28 = ssub.s32 (%p852_p4), 3, %s863_s25  ;;  %s581_s12 = sshll.u32 (%p852_p4), %s840_s15, 3 }
  0x14   : > { %s549_s29 = sshll.u32 %s179_s26, 2  ;;  %603 = vmatpush3.bf16.msra.mxu0 %v710_v3  ;;  %s547_s26 = sshll.u32 %s170_s24, 3 }
  0x15   : > { %s181_s5 = scalar_lea.vmem %s936_s0, %s549_s29  ;;  %604 = vmatprep.subr.bf16.mxu0 %v805_v1  ;;  %s892_s27 = scalar_lea.vmem [#allocation2], %s547_s26  }
  0x16   : > { %v716_v9 = vld [vmem:[%s181_s5] sm:$0xff]   ;;  %p334_p8 = scmp.lt.s32.totalorder (%p852_p4), %s333_s28, 2  ;;  %s902_s4 = scalar_lea.vmem (%p852_p4), %s939_s3, %s581_s12  }
  0x18   : > { %605 = vmatpush3.bf16.msra.mxu0 %v711_v4 }
  0x19   : > { %606 = vmatprep.subr.bf16.mxu0 %v805_v1 }
  0x1c   : > { %607 = vmatpush3.bf16.msra.mxu0 %v712_v5 }
  0x1d   : > { %608 = vmatprep.subr.bf16.mxu0 %v805_v1 }
  0x20   : > { %609 = vmatpush3.bf16.msra.mxu0 %v713_v6 }
  0x21   : > { %610 = vmatprep.subr.bf16.mxu0 %v805_v1 }
  0x24   : > { %611 = vmatpush3.bf16.msra.mxu0 %v714_v7 }
  0x25   : > { %612 = vmatprep.subr.bf16.mxu0 %v805_v1 }
  0x28   : > { %613 = vmatpush3.bf16.msra.mxu0 %v715_v8 }
  0x2b   : > { %615 = vmatmul.mubr.bf16.vlgmr.msra.gmra.mrb[0].mxu0 %v716_v9 }
  0xfe   : > { %v306_v11 = vpop.f32.mrb[0].mxu0 }
  0xff   : > { %v307_v12 = vadd.f32 %v550_v10, %v306_v11  ;;  %v616_v13 = vpop.f32.mrb[1].mxu0 }
 0x100   : > { %v309_v14 = vpop.f32.mrb[2].mxu0 }
 0x101   : > { %v310_v15 = vadd.f32 %v550_v10, %v309_v14  ;;  %v617_v16 = vpop.f32.mrb[3].mxu0  ;;  %v313_v17 = vmax.f32 %v307_v12, 0.0  ;;  %331 = sbr.rel (!%p852_p4) target bundleno = 313 (0x139), region = 36 }
 0x103   : > { %v314_v18 = vmax.f32 %v310_v15, 0.0 }
 0x105   : > { %v587_v19 = vpack.c.bf16 %v314_v18, %v313_v17 }
 0x107   : > { %588 = vst [vmem:[%s892_s27] sm:$0xff] %v587_v19  }
 0x108   : > { %s945_s28 = smov (!%p334_p8, %s333_s28), 2 }
 0x109   : > { %s564_s5 = sshll.u32 %s945_s28, 6 }
 0x10a   : > { %p567_p9 = scmp.eq.s32.totalorder %s564_s5, 0 }
 0x10b   : > { %s908_s6 = sshrl.u32 (!%p567_p9), %s945_s28, 1 }
 0x10c   : > { %342 = sbr.rel (%p567_p9) target bundleno = 313 (0x139), region = 40  ;;  %p568_p10 = scmp.le.s32.totalorder (!%p567_p9), %s908_s6, 0 }
 0x113   : > { %499 = sbr.rel (%p568_p10) target bundleno = 292 (0x124), region = 112  ;;  %s773_s15 = smov (!%p568_p10), %s902_s4  }
 0x114   : > { %s777_s20 = smov (!%p568_p10), %s892_s27   ;;  %s781_s25 = smov (!%p568_p10), 0  }
 0x115   : > { %s785_s7 = smov (!%p568_p10), 0  }
 0x11a LB: >> { %v358_v20 = vld [vmem:[%s779_s20] sm:$0xf]  ;;  %v360_v21 = vld [vmem:[%s779_s20 + $0x4] sm:$0xf]  ;;  %s362_s8 = sadd.s32 1, %s783_s25  ;;  %s352_s7 = sadd.s32 1, %s787_s7   ;;  %s787_s7 = sphi %s785_s7, %s352_s7   ;;  %s783_s25 = sphi %s781_s25, %s782_s25   ;;  %s779_s20 = sphi %s777_s20, %s367_s20   ;;  %s775_s15 = sphi %s773_s15, %s368_s15  }
 0x11b   : >> { %359 = vst [vmem:[%s775_s15] sm:$0xf] %v358_v20  ;;  %361 = vst [vmem:[%s775_s15 + $0x4] sm:$0xf] %v360_v21  ;;  %p363_p11 = scmp.ge.s32.totalorder %s362_s8, %s908_s6  ;;  %p351_p12 = scmp.ge.s32.totalorder %s352_s7, %s908_s6 }
 0x11d   : >> { %s947_s8 = smov (%p363_p11, %s362_s8), 0  ;;  %354 = sbr.rel (!%p351_p12) target bundleno = 282 (0x11a), region = 118 }
 0x11e   : >> { %s569_s9 = sshll.u32 %s947_s8, 3  ;;  %s782_s25 = smov %s947_s8  }
 0x11f   : >> { %s367_s20 = scalar_lea.vmem %s892_s27, %s569_s9 [#allocation2]   ;;  %s368_s15 = scalar_lea.vmem %s902_s4, %s569_s9  }
 0x124 PF: > { %s918_s10 = sand.u32 1, %s945_s28   ;;  %s582_s11 = sshll.u32 %s908_s6, 3 }
 0x125   : > { %s373_s14 = scalar_lea.vmem %s892_s27, %s582_s11 [#allocation2]   ;;  %s375_s17 = scalar_lea.vmem %s902_s4, %s582_s11  }
 0x126   : > { %p574_p13 = scmp.le.s32.totalorder %s918_s10, 0 }
 0x127   : > { %s789_s18 = smov (!%p574_p13), %s375_s17   ;;  %s793_s21 = smov (!%p574_p13), %s373_s14  }
 0x128   : > { %513 = sbr.rel (%p574_p13) target bundleno = 313 (0x139), region = 123  ;;  %s797_s22 = smov (!%p574_p13), 0  }
 0x129   : > { %s801_s23 = smov (!%p574_p13), 0  }
 0x12f LB: >> { %v385_v22 = vld [vmem:[%s795_s21] sm:$0xf]  ;;  %s387_s24 = sadd.s32 1, %s799_s22  ;;  %s379_s23 = sadd.s32 1, %s803_s23   ;;  %s803_s23 = sphi %s801_s23, %s379_s23   ;;  %s799_s22 = sphi %s797_s22, %s798_s22   ;;  %s795_s21 = sphi %s793_s21, %s392_s21   ;;  %s791_s18 = sphi %s789_s18, %s393_s18  }
 0x130   : >> { %386 = vst [vmem:[%s791_s18] sm:$0xf] %v385_v22  ;;  %p388_p0 = scmp.ge.s32.totalorder %s387_s24, %s918_s10  ;;  %p378_p1 = scmp.ge.s32.totalorder %s379_s23, %s918_s10 }
 0x132   : >> { %s949_s24 = smov (%p388_p0, %s387_s24), 0  ;;  %381 = sbr.rel (!%p378_p1) target bundleno = 303 (0x12f), region = 129 }
 0x133   : >> { %s575_s26 = sshll.u32 %s949_s24, 2  ;;  %s798_s22 = smov %s949_s24  }
 0x134   : >> { %s392_s21 = scalar_lea.vmem %s373_s14, %s575_s26 [#allocation2]   ;;  %s393_s18 = scalar_lea.vmem %s375_s17, %s575_s26  }
 0x139 PF: > { %p10_p2 = scmp.ge.s32.totalorder %s842_s16, 4   ;;  %s941_s12 = smov %s767_s13 }
 0x13a   : > { %s942_s13 = smov %s850_s19  ;;  %s943_s14 = smov %s842_s16 }
 0x13b   :  { %12 = sbr.rel (!%p10_p2) target bundleno = 2 (0x2), region = 140 }

// kernel: pcb_forward.36
= control target key start
LH: loop header
LB: loop body
LE: loop exit
PB: predicated region body
PF: predicated region fallthrough
CT: control target
= control target key end

     0   :  { %s863_s12 = smov 0   ;;  %s865_s13 = smov 0   ;;  %s997_s0 = inlined_call_operand.vmem [shape: bf16[24,128], index: 0, kind: input, shape index: {}]   ;;  %s998_s1 = inlined_call_operand.vmem [shape: bf16[128,256], index: 1, kind: input, shape index: {}]   ;;  %s999_s2 = inlined_call_operand.vmem [shape: f32[1,256], index: 2, kind: input, shape index: {}]   ;;  %s1000_s3 = inlined_call_operand.vmem [shape: bf16[24,256], index: 3, kind: output, shape index: {}]  }
   0x1   :  { %s867_s14 = smov 0  }
   0x2 LB: > { %s876_s15 = sadd.s32 4294967295, %s808_s14   ;;  %s878_s16 = sadd.s32 1, %s808_s14   ;;  %s808_s14 = sphi %s867_s14, %s1004_s14   ;;  %s804_s13 = sphi %s865_s13, %s1003_s13   ;;  %s800_s12 = sphi %s863_s12, %s1002_s12  }
   0x3   : > { %s85_s17 = ssub.s32 %s808_s14, %s878_s16  ;;  %s88_s18 = sadd.s32 1, %s804_s13 }
   0x4   : > { %p86_p0 = scmp.eq.s32.totalorder %s85_s17, 0  ;;  %p98_p1 = scmp.ne.s32.totalorder %s804_s13, %s800_s12 }
   0x5   : > { %p99_p2 = scmp.eq.s32.totalorder %s876_s15, 1  ;;  %p591_p3 = scmp.ge.s32.totalorder %s808_s14, 1 }
   0x6   : > { %s886_s19 = scalar_select %p86_p0, %s804_s13, %s88_s18  }
   0x7   : > { %p888_p4 = por %p99_p2, %p98_p1  ;;  %p146_p5 = scmp.lt.s32.totalorder %s808_s14, 3 }
   0x9   : > { %p147_p6 = pnand %p591_p3, %p146_p5 }
   0xa   : > { %v729_v0 = vld [vmem:[%s998_s1 + $0x4] ss:$8 sps:$4 sm:$0xff] (!%p147_p6)   ;;  %s896_s23 = sshll.u32 (!%p147_p6), %s876_s15, 1  ;;  %v731_v1 = vld [vmem:[%s998_s1] ss:$8 sps:$4 sm:$0xff] (!%p147_p6)   ;;  %v842_v2 = vmov (!%p147_p6), 0   ;;  %v214_v18 = vlaneseq (!%p147_p6) }
   0xb   : > { %150 = sbr.rel (%p147_p6) target bundleno = 312 (0x138), region = 32  ;;  %342 = vmatprep.mubr.bf16.mxu0 (!%p147_p6), %v842_v2  ;;  %p178_p7 = scmp.lt.s32.totalorder (!%p147_p6), %s896_s23, 2  ;;  %310 = vmatprep.subr.bf16.mxu0 (!%p147_p6), %v729_v0  ;;  %v732_v3 = vld [vmem:[%s998_s1 + $0x14] ss:$8 sps:$4 sm:$0xff] (!%p147_p6)   ;;  %v734_v4 = vld [vmem:[%s998_s1 + $0x10] ss:$8 sps:$4 sm:$0xff] (!%p147_p6)  }
   0xc   : > { %311 = vmatpush1.bf16.msra.mxu0 (!%p147_p6), %v731_v1  ;;  %v735_v5 = vld [vmem:[%s998_s1 + $0x24] ss:$8 sps:$4 sm:$0xff] (!%p147_p6)   ;;  %v737_v6 = vld [vmem:[%s998_s1 + $0x20] ss:$8 sps:$4 sm:$0xff] (!%p147_p6)   ;;  %v738_v7 = vld [vmem:[%s998_s1 + $0x34] ss:$8 sps:$4 sm:$0xff] (!%p147_p6)  }
   0xd   : > { %312 = vmatprep.subr.bf16.mxu0 (!%p147_p6), %v732_v3  ;;  %v740_v8 = vld [vmem:[%s998_s1 + $0x30] ss:$8 sps:$4 sm:$0xff] (!%p147_p6)   ;;  %v741_v9 = vld [vmem:[%s998_s1 + $0x44] ss:$8 sps:$4 sm:$0xff] (!%p147_p6)   ;;  %v743_v10 = vld [vmem:[%s998_s1 + $0x40] ss:$8 sps:$4 sm:$0xff] (!%p147_p6)  }
   0xe   : > { %v744_v11 = vld [vmem:[%s998_s1 + $0x54] ss:$8 sps:$4 sm:$0xff] (!%p147_p6)   ;;  %v746_v12 = vld [vmem:[%s998_s1 + $0x50] ss:$8 sps:$4 sm:$0xff] (!%p147_p6)   ;;  %v747_v13 = vld [vmem:[%s998_s1 + $0x64] ss:$8 sps:$4 sm:$0xff] (!%p147_p6)  }
   0xf   : > { %v749_v14 = vld [vmem:[%s998_s1 + $0x60] ss:$8 sps:$4 sm:$0xff] (!%p147_p6)   ;;  %v750_v15 = vld [vmem:[%s998_s1 + $0x74] ss:$8 sps:$4 sm:$0xff] (!%p147_p6)   ;;  %v752_v16 = vld [vmem:[%s998_s1 + $0x70] ss:$8 sps:$4 sm:$0xff] (!%p147_p6)  }
  0x10   : > { %313 = vmatpush1.bf16.msra.mxu0 (!%p147_p6), %v734_v4  ;;  %v215_v19 = vshrl.u32 (!%p147_p6), %v214_v18, 7  ;;  %v212_v21 = vld [vmem:[%s999_s2] sm:$0x3] (!%p147_p6)  ;;  %s170_s21 = sand.u32 (!%p147_p6), 1, %s800_s12  }
  0x11   : > { %314 = vmatprep.subr.bf16.mxu0 (!%p147_p6), %v735_v5  ;;  %s592_s22 = sshll.u32 (!%p147_p6), %s170_s21, 4 }
  0x12   : > { %s179_s30 = scalar_select %p178_p7, %s896_s23, 2  ;;  %v216_v20 = vsub.s32 0, %v215_v19  ;;  %v220_v22 = vsub.s32 1, %v215_v19 }
  0x13   : > { %s375_s12 = ssub.s32 (%p888_p4), 3, %s896_s23  ;;  %s637_s24 = sshll.u32 (%p888_p4), %s876_s15, 4 }
  0x14   : > { %s594_s6 = sshll.u32 %s179_s30, 2  ;;  %315 = vmatpush1.bf16.msra.mxu0 %v737_v6  ;;  %v217_v23 = vrot.slane %v212_v21, %v216_v20  ;;  %v221_v24 = vrot.slane %v212_v21, %v220_v22  ;;  %p376_p8 = scmp.lt.s32.totalorder (%p888_p4), %s375_s12, 2 }
  0x15   : > { %s181_s17 = scalar_lea.vmem %s997_s0, %s594_s6  ;;  %316 = vmatprep.subr.bf16.mxu0 %v738_v7  ;;  %s963_s27 = scalar_lea.vmem (%p888_p4), %s1000_s3, %s637_s24  }
  0x16   : > { %v753_v17 = vld [vmem:[%s181_s17] sm:$0xff]   ;;  %s952_s17 = scalar_lea.vmem [#allocation2], %s592_s22  }
  0x18   : > { %317 = vmatpush1.bf16.msra.mxu0 %v740_v8 }
  0x19   : > { %318 = vmatprep.subr.bf16.mxu0 %v741_v9 }
  0x1c   : > { %319 = vmatpush1.bf16.msra.mxu0 %v743_v10 }
  0x1d   : > { %320 = vmatprep.subr.bf16.mxu0 %v744_v11 }
  0x20   : > { %321 = vmatpush1.bf16.msra.mxu0 %v746_v12 }
  0x21   : > { %322 = vmatprep.subr.bf16.mxu0 %v747_v13 }
  0x24   : > { %323 = vmatpush1.bf16.msra.mxu0 %v749_v14 }
  0x25   : > { %324 = vmatprep.subr.bf16.mxu0 %v750_v15 }
  0x28   : > { %325 = vmatpush1.bf16.msra.mxu0 %v752_v16 }
  0x2b   : > { %343 = vmatmul.mubr.bf16.vlgmr.msra.gmra.mrb[0].mxu0 %v753_v17 }
  0xfe   : > { %v344_v25 = vpop.f32.mrb[0].mxu0 }
  0xff   : > { %v345_v26 = vadd.f32 %v344_v25, %v217_v23  ;;  %v346_v27 = vpop.f32.mrb[1].mxu0 }
 0x100   : > { %v347_v28 = vadd.f32 %v346_v27, %v221_v24  ;;  %v348_v29 = vpop.f32.mrb[2].mxu0  ;;  %373 = sbr.rel (!%p888_p4) target bundleno = 312 (0x138), region = 36 }
 0x101   : > { %v349_v30 = vadd.f32 %v348_v29, %v217_v23  ;;  %v350_v31 = vpop.f32.mrb[3].mxu0 }
 0x102   : > { %v633_v32 = vpack.c.bf16 %v347_v28, %v345_v26  ;;  %v351_v33 = vadd.f32 %v350_v31, %v221_v24 }
 0x104   : > { %365 = vst [vmem:[%s952_s17] sm:$0xff] %v633_v32  ;;  %v634_v34 = vpack.c.bf16 %v351_v33, %v349_v30 }
 0x106   : > { %366 = vst [vmem:[%s952_s17 + $0x8] sm:$0xff] %v634_v34 }
 0x107   : > { %s1006_s12 = smov (!%p376_p8, %s375_s12), 2 }
 0x108   : > { %s635_s28 = sshll.u32 %s1006_s12, 7 }
 0x109   : > { %p621_p9 = scmp.eq.s32.totalorder %s635_s28, 0 }
 0x10a   : > { %s969_s29 = sshrl.u32 (!%p621_p9), %s1006_s12, 1 }
 0x10b   : > { %386 = sbr.rel (%p621_p9) target bundleno = 312 (0x138), region = 40  ;;  %p622_p10 = scmp.le.s32.totalorder (!%p621_p9), %s969_s29, 0 }
 0x112   : > { %544 = sbr.rel (%p622_p10) target bundleno = 291 (0x123), region = 116  ;;  %s810_s15 = smov (!%p622_p10), %s963_s27  }
 0x113   : > { %s814_s20 = smov (!%p622_p10), %s952_s17   ;;  %s818_s23 = smov (!%p622_p10), 0  }
 0x114   : > { %s822_s30 = smov (!%p622_p10), 0  }
 0x119 LB: >> { %v450_v35 = vld [vmem:[%s816_s20] sm:$0xff]  ;;  %v452_v36 = vld [vmem:[%s816_s20 + $0x8] sm:$0xff]  ;;  %s454_s4 = sadd.s32 1, %s820_s23  ;;  %s444_s30 = sadd.s32 1, %s824_s30   ;;  %s824_s30 = sphi %s822_s30, %s444_s30   ;;  %s820_s23 = sphi %s818_s23, %s819_s23   ;;  %s816_s20 = sphi %s814_s20, %s459_s20   ;;  %s812_s15 = sphi %s810_s15, %s460_s15  }
 0x11a   : >> { %451 = vst [vmem:[%s812_s15] sm:$0xff] %v450_v35  ;;  %453 = vst [vmem:[%s812_s15 + $0x8] sm:$0xff] %v452_v36  ;;  %p455_p11 = scmp.ge.s32.totalorder %s454_s4, %s969_s29  ;;  %p443_p12 = scmp.ge.s32.totalorder %s444_s30, %s969_s29 }
 0x11c   : >> { %s1008_s4 = smov (%p455_p11, %s454_s4), 0  ;;  %446 = sbr.rel (!%p443_p12) target bundleno = 281 (0x119), region = 122 }
 0x11d   : >> { %s623_s5 = sshll.u32 %s1008_s4, 4  ;;  %s819_s23 = smov %s1008_s4  }
 0x11e   : >> { %s459_s20 = scalar_lea.vmem %s952_s17, %s623_s5 [#allocation2]   ;;  %s460_s15 = scalar_lea.vmem %s963_s27, %s623_s5  }
 0x123 PF: > { %s979_s6 = sand.u32 1, %s1006_s12   ;;  %s638_s7 = sshll.u32 %s969_s29, 4 }
 0x124   : > { %s465_s8 = scalar_lea.vmem %s952_s17, %s638_s7 [#allocation2]   ;;  %s467_s9 = scalar_lea.vmem %s963_s27, %s638_s7  }
 0x125   : > { %p628_p13 = scmp.le.s32.totalorder %s979_s6, 0 }
 0x126   : > { %s826_s10 = smov (!%p628_p13), %s467_s9   ;;  %s830_s11 = smov (!%p628_p13), %s465_s8  }
 0x127   : > { %558 = sbr.rel (%p628_p13) target bundleno = 312 (0x138), region = 127  ;;  %s834_s14 = smov (!%p628_p13), 0  }
 0x128   : > { %s838_s18 = smov (!%p628_p13), 0  }
 0x12e LB: >> { %v477_v37 = vld [vmem:[%s832_s11] sm:$0xff]  ;;  %s479_s21 = sadd.s32 1, %s836_s14  ;;  %s471_s18 = sadd.s32 1, %s840_s18   ;;  %s840_s18 = sphi %s838_s18, %s471_s18   ;;  %s836_s14 = sphi %s834_s14, %s835_s14   ;;  %s832_s11 = sphi %s830_s11, %s484_s11   ;;  %s828_s10 = sphi %s826_s10, %s485_s10  }
 0x12f   : >> { %478 = vst [vmem:[%s828_s10] sm:$0xff] %v477_v37  ;;  %p480_p0 = scmp.ge.s32.totalorder %s479_s21, %s979_s6  ;;  %p470_p1 = scmp.ge.s32.totalorder %s471_s18, %s979_s6 }
 0x131   : >> { %s1010_s21 = smov (%p480_p0, %s479_s21), 0  ;;  %473 = sbr.rel (!%p470_p1) target bundleno = 302 (0x12e), region = 133 }
 0x132   : >> { %s629_s22 = sshll.u32 %s1010_s21, 3  ;;  %s835_s14 = smov %s1010_s21  }
 0x133   : >> { %s484_s11 = scalar_lea.vmem %s465_s8, %s629_s22 [#allocation2]   ;;  %s485_s10 = scalar_lea.vmem %s467_s9, %s629_s22  }
 0x138 PF: > { %p10_p2 = scmp.ge.s32.totalorder %s878_s16, 4   ;;  %s1002_s12 = smov %s804_s13 }
 0x139   : > { %s1003_s13 = smov %s886_s19  ;;  %s1004_s14 = smov %s878_s16 }
 0x13a   :  { %12 = sbr.rel (!%p10_p2) target bundleno = 2 (0x2), region = 144 }

// kernel: pcb_forward.38
= control target key start
LH: loop header
LB: loop body
LE: loop exit
PB: predicated region body
PF: predicated region fallthrough
CT: control target
= control target key end

     0   :  { %v420_v2 = vmov 1983009808   ;;  %v47_v4 = vlaneseq  ;;  %vm164_vm0 = vcmask 1041408   ;;  %vm382_vm1 = vcmask 1041409   ;;  %s635_s0 = inlined_call_operand.vmem [shape: bf16[2,6,2,256], index: 0, kind: input, shape index: {}]   ;;  %s636_s1 = inlined_call_operand.vmem [shape: f32[2,6,256], index: 1, kind: output, shape index: {}]  }
   0x1   :  { %v8_v0 = vld [vmem:[%s635_s0] sm:$0x3]  ;;  %v9_v1 = vld [vmem:[%s635_s0 + $0x2] sm:$0x3]  ;;  %v45_v3 = vunpack.c.l.s4 %v420_v2  ;;  %v10_v5 = vld [vmem:[%s635_s0 + $0x4] sm:$0x3] }
   0x2   :  { %v11_v6 = vld [vmem:[%s635_s0 + $0x6] sm:$0x3]  ;;  %v12_v7 = vld [vmem:[%s635_s0 + $0x8] sm:$0x3]  ;;  %v13_v8 = vld [vmem:[%s635_s0 + $0xa] sm:$0x3]  ;;  %v20_v14 = vunpack.c.l.bf16 %v8_v0  ;;  %v21_v17 = vunpack.c.l.bf16 %v9_v1  ;;  %v22_v18 = vunpack.c.l.bf16 %v10_v5 }
   0x3   :  { %v14_v9 = vld [vmem:[%s635_s0 + $0xc] sm:$0x3]  ;;  %v15_v10 = vld [vmem:[%s635_s0 + $0xe] sm:$0x3]  ;;  %v46_v11 = vunpack.c.0.s8 %v45_v3  ;;  %v16_v12 = vld [vmem:[%s635_s0 + $0x10] sm:$0x3]  ;;  %v23_v19 = vunpack.c.l.bf16 %v11_v6  ;;  %v24_v21 = vunpack.c.l.bf16 %v12_v7  ;;  %v25_v22 = vunpack.c.l.bf16 %v13_v8 }
   0x4   :  { %v17_v13 = vld [vmem:[%s635_s0 + $0x12] sm:$0x3]  ;;  %v18_v15 = vld [vmem:[%s635_s0 + $0x14] sm:$0x3]  ;;  %v19_v16 = vld [vmem:[%s635_s0 + $0x16] sm:$0x3]  ;;  %v26_v23 = vunpack.c.l.bf16 %v14_v9  ;;  %v27_v24 = vunpack.c.l.bf16 %v15_v10  ;;  %v28_v26 = vunpack.c.l.bf16 %v16_v12 }
   0x5   :  { %v48_v20 = vshrl.u32 %v47_v4, 7  ;;  %v29_v27 = vunpack.c.l.bf16 %v17_v13  ;;  %v30_v28 = vunpack.c.l.bf16 %v18_v15  ;;  %v31_v29 = vunpack.c.l.bf16 %v19_v16 }
   0x6   :  { %vm384_vm2 = vcmask 1042434   ;;  %vm386_vm3 = vcmask 1043459   ;;  %vm388_vm4 = vcmask 1044484   ;;  %vm390_vm5 = vcmask 1045509  }
   0x7   :  { %v49_v25 = vsub.s32 %v46_v11, %v48_v20 }
   0x9   :  { %v50_v30 = vrot.slane %v20_v14, %v49_v25  ;;  %v58_v31 = vrot.slane %v21_v17, %v49_v25  ;;  %v66_v32 = vrot.slane %v22_v18, %v49_v25  ;;  %v74_v33 = vrot.slane %v23_v19, %v49_v25 }
   0xa   :  { %v467_v34 = vrot.slane %v24_v21, %v49_v25  ;;  %v469_v35 = vrot.slane %v25_v22, %v49_v25  ;;  %v471_v36 = vrot.slane %v26_v23, %v49_v25  ;;  %v473_v37 = vrot.slane %v27_v24, %v49_v25 }
   0xb   :  { %v51_v38 = vcombine.high %v50_v30, %v50_v30  ;;  %v59_v39 = vcombine.high %v58_v31, %v58_v31  ;;  %v67_v40 = vcombine.high %v66_v32, %v66_v32  ;;  %v75_v41 = vcombine.high %v74_v33, %v74_v33 }
   0xc   :  { %v83_v42 = vcombine.high %v467_v34, %v467_v34  ;;  %v91_v43 = vcombine.high %v469_v35, %v469_v35  ;;  %v99_v44 = vcombine.high %v471_v36, %v471_v36  ;;  %v107_v45 = vcombine.high %v473_v37, %v473_v37 }
   0xd   :  { %v483_v46 = vrot.slane %v28_v26, %v49_v25  ;;  %v485_v47 = vrot.slane %v29_v27, %v49_v25  ;;  %v487_v48 = vrot.slane %v30_v28, %v49_v25  ;;  %v489_v49 = vrot.slane %v31_v29, %v49_v25 }
   0xe   :  { %v165_v50 = vsel %vm164_vm0, %v50_v30, 0.0  ;;  %v172_v51 = vsel %vm164_vm0, %v51_v38, 0.0  ;;  %v179_v52 = vsel %vm164_vm0, %v58_v31, 0.0  ;;  %v186_v53 = vsel %vm164_vm0, %v59_v39, 0.0 }
   0xf   :  { %v115_v54 = vcombine.high %v483_v46, %v483_v46  ;;  %v123_v55 = vcombine.high %v485_v47, %v485_v47  ;;  %v131_v56 = vcombine.high %v487_v48, %v487_v48  ;;  %v139_v57 = vcombine.high %v489_v49, %v489_v49 }
  0x10   :  { %v166_v58 = vrot.slane %v165_v50, 4  ;;  %v173_v59 = vrot.slane %v172_v51, 4  ;;  %v180_v60 = vrot.slane %v179_v52, 4  ;;  %v187_v61 = vrot.slane %v186_v53, 4 }
  0x11   :  { %v193_v62 = vsel %vm164_vm0, %v66_v32, 0.0  ;;  %v200_v63 = vsel %vm164_vm0, %v67_v40, 0.0  ;;  %v207_v0 = vsel %vm164_vm0, %v74_v33, 0.0  ;;  %v214_v1 = vsel %vm164_vm0, %v75_v41, 0.0 }
  0x12   :  { %v167_v2 = vadd.f32 %v166_v58, %v165_v50  ;;  %v174_v3 = vadd.f32 %v173_v59, %v172_v51  ;;  %v181_v4 = vadd.f32 %v180_v60, %v179_v52  ;;  %v188_v5 = vadd.f32 %v187_v61, %v186_v53 }
  0x13   :  { %v194_v6 = vrot.slane %v193_v62, 4  ;;  %v201_v7 = vrot.slane %v200_v63, 4  ;;  %v208_v8 = vrot.slane %v207_v0, 4  ;;  %v215_v9 = vrot.slane %v214_v1, 4 }
  0x14   :  { %v168_v10 = vrot.slane %v167_v2, 2  ;;  %v175_v11 = vrot.slane %v174_v3, 2  ;;  %v182_v12 = vrot.slane %v181_v4, 2  ;;  %v189_v13 = vrot.slane %v188_v5, 2 }
  0x15   :  { %v195_v14 = vadd.f32 %v194_v6, %v193_v62  ;;  %v202_v15 = vadd.f32 %v201_v7, %v200_v63  ;;  %v209_v16 = vadd.f32 %v208_v8, %v207_v0  ;;  %v216_v17 = vadd.f32 %v215_v9, %v214_v1 }
  0x16   :  { %v169_v18 = vadd.f32 %v168_v10, %v167_v2  ;;  %v176_v19 = vadd.f32 %v175_v11, %v174_v3  ;;  %v183_v20 = vadd.f32 %v182_v12, %v181_v4  ;;  %v190_v21 = vadd.f32 %v189_v13, %v188_v5 }
  0x17   :  { %v196_v22 = vrot.slane %v195_v14, 2  ;;  %v203_v23 = vrot.slane %v202_v15, 2  ;;  %v210_v24 = vrot.slane %v209_v16, 2  ;;  %v217_v25 = vrot.slane %v216_v17, 2 }
  0x18   :  { %v170_v26 = vrot.slane %v169_v18, 1  ;;  %v177_v27 = vrot.slane %v176_v19, 1  ;;  %v184_v28 = vrot.slane %v183_v20, 1  ;;  %v191_v29 = vrot.slane %v190_v21, 1 }
  0x19   :  { %v197_v30 = vadd.f32 %v196_v22, %v195_v14  ;;  %v204_v31 = vadd.f32 %v203_v23, %v202_v15  ;;  %v211_v32 = vadd.f32 %v210_v24, %v209_v16  ;;  %v218_v33 = vadd.f32 %v217_v25, %v216_v17 }
  0x1a   :  { %v507_v38 = vadd.f32 %v170_v26, %v169_v18  ;;  %v509_v39 = vadd.f32 %v177_v27, %v176_v19  ;;  %v511_v40 = vadd.f32 %v184_v28, %v183_v20  ;;  %v513_v41 = vadd.f32 %v191_v29, %v190_v21 }
  0x1b   :  { %v198_v50 = vrot.slane %v197_v30, 1  ;;  %v205_v51 = vrot.slane %v204_v31, 1  ;;  %v212_v52 = vrot.slane %v211_v32, 1  ;;  %v219_v53 = vrot.slane %v218_v33, 1 }
  0x1c   :  { %v221_v58 = vsel %vm164_vm0, %v467_v34, 0.0  ;;  %v228_v59 = vsel %vm164_vm0, %v83_v42, 0.0  ;;  %v235_v60 = vsel %vm164_vm0, %v469_v35, 0.0  ;;  %v242_v61 = vsel %vm164_vm0, %v91_v43, 0.0 }
  0x1d   :  { %v527_v62 = vadd.f32 %v198_v50, %v197_v30  ;;  %v529_v63 = vadd.f32 %v205_v51, %v204_v31  ;;  %v531_v0 = vadd.f32 %v212_v52, %v211_v32  ;;  %v533_v1 = vadd.f32 %v219_v53, %v218_v33 }
  0x1e   :  { %v222_v2 = vrot.slane %v221_v58, 4  ;;  %v229_v34 = vrot.slane %v228_v59, 4  ;;  %v236_v3 = vrot.slane %v235_v60, 4  ;;  %v243_v42 = vrot.slane %v242_v61, 4 }
  0x1f   :  { %v249_v4 = vsel %vm164_vm0, %v471_v36, 0.0  ;;  %v256_v35 = vsel %vm164_vm0, %v99_v44, 0.0  ;;  %v263_v43 = vsel %vm164_vm0, %v473_v37, 0.0  ;;  %v270_v5 = vsel %vm164_vm0, %v107_v45, 0.0 }
  0x20   :  { %v223_v6 = vadd.f32 %v222_v2, %v221_v58  ;;  %v230_v7 = vadd.f32 %v229_v34, %v228_v59  ;;  %v237_v8 = vadd.f32 %v236_v3, %v235_v60  ;;  %v244_v9 = vadd.f32 %v243_v42, %v242_v61 }
  0x21   :  { %v250_v10 = vrot.slane %v249_v4, 4  ;;  %v257_v11 = vrot.slane %v256_v35, 4  ;;  %v264_v12 = vrot.slane %v263_v43, 4  ;;  %v271_v13 = vrot.slane %v270_v5, 4 }
  0x22   :  { %v224_v14 = vrot.slane %v223_v6, 2  ;;  %v231_v36 = vrot.slane %v230_v7, 2  ;;  %v238_v15 = vrot.slane %v237_v8, 2  ;;  %v245_v44 = vrot.slane %v244_v9, 2 }
  0x23   :  { %v251_v16 = vadd.f32 %v250_v10, %v249_v4  ;;  %v258_v17 = vadd.f32 %v257_v11, %v256_v35  ;;  %v265_v18 = vadd.f32 %v264_v12, %v263_v43  ;;  %v272_v19 = vadd.f32 %v271_v13, %v270_v5 }
  0x24   :  { %v225_v20 = vadd.f32 %v224_v14, %v223_v6  ;;  %v232_v37 = vadd.f32 %v231_v36, %v230_v7  ;;  %v239_v21 = vadd.f32 %v238_v15, %v237_v8  ;;  %v246_v45 = vadd.f32 %v245_v44, %v244_v9 }
  0x25   :  { %v252_v22 = vrot.slane %v251_v16, 2  ;;  %v259_v23 = vrot.slane %v258_v17, 2  ;;  %v266_v24 = vrot.slane %v265_v18, 2  ;;  %v273_v25 = vrot.slane %v272_v19, 2 }
  0x26   :  { %v226_v26 = vrot.slane %v225_v20, 1  ;;  %v233_v27 = vrot.slane %v232_v37, 1  ;;  %v240_v28 = vrot.slane %v239_v21, 1  ;;  %v247_v29 = vrot.slane %v246_v45, 1 }
  0x27   :  { %v253_v30 = vadd.f32 %v252_v22, %v251_v16  ;;  %v260_v31 = vadd.f32 %v259_v23, %v258_v17  ;;  %v267_v32 = vadd.f32 %v266_v24, %v265_v18  ;;  %v274_v33 = vadd.f32 %v273_v25, %v272_v19 }
  0x28   :  { %v547_v50 = vadd.f32 %v226_v26, %v225_v20  ;;  %v549_v51 = vadd.f32 %v233_v27, %v232_v37  ;;  %v551_v52 = vadd.f32 %v240_v28, %v239_v21  ;;  %v553_v53 = vadd.f32 %v247_v29, %v246_v45 }
  0x29   :  { %v254_v58 = vrot.slane %v253_v30, 1  ;;  %v261_v59 = vrot.slane %v260_v31, 1  ;;  %v268_v60 = vrot.slane %v267_v32, 1  ;;  %v275_v61 = vrot.slane %v274_v33, 1 }
  0x2a   :  { %v277_v2 = vsel %vm164_vm0, %v483_v46, 0.0  ;;  %v284_v34 = vsel %vm164_vm0, %v115_v54, 0.0  ;;  %v291_v3 = vsel %vm164_vm0, %v485_v47, 0.0  ;;  %v298_v42 = vsel %vm164_vm0, %v123_v55, 0.0 }
  0x2b   :  { %v567_v4 = vadd.f32 %v254_v58, %v253_v30  ;;  %v569_v35 = vadd.f32 %v261_v59, %v260_v31  ;;  %v571_v43 = vadd.f32 %v268_v60, %v267_v32  ;;  %v573_v5 = vadd.f32 %v275_v61, %v274_v33 }
  0x2c   :  { %v278_v6 = vrot.slane %v277_v2, 4  ;;  %v285_v46 = vrot.slane %v284_v34, 4  ;;  %v292_v7 = vrot.slane %v291_v3, 4  ;;  %v299_v54 = vrot.slane %v298_v42, 4 }
  0x2d   :  { %v305_v8 = vsel %vm164_vm0, %v487_v48, 0.0  ;;  %v312_v47 = vsel %vm164_vm0, %v131_v56, 0.0  ;;  %v319_v55 = vsel %vm164_vm0, %v489_v49, 0.0  ;;  %v326_v9 = vsel %vm164_vm0, %v139_v57, 0.0 }
  0x2e   :  { %v279_v10 = vadd.f32 %v278_v6, %v277_v2  ;;  %v286_v11 = vadd.f32 %v285_v46, %v284_v34  ;;  %v293_v12 = vadd.f32 %v292_v7, %v291_v3  ;;  %v300_v13 = vadd.f32 %v299_v54, %v298_v42 }
  0x2f   :  { %v306_v14 = vrot.slane %v305_v8, 4  ;;  %v313_v36 = vrot.slane %v312_v47, 4  ;;  %v320_v15 = vrot.slane %v319_v55, 4  ;;  %v327_v44 = vrot.slane %v326_v9, 4 }
  0x30   :  { %v280_v16 = vrot.slane %v279_v10, 2  ;;  %v287_v48 = vrot.slane %v286_v11, 2  ;;  %v294_v17 = vrot.slane %v293_v12, 2  ;;  %v301_v56 = vrot.slane %v300_v13, 2 }
  0x31   :  { %v307_v18 = vadd.f32 %v306_v14, %v305_v8  ;;  %v314_v19 = vadd.f32 %v313_v36, %v312_v47  ;;  %v321_v20 = vadd.f32 %v320_v15, %v319_v55  ;;  %v328_v37 = vadd.f32 %v327_v44, %v326_v9 }
  0x32   :  { %v281_v21 = vadd.f32 %v280_v16, %v279_v10  ;;  %v288_v49 = vadd.f32 %v287_v48, %v286_v11  ;;  %v295_v45 = vadd.f32 %v294_v17, %v293_v12  ;;  %v302_v57 = vadd.f32 %v301_v56, %v300_v13 }
  0x33   :  { %v308_v22 = vrot.slane %v307_v18, 2  ;;  %v315_v23 = vrot.slane %v314_v19, 2  ;;  %v322_v24 = vrot.slane %v321_v20, 2  ;;  %v329_v25 = vrot.slane %v328_v37, 2 }
  0x34   :  { %v282_v26 = vrot.slane %v281_v21, 1  ;;  %v289_v27 = vrot.slane %v288_v49, 1  ;;  %v296_v28 = vrot.slane %v295_v45, 1  ;;  %v303_v29 = vrot.slane %v302_v57, 1 }
  0x35   :  { %v309_v30 = vadd.f32 %v308_v22, %v307_v18  ;;  %v316_v31 = vadd.f32 %v315_v23, %v314_v19  ;;  %v323_v32 = vadd.f32 %v322_v24, %v321_v20  ;;  %v330_v33 = vadd.f32 %v329_v25, %v328_v37 }
  0x36   :  { %v283_v58 = vadd.f32 %v282_v26, %v281_v21  ;;  %v290_v59 = vadd.f32 %v289_v27, %v288_v49  ;;  %v297_v60 = vadd.f32 %v296_v28, %v295_v45  ;;  %v304_v61 = vadd.f32 %v303_v29, %v302_v57 }
  0x37   :  { %v310_v2 = vrot.slane %v309_v30, 1  ;;  %v317_v34 = vrot.slane %v316_v31, 1  ;;  %v324_v3 = vrot.slane %v323_v32, 1  ;;  %v331_v42 = vrot.slane %v330_v33, 1 }
  0x38   :  { %v334_v6 = vmul.f32 0.5, %v507_v38  ;;  %v335_v46 = vmul.f32 0.5, %v509_v39  ;;  %v336_v7 = vmul.f32 0.5, %v511_v40  ;;  %v337_v54 = vmul.f32 0.5, %v513_v41 }
  0x39   :  { %v311_v8 = vadd.f32 %v310_v2, %v309_v30  ;;  %v318_v47 = vadd.f32 %v317_v34, %v316_v31  ;;  %v325_v55 = vadd.f32 %v324_v3, %v323_v32  ;;  %v332_v9 = vadd.f32 %v331_v42, %v330_v33 }
  0x3a   :  { %v338_v10 = vmul.f32 0.5, %v527_v62  ;;  %v339_v11 = vmul.f32 0.5, %v529_v63  ;;  %v340_v12 = vmul.f32 0.5, %v531_v0  ;;  %v341_v13 = vmul.f32 0.5, %v533_v1 }
  0x3b   :  { %v342_v38 = vmul.f32 0.5, %v547_v50  ;;  %v343_v39 = vmul.f32 0.5, %v549_v51  ;;  %v344_v40 = vmul.f32 0.5, %v551_v52  ;;  %v345_v41 = vmul.f32 0.5, %v553_v53 }
  0x3c   :  { %v346_v14 = vmul.f32 0.5, %v567_v4  ;;  %v347_v36 = vmul.f32 0.5, %v569_v35  ;;  %v348_v62 = vmul.f32 0.5, %v571_v43  ;;  %v349_v63 = vmul.f32 0.5, %v573_v5 }
  0x3d   :  { %v350_v15 = vmul.f32 0.5, %v283_v58  ;;  %v351_v0 = vmul.f32 0.5, %v290_v59  ;;  %v352_v44 = vmul.f32 0.5, %v297_v60  ;;  %v353_v1 = vmul.f32 0.5, %v304_v61 }
  0x3e   :  { %v354_v16 = vmul.f32 0.5, %v311_v8  ;;  %v355_v50 = vmul.f32 0.5, %v318_v47  ;;  %v356_v48 = vmul.f32 0.5, %v325_v55  ;;  %v357_v51 = vmul.f32 0.5, %v332_v9 }
  0x3f   :  { %v383_v52 = vsel %vm382_vm1, %v336_v7, %v334_v6  ;;  %v392_v53 = vsel %vm382_vm1, %v337_v54, %v335_v46  ;;  %v397_v4 = vsel %vm382_vm1, %v348_v62, %v346_v14  ;;  %v402_v35 = vsel %vm382_vm1, %v349_v63, %v347_v36 }
  0x40   :  { %v385_v43 = vsel %vm384_vm2, %v338_v10, %v383_v52  ;;  %v393_v5 = vsel %vm384_vm2, %v339_v11, %v392_v53  ;;  %v398_v17 = vsel %vm384_vm2, %v350_v15, %v397_v4  ;;  %v403_v56 = vsel %vm384_vm2, %v351_v0, %v402_v35 }
  0x41   :  { %v387_v18 = vsel %vm386_vm3, %v340_v12, %v385_v43  ;;  %v394_v19 = vsel %vm386_vm3, %v341_v13, %v393_v5  ;;  %v399_v20 = vsel %vm386_vm3, %v352_v44, %v398_v17  ;;  %v404_v37 = vsel %vm386_vm3, %v353_v1, %v403_v56 }
  0x42   :  { %v389_v21 = vsel %vm388_vm4, %v342_v38, %v387_v18  ;;  %v395_v49 = vsel %vm388_vm4, %v343_v39, %v394_v19  ;;  %v400_v45 = vsel %vm388_vm4, %v354_v16, %v399_v20  ;;  %v405_v57 = vsel %vm388_vm4, %v355_v50, %v404_v37 }
  0x43   :  { %v391_v22 = vsel %vm390_vm5, %v344_v40, %v389_v21  ;;  %v396_v23 = vsel %vm390_vm5, %v345_v41, %v395_v49  ;;  %v401_v24 = vsel %vm390_vm5, %v356_v48, %v400_v45  ;;  %v406_v25 = vsel %vm390_vm5, %v357_v51, %v405_v57 }
  0x44   :  { %411 = vst [vmem:[%s636_s1] sm:$0x3f] %v391_v22  ;;  %412 = vst [vmem:[%s636_s1 + $0x8] sm:$0x3f] %v396_v23 }
  0x45   :  { %413 = vst [vmem:[%s636_s1 + $0x10] sm:$0x3f] %v401_v24  ;;  %414 = vst [vmem:[%s636_s1 + $0x18] sm:$0x3f] %v406_v25 }

// kernel: pcb_forward.37
= control target key start
LH: loop header
LB: loop body
LE: loop exit
PB: predicated region body
PF: predicated region fallthrough
CT: control target
= control target key end

     0   :  { %s975_s15 = smov 0   ;;  %s977_s16 = smov 0   ;;  %s1116_s0 = inlined_call_operand.vmem [shape: bf16[24,128], index: 0, kind: input, shape index: {}]   ;;  %s1117_s1 = inlined_call_operand.vmem [shape: bf16[128,256], index: 1, kind: input, shape index: {}]   ;;  %s1118_s2 = inlined_call_operand.vmem [shape: f32[1,256], index: 2, kind: input, shape index: {}]   ;;  %s1119_s3 = inlined_call_operand.vmem [shape: bf16[24,256], index: 3, kind: input, shape index: {}]   ;;  %s1120_s4 = inlined_call_operand.vmem [shape: bf16[24,256], index: 4, kind: output, shape index: {}]  }
   0x1   :  { %s979_s17 = smov 0  }
   0x2 LB: > { %s988_s18 = sadd.s32 4294967295, %s915_s17   ;;  %s990_s19 = sadd.s32 1, %s915_s17   ;;  %s915_s17 = sphi %s979_s17, %s1124_s17   ;;  %s911_s16 = sphi %s977_s16, %s1123_s16   ;;  %s907_s15 = sphi %s975_s15, %s1122_s15  }
   0x3   : > { %s112_s20 = ssub.s32 %s915_s17, %s990_s19  ;;  %s115_s21 = sadd.s32 1, %s911_s16 }
   0x4   : > { %p113_p0 = scmp.eq.s32.totalorder %s112_s20, 0  ;;  %p125_p1 = scmp.ne.s32.totalorder %s911_s16, %s907_s15 }
   0x5   : > { %p126_p2 = scmp.eq.s32.totalorder %s988_s18, 1  ;;  %p694_p3 = scmp.ge.s32.totalorder %s915_s17, 1 }
   0x6   : > { %s998_s22 = scalar_select %p113_p0, %s911_s16, %s115_s21  }
   0x7   : > { %p1000_p4 = por %p126_p2, %p125_p1  ;;  %p193_p5 = scmp.lt.s32.totalorder %s915_s17, 3 }
   0x9   : > { %p194_p6 = pnand %p694_p3, %p193_p5 }
   0xa   : > { %v836_v0 = vld [vmem:[%s1117_s1 + $0x4] ss:$8 sps:$4 sm:$0xff] (!%p194_p6)   ;;  %s1008_s26 = sshll.u32 (!%p194_p6), %s988_s18, 1  ;;  %v838_v1 = vld [vmem:[%s1117_s1] ss:$8 sps:$4 sm:$0xff] (!%p194_p6)   ;;  %v949_v2 = vmov (!%p194_p6), 0   ;;  %v291_v18 = vlaneseq (!%p194_p6) }
   0xb   : > { %197 = sbr.rel (%p194_p6) target bundleno = 316 (0x13c), region = 36  ;;  %419 = vmatprep.mubr.bf16.mxu0 (!%p194_p6), %v949_v2  ;;  %p238_p7 = scmp.lt.s32.totalorder (!%p194_p6), %s1008_s26, 2  ;;  %387 = vmatprep.subr.bf16.mxu0 (!%p194_p6), %v836_v0  ;;  %v839_v3 = vld [vmem:[%s1117_s1 + $0x14] ss:$8 sps:$4 sm:$0xff] (!%p194_p6)   ;;  %v841_v4 = vld [vmem:[%s1117_s1 + $0x10] ss:$8 sps:$4 sm:$0xff] (!%p194_p6)  }
   0xc   : > { %388 = vmatpush1.bf16.msra.mxu0 (!%p194_p6), %v838_v1  ;;  %v842_v5 = vld [vmem:[%s1117_s1 + $0x24] ss:$8 sps:$4 sm:$0xff] (!%p194_p6)   ;;  %v844_v6 = vld [vmem:[%s1117_s1 + $0x20] ss:$8 sps:$4 sm:$0xff] (!%p194_p6)   ;;  %v845_v7 = vld [vmem:[%s1117_s1 + $0x34] ss:$8 sps:$4 sm:$0xff] (!%p194_p6)  }
   0xd   : > { %389 = vmatprep.subr.bf16.mxu0 (!%p194_p6), %v839_v3  ;;  %v847_v8 = vld [vmem:[%s1117_s1 + $0x30] ss:$8 sps:$4 sm:$0xff] (!%p194_p6)   ;;  %v848_v9 = vld [vmem:[%s1117_s1 + $0x44] ss:$8 sps:$4 sm:$0xff] (!%p194_p6)   ;;  %v850_v10 = vld [vmem:[%s1117_s1 + $0x40] ss:$8 sps:$4 sm:$0xff] (!%p194_p6)  }
   0xe   : > { %v851_v11 = vld [vmem:[%s1117_s1 + $0x54] ss:$8 sps:$4 sm:$0xff] (!%p194_p6)   ;;  %v853_v12 = vld [vmem:[%s1117_s1 + $0x50] ss:$8 sps:$4 sm:$0xff] (!%p194_p6)   ;;  %v854_v13 = vld [vmem:[%s1117_s1 + $0x64] ss:$8 sps:$4 sm:$0xff] (!%p194_p6)  }
   0xf   : > { %v856_v14 = vld [vmem:[%s1117_s1 + $0x60] ss:$8 sps:$4 sm:$0xff] (!%p194_p6)   ;;  %v857_v15 = vld [vmem:[%s1117_s1 + $0x74] ss:$8 sps:$4 sm:$0xff] (!%p194_p6)   ;;  %v859_v16 = vld [vmem:[%s1117_s1 + $0x70] ss:$8 sps:$4 sm:$0xff] (!%p194_p6)  }
  0x10   : > { %390 = vmatpush1.bf16.msra.mxu0 (!%p194_p6), %v841_v4  ;;  %v292_v19 = vshrl.u32 (!%p194_p6), %v291_v18, 7  ;;  %v289_v21 = vld [vmem:[%s1118_s2] sm:$0x3] (!%p194_p6) }
  0x11   : > { %391 = vmatprep.subr.bf16.mxu0 (!%p194_p6), %v842_v5 }
  0x12   : > { %s1021_s7 = scalar_select %p238_p7, %s1008_s26, 2  ;;  %v293_v20 = vsub.s32 0, %v292_v19  ;;  %v297_v22 = vsub.s32 1, %v292_v19 }
  0x13   : > { %s744_s8 = sshll.u32 (%p1000_p4), %s988_s18, 4 }
  0x14   : > { %s697_s10 = sshll.u32 %s1021_s7, 2  ;;  %392 = vmatpush1.bf16.msra.mxu0 %v844_v6  ;;  %s739_s25 = sshll.u32 %s1021_s7, 3  ;;  %v294_v24 = vrot.slane %v289_v21, %v293_v20  ;;  %v298_v25 = vrot.slane %v289_v21, %v297_v22 }
  0x15   : > { %s241_s21 = scalar_lea.vmem %s1116_s0, %s697_s10  ;;  %393 = vmatprep.subr.bf16.mxu0 %v845_v7  ;;  %s257_s29 = scalar_lea.vmem %s1119_s3, %s739_s25 }
  0x16   : > { %v860_v17 = vld [vmem:[%s241_s21] sm:$0xff]   ;;  %v431_v26 = vld [vmem:[%s257_s29 + $0x8] sm:$0xff]  ;;  %s230_s21 = sand.u32 1, %s907_s15   ;;  %s466_s15 = ssub.s32 (%p1000_p4), 3, %s1008_s26 }
  0x17   : > { %v430_v23 = vld [vmem:[%s257_s29] sm:$0xff]  ;;  %v434_v32 = vunpack.c.l.bf16 %v431_v26  ;;  %v435_v35 = vunpack.c.h.bf16 %v431_v26  ;;  %s695_s7 = sshll.u32 %s230_s21, 4  ;;  %p467_p8 = scmp.lt.s32.totalorder (%p1000_p4), %s466_s15, 2 }
  0x18   : > { %394 = vmatpush1.bf16.msra.mxu0 %v847_v8  ;;  %v432_v27 = vunpack.c.l.bf16 %v430_v23  ;;  %v433_v29 = vunpack.c.h.bf16 %v430_v23  ;;  %s1071_s6 = scalar_lea.vmem [#allocation2], %s695_s7   ;;  %s1082_s11 = scalar_lea.vmem (%p1000_p4), %s1120_s4, %s744_s8  }
  0x19   : > { %395 = vmatprep.subr.bf16.mxu0 %v848_v9 }
  0x1c   : > { %396 = vmatpush1.bf16.msra.mxu0 %v850_v10 }
  0x1d   : > { %397 = vmatprep.subr.bf16.mxu0 %v851_v11 }
  0x20   : > { %398 = vmatpush1.bf16.msra.mxu0 %v853_v12 }
  0x21   : > { %399 = vmatprep.subr.bf16.mxu0 %v854_v13 }
  0x24   : > { %400 = vmatpush1.bf16.msra.mxu0 %v856_v14 }
  0x25   : > { %401 = vmatprep.subr.bf16.mxu0 %v857_v15 }
  0x28   : > { %402 = vmatpush1.bf16.msra.mxu0 %v859_v16 }
  0x2b   : > { %420 = vmatmul.mubr.bf16.vlgmr.msra.gmra.mrb[0].mxu0 %v860_v17 }
  0xfe   : > { %v421_v28 = vpop.f32.mrb[0].mxu0 }
  0xff   : > { %v422_v30 = vadd.f32 %v421_v28, %v294_v24  ;;  %v423_v31 = vpop.f32.mrb[1].mxu0 }
 0x100   : > { %v424_v33 = vadd.f32 %v423_v31, %v298_v25  ;;  %v425_v34 = vpop.f32.mrb[2].mxu0 }
 0x101   : > { %v436_v36 = vadd.f32 %v432_v27, %v422_v30  ;;  %v426_v37 = vadd.f32 %v425_v34, %v294_v24  ;;  %v427_v38 = vpop.f32.mrb[3].mxu0 }
 0x102   : > { %v437_v39 = vadd.f32 %v433_v29, %v424_v33  ;;  %v428_v40 = vadd.f32 %v427_v38, %v298_v25 }
 0x103   : > { %v440_v41 = vmax.f32 %v436_v36, 0.0  ;;  %v438_v42 = vadd.f32 %v434_v32, %v426_v37 }
 0x104   : > { %v441_v43 = vmax.f32 %v437_v39, 0.0  ;;  %v439_v44 = vadd.f32 %v435_v35, %v428_v40  ;;  %464 = sbr.rel (!%p1000_p4) target bundleno = 316 (0x13c), region = 40 }
 0x105   : > { %v442_v45 = vmax.f32 %v438_v42, 0.0 }
 0x106   : > { %v740_v46 = vpack.c.bf16 %v441_v43, %v440_v41  ;;  %v443_v47 = vmax.f32 %v439_v44, 0.0 }
 0x108   : > { %456 = vst [vmem:[%s1071_s6] sm:$0xff] %v740_v46  ;;  %v741_v48 = vpack.c.bf16 %v443_v47, %v442_v45 }
 0x10a   : > { %457 = vst [vmem:[%s1071_s6 + $0x8] sm:$0xff] %v741_v48 }
 0x10b   : > { %s1126_s15 = smov (!%p467_p8, %s466_s15), 2 }
 0x10c   : > { %s742_s12 = sshll.u32 %s1126_s15, 7 }
 0x10d   : > { %p727_p9 = scmp.eq.s32.totalorder %s742_s12, 0 }
 0x10e   : > { %s1088_s13 = sshrl.u32 (!%p727_p9), %s1126_s15, 1 }
 0x10f   : > { %477 = sbr.rel (%p727_p9) target bundleno = 316 (0x13c), region = 44  ;;  %p728_p10 = scmp.le.s32.totalorder (!%p727_p9), %s1088_s13, 0 }
 0x116   : > { %641 = sbr.rel (%p728_p10) target bundleno = 295 (0x127), region = 123  ;;  %s917_s18 = smov (!%p728_p10), %s1082_s11  }
 0x117   : > { %s921_s23 = smov (!%p728_p10), %s1071_s6   ;;  %s925_s26 = smov (!%p728_p10), 0  }
 0x118   : > { %s929_s14 = smov (!%p728_p10), 0  }
 0x11d LB: >> { %v541_v49 = vld [vmem:[%s923_s23] sm:$0xff]  ;;  %v543_v50 = vld [vmem:[%s923_s23 + $0x8] sm:$0xff]  ;;  %s545_s17 = sadd.s32 1, %s927_s26  ;;  %s535_s14 = sadd.s32 1, %s931_s14   ;;  %s931_s14 = sphi %s929_s14, %s535_s14   ;;  %s927_s26 = sphi %s925_s26, %s926_s26   ;;  %s923_s23 = sphi %s921_s23, %s550_s23   ;;  %s919_s18 = sphi %s917_s18, %s551_s18  }
 0x11e   : >> { %542 = vst [vmem:[%s919_s18] sm:$0xff] %v541_v49  ;;  %544 = vst [vmem:[%s919_s18 + $0x8] sm:$0xff] %v543_v50  ;;  %p546_p11 = scmp.ge.s32.totalorder %s545_s17, %s1088_s13  ;;  %p534_p12 = scmp.ge.s32.totalorder %s535_s14, %s1088_s13 }
 0x120   : >> { %s1128_s17 = smov (%p546_p11, %s545_s17), 0  ;;  %537 = sbr.rel (!%p534_p12) target bundleno = 285 (0x11d), region = 129 }
 0x121   : >> { %s729_s20 = sshll.u32 %s1128_s17, 4  ;;  %s926_s26 = smov %s1128_s17  }
 0x122   : >> { %s550_s23 = scalar_lea.vmem %s1071_s6, %s729_s20 [#allocation2]   ;;  %s551_s18 = scalar_lea.vmem %s1082_s11, %s729_s20  }
 0x127 PF: > { %s1098_s24 = sand.u32 1, %s1126_s15   ;;  %s745_s25 = sshll.u32 %s1088_s13, 4 }
 0x128   : > { %s556_s27 = scalar_lea.vmem %s1071_s6, %s745_s25 [#allocation2]   ;;  %s558_s28 = scalar_lea.vmem %s1082_s11, %s745_s25  }
 0x129   : > { %p734_p13 = scmp.le.s32.totalorder %s1098_s24, 0 }
 0x12a   : > { %s933_s29 = smov (!%p734_p13), %s558_s28   ;;  %s937_s30 = smov (!%p734_p13), %s556_s27  }
 0x12b   : > { %655 = sbr.rel (%p734_p13) target bundleno = 316 (0x13c), region = 134  ;;  %s941_s5 = smov (!%p734_p13), 0  }
 0x12c   : > { %s945_s21 = smov (!%p734_p13), 0  }
 0x132 LB: >> { %v568_v51 = vld [vmem:[%s939_s30] sm:$0xff]  ;;  %s570_s7 = sadd.s32 1, %s943_s5  ;;  %s562_s21 = sadd.s32 1, %s947_s21   ;;  %s947_s21 = sphi %s945_s21, %s562_s21   ;;  %s943_s5 = sphi %s941_s5, %s942_s5   ;;  %s939_s30 = sphi %s937_s30, %s575_s30   ;;  %s935_s29 = sphi %s933_s29, %s576_s29  }
 0x133   : >> { %569 = vst [vmem:[%s935_s29] sm:$0xff] %v568_v51  ;;  %p571_p0 = scmp.ge.s32.totalorder %s570_s7, %s1098_s24  ;;  %p561_p1 = scmp.ge.s32.totalorder %s562_s21, %s1098_s24 }
 0x135   : >> { %s1130_s7 = smov (%p571_p0, %s570_s7), 0  ;;  %564 = sbr.rel (!%p561_p1) target bundleno = 306 (0x132), region = 140 }
 0x136   : >> { %s735_s6 = sshll.u32 %s1130_s7, 3  ;;  %s942_s5 = smov %s1130_s7  }
 0x137   : >> { %s575_s30 = scalar_lea.vmem %s556_s27, %s735_s6 [#allocation2]   ;;  %s576_s29 = scalar_lea.vmem %s558_s28, %s735_s6  }
 0x13c PF: > { %p11_p2 = scmp.ge.s32.totalorder %s990_s19, 4   ;;  %s1122_s15 = smov %s911_s16 }
 0x13d   : > { %s1123_s16 = smov %s998_s22  ;;  %s1124_s17 = smov %s990_s19 }
 0x13e   :  { %13 = sbr.rel (!%p11_p2) target bundleno = 2 (0x2), region = 151 }

// kernel: pcb_forward.39
= control target key start
LH: loop header
LB: loop body
LE: loop exit
PB: predicated region body
PF: predicated region fallthrough
CT: control target
= control target key end

     0   :  { %s922_s18 = smov 0   ;;  %s1002_s0 = inlined_call_operand.vmem [shape: bf16[6,2,256], index: 0, kind: input, shape index: {}]   ;;  %s1003_s1 = inlined_call_operand.vmem [shape: bf16[6,256,128], index: 1, kind: input, shape index: {}]   ;;  %s1004_s2 = inlined_call_operand.vmem [shape: f32[6,1,128], index: 2, kind: input, shape index: {}]   ;;  %s1005_s3 = inlined_call_operand.vmem [shape: bf16[6,128,256], index: 3, kind: input, shape index: {}]   ;;  %s1006_s4 = inlined_call_operand.vmem [shape: f32[6,1,256], index: 4, kind: input, shape index: {}]   ;;  %s1007_s5 = inlined_call_operand.vmem [shape: f32[6,2,256], index: 5, kind: output, shape index: {}]  }
   0x1 LB: > { %s757_s19 = sadd.s32 4294967295, %s888_s18   ;;  %p761_p0 = scmp.ge.s32.totalorder %s888_s18, 1  ;;  %s888_s18 = sphi %s922_s18, %s15_s18  }
   0x2   : > { %p223_p1 = scmp.lt.s32.totalorder %s888_s18, 7 }
   0x4   : > { %p224_p2 = pnand %p761_p0, %p223_p1 }
   0x5   : > { %p267_p3 = scmp.lt.s32.totalorder (!%p224_p2), %s757_s19, 5  ;;  %v890_v6 = vmov (!%p224_p2), 1966171168   ;;  %v346_v8 = vlaneseq (!%p224_p2)  ;;  %v891_v42 = vmov (!%p224_p2), 0  }
   0x6   : > { %227 = sbr.rel (%p224_p2) target bundleno = 486 (0x1e6), region = 40  ;;  %v344_v7 = vunpack.c.l.s4 (!%p224_p2), %v890_v6  ;;  %636 = vmatprep.mubr.bf16.mxu1 (!%p224_p2), %v891_v42 }
   0x7   : > { %v947_v12 = vshrl.u32 (!%p224_p2), %v346_v8, 7 }
   0x8   : > { %v345_v11 = vunpack.c.0.s8 (!%p224_p2), %v344_v7 }
   0x9   : > { %v516_v51 = vsub.s32 (!%p224_p2), 0, %v947_v12  ;;  %v520_v53 = vsub.s32 (!%p224_p2), 1, %v947_v12 }
   0xa   : > { %v348_v16 = vsub.s32 (!%p224_p2), %v345_v11, %v947_v12 }
   0xd   : > { %s1009_s19 = smov (!%p267_p3, %s757_s19), 5 }
   0xe   : > { %s807_s20 = sshll.u32 %s1009_s19, 7  ;;  %s762_s24 = sshll.u32 %s1009_s19, 1 }
   0xf   : > { %s936_s23 = scalar_lea.vmem %s1003_s1, %s807_s20  ;;  %s270_s27 = scalar_lea.vmem %s1002_s0, %s762_s24 }
  0x10   : > { %v842_v0 = vld [vmem:[%s936_s23 + $0x40] sm:$0xff]   ;;  %v844_v2 = vld [vmem:[%s936_s23 + $0x48] sm:$0xff]   ;;  %v846_v4 = vld [vmem:[%s936_s23 + $0x50] sm:$0xff]   ;;  %s959_s30 = scalar_lea.vmem %s1005_s3, %s807_s20  ;;  %s278_s8 = scalar_lea.vmem %s1004_s2, %s1009_s19 }
  0x11   : > { %v843_v1 = vld [vmem:[%s936_s23] sm:$0xff]   ;;  %810 = vmatprep.subr.bf16.mxu0 %v842_v0  ;;  %v845_v3 = vld [vmem:[%s936_s23 + $0x8] sm:$0xff]   ;;  %v847_v5 = vld [vmem:[%s936_s23 + $0x10] sm:$0xff]   ;;  %s287_s11 = scalar_lea.vmem %s1006_s4, %s762_s24  ;;  %s809_s12 = sshll.u32 %s1009_s19, 2 }
  0x12   : > { %811 = vmatpush3.bf16.msra.mxu0 %v843_v1  ;;  %v848_v9 = vld [vmem:[%s936_s23 + $0x58] sm:$0xff]   ;;  %v850_v13 = vld [vmem:[%s936_s23 + $0x60] sm:$0xff]   ;;  %v852_v15 = vld [vmem:[%s936_s23 + $0x68] sm:$0xff]   ;;  %s292_s15 = scalar_lea.vmem %s1007_s5, %s809_s12 }
  0x13   : > { %812 = vmatprep.subr.bf16.mxu0 %v844_v2  ;;  %v849_v10 = vld [vmem:[%s936_s23 + $0x18] sm:$0xff]   ;;  %v851_v14 = vld [vmem:[%s936_s23 + $0x20] sm:$0xff]   ;;  %v853_v21 = vld [vmem:[%s936_s23 + $0x28] sm:$0xff]  }
  0x14   : > { %v771_v17 = vld.sshfl [vmem:[%s270_s27] sm:$0x11 pattern:$0x75316420]  ;;  %v858_v19 = vld [vmem:[%s959_s30 + $0x4] ss:$8 sps:$4 sm:$0xff]  }
  0x15   : > { %v342_v18 = vcombine.high %v771_v17, %v771_v17  ;;  %v860_v20 = vld [vmem:[%s959_s30] ss:$8 sps:$4 sm:$0xff]   ;;  %v861_v22 = vld [vmem:[%s959_s30 + $0x14] ss:$8 sps:$4 sm:$0xff]   ;;  %604 = vmatprep.subr.bf16.mxu1 %v858_v19  ;;  %v863_v25 = vld [vmem:[%s959_s30 + $0x10] ss:$8 sps:$4 sm:$0xff]   ;;  %v349_v34 = vrot.slane %v771_v17, %v348_v16 }
  0x16   : > { %813 = vmatpush3.bf16.msra.mxu0 %v845_v3  ;;  %v854_v23 = vld [vmem:[%s936_s23 + $0x70] sm:$0xff]   ;;  %605 = vmatpush1.bf16.msra.mxu1 %v860_v20  ;;  %v864_v26 = vld [vmem:[%s959_s30 + $0x24] ss:$8 sps:$4 sm:$0xff]   ;;  %v856_v28 = vld [vmem:[%s936_s23 + $0x78] sm:$0xff]  }
  0x17   : > { %814 = vmatprep.subr.bf16.mxu0 %v846_v4  ;;  %v356_v24 = vrot.slane %v342_v18, %v348_v16  ;;  %606 = vmatprep.subr.bf16.mxu1 %v861_v22  ;;  %v855_v27 = vld [vmem:[%s936_s23 + $0x30] sm:$0xff]   ;;  %v866_v29 = vld [vmem:[%s959_s30 + $0x20] ss:$8 sps:$4 sm:$0xff]   ;;  %v857_v31 = vld [vmem:[%s936_s23 + $0x38] sm:$0xff]  }
  0x18   : > { %v867_v30 = vld [vmem:[%s959_s30 + $0x34] ss:$8 sps:$4 sm:$0xff]   ;;  %v869_v32 = vld [vmem:[%s959_s30 + $0x30] ss:$8 sps:$4 sm:$0xff]   ;;  %v870_v33 = vld [vmem:[%s959_s30 + $0x44] ss:$8 sps:$4 sm:$0xff]  }
  0x19   : > { %487 = vmatprep.mubr.bf16.mxu0 %v356_v24  ;;  %v872_v35 = vld [vmem:[%s959_s30 + $0x40] ss:$8 sps:$4 sm:$0xff]   ;;  %v873_v36 = vld [vmem:[%s959_s30 + $0x54] ss:$8 sps:$4 sm:$0xff]   ;;  %v875_v37 = vld [vmem:[%s959_s30 + $0x50] ss:$8 sps:$4 sm:$0xff]  }
  0x1a   : > { %815 = vmatpush3.bf16.msra.mxu0 %v847_v5  ;;  %607 = vmatpush1.bf16.msra.mxu1 %v863_v25  ;;  %v876_v38 = vld [vmem:[%s959_s30 + $0x64] ss:$8 sps:$4 sm:$0xff]   ;;  %v878_v39 = vld [vmem:[%s959_s30 + $0x60] ss:$8 sps:$4 sm:$0xff]   ;;  %v879_v40 = vld [vmem:[%s959_s30 + $0x74] ss:$8 sps:$4 sm:$0xff]  }
  0x1b   : > { %816 = vmatprep.subr.bf16.mxu0 %v848_v9  ;;  %608 = vmatprep.subr.bf16.mxu1 %v864_v26  ;;  %v881_v41 = vld [vmem:[%s959_s30 + $0x70] ss:$8 sps:$4 sm:$0xff]   ;;  %v770_v44 = vld [vmem:[%s278_s8] ss:$0 sm:$0xff] }
  0x1c   : > { %v512_v52 = vld [vmem:[%s287_s11] sm:$0x3] }
  0x1d   : > { %v517_v54 = vrot.slane %v512_v52, %v516_v51  ;;  %v521_v55 = vrot.slane %v512_v52, %v520_v53 }
  0x1e   : > { %817 = vmatpush3.bf16.msra.mxu0 %v849_v10  ;;  %609 = vmatpush1.bf16.msra.mxu1 %v866_v29 }
  0x1f   : > { %818 = vmatprep.subr.bf16.mxu0 %v850_v13  ;;  %610 = vmatprep.subr.bf16.mxu1 %v867_v30 }
  0x22   : > { %819 = vmatpush3.bf16.msra.mxu0 %v851_v14  ;;  %611 = vmatpush1.bf16.msra.mxu1 %v869_v32 }
  0x23   : > { %820 = vmatprep.subr.bf16.mxu0 %v852_v15  ;;  %612 = vmatprep.subr.bf16.mxu1 %v870_v33 }
  0x26   : > { %821 = vmatpush3.bf16.msra.mxu0 %v853_v21  ;;  %613 = vmatpush1.bf16.msra.mxu1 %v872_v35 }
  0x27   : > { %822 = vmatprep.subr.bf16.mxu0 %v854_v23  ;;  %614 = vmatprep.subr.bf16.mxu1 %v873_v36 }
  0x2a   : > { %823 = vmatpush3.bf16.msra.mxu0 %v855_v27  ;;  %615 = vmatpush1.bf16.msra.mxu1 %v875_v37 }
  0x2b   : > { %824 = vmatprep.subr.bf16.mxu0 %v856_v28  ;;  %616 = vmatprep.subr.bf16.mxu1 %v876_v38 }
  0x2e   : > { %825 = vmatpush3.bf16.msra.mxu0 %v857_v31  ;;  %617 = vmatpush1.bf16.msra.mxu1 %v878_v39 }
  0x2f   : > { %618 = vmatprep.subr.bf16.mxu1 %v879_v40 }
  0x31   : > { %488 = vmatmul.mubr.bf16.vlgmr.msra.gmra.mrb[0].mxu0 %v349_v34 }
  0x32   : > { %619 = vmatpush1.bf16.msra.mxu1 %v881_v41 }
 0x104   : > { %v826_v43 = vpop.f32.mrb[0].mxu0 }
 0x105   : > { %v827_v45 = vpop.f32.mrb[1].mxu0 }
 0x106   : > { %v828_v46 = vadd.f32 %v827_v45, %v826_v43  ;;  %v829_v47 = vpop.f32.mrb[2].mxu0 }
 0x107   : > { %v830_v48 = vpop.f32.mrb[3].mxu0 }
 0x108   : > { %v490_v49 = vadd.f32 %v828_v46, %v770_v44 }
 0x10a   : > { %v495_v50 = vpack.c.bf16 %v490_v49, %v490_v49 }
 0x10c   : > { %637 = vmatmul.mubr.bf16.vlgmr.msra.gmra.mrb[0].mxu1 %v495_v50 }
 0x1df   : > { %v638_v56 = vpop.f32.mrb[0].mxu1 }
 0x1e0   : > { %v639_v57 = vadd.f32 %v638_v56, %v517_v54  ;;  %v640_v58 = vpop.f32.mrb[1].mxu1 }
 0x1e1   : > { %v641_v59 = vadd.f32 %v640_v58, %v521_v55  ;;  %v642_v60 = vpop.f32.mrb[2].mxu1 }
 0x1e2   : > { %v643_v61 = vpop.f32.mrb[3].mxu1 }
 0x1e3   : > { %v647_v62 = vcombine.low %v639_v57, %v641_v59 }
 0x1e5   : > { %804 = vst.sshfl [vmem:[%s292_s15] sm:$0x33 pattern:$0x76325410] %v647_v62 }
 0x1e6 PF: > { %s15_s18 = sadd.s32 1, %s888_s18  }
 0x1e7   : > { %p12_p4 = scmp.ge.s32.totalorder %s15_s18, 8  }
 0x1e9   :  { %14 = sbr.rel (!%p12_p4) target bundleno = 1 (0x1), region = 82 }

</bundles_post_ra>
